<compile_context>
chip_gen: v7x
topology: tpu7x:2x2x1
jax: 0.10.0
libtpu: 0.0.40
codegen_flags: <defaults>
</compile_context>

<pallas_src>
import jax
import jax.numpy as jnp
from jax.experimental import pallas as pl
from jax.experimental.pallas import tpu as pltpu

_EPS = 1e-5
_LANE = 128        # pad channel dims to a multiple of the lane width
_TM_MAX = 256      # max GEMM rows (M = N*Ho*Wo) per tile (v7x-safe)
_TK_MAX = 2048     # max GEMM reduction (K = KH*KW*Cin) per tile


def _round_up(x, m):
    return ((x + m - 1) // m) * m


def _default_vmem_limit():
    # Generation-aware scoped-VMEM limit: ~3/4 of physical VMEM, capped at
    # 96 MiB (v5e/v6e have 128 MiB per core, v7x only 64 MiB).
    try:
        info = pltpu.get_tpu_info()
        cap = getattr(info, "vmem_capacity_bytes", None)
        if cap:
            return int(min(cap * 3 // 4, 96 * 1024 * 1024))
    except Exception:
        pass
    return 48 * 1024 * 1024


_VMEM_LIMIT = _default_vmem_limit()


def _cparams(dims):
    return pltpu.CompilerParams(
        dimension_semantics=dims, vmem_limit_bytes=_VMEM_LIMIT)


def _tile_rows(m):
    m8 = _round_up(max(m, 1), 8)
    nm = pl.cdiv(m8, _TM_MAX)
    tm = _round_up(pl.cdiv(m8, nm), 8)
    return nm, tm, nm * tm


def _tile_k(k):
    k8 = _round_up(k, 8)
    nk = pl.cdiv(k8, _TK_MAX)
    tk = _round_up(pl.cdiv(k8, nk), _LANE) if nk > 1 else k8
    return nk, tk, nk * tk


# ---------------------------------------------------------------------------
# Pallas kernels
# ---------------------------------------------------------------------------
def _gemm_stats_kernel(a_ref, b_ref, y_ref, st_ref, acc_ref):
    """Tiled conv-as-GEMM (bf16 in, f32 acc) + per-M-tile BN partial stats."""
    k = pl.program_id(1)

    @pl.when(k == 0)
    def _():
        acc_ref[...] = jnp.zeros_like(acc_ref)

    acc_ref[...] += jnp.dot(
        a_ref[...], b_ref[...], preferred_element_type=jnp.float32)

    @pl.when(k == pl.num_programs(1) - 1)
    def _():
        y = acc_ref[...]
        y_ref[...] = y
        st_ref[...] = jnp.zeros_like(st_ref)
        st_ref[0:1, :] = jnp.sum(y, axis=0, keepdims=True)
        st_ref[1:2, :] = jnp.sum(y * y, axis=0, keepdims=True)


def _make_bn_apply_kernel(m_true, relu, has_residual):
    inv_m = 1.0 / float(m_true)

    def kernel(y_ref, st_ref, g_ref, b_ref, *rest):
        if has_residual:
            res_ref, o_ref = rest
        else:
            (o_ref,) = rest
        st = st_ref[...]                           # (nm, 8, Cp) partial stats
        s = jnp.sum(st[:, 0:1, :], axis=0)         # (1, Cp) sum over all M
        ss = jnp.sum(st[:, 1:2, :], axis=0)        # (1, Cp) sum of squares
        mean = s * inv_m
        var = jnp.maximum(ss * inv_m - mean * mean, 0.0)   # biased variance
        scale = g_ref[...] * jax.lax.rsqrt(var + _EPS)
        shift = b_ref[...] - mean * scale
        y = y_ref[...] * scale + shift
        if has_residual:
            y = y + res_ref[...]
        if relu:
            y = jnp.maximum(y, 0.0)
        o_ref[...] = y.astype(o_ref.dtype)

    return kernel


def _maxpool_kernel(x_ref, o_ref):
    # x: [taps, tm, C] -> max over taps (cheap VPU op on VMEM-resident data)
    o_ref[...] = jnp.max(x_ref[...], axis=0)


def _head_kernel(x_ref, w_ref, b_ref, o_ref):
    # Fused AdaptiveAvgPool2d((1,1)) + Linear: mean over spatial, then matmul.
    xm = jnp.mean(x_ref[...], axis=1)
    o_ref[...] = (jnp.dot(xm, w_ref[...], preferred_element_type=jnp.float32)
                  + b_ref[...]).astype(o_ref.dtype)


# ---------------------------------------------------------------------------
# Wrappers (glue: im2col, padding, reshapes, pallas_call plumbing)
# ---------------------------------------------------------------------------
def _im2col(x, kh, kw, stride, pad):
    # TODO(synk): fold the tap extraction into the GEMM kernel (manual DMA over
    # shifted windows) to avoid materializing KH*KW shifted activation copies.
    n, h, w, c = x.shape
    ho = (h + 2 * pad - kh) // stride + 1
    wo = (w + 2 * pad - kw) // stride + 1
    xp = jnp.pad(x, ((0, 0), (pad, pad), (pad, pad), (0, 0)))
    cols = []
    for ky in range(kh):
        for kx in range(kw):
            cols.append(
                xp[:, ky: ky + stride * (ho - 1) + 1: stride,
                      kx: kx + stride * (wo - 1) + 1: stride, :])
    patches = jnp.stack(cols, axis=3)              # (N, Ho, Wo, KH*KW, C)
    return patches.reshape(n * ho * wo, kh * kw * c), (n, ho, wo)


def conv_bn(x, w, gamma, beta, *, stride, pad, relu=True, residual=None):
    kh, kw, cin, cout = w.shape
    a, (n, ho, wo) = _im2col(x, kh, kw, stride, pad)
    m, k = a.shape
    cp = _round_up(cout, _LANE)
    nm, tm, mp = _tile_rows(m)
    nk, tk, kp = _tile_k(k)

    # Glue: pad to tile multiples, cast GEMM operands to bf16 (f32 accumulate).
    a_p = jnp.pad(a, ((0, mp - m), (0, kp - k))).astype(jnp.bfloat16)
    b_p = jnp.pad(w.reshape(kh * kw * cin, cout).astype(jnp.float32),
                  ((0, kp - k), (0, cp - cout))).astype(jnp.bfloat16)
    g_p = jnp.pad(gamma.astype(jnp.float32).reshape(1, cout),
                  ((0, 0), (0, cp - cout)))
    bt_p = jnp.pad(beta.astype(jnp.float32).reshape(1, cout),
                   ((0, 0), (0, cp - cout)))

    cost = pl.CostEstimate(
        flops=2 * mp * kp * cp,
        transcendentals=0,
        bytes_accessed=(a_p.size * 2 + b_p.size * 2
                        + mp * cp * 4 + nm * 8 * cp * 4))

    y, stats = pl.pallas_call(
        _gemm_stats_kernel,
        grid=(nm, nk),
        in_specs=[
            pl.BlockSpec((tm, tk), lambda i, j: (i, j)),
            pl.BlockSpec((tk, cp), lambda i, j: (j, 0)),
        ],
        out_specs=[
            pl.BlockSpec((tm, cp), lambda i, j: (i, 0)),
            pl.BlockSpec((8, cp), lambda i, j: (i, 0)),
        ],
        out_shape=[
            jax.ShapeDtypeStruct((mp, cp), jnp.float32),
            jax.ShapeDtypeStruct((nm * 8, cp), jnp.float32),
        ],
        scratch_shapes=[pltpu.VMEM((tm, cp), jnp.float32)],
        compiler_params=_cparams(("parallel", "arbitrary")),
        cost_estimate=cost,
    )(a_p, b_p)

    inputs = [y, stats.reshape(nm, 8, cp), g_p, bt_p]
    in_specs = [
        pl.BlockSpec((tm, cp), lambda i: (i, 0)),
        pl.BlockSpec((nm, 8, cp), lambda i: (0, 0, 0)),
        pl.BlockSpec((1, cp), lambda i: (0, 0)),
        pl.BlockSpec((1, cp), lambda i: (0, 0)),
    ]
    if residual is not None:
        res = jnp.pad(residual.reshape(m, cout).astype(jnp.float32),
                      ((0, mp - m), (0, cp - cout)))
        inputs.append(res)
        in_specs.append(pl.BlockSpec((tm, cp), lambda i: (i, 0)))

    out = pl.pallas_call(
        _make_bn_apply_kernel(m, relu, residual is not None),
        grid=(nm,),
        in_specs=in_specs,
        out_specs=pl.BlockSpec((tm, cp), lambda i: (i, 0)),
        out_shape=jax.ShapeDtypeStruct((mp, cp), jnp.float32),
        compiler_params=_cparams(("parallel",)),
    )(*inputs)
    return out[:m, :cout].reshape(n, ho, wo, cout)


def maxpool2d(x, k=3, stride=2, pad=1):
    n, h, w, c = x.shape
    ho = (h + 2 * pad - k) // stride + 1
    wo = (w + 2 * pad - k) // stride + 1
    xp = jnp.pad(x, ((0, 0), (pad, pad), (pad, pad), (0, 0)),
                 constant_values=-jnp.inf)
    taps = []
    for ky in range(k):
        for kx in range(k):
            taps.append(
                xp[:, ky: ky + stride * (ho - 1) + 1: stride,
                      kx: kx + stride * (wo - 1) + 1: stride, :])
    m = n * ho * wo
    stacked = jnp.stack(taps, axis=0).reshape(k * k, m, c)
    nm, tm, mp = _tile_rows(m)
    stacked = jnp.pad(stacked, ((0, 0), (0, mp - m), (0, 0)))
    # TODO(synk): iterate the k*k taps as a grid reduction axis over shifted
    # windows instead of stacking copies in HBM (used once, on the tiny stem).
    out = pl.pallas_call(
        _maxpool_kernel,
        grid=(nm,),
        in_specs=[pl.BlockSpec((k * k, tm, c), lambda i: (0, i, 0))],
        out_specs=pl.BlockSpec((tm, c), lambda i: (i, 0)),
        out_shape=jax.ShapeDtypeStruct((mp, c), jnp.float32),
        compiler_params=_cparams(("parallel",)),
    )(stacked)
    return out[:m].reshape(n, ho, wo, c)


def head(x, w, b):
    # Fused AdaptiveAvgPool2d((1,1)) + Linear(512 -> 10), output lane-padded.
    n, h, wd, c = x.shape
    cout = w.shape[1]
    cp = _round_up(cout, _LANE)
    nb, tb, npad = _tile_rows(n)
    xf = jnp.pad(x.reshape(n, h * wd, c), ((0, npad - n), (0, 0), (0, 0)))
    wp = jnp.pad(w.astype(jnp.float32), ((0, 0), (0, cp - cout)))
    bp = jnp.pad(b.astype(jnp.float32).reshape(1, cout),
                 ((0, 0), (0, cp - cout)))
    out = pl.pallas_call(
        _head_kernel,
        grid=(nb,),
        in_specs=[
            pl.BlockSpec((tb, h * wd, c), lambda i: (i, 0, 0)),
            pl.BlockSpec((c, cp), lambda i: (0, 0)),
            pl.BlockSpec((1, cp), lambda i: (0, 0)),
        ],
        out_specs=pl.BlockSpec((tb, cp), lambda i: (i, 0)),
        out_shape=jax.ShapeDtypeStruct((npad, cp), jnp.float32),
        compiler_params=_cparams(("parallel",)),
    )(xf, wp, bp)
    return out[:n, :cout]


# ---------------------------------------------------------------------------
# ResNet-18 structure
# ---------------------------------------------------------------------------
def basic_block(x, bp, stride):
    # TODO(synk): fuse the whole basic block into one pallas_call (keep the
    # intermediate activation in VMEM) to amortize launch/DMA overhead.
    if "down_conv" in bp:
        identity = conv_bn(x, bp["down_conv"], bp["down_bn"]["gamma"],
                           bp["down_bn"]["beta"], stride=stride, pad=0,
                           relu=False)
    else:
        identity = x
    out = conv_bn(x, bp["conv1"], bp["bn1"]["gamma"], bp["bn1"]["beta"],
                  stride=stride, pad=1, relu=True)
    # second conv: BN -> residual add -> ReLU fused in the BN-apply kernel.
    out = conv_bn(out, bp["conv2"], bp["bn2"]["gamma"], bp["bn2"]["beta"],
                  stride=1, pad=1, relu=True, residual=identity)
    return out


def modified_resnet18_forward(x_nchw, params):
    # PyTorch input is NCHW; convert to NHWC once.
    x = jnp.transpose(x_nchw, (0, 2, 3, 1)).astype(jnp.float32)
    x = conv_bn(x, params["conv1"], params["bn1"]["gamma"],
                params["bn1"]["beta"], stride=2, pad=3, relu=True)
    x = maxpool2d(x, k=3, stride=2, pad=1)
    for si, blocks in enumerate(params["layers"]):
        for bi, bp in enumerate(blocks):
            stride = 2 if (si > 0 and bi == 0) else 1
            x = basic_block(x, bp, stride)
    return head(x, params["fc_w"], params["fc_b"])    # (N, 10)


def init_params(key):
    keys = iter(jax.random.split(key, 64))

    def conv(kh, kw, cin, cout):
        fan_in = kh * kw * cin
        return jax.random.normal(next(keys), (kh, kw, cin, cout),
                                 jnp.float32) * jnp.sqrt(2.0 / fan_in)

    def bn(c):
        return {"gamma": jnp.ones((c,), jnp.float32),
                "beta": jnp.zeros((c,), jnp.float32)}

    p = {"conv1": conv(7, 7, 1, 64), "bn1": bn(64)}
    stages = [(64, 64), (64, 128), (128, 256), (256, 512)]
    layers = []
    for si, (cin, cout) in enumerate(stages):
        b0 = {"conv1": conv(3, 3, cin, cout), "bn1": bn(cout),
              "conv2": conv(3, 3, cout, cout), "bn2": bn(cout)}
        if si > 0:  # stride-2 stage with channel change -> 1x1 downsample
            b0["down_conv"] = conv(1, 1, cin, cout)
            b0["down_bn"] = bn(cout)
        b1 = {"conv1": conv(3, 3, cout, cout), "bn1": bn(cout),
              "conv2": conv(3, 3, cout, cout), "bn2": bn(cout)}
        layers.append([b0, b1])
    p["layers"] = layers
    p["fc_w"] = jax.random.normal(next(keys), (512, 10), jnp.float32) * 0.05
    p["fc_b"] = jnp.zeros((10,), jnp.float32)
    return p


if __name__ == "__main__":
    key = jax.random.PRNGKey(0)
    pkey, xkey = jax.random.split(key)
    params = init_params(pkey)
    # ModifiedResNet18.conv1 expects 1 input channel; small spatial size 16.
    x = jax.random.normal(xkey, (2, 1, 16, 16), jnp.float32)  # NCHW (PyTorch)
    fwd = jax.jit(modified_resnet18_forward)
    logits = jax.block_until_ready(fwd(x, params))
    assert logits.shape == (2, 10), logits.shape
    assert bool(jnp.all(jnp.isfinite(logits)))
    print("KERNEL_OK")
</pallas_src>

<mosaic_0001>
module attributes {stable_mosaic.version = 11 : i64} {
  func.func @_gemm_stats_kernel(%arg0: i32, %arg1: i32, %arg2: memref<128x56xbf16, #tpu.memory_space<vmem>>, %arg3: memref<56x128xbf16, #tpu.memory_space<vmem>>, %arg4: memref<128x128xf32, #tpu.memory_space<vmem>>, %arg5: memref<8x128xf32, #tpu.memory_space<vmem>>, %arg6: memref<128x128xf32, #tpu.memory_space<vmem>>) attributes {dimension_semantics = [#tpu.dimension_semantics<parallel>, #tpu.dimension_semantics<arbitrary>], iteration_bounds = array<i64: 1, 1>, scalar_prefetch = 0 : i64, scratch_operands = 1 : i64, tpu.core_type = #tpu.core_type<tc>, window_params = [{transform_indices = @transform_0, window_bounds = array<i64: 128, 56>}, {transform_indices = @transform_1, window_bounds = array<i64: 56, 128>}, {transform_indices = @transform_2, window_bounds = array<i64: 128, 128>}, {transform_indices = @transform_3, window_bounds = array<i64: 8, 128>}]} {
    %c0_i32 = arith.constant 0 : i32
    %0 = arith.cmpi eq, %arg1, %c0_i32 : i32
    %1 = arith.extui %0 : i1 to i32
    %c0_i32_0 = arith.constant 0 : i32
    %2 = arith.cmpi ne, %1, %c0_i32_0 : i32
    scf.if %2 {
      %cst_10 = arith.constant 0.000000e+00 : f32
      %12 = vector.broadcast %cst_10 : f32 to vector<128x128xf32>
      %c0_11 = arith.constant 0 : index
      %c0_12 = arith.constant 0 : index
      %13 = vector.load %arg6[%c0_11, %c0_12] : memref<128x128xf32, #tpu.memory_space<vmem>>, vector<128x128xf32>
      tpu.vector_store %arg6[%c0_11, %c0_12], %12 {strides = array<i32>} : memref<128x128xf32, #tpu.memory_space<vmem>>, vector<128x128xf32>,
    } else {
    }
    %c0 = arith.constant 0 : index
    %c0_1 = arith.constant 0 : index
    %3 = vector.load %arg6[%c0, %c0_1] : memref<128x128xf32, #tpu.memory_space<vmem>>, vector<128x128xf32>
    %c0_2 = arith.constant 0 : index
    %c0_3 = arith.constant 0 : index
    %4 = vector.load %arg2[%c0_2, %c0_3] : memref<128x56xbf16, #tpu.memory_space<vmem>>, vector<128x56xbf16>
    %c0_4 = arith.constant 0 : index
    %c0_5 = arith.constant 0 : index
    %5 = vector.load %arg3[%c0_4, %c0_5] : memref<56x128xbf16, #tpu.memory_space<vmem>>, vector<56x128xbf16>
    %cst = arith.constant dense<0.000000e+00> : vector<128x128xf32>
    %6 = tpu.matmul %4, %5, %cst {dimension_numbers = #tpu.dot_dimension_numbers<[1], [0], [0], [1], [0, 0, 1, 1], [], []>} : vector<128x56xbf16>, vector<56x128xbf16>, vector<128x128xf32> -> vector<128x128xf32>
    %7 = arith.addf %3, %6 : vector<128x128xf32>
    %c0_6 = arith.constant 0 : index
    %c0_7 = arith.constant 0 : index
    %8 = vector.load %arg6[%c0_6, %c0_7] : memref<128x128xf32, #tpu.memory_space<vmem>>, vector<128x128xf32>
    tpu.vector_store %arg6[%c0_6, %c0_7], %7 {strides = array<i32>} : memref<128x128xf32, #tpu.memory_space<vmem>>, vector<128x128xf32>,
    %c0_i32_8 = arith.constant 0 : i32
    %9 = arith.cmpi eq, %arg1, %c0_i32_8 : i32
    %10 = arith.extui %9 : i1 to i32
    %c0_i32_9 = arith.constant 0 : i32
    %11 = arith.cmpi ne, %10, %c0_i32_9 : i32
    scf.if %11 {
      %c0_10 = arith.constant 0 : index
      %c0_11 = arith.constant 0 : index
      %12 = vector.load %arg6[%c0_10, %c0_11] : memref<128x128xf32, #tpu.memory_space<vmem>>, vector<128x128xf32>
      %c0_12 = arith.constant 0 : index
      %c0_13 = arith.constant 0 : index
      %13 = vector.load %arg4[%c0_12, %c0_13] : memref<128x128xf32, #tpu.memory_space<vmem>>, vector<128x128xf32>
      tpu.vector_store %arg4[%c0_12, %c0_13], %12 {strides = array<i32>} : memref<128x128xf32, #tpu.memory_space<vmem>>, vector<128x128xf32>,
      %cst_14 = arith.constant 0.000000e+00 : f32
      %14 = vector.broadcast %cst_14 : f32 to vector<8x128xf32>
      %c0_15 = arith.constant 0 : index
      %c0_16 = arith.constant 0 : index
      %15 = vector.load %arg5[%c0_15, %c0_16] : memref<8x128xf32, #tpu.memory_space<vmem>>, vector<8x128xf32>
      tpu.vector_store %arg5[%c0_15, %c0_16], %14 {strides = array<i32>} : memref<8x128xf32, #tpu.memory_space<vmem>>, vector<8x128xf32>,
      %cst_17 = arith.constant dense<0.000000e+00> : vector<128xf32>
      %16 = vector.multi_reduction <add>, %12, %cst_17 [0] : vector<128x128xf32> to vector<128xf32>
      %17 = vector.shape_cast %16 : vector<128xf32> to vector<1x128xf32>
      %c0_18 = arith.constant 0 : index
      %c0_19 = arith.constant 0 : index
      %18 = vector.load %arg5[%c0_18, %c0_19] : memref<8x128xf32, #tpu.memory_space<vmem>>, vector<1x128xf32>
      tpu.vector_store %arg5[%c0_18, %c0_19], %17 {strides = array<i32>} : memref<8x128xf32, #tpu.memory_space<vmem>>, vector<1x128xf32>,
      %19 = arith.mulf %12, %12 : vector<128x128xf32>
      %cst_20 = arith.constant dense<0.000000e+00> : vector<128xf32>
      %20 = vector.multi_reduction <add>, %19, %cst_20 [0] : vector<128x128xf32> to vector<128xf32>
      %21 = vector.shape_cast %20 : vector<128xf32> to vector<1x128xf32>
      %c1 = arith.constant 1 : index
      %c0_21 = arith.constant 0 : index
      %22 = vector.load %arg5[%c1, %c0_21] : memref<8x128xf32, #tpu.memory_space<vmem>>, vector<1x128xf32>
      tpu.vector_store %arg5[%c1, %c0_21], %21 {strides = array<i32>} : memref<8x128xf32, #tpu.memory_space<vmem>>, vector<1x128xf32>,
    } else {
    }
    return
  }
  func.func @transform_0(%arg0: i32, %arg1: i32) -> (i32, i32) {
    %c0_i32 = arith.constant 0 : i32
    return %arg0, %arg1 : i32, i32
  }
  func.func @transform_1(%arg0: i32, %arg1: i32) -> (i32, i32) {
    %c0_i32 = arith.constant 0 : i32
    %c0_i32_0 = arith.constant 0 : i32
    return %arg1, %c0_i32 : i32, i32
  }
  func.func @transform_2(%arg0: i32, %arg1: i32) -> (i32, i32) {
    %c0_i32 = arith.constant 0 : i32
    %c0_i32_0 = arith.constant 0 : i32
    return %arg0, %c0_i32 : i32, i32
  }
  func.func @transform_3(%arg0: i32, %arg1: i32) -> (i32, i32) {
    %c0_i32 = arith.constant 0 : i32
    %c0_i32_0 = arith.constant 0 : i32
    return %arg0, %c0_i32 : i32, i32
  }
}

module attributes {stable_mosaic.version = 11 : i64} {
  func.func @kernel(%arg0: i32, %arg1: memref<128x128xf32, #tpu.memory_space<vmem>>, %arg2: memref<1x8x128xf32, #tpu.memory_space<vmem>>, %arg3: memref<1x128xf32, #tpu.memory_space<vmem>>, %arg4: memref<1x128xf32, #tpu.memory_space<vmem>>, %arg5: memref<128x128xf32, #tpu.memory_space<vmem>>) attributes {dimension_semantics = [#tpu.dimension_semantics<parallel>], iteration_bounds = array<i64: 1>, scalar_prefetch = 0 : i64, scratch_operands = 0 : i64, tpu.core_type = #tpu.core_type<tc>, window_params = [{transform_indices = @transform_0, window_bounds = array<i64: 128, 128>}, {pipeline_mode = #tpu.pipeline_mode<synchronous>, transform_indices = @transform_1, window_bounds = array<i64: 1, 8, 128>}, {pipeline_mode = #tpu.pipeline_mode<synchronous>, transform_indices = @transform_2, window_bounds = array<i64: 1, 128>}, {pipeline_mode = #tpu.pipeline_mode<synchronous>, transform_indices = @transform_3, window_bounds = array<i64: 1, 128>}, {transform_indices = @transform_4, window_bounds = array<i64: 128, 128>}]} {
    %c0 = arith.constant 0 : index
    %c0_0 = arith.constant 0 : index
    %c0_1 = arith.constant 0 : index
    %0 = vector.load %arg2[%c0, %c0_0, %c0_1] : memref<1x8x128xf32, #tpu.memory_space<vmem>>, vector<1x8x128xf32>
    %1 = vector.extract_strided_slice %0 {offsets = [0, 0, 0], sizes = [1, 1, 128], strides = [1, 1, 1]} : vector<1x8x128xf32> to vector<1x1x128xf32>
    %cst = arith.constant dense<0.000000e+00> : vector<1x128xf32>
    %2 = vector.multi_reduction <add>, %1, %cst [0] : vector<1x1x128xf32> to vector<1x128xf32>
    %3 = vector.extract_strided_slice %0 {offsets = [0, 1, 0], sizes = [1, 1, 128], strides = [1, 1, 1]} : vector<1x8x128xf32> to vector<1x1x128xf32>
    %cst_2 = arith.constant dense<0.000000e+00> : vector<1x128xf32>
    %4 = vector.multi_reduction <add>, %3, %cst_2 [0] : vector<1x1x128xf32> to vector<1x128xf32>
    %cst_3 = arith.constant 7.812500e-03 : f32
    %5 = vector.broadcast %cst_3 : f32 to vector<1x128xf32>
    %6 = arith.mulf %2, %5 : vector<1x128xf32>
    %cst_4 = arith.constant 7.812500e-03 : f32
    %7 = vector.broadcast %cst_4 : f32 to vector<1x128xf32>
    %8 = arith.mulf %4, %7 : vector<1x128xf32>
    %9 = arith.mulf %6, %6 : vector<1x128xf32>
    %10 = arith.subf %8, %9 : vector<1x128xf32>
    %cst_5 = arith.constant 0.000000e+00 : f32
    %11 = vector.broadcast %cst_5 : f32 to vector<1x128xf32>
    %12 = arith.maximumf %10, %11 : vector<1x128xf32>
    %c0_6 = arith.constant 0 : index
    %c0_7 = arith.constant 0 : index
    %13 = vector.load %arg3[%c0_6, %c0_7] : memref<1x128xf32, #tpu.memory_space<vmem>>, vector<1x128xf32>
    %cst_8 = arith.constant 9.99999974E-6 : f32
    %14 = vector.broadcast %cst_8 : f32 to vector<1x128xf32>
    %15 = arith.addf %12, %14 : vector<1x128xf32>
    %16 = math.rsqrt %15 : vector<1x128xf32>
    %17 = arith.mulf %13, %16 : vector<1x128xf32>
    %c0_9 = arith.constant 0 : index
    %c0_10 = arith.constant 0 : index
    %18 = vector.load %arg4[%c0_9, %c0_10] : memref<1x128xf32, #tpu.memory_space<vmem>>, vector<1x128xf32>
    %19 = arith.mulf %6, %17 : vector<1x128xf32>
    %20 = arith.subf %18, %19 : vector<1x128xf32>
    %c0_11 = arith.constant 0 : index
    %c0_12 = arith.constant 0 : index
    %21 = vector.load %arg1[%c0_11, %c0_12] : memref<128x128xf32, #tpu.memory_space<vmem>>, vector<128x128xf32>
    %22 = vector.broadcast %17 : vector<1x128xf32> to vector<128x128xf32>
    %23 = arith.mulf %21, %22 : vector<128x128xf32>
    %24 = vector.broadcast %20 : vector<1x128xf32> to vector<128x128xf32>
    %25 = arith.addf %23, %24 : vector<128x128xf32>
    %cst_13 = arith.constant 0.000000e+00 : f32
    %26 = vector.broadcast %cst_13 : f32 to vector<128x128xf32>
    %27 = arith.maximumf %25, %26 : vector<128x128xf32>
    %c0_14 = arith.constant 0 : index
    %c0_15 = arith.constant 0 : index
    %28 = vector.load %arg5[%c0_14, %c0_15] : memref<128x128xf32, #tpu.memory_space<vmem>>, vector<128x128xf32>
    tpu.vector_store %arg5[%c0_14, %c0_15], %27 {strides = array<i32>} : memref<128x128xf32, #tpu.memory_space<vmem>>, vector<128x128xf32>,
    return
  }
  func.func @transform_0(%arg0: i32) -> (i32, i32) {
    %c0_i32 = arith.constant 0 : i32
    %c0_i32_0 = arith.constant 0 : i32
    return %arg0, %c0_i32 : i32, i32
  }
  func.func @transform_1(%arg0: i32) -> (i32, i32, i32) {
    %c0_i32 = arith.constant 0 : i32
    %c0_i32_0 = arith.constant 0 : i32
    %c0_i32_1 = arith.constant 0 : i32
    %c0_i32_2 = arith.constant 0 : i32
    return %c0_i32, %c0_i32_0, %c0_i32_1 : i32, i32, i32
  }
  func.func @transform_2(%arg0: i32) -> (i32, i32) {
    %c0_i32 = arith.constant 0 : i32
    %c0_i32_0 = arith.constant 0 : i32
    %c0_i32_1 = arith.constant 0 : i32
    return %c0_i32, %c0_i32_0 : i32, i32
  }
  func.func @transform_3(%arg0: i32) -> (i32, i32) {
    %c0_i32 = arith.constant 0 : i32
    %c0_i32_0 = arith.constant 0 : i32
    %c0_i32_1 = arith.constant 0 : i32
    return %c0_i32, %c0_i32_0 : i32, i32
  }
  func.func @transform_4(%arg0: i32) -> (i32, i32) {
    %c0_i32 = arith.constant 0 : i32
    %c0_i32_0 = arith.constant 0 : i32
    return %arg0, %c0_i32 : i32, i32
  }
}

module attributes {stable_mosaic.version = 11 : i64} {
  func.func @_maxpool_kernel(%arg0: i32, %arg1: memref<9x32x64xf32, #tpu.memory_space<vmem>>, %arg2: memref<32x64xf32, #tpu.memory_space<vmem>>) attributes {dimension_semantics = [#tpu.dimension_semantics<parallel>], iteration_bounds = array<i64: 1>, scalar_prefetch = 0 : i64, scratch_operands = 0 : i64, tpu.core_type = #tpu.core_type<tc>, window_params = [{transform_indices = @transform_0, window_bounds = array<i64: 9, 32, 64>}, {transform_indices = @transform_1, window_bounds = array<i64: 32, 64>}]} {
    %c0 = arith.constant 0 : index
    %c0_0 = arith.constant 0 : index
    %c0_1 = arith.constant 0 : index
    %0 = vector.load %arg1[%c0, %c0_0, %c0_1] : memref<9x32x64xf32, #tpu.memory_space<vmem>>, vector<9x32x64xf32>
    %cst = arith.constant dense<0xFF800000> : vector<32x64xf32>
    %1 = vector.multi_reduction <maximumf>, %0, %cst [0] : vector<9x32x64xf32> to vector<32x64xf32>
    %c0_2 = arith.constant 0 : index
    %c0_3 = arith.constant 0 : index
    %2 = vector.load %arg2[%c0_2, %c0_3] : memref<32x64xf32, #tpu.memory_space<vmem>>, vector<32x64xf32>
    tpu.vector_store %arg2[%c0_2, %c0_3], %1 {strides = array<i32>} : memref<32x64xf32, #tpu.memory_space<vmem>>, vector<32x64xf32>,
    return
  }
  func.func @transform_0(%arg0: i32) -> (i32, i32, i32) {
    %c0_i32 = arith.constant 0 : i32
    %c0_i32_0 = arith.constant 0 : i32
    %c0_i32_1 = arith.constant 0 : i32
    return %c0_i32, %arg0, %c0_i32_0 : i32, i32, i32
  }
  func.func @transform_1(%arg0: i32) -> (i32, i32) {
    %c0_i32 = arith.constant 0 : i32
    %c0_i32_0 = arith.constant 0 : i32
    return %arg0, %c0_i32 : i32, i32
  }
}

module attributes {stable_mosaic.version = 11 : i64} {
  func.func @_gemm_stats_kernel(%arg0: i32, %arg1: i32, %arg2: memref<32x576xbf16, #tpu.memory_space<vmem>>, %arg3: memref<576x128xbf16, #tpu.memory_space<vmem>>, %arg4: memref<32x128xf32, #tpu.memory_space<vmem>>, %arg5: memref<8x128xf32, #tpu.memory_space<vmem>>, %arg6: memref<32x128xf32, #tpu.memory_space<vmem>>) attributes {dimension_semantics = [#tpu.dimension_semantics<parallel>, #tpu.dimension_semantics<arbitrary>], iteration_bounds = array<i64: 1, 1>, scalar_prefetch = 0 : i64, scratch_operands = 1 : i64, tpu.core_type = #tpu.core_type<tc>, window_params = [{transform_indices = @transform_0, window_bounds = array<i64: 32, 576>}, {transform_indices = @transform_1, window_bounds = array<i64: 576, 128>}, {transform_indices = @transform_2, window_bounds = array<i64: 32, 128>}, {transform_indices = @transform_3, window_bounds = array<i64: 8, 128>}]} {
    %c0_i32 = arith.constant 0 : i32
    %0 = arith.cmpi eq, %arg1, %c0_i32 : i32
    %1 = arith.extui %0 : i1 to i32
    %c0_i32_0 = arith.constant 0 : i32
    %2 = arith.cmpi ne, %1, %c0_i32_0 : i32
    scf.if %2 {
      %cst_10 = arith.constant 0.000000e+00 : f32
      %12 = vector.broadcast %cst_10 : f32 to vector<32x128xf32>
      %c0_11 = arith.constant 0 : index
      %c0_12 = arith.constant 0 : index
      %13 = vector.load %arg6[%c0_11, %c0_12] : memref<32x128xf32, #tpu.memory_space<vmem>>, vector<32x128xf32>
      tpu.vector_store %arg6[%c0_11, %c0_12], %12 {strides = array<i32>} : memref<32x128xf32, #tpu.memory_space<vmem>>, vector<32x128xf32>,
    } else {
    }
    %c0 = arith.constant 0 : index
    %c0_1 = arith.constant 0 : index
    %3 = vector.load %arg6[%c0, %c0_1] : memref<32x128xf32, #tpu.memory_space<vmem>>, vector<32x128xf32>
    %c0_2 = arith.constant 0 : index
    %c0_3 = arith.constant 0 : index
    %4 = vector.load %arg2[%c0_2, %c0_3] : memref<32x576xbf16, #tpu.memory_space<vmem>>, vector<32x576xbf16>
    %c0_4 = arith.constant 0 : index
    %c0_5 = arith.constant 0 : index
    %5 = vector.load %arg3[%c0_4, %c0_5] : memref<576x128xbf16, #tpu.memory_space<vmem>>, vector<576x128xbf16>
    %cst = arith.constant dense<0.000000e+00> : vector<32x128xf32>
    %6 = tpu.matmul %4, %5, %cst {dimension_numbers = #tpu.dot_dimension_numbers<[1], [0], [0], [1], [0, 0, 1, 1], [], []>} : vector<32x576xbf16>, vector<576x128xbf16>, vector<32x128xf32> -> vector<32x128xf32>
    %7 = arith.addf %3, %6 : vector<32x128xf32>
    %c0_6 = arith.constant 0 : index
    %c0_7 = arith.constant 0 : index
    %8 = vector.load %arg6[%c0_6, %c0_7] : memref<32x128xf32, #tpu.memory_space<vmem>>, vector<32x128xf32>
    tpu.vector_store %arg6[%c0_6, %c0_7], %7 {strides = array<i32>} : memref<32x128xf32, #tpu.memory_space<vmem>>, vector<32x128xf32>,
    %c0_i32_8 = arith.constant 0 : i32
    %9 = arith.cmpi eq, %arg1, %c0_i32_8 : i32
    %10 = arith.extui %9 : i1 to i32
    %c0_i32_9 = arith.constant 0 : i32
    %11 = arith.cmpi ne, %10, %c0_i32_9 : i32
    scf.if %11 {
      %c0_10 = arith.constant 0 : index
      %c0_11 = arith.constant 0 : index
      %12 = vector.load %arg6[%c0_10, %c0_11] : memref<32x128xf32, #tpu.memory_space<vmem>>, vector<32x128xf32>
      %c0_12 = arith.constant 0 : index
      %c0_13 = arith.constant 0 : index
      %13 = vector.load %arg4[%c0_12, %c0_13] : memref<32x128xf32, #tpu.memory_space<vmem>>, vector<32x128xf32>
      tpu.vector_store %arg4[%c0_12, %c0_13], %12 {strides = array<i32>} : memref<32x128xf32, #tpu.memory_space<vmem>>, vector<32x128xf32>,
      %cst_14 = arith.constant 0.000000e+00 : f32
      %14 = vector.broadcast %cst_14 : f32 to vector<8x128xf32>
      %c0_15 = arith.constant 0 : index
      %c0_16 = arith.constant 0 : index
      %15 = vector.load %arg5[%c0_15, %c0_16] : memref<8x128xf32, #tpu.memory_space<vmem>>, vector<8x128xf32>
      tpu.vector_store %arg5[%c0_15, %c0_16], %14 {strides = array<i32>} : memref<8x128xf32, #tpu.memory_space<vmem>>, vector<8x128xf32>,
      %cst_17 = arith.constant dense<0.000000e+00> : vector<128xf32>
      %16 = vector.multi_reduction <add>, %12, %cst_17 [0] : vector<32x128xf32> to vector<128xf32>
      %17 = vector.shape_cast %16 : vector<128xf32> to vector<1x128xf32>
      %c0_18 = arith.constant 0 : index
      %c0_19 = arith.constant 0 : index
      %18 = vector.load %arg5[%c0_18, %c0_19] : memref<8x128xf32, #tpu.memory_space<vmem>>, vector<1x128xf32>
      tpu.vector_store %arg5[%c0_18, %c0_19], %17 {strides = array<i32>} : memref<8x128xf32, #tpu.memory_space<vmem>>, vector<1x128xf32>,
      %19 = arith.mulf %12, %12 : vector<32x128xf32>
      %cst_20 = arith.constant dense<0.000000e+00> : vector<128xf32>
      %20 = vector.multi_reduction <add>, %19, %cst_20 [0] : vector<32x128xf32> to vector<128xf32>
      %21 = vector.shape_cast %20 : vector<128xf32> to vector<1x128xf32>
      %c1 = arith.constant 1 : index
      %c0_21 = arith.constant 0 : index
      %22 = vector.load %arg5[%c1, %c0_21] : memref<8x128xf32, #tpu.memory_space<vmem>>, vector<1x128xf32>
      tpu.vector_store %arg5[%c1, %c0_21], %21 {strides = array<i32>} : memref<8x128xf32, #tpu.memory_space<vmem>>, vector<1x128xf32>,
    } else {
    }
    return
  }
  func.func @transform_0(%arg0: i32, %arg1: i32) -> (i32, i32) {
    %c0_i32 = arith.constant 0 : i32
    return %arg0, %arg1 : i32, i32
  }
  func.func @transform_1(%arg0: i32, %arg1: i32) -> (i32, i32) {
    %c0_i32 = arith.constant 0 : i32
    %c0_i32_0 = arith.constant 0 : i32
    return %arg1, %c0_i32 : i32, i32
  }
  func.func @transform_2(%arg0: i32, %arg1: i32) -> (i32, i32) {
    %c0_i32 = arith.constant 0 : i32
    %c0_i32_0 = arith.constant 0 : i32
    return %arg0, %c0_i32 : i32, i32
  }
  func.func @transform_3(%arg0: i32, %arg1: i32) -> (i32, i32) {
    %c0_i32 = arith.constant 0 : i32
    %c0_i32_0 = arith.constant 0 : i32
    return %arg0, %c0_i32 : i32, i32
  }
}

module attributes {stable_mosaic.version = 11 : i64} {
  func.func @kernel(%arg0: i32, %arg1: memref<32x128xf32, #tpu.memory_space<vmem>>, %arg2: memref<1x8x128xf32, #tpu.memory_space<vmem>>, %arg3: memref<1x128xf32, #tpu.memory_space<vmem>>, %arg4: memref<1x128xf32, #tpu.memory_space<vmem>>, %arg5: memref<32x128xf32, #tpu.memory_space<vmem>>) attributes {dimension_semantics = [#tpu.dimension_semantics<parallel>], iteration_bounds = array<i64: 1>, scalar_prefetch = 0 : i64, scratch_operands = 0 : i64, tpu.core_type = #tpu.core_type<tc>, window_params = [{transform_indices = @transform_0, window_bounds = array<i64: 32, 128>}, {pipeline_mode = #tpu.pipeline_mode<synchronous>, transform_indices = @transform_1, window_bounds = array<i64: 1, 8, 128>}, {pipeline_mode = #tpu.pipeline_mode<synchronous>, transform_indices = @transform_2, window_bounds = array<i64: 1, 128>}, {pipeline_mode = #tpu.pipeline_mode<synchronous>, transform_indices = @transform_3, window_bounds = array<i64: 1, 128>}, {transform_indices = @transform_4, window_bounds = array<i64: 32, 128>}]} {
    %c0 = arith.constant 0 : index
    %c0_0 = arith.constant 0 : index
    %c0_1 = arith.constant 0 : index
    %0 = vector.load %arg2[%c0, %c0_0, %c0_1] : memref<1x8x128xf32, #tpu.memory_space<vmem>>, vector<1x8x128xf32>
    %1 = vector.extract_strided_slice %0 {offsets = [0, 0, 0], sizes = [1, 1, 128], strides = [1, 1, 1]} : vector<1x8x128xf32> to vector<1x1x128xf32>
    %cst = arith.constant dense<0.000000e+00> : vector<1x128xf32>
    %2 = vector.multi_reduction <add>, %1, %cst [0] : vector<1x1x128xf32> to vector<1x128xf32>
    %3 = vector.extract_strided_slice %0 {offsets = [0, 1, 0], sizes = [1, 1, 128], strides = [1, 1, 1]} : vector<1x8x128xf32> to vector<1x1x128xf32>
    %cst_2 = arith.constant dense<0.000000e+00> : vector<1x128xf32>
    %4 = vector.multi_reduction <add>, %3, %cst_2 [0] : vector<1x1x128xf32> to vector<1x128xf32>
    %cst_3 = arith.constant 3.125000e-02 : f32
    %5 = vector.broadcast %cst_3 : f32 to vector<1x128xf32>
    %6 = arith.mulf %2, %5 : vector<1x128xf32>
    %cst_4 = arith.constant 3.125000e-02 : f32
    %7 = vector.broadcast %cst_4 : f32 to vector<1x128xf32>
    %8 = arith.mulf %4, %7 : vector<1x128xf32>
    %9 = arith.mulf %6, %6 : vector<1x128xf32>
    %10 = arith.subf %8, %9 : vector<1x128xf32>
    %cst_5 = arith.constant 0.000000e+00 : f32
    %11 = vector.broadcast %cst_5 : f32 to vector<1x128xf32>
    %12 = arith.maximumf %10, %11 : vector<1x128xf32>
    %c0_6 = arith.constant 0 : index
    %c0_7 = arith.constant 0 : index
    %13 = vector.load %arg3[%c0_6, %c0_7] : memref<1x128xf32, #tpu.memory_space<vmem>>, vector<1x128xf32>
    %cst_8 = arith.constant 9.99999974E-6 : f32
    %14 = vector.broadcast %cst_8 : f32 to vector<1x128xf32>
    %15 = arith.addf %12, %14 : vector<1x128xf32>
    %16 = math.rsqrt %15 : vector<1x128xf32>
    %17 = arith.mulf %13, %16 : vector<1x128xf32>
    %c0_9 = arith.constant 0 : index
    %c0_10 = arith.constant 0 : index
    %18 = vector.load %arg4[%c0_9, %c0_10] : memref<1x128xf32, #tpu.memory_space<vmem>>, vector<1x128xf32>
    %19 = arith.mulf %6, %17 : vector<1x128xf32>
    %20 = arith.subf %18, %19 : vector<1x128xf32>
    %c0_11 = arith.constant 0 : index
    %c0_12 = arith.constant 0 : index
    %21 = vector.load %arg1[%c0_11, %c0_12] : memref<32x128xf32, #tpu.memory_space<vmem>>, vector<32x128xf32>
    %22 = vector.broadcast %17 : vector<1x128xf32> to vector<32x128xf32>
    %23 = arith.mulf %21, %22 : vector<32x128xf32>
    %24 = vector.broadcast %20 : vector<1x128xf32> to vector<32x128xf32>
    %25 = arith.addf %23, %24 : vector<32x128xf32>
    %cst_13 = arith.constant 0.000000e+00 : f32
    %26 = vector.broadcast %cst_13 : f32 to vector<32x128xf32>
    %27 = arith.maximumf %25, %26 : vector<32x128xf32>
    %c0_14 = arith.constant 0 : index
    %c0_15 = arith.constant 0 : index
    %28 = vector.load %arg5[%c0_14, %c0_15] : memref<32x128xf32, #tpu.memory_space<vmem>>, vector<32x128xf32>
    tpu.vector_store %arg5[%c0_14, %c0_15], %27 {strides = array<i32>} : memref<32x128xf32, #tpu.memory_space<vmem>>, vector<32x128xf32>,
    return
  }
  func.func @transform_0(%arg0: i32) -> (i32, i32) {
    %c0_i32 = arith.constant 0 : i32
    %c0_i32_0 = arith.constant 0 : i32
    return %arg0, %c0_i32 : i32, i32
  }
  func.func @transform_1(%arg0: i32) -> (i32, i32, i32) {
    %c0_i32 = arith.constant 0 : i32
    %c0_i32_0 = arith.constant 0 : i32
    %c0_i32_1 = arith.constant 0 : i32
    %c0_i32_2 = arith.constant 0 : i32
    return %c0_i32, %c0_i32_0, %c0_i32_1 : i32, i32, i32
  }
  func.func @transform_2(%arg0: i32) -> (i32, i32) {
    %c0_i32 = arith.constant 0 : i32
    %c0_i32_0 = arith.constant 0 : i32
    %c0_i32_1 = arith.constant 0 : i32
    return %c0_i32, %c0_i32_0 : i32, i32
  }
  func.func @transform_3(%arg0: i32) -> (i32, i32) {
    %c0_i32 = arith.constant 0 : i32
    %c0_i32_0 = arith.constant 0 : i32
    %c0_i32_1 = arith.constant 0 : i32
    return %c0_i32, %c0_i32_0 : i32, i32
  }
  func.func @transform_4(%arg0: i32) -> (i32, i32) {
    %c0_i32 = arith.constant 0 : i32
    %c0_i32_0 = arith.constant 0 : i32
    return %arg0, %c0_i32 : i32, i32
  }
}

module attributes {stable_mosaic.version = 11 : i64} {
  func.func @kernel(%arg0: i32, %arg1: memref<32x128xf32, #tpu.memory_space<vmem>>, %arg2: memref<1x8x128xf32, #tpu.memory_space<vmem>>, %arg3: memref<1x128xf32, #tpu.memory_space<vmem>>, %arg4: memref<1x128xf32, #tpu.memory_space<vmem>>, %arg5: memref<32x128xf32, #tpu.memory_space<vmem>>, %arg6: memref<32x128xf32, #tpu.memory_space<vmem>>) attributes {dimension_semantics = [#tpu.dimension_semantics<parallel>], iteration_bounds = array<i64: 1>, scalar_prefetch = 0 : i64, scratch_operands = 0 : i64, tpu.core_type = #tpu.core_type<tc>, window_params = [{transform_indices = @transform_0, window_bounds = array<i64: 32, 128>}, {pipeline_mode = #tpu.pipeline_mode<synchronous>, transform_indices = @transform_1, window_bounds = array<i64: 1, 8, 128>}, {pipeline_mode = #tpu.pipeline_mode<synchronous>, transform_indices = @transform_2, window_bounds = array<i64: 1, 128>}, {pipeline_mode = #tpu.pipeline_mode<synchronous>, transform_indices = @transform_3, window_bounds = array<i64: 1, 128>}, {transform_indices = @transform_4, window_bounds = array<i64: 32, 128>}, {transform_indices = @transform_5, window_bounds = array<i64: 32, 128>}]} {
    %c0 = arith.constant 0 : index
    %c0_0 = arith.constant 0 : index
    %c0_1 = arith.constant 0 : index
    %0 = vector.load %arg2[%c0, %c0_0, %c0_1] : memref<1x8x128xf32, #tpu.memory_space<vmem>>, vector<1x8x128xf32>
    %1 = vector.extract_strided_slice %0 {offsets = [0, 0, 0], sizes = [1, 1, 128], strides = [1, 1, 1]} : vector<1x8x128xf32> to vector<1x1x128xf32>
    %cst = arith.constant dense<0.000000e+00> : vector<1x128xf32>
    %2 = vector.multi_reduction <add>, %1, %cst [0] : vector<1x1x128xf32> to vector<1x128xf32>
    %3 = vector.extract_strided_slice %0 {offsets = [0, 1, 0], sizes = [1, 1, 128], strides = [1, 1, 1]} : vector<1x8x128xf32> to vector<1x1x128xf32>
    %cst_2 = arith.constant dense<0.000000e+00> : vector<1x128xf32>
    %4 = vector.multi_reduction <add>, %3, %cst_2 [0] : vector<1x1x128xf32> to vector<1x128xf32>
    %cst_3 = arith.constant 3.125000e-02 : f32
    %5 = vector.broadcast %cst_3 : f32 to vector<1x128xf32>
    %6 = arith.mulf %2, %5 : vector<1x128xf32>
    %cst_4 = arith.constant 3.125000e-02 : f32
    %7 = vector.broadcast %cst_4 : f32 to vector<1x128xf32>
    %8 = arith.mulf %4, %7 : vector<1x128xf32>
    %9 = arith.mulf %6, %6 : vector<1x128xf32>
    %10 = arith.subf %8, %9 : vector<1x128xf32>
    %cst_5 = arith.constant 0.000000e+00 : f32
    %11 = vector.broadcast %cst_5 : f32 to vector<1x128xf32>
    %12 = arith.maximumf %10, %11 : vector<1x128xf32>
    %c0_6 = arith.constant 0 : index
    %c0_7 = arith.constant 0 : index
    %13 = vector.load %arg3[%c0_6, %c0_7] : memref<1x128xf32, #tpu.memory_space<vmem>>, vector<1x128xf32>
    %cst_8 = arith.constant 9.99999974E-6 : f32
    %14 = vector.broadcast %cst_8 : f32 to vector<1x128xf32>
    %15 = arith.addf %12, %14 : vector<1x128xf32>
    %16 = math.rsqrt %15 : vector<1x128xf32>
    %17 = arith.mulf %13, %16 : vector<1x128xf32>
    %c0_9 = arith.constant 0 : index
    %c0_10 = arith.constant 0 : index
    %18 = vector.load %arg4[%c0_9, %c0_10] : memref<1x128xf32, #tpu.memory_space<vmem>>, vector<1x128xf32>
    %19 = arith.mulf %6, %17 : vector<1x128xf32>
    %20 = arith.subf %18, %19 : vector<1x128xf32>
    %c0_11 = arith.constant 0 : index
    %c0_12 = arith.constant 0 : index
    %21 = vector.load %arg1[%c0_11, %c0_12] : memref<32x128xf32, #tpu.memory_space<vmem>>, vector<32x128xf32>
    %22 = vector.broadcast %17 : vector<1x128xf32> to vector<32x128xf32>
    %23 = arith.mulf %21, %22 : vector<32x128xf32>
    %24 = vector.broadcast %20 : vector<1x128xf32> to vector<32x128xf32>
    %25 = arith.addf %23, %24 : vector<32x128xf32>
    %c0_13 = arith.constant 0 : index
    %c0_14 = arith.constant 0 : index
    %26 = vector.load %arg5[%c0_13, %c0_14] : memref<32x128xf32, #tpu.memory_space<vmem>>, vector<32x128xf32>
    %27 = arith.addf %25, %26 : vector<32x128xf32>
    %cst_15 = arith.constant 0.000000e+00 : f32
    %28 = vector.broadcast %cst_15 : f32 to vector<32x128xf32>
    %29 = arith.maximumf %27, %28 : vector<32x128xf32>
    %c0_16 = arith.constant 0 : index
    %c0_17 = arith.constant 0 : index
    %30 = vector.load %arg6[%c0_16, %c0_17] : memref<32x128xf32, #tpu.memory_space<vmem>>, vector<32x128xf32>
    tpu.vector_store %arg6[%c0_16, %c0_17], %29 {strides = array<i32>} : memref<32x128xf32, #tpu.memory_space<vmem>>, vector<32x128xf32>,
    return
  }
  func.func @transform_0(%arg0: i32) -> (i32, i32) {
    %c0_i32 = arith.constant 0 : i32
    %c0_i32_0 = arith.constant 0 : i32
    return %arg0, %c0_i32 : i32, i32
  }
  func.func @transform_1(%arg0: i32) -> (i32, i32, i32) {
    %c0_i32 = arith.constant 0 : i32
    %c0_i32_0 = arith.constant 0 : i32
    %c0_i32_1 = arith.constant 0 : i32
    %c0_i32_2 = arith.constant 0 : i32
    return %c0_i32, %c0_i32_0, %c0_i32_1 : i32, i32, i32
  }
  func.func @transform_2(%arg0: i32) -> (i32, i32) {
    %c0_i32 = arith.constant 0 : i32
    %c0_i32_0 = arith.constant 0 : i32
    %c0_i32_1 = arith.constant 0 : i32
    return %c0_i32, %c0_i32_0 : i32, i32
  }
  func.func @transform_3(%arg0: i32) -> (i32, i32) {
    %c0_i32 = arith.constant 0 : i32
    %c0_i32_0 = arith.constant 0 : i32
    %c0_i32_1 = arith.constant 0 : i32
    return %c0_i32, %c0_i32_0 : i32, i32
  }
  func.func @transform_4(%arg0: i32) -> (i32, i32) {
    %c0_i32 = arith.constant 0 : i32
    %c0_i32_0 = arith.constant 0 : i32
    return %arg0, %c0_i32 : i32, i32
  }
  func.func @transform_5(%arg0: i32) -> (i32, i32) {
    %c0_i32 = arith.constant 0 : i32
    %c0_i32_0 = arith.constant 0 : i32
    return %arg0, %c0_i32 : i32, i32
  }
}

module attributes {stable_mosaic.version = 11 : i64} {
  func.func @_gemm_stats_kernel(%arg0: i32, %arg1: i32, %arg2: memref<8x64xbf16, #tpu.memory_space<vmem>>, %arg3: memref<64x128xbf16, #tpu.memory_space<vmem>>, %arg4: memref<8x128xf32, #tpu.memory_space<vmem>>, %arg5: memref<8x128xf32, #tpu.memory_space<vmem>>, %arg6: memref<8x128xf32, #tpu.memory_space<vmem>>) attributes {dimension_semantics = [#tpu.dimension_semantics<parallel>, #tpu.dimension_semantics<arbitrary>], iteration_bounds = array<i64: 1, 1>, scalar_prefetch = 0 : i64, scratch_operands = 1 : i64, tpu.core_type = #tpu.core_type<tc>, window_params = [{transform_indices = @transform_0, window_bounds = array<i64: 8, 64>}, {transform_indices = @transform_1, window_bounds = array<i64: 64, 128>}, {transform_indices = @transform_2, window_bounds = array<i64: 8, 128>}, {transform_indices = @transform_3, window_bounds = array<i64: 8, 128>}]} {
    %c0_i32 = arith.constant 0 : i32
    %0 = arith.cmpi eq, %arg1, %c0_i32 : i32
    %1 = arith.extui %0 : i1 to i32
    %c0_i32_0 = arith.constant 0 : i32
    %2 = arith.cmpi ne, %1, %c0_i32_0 : i32
    scf.if %2 {
      %cst_10 = arith.constant 0.000000e+00 : f32
      %12 = vector.broadcast %cst_10 : f32 to vector<8x128xf32>
      %c0_11 = arith.constant 0 : index
      %c0_12 = arith.constant 0 : index
      %13 = vector.load %arg6[%c0_11, %c0_12] : memref<8x128xf32, #tpu.memory_space<vmem>>, vector<8x128xf32>
      tpu.vector_store %arg6[%c0_11, %c0_12], %12 {strides = array<i32>} : memref<8x128xf32, #tpu.memory_space<vmem>>, vector<8x128xf32>,
    } else {
    }
    %c0 = arith.constant 0 : index
    %c0_1 = arith.constant 0 : index
    %3 = vector.load %arg6[%c0, %c0_1] : memref<8x128xf32, #tpu.memory_space<vmem>>, vector<8x128xf32>
    %c0_2 = arith.constant 0 : index
    %c0_3 = arith.constant 0 : index
    %4 = vector.load %arg2[%c0_2, %c0_3] : memref<8x64xbf16, #tpu.memory_space<vmem>>, vector<8x64xbf16>
    %c0_4 = arith.constant 0 : index
    %c0_5 = arith.constant 0 : index
    %5 = vector.load %arg3[%c0_4, %c0_5] : memref<64x128xbf16, #tpu.memory_space<vmem>>, vector<64x128xbf16>
    %cst = arith.constant dense<0.000000e+00> : vector<8x128xf32>
    %6 = tpu.matmul %4, %5, %cst {dimension_numbers = #tpu.dot_dimension_numbers<[1], [0], [0], [1], [0, 0, 1, 1], [], []>} : vector<8x64xbf16>, vector<64x128xbf16>, vector<8x128xf32> -> vector<8x128xf32>
    %7 = arith.addf %3, %6 : vector<8x128xf32>
    %c0_6 = arith.constant 0 : index
    %c0_7 = arith.constant 0 : index
    %8 = vector.load %arg6[%c0_6, %c0_7] : memref<8x128xf32, #tpu.memory_space<vmem>>, vector<8x128xf32>
    tpu.vector_store %arg6[%c0_6, %c0_7], %7 {strides = array<i32>} : memref<8x128xf32, #tpu.memory_space<vmem>>, vector<8x128xf32>,
    %c0_i32_8 = arith.constant 0 : i32
    %9 = arith.cmpi eq, %arg1, %c0_i32_8 : i32
    %10 = arith.extui %9 : i1 to i32
    %c0_i32_9 = arith.constant 0 : i32
    %11 = arith.cmpi ne, %10, %c0_i32_9 : i32
    scf.if %11 {
      %c0_10 = arith.constant 0 : index
      %c0_11 = arith.constant 0 : index
      %12 = vector.load %arg6[%c0_10, %c0_11] : memref<8x128xf32, #tpu.memory_space<vmem>>, vector<8x128xf32>
      %c0_12 = arith.constant 0 : index
      %c0_13 = arith.constant 0 : index
      %13 = vector.load %arg4[%c0_12, %c0_13] : memref<8x128xf32, #tpu.memory_space<vmem>>, vector<8x128xf32>
      tpu.vector_store %arg4[%c0_12, %c0_13], %12 {strides = array<i32>} : memref<8x128xf32, #tpu.memory_space<vmem>>, vector<8x128xf32>,
      %cst_14 = arith.constant 0.000000e+00 : f32
      %14 = vector.broadcast %cst_14 : f32 to vector<8x128xf32>
      %c0_15 = arith.constant 0 : index
      %c0_16 = arith.constant 0 : index
      %15 = vector.load %arg5[%c0_15, %c0_16] : memref<8x128xf32, #tpu.memory_space<vmem>>, vector<8x128xf32>
      tpu.vector_store %arg5[%c0_15, %c0_16], %14 {strides = array<i32>} : memref<8x128xf32, #tpu.memory_space<vmem>>, vector<8x128xf32>,
      %cst_17 = arith.constant dense<0.000000e+00> : vector<128xf32>
      %16 = vector.multi_reduction <add>, %12, %cst_17 [0] : vector<8x128xf32> to vector<128xf32>
      %17 = vector.shape_cast %16 : vector<128xf32> to vector<1x128xf32>
      %c0_18 = arith.constant 0 : index
      %c0_19 = arith.constant 0 : index
      %18 = vector.load %arg5[%c0_18, %c0_19] : memref<8x128xf32, #tpu.memory_space<vmem>>, vector<1x128xf32>
      tpu.vector_store %arg5[%c0_18, %c0_19], %17 {strides = array<i32>} : memref<8x128xf32, #tpu.memory_space<vmem>>, vector<1x128xf32>,
      %19 = arith.mulf %12, %12 : vector<8x128xf32>
      %cst_20 = arith.constant dense<0.000000e+00> : vector<128xf32>
      %20 = vector.multi_reduction <add>, %19, %cst_20 [0] : vector<8x128xf32> to vector<128xf32>
      %21 = vector.shape_cast %20 : vector<128xf32> to vector<1x128xf32>
      %c1 = arith.constant 1 : index
      %c0_21 = arith.constant 0 : index
      %22 = vector.load %arg5[%c1, %c0_21] : memref<8x128xf32, #tpu.memory_space<vmem>>, vector<1x128xf32>
      tpu.vector_store %arg5[%c1, %c0_21], %21 {strides = array<i32>} : memref<8x128xf32, #tpu.memory_space<vmem>>, vector<1x128xf32>,
    } else {
    }
    return
  }
  func.func @transform_0(%arg0: i32, %arg1: i32) -> (i32, i32) {
    %c0_i32 = arith.constant 0 : i32
    return %arg0, %arg1 : i32, i32
  }
  func.func @transform_1(%arg0: i32, %arg1: i32) -> (i32, i32) {
    %c0_i32 = arith.constant 0 : i32
    %c0_i32_0 = arith.constant 0 : i32
    return %arg1, %c0_i32 : i32, i32
  }
  func.func @transform_2(%arg0: i32, %arg1: i32) -> (i32, i32) {
    %c0_i32 = arith.constant 0 : i32
    %c0_i32_0 = arith.constant 0 : i32
    return %arg0, %c0_i32 : i32, i32
  }
  func.func @transform_3(%arg0: i32, %arg1: i32) -> (i32, i32) {
    %c0_i32 = arith.constant 0 : i32
    %c0_i32_0 = arith.constant 0 : i32
    return %arg0, %c0_i32 : i32, i32
  }
}

module attributes {stable_mosaic.version = 11 : i64} {
  func.func @kernel(%arg0: i32, %arg1: memref<8x128xf32, #tpu.memory_space<vmem>>, %arg2: memref<1x8x128xf32, #tpu.memory_space<vmem>>, %arg3: memref<1x128xf32, #tpu.memory_space<vmem>>, %arg4: memref<1x128xf32, #tpu.memory_space<vmem>>, %arg5: memref<8x128xf32, #tpu.memory_space<vmem>>) attributes {dimension_semantics = [#tpu.dimension_semantics<parallel>], iteration_bounds = array<i64: 1>, scalar_prefetch = 0 : i64, scratch_operands = 0 : i64, tpu.core_type = #tpu.core_type<tc>, window_params = [{transform_indices = @transform_0, window_bounds = array<i64: 8, 128>}, {pipeline_mode = #tpu.pipeline_mode<synchronous>, transform_indices = @transform_1, window_bounds = array<i64: 1, 8, 128>}, {pipeline_mode = #tpu.pipeline_mode<synchronous>, transform_indices = @transform_2, window_bounds = array<i64: 1, 128>}, {pipeline_mode = #tpu.pipeline_mode<synchronous>, transform_indices = @transform_3, window_bounds = array<i64: 1, 128>}, {transform_indices = @transform_4, window_bounds = array<i64: 8, 128>}]} {
    %c0 = arith.constant 0 : index
    %c0_0 = arith.constant 0 : index
    %c0_1 = arith.constant 0 : index
    %0 = vector.load %arg2[%c0, %c0_0, %c0_1] : memref<1x8x128xf32, #tpu.memory_space<vmem>>, vector<1x8x128xf32>
    %1 = vector.extract_strided_slice %0 {offsets = [0, 0, 0], sizes = [1, 1, 128], strides = [1, 1, 1]} : vector<1x8x128xf32> to vector<1x1x128xf32>
    %cst = arith.constant dense<0.000000e+00> : vector<1x128xf32>
    %2 = vector.multi_reduction <add>, %1, %cst [0] : vector<1x1x128xf32> to vector<1x128xf32>
    %3 = vector.extract_strided_slice %0 {offsets = [0, 1, 0], sizes = [1, 1, 128], strides = [1, 1, 1]} : vector<1x8x128xf32> to vector<1x1x128xf32>
    %cst_2 = arith.constant dense<0.000000e+00> : vector<1x128xf32>
    %4 = vector.multi_reduction <add>, %3, %cst_2 [0] : vector<1x1x128xf32> to vector<1x128xf32>
    %cst_3 = arith.constant 1.250000e-01 : f32
    %5 = vector.broadcast %cst_3 : f32 to vector<1x128xf32>
    %6 = arith.mulf %2, %5 : vector<1x128xf32>
    %cst_4 = arith.constant 1.250000e-01 : f32
    %7 = vector.broadcast %cst_4 : f32 to vector<1x128xf32>
    %8 = arith.mulf %4, %7 : vector<1x128xf32>
    %9 = arith.mulf %6, %6 : vector<1x128xf32>
    %10 = arith.subf %8, %9 : vector<1x128xf32>
    %cst_5 = arith.constant 0.000000e+00 : f32
    %11 = vector.broadcast %cst_5 : f32 to vector<1x128xf32>
    %12 = arith.maximumf %10, %11 : vector<1x128xf32>
    %c0_6 = arith.constant 0 : index
    %c0_7 = arith.constant 0 : index
    %13 = vector.load %arg3[%c0_6, %c0_7] : memref<1x128xf32, #tpu.memory_space<vmem>>, vector<1x128xf32>
    %cst_8 = arith.constant 9.99999974E-6 : f32
    %14 = vector.broadcast %cst_8 : f32 to vector<1x128xf32>
    %15 = arith.addf %12, %14 : vector<1x128xf32>
    %16 = math.rsqrt %15 : vector<1x128xf32>
    %17 = arith.mulf %13, %16 : vector<1x128xf32>
    %c0_9 = arith.constant 0 : index
    %c0_10 = arith.constant 0 : index
    %18 = vector.load %arg4[%c0_9, %c0_10] : memref<1x128xf32, #tpu.memory_space<vmem>>, vector<1x128xf32>
    %19 = arith.mulf %6, %17 : vector<1x128xf32>
    %20 = arith.subf %18, %19 : vector<1x128xf32>
    %c0_11 = arith.constant 0 : index
    %c0_12 = arith.constant 0 : index
    %21 = vector.load %arg1[%c0_11, %c0_12] : memref<8x128xf32, #tpu.memory_space<vmem>>, vector<8x128xf32>
    %22 = vector.broadcast %17 : vector<1x128xf32> to vector<8x128xf32>
    %23 = arith.mulf %21, %22 : vector<8x128xf32>
    %24 = vector.broadcast %20 : vector<1x128xf32> to vector<8x128xf32>
    %25 = arith.addf %23, %24 : vector<8x128xf32>
    %c0_13 = arith.constant 0 : index
    %c0_14 = arith.constant 0 : index
    %26 = vector.load %arg5[%c0_13, %c0_14] : memref<8x128xf32, #tpu.memory_space<vmem>>, vector<8x128xf32>
    tpu.vector_store %arg5[%c0_13, %c0_14], %25 {strides = array<i32>} : memref<8x128xf32, #tpu.memory_space<vmem>>, vector<8x128xf32>,
    return
  }
  func.func @transform_0(%arg0: i32) -> (i32, i32) {
    %c0_i32 = arith.constant 0 : i32
    %c0_i32_0 = arith.constant 0 : i32
    return %arg0, %c0_i32 : i32, i32
  }
  func.func @transform_1(%arg0: i32) -> (i32, i32, i32) {
    %c0_i32 = arith.constant 0 : i32
    %c0_i32_0 = arith.constant 0 : i32
    %c0_i32_1 = arith.constant 0 : i32
    %c0_i32_2 = arith.constant 0 : i32
    return %c0_i32, %c0_i32_0, %c0_i32_1 : i32, i32, i32
  }
  func.func @transform_2(%arg0: i32) -> (i32, i32) {
    %c0_i32 = arith.constant 0 : i32
    %c0_i32_0 = arith.constant 0 : i32
    %c0_i32_1 = arith.constant 0 : i32
    return %c0_i32, %c0_i32_0 : i32, i32
  }
  func.func @transform_3(%arg0: i32) -> (i32, i32) {
    %c0_i32 = arith.constant 0 : i32
    %c0_i32_0 = arith.constant 0 : i32
    %c0_i32_1 = arith.constant 0 : i32
    return %c0_i32, %c0_i32_0 : i32, i32
  }
  func.func @transform_4(%arg0: i32) -> (i32, i32) {
    %c0_i32 = arith.constant 0 : i32
    %c0_i32_0 = arith.constant 0 : i32
    return %arg0, %c0_i32 : i32, i32
  }
}

module attributes {stable_mosaic.version = 11 : i64} {
  func.func @_gemm_stats_kernel(%arg0: i32, %arg1: i32, %arg2: memref<8x576xbf16, #tpu.memory_space<vmem>>, %arg3: memref<576x128xbf16, #tpu.memory_space<vmem>>, %arg4: memref<8x128xf32, #tpu.memory_space<vmem>>, %arg5: memref<8x128xf32, #tpu.memory_space<vmem>>, %arg6: memref<8x128xf32, #tpu.memory_space<vmem>>) attributes {dimension_semantics = [#tpu.dimension_semantics<parallel>, #tpu.dimension_semantics<arbitrary>], iteration_bounds = array<i64: 1, 1>, scalar_prefetch = 0 : i64, scratch_operands = 1 : i64, tpu.core_type = #tpu.core_type<tc>, window_params = [{transform_indices = @transform_0, window_bounds = array<i64: 8, 576>}, {transform_indices = @transform_1, window_bounds = array<i64: 576, 128>}, {transform_indices = @transform_2, window_bounds = array<i64: 8, 128>}, {transform_indices = @transform_3, window_bounds = array<i64: 8, 128>}]} {
    %c0_i32 = arith.constant 0 : i32
    %0 = arith.cmpi eq, %arg1, %c0_i32 : i32
    %1 = arith.extui %0 : i1 to i32
    %c0_i32_0 = arith.constant 0 : i32
    %2 = arith.cmpi ne, %1, %c0_i32_0 : i32
    scf.if %2 {
      %cst_10 = arith.constant 0.000000e+00 : f32
      %12 = vector.broadcast %cst_10 : f32 to vector<8x128xf32>
      %c0_11 = arith.constant 0 : index
      %c0_12 = arith.constant 0 : index
      %13 = vector.load %arg6[%c0_11, %c0_12] : memref<8x128xf32, #tpu.memory_space<vmem>>, vector<8x128xf32>
      tpu.vector_store %arg6[%c0_11, %c0_12], %12 {strides = array<i32>} : memref<8x128xf32, #tpu.memory_space<vmem>>, vector<8x128xf32>,
    } else {
    }
    %c0 = arith.constant 0 : index
    %c0_1 = arith.constant 0 : index
    %3 = vector.load %arg6[%c0, %c0_1] : memref<8x128xf32, #tpu.memory_space<vmem>>, vector<8x128xf32>
    %c0_2 = arith.constant 0 : index
    %c0_3 = arith.constant 0 : index
    %4 = vector.load %arg2[%c0_2, %c0_3] : memref<8x576xbf16, #tpu.memory_space<vmem>>, vector<8x576xbf16>
    %c0_4 = arith.constant 0 : index
    %c0_5 = arith.constant 0 : index
    %5 = vector.load %arg3[%c0_4, %c0_5] : memref<576x128xbf16, #tpu.memory_space<vmem>>, vector<576x128xbf16>
    %cst = arith.constant dense<0.000000e+00> : vector<8x128xf32>
    %6 = tpu.matmul %4, %5, %cst {dimension_numbers = #tpu.dot_dimension_numbers<[1], [0], [0], [1], [0, 0, 1, 1], [], []>} : vector<8x576xbf16>, vector<576x128xbf16>, vector<8x128xf32> -> vector<8x128xf32>
    %7 = arith.addf %3, %6 : vector<8x128xf32>
    %c0_6 = arith.constant 0 : index
    %c0_7 = arith.constant 0 : index
    %8 = vector.load %arg6[%c0_6, %c0_7] : memref<8x128xf32, #tpu.memory_space<vmem>>, vector<8x128xf32>
    tpu.vector_store %arg6[%c0_6, %c0_7], %7 {strides = array<i32>} : memref<8x128xf32, #tpu.memory_space<vmem>>, vector<8x128xf32>,
    %c0_i32_8 = arith.constant 0 : i32
    %9 = arith.cmpi eq, %arg1, %c0_i32_8 : i32
    %10 = arith.extui %9 : i1 to i32
    %c0_i32_9 = arith.constant 0 : i32
    %11 = arith.cmpi ne, %10, %c0_i32_9 : i32
    scf.if %11 {
      %c0_10 = arith.constant 0 : index
      %c0_11 = arith.constant 0 : index
      %12 = vector.load %arg6[%c0_10, %c0_11] : memref<8x128xf32, #tpu.memory_space<vmem>>, vector<8x128xf32>
      %c0_12 = arith.constant 0 : index
      %c0_13 = arith.constant 0 : index
      %13 = vector.load %arg4[%c0_12, %c0_13] : memref<8x128xf32, #tpu.memory_space<vmem>>, vector<8x128xf32>
      tpu.vector_store %arg4[%c0_12, %c0_13], %12 {strides = array<i32>} : memref<8x128xf32, #tpu.memory_space<vmem>>, vector<8x128xf32>,
      %cst_14 = arith.constant 0.000000e+00 : f32
      %14 = vector.broadcast %cst_14 : f32 to vector<8x128xf32>
      %c0_15 = arith.constant 0 : index
      %c0_16 = arith.constant 0 : index
      %15 = vector.load %arg5[%c0_15, %c0_16] : memref<8x128xf32, #tpu.memory_space<vmem>>, vector<8x128xf32>
      tpu.vector_store %arg5[%c0_15, %c0_16], %14 {strides = array<i32>} : memref<8x128xf32, #tpu.memory_space<vmem>>, vector<8x128xf32>,
      %cst_17 = arith.constant dense<0.000000e+00> : vector<128xf32>
      %16 = vector.multi_reduction <add>, %12, %cst_17 [0] : vector<8x128xf32> to vector<128xf32>
      %17 = vector.shape_cast %16 : vector<128xf32> to vector<1x128xf32>
      %c0_18 = arith.constant 0 : index
      %c0_19 = arith.constant 0 : index
      %18 = vector.load %arg5[%c0_18, %c0_19] : memref<8x128xf32, #tpu.memory_space<vmem>>, vector<1x128xf32>
      tpu.vector_store %arg5[%c0_18, %c0_19], %17 {strides = array<i32>} : memref<8x128xf32, #tpu.memory_space<vmem>>, vector<1x128xf32>,
      %19 = arith.mulf %12, %12 : vector<8x128xf32>
      %cst_20 = arith.constant dense<0.000000e+00> : vector<128xf32>
      %20 = vector.multi_reduction <add>, %19, %cst_20 [0] : vector<8x128xf32> to vector<128xf32>
      %21 = vector.shape_cast %20 : vector<128xf32> to vector<1x128xf32>
      %c1 = arith.constant 1 : index
      %c0_21 = arith.constant 0 : index
      %22 = vector.load %arg5[%c1, %c0_21] : memref<8x128xf32, #tpu.memory_space<vmem>>, vector<1x128xf32>
      tpu.vector_store %arg5[%c1, %c0_21], %21 {strides = array<i32>} : memref<8x128xf32, #tpu.memory_space<vmem>>, vector<1x128xf32>,
    } else {
    }
    return
  }
  func.func @transform_0(%arg0: i32, %arg1: i32) -> (i32, i32) {
    %c0_i32 = arith.constant 0 : i32
    return %arg0, %arg1 : i32, i32
  }
  func.func @transform_1(%arg0: i32, %arg1: i32) -> (i32, i32) {
    %c0_i32 = arith.constant 0 : i32
    %c0_i32_0 = arith.constant 0 : i32
    return %arg1, %c0_i32 : i32, i32
  }
  func.func @transform_2(%arg0: i32, %arg1: i32) -> (i32, i32) {
    %c0_i32 = arith.constant 0 : i32
    %c0_i32_0 = arith.constant 0 : i32
    return %arg0, %c0_i32 : i32, i32
  }
  func.func @transform_3(%arg0: i32, %arg1: i32) -> (i32, i32) {
    %c0_i32 = arith.constant 0 : i32
    %c0_i32_0 = arith.constant 0 : i32
    return %arg0, %c0_i32 : i32, i32
  }
}

module attributes {stable_mosaic.version = 11 : i64} {
  func.func @kernel(%arg0: i32, %arg1: memref<8x128xf32, #tpu.memory_space<vmem>>, %arg2: memref<1x8x128xf32, #tpu.memory_space<vmem>>, %arg3: memref<1x128xf32, #tpu.memory_space<vmem>>, %arg4: memref<1x128xf32, #tpu.memory_space<vmem>>, %arg5: memref<8x128xf32, #tpu.memory_space<vmem>>) attributes {dimension_semantics = [#tpu.dimension_semantics<parallel>], iteration_bounds = array<i64: 1>, scalar_prefetch = 0 : i64, scratch_operands = 0 : i64, tpu.core_type = #tpu.core_type<tc>, window_params = [{transform_indices = @transform_0, window_bounds = array<i64: 8, 128>}, {pipeline_mode = #tpu.pipeline_mode<synchronous>, transform_indices = @transform_1, window_bounds = array<i64: 1, 8, 128>}, {pipeline_mode = #tpu.pipeline_mode<synchronous>, transform_indices = @transform_2, window_bounds = array<i64: 1, 128>}, {pipeline_mode = #tpu.pipeline_mode<synchronous>, transform_indices = @transform_3, window_bounds = array<i64: 1, 128>}, {transform_indices = @transform_4, window_bounds = array<i64: 8, 128>}]} {
    %c0 = arith.constant 0 : index
    %c0_0 = arith.constant 0 : index
    %c0_1 = arith.constant 0 : index
    %0 = vector.load %arg2[%c0, %c0_0, %c0_1] : memref<1x8x128xf32, #tpu.memory_space<vmem>>, vector<1x8x128xf32>
    %1 = vector.extract_strided_slice %0 {offsets = [0, 0, 0], sizes = [1, 1, 128], strides = [1, 1, 1]} : vector<1x8x128xf32> to vector<1x1x128xf32>
    %cst = arith.constant dense<0.000000e+00> : vector<1x128xf32>
    %2 = vector.multi_reduction <add>, %1, %cst [0] : vector<1x1x128xf32> to vector<1x128xf32>
    %3 = vector.extract_strided_slice %0 {offsets = [0, 1, 0], sizes = [1, 1, 128], strides = [1, 1, 1]} : vector<1x8x128xf32> to vector<1x1x128xf32>
    %cst_2 = arith.constant dense<0.000000e+00> : vector<1x128xf32>
    %4 = vector.multi_reduction <add>, %3, %cst_2 [0] : vector<1x1x128xf32> to vector<1x128xf32>
    %cst_3 = arith.constant 1.250000e-01 : f32
    %5 = vector.broadcast %cst_3 : f32 to vector<1x128xf32>
    %6 = arith.mulf %2, %5 : vector<1x128xf32>
    %cst_4 = arith.constant 1.250000e-01 : f32
    %7 = vector.broadcast %cst_4 : f32 to vector<1x128xf32>
    %8 = arith.mulf %4, %7 : vector<1x128xf32>
    %9 = arith.mulf %6, %6 : vector<1x128xf32>
    %10 = arith.subf %8, %9 : vector<1x128xf32>
    %cst_5 = arith.constant 0.000000e+00 : f32
    %11 = vector.broadcast %cst_5 : f32 to vector<1x128xf32>
    %12 = arith.maximumf %10, %11 : vector<1x128xf32>
    %c0_6 = arith.constant 0 : index
    %c0_7 = arith.constant 0 : index
    %13 = vector.load %arg3[%c0_6, %c0_7] : memref<1x128xf32, #tpu.memory_space<vmem>>, vector<1x128xf32>
    %cst_8 = arith.constant 9.99999974E-6 : f32
    %14 = vector.broadcast %cst_8 : f32 to vector<1x128xf32>
    %15 = arith.addf %12, %14 : vector<1x128xf32>
    %16 = math.rsqrt %15 : vector<1x128xf32>
    %17 = arith.mulf %13, %16 : vector<1x128xf32>
    %c0_9 = arith.constant 0 : index
    %c0_10 = arith.constant 0 : index
    %18 = vector.load %arg4[%c0_9, %c0_10] : memref<1x128xf32, #tpu.memory_space<vmem>>, vector<1x128xf32>
    %19 = arith.mulf %6, %17 : vector<1x128xf32>
    %20 = arith.subf %18, %19 : vector<1x128xf32>
    %c0_11 = arith.constant 0 : index
    %c0_12 = arith.constant 0 : index
    %21 = vector.load %arg1[%c0_11, %c0_12] : memref<8x128xf32, #tpu.memory_space<vmem>>, vector<8x128xf32>
    %22 = vector.broadcast %17 : vector<1x128xf32> to vector<8x128xf32>
    %23 = arith.mulf %21, %22 : vector<8x128xf32>
    %24 = vector.broadcast %20 : vector<1x128xf32> to vector<8x128xf32>
    %25 = arith.addf %23, %24 : vector<8x128xf32>
    %cst_13 = arith.constant 0.000000e+00 : f32
    %26 = vector.broadcast %cst_13 : f32 to vector<8x128xf32>
    %27 = arith.maximumf %25, %26 : vector<8x128xf32>
    %c0_14 = arith.constant 0 : index
    %c0_15 = arith.constant 0 : index
    %28 = vector.load %arg5[%c0_14, %c0_15] : memref<8x128xf32, #tpu.memory_space<vmem>>, vector<8x128xf32>
    tpu.vector_store %arg5[%c0_14, %c0_15], %27 {strides = array<i32>} : memref<8x128xf32, #tpu.memory_space<vmem>>, vector<8x128xf32>,
    return
  }
  func.func @transform_0(%arg0: i32) -> (i32, i32) {
    %c0_i32 = arith.constant 0 : i32
    %c0_i32_0 = arith.constant 0 : i32
    return %arg0, %c0_i32 : i32, i32
  }
  func.func @transform_1(%arg0: i32) -> (i32, i32, i32) {
    %c0_i32 = arith.constant 0 : i32
    %c0_i32_0 = arith.constant 0 : i32
    %c0_i32_1 = arith.constant 0 : i32
    %c0_i32_2 = arith.constant 0 : i32
    return %c0_i32, %c0_i32_0, %c0_i32_1 : i32, i32, i32
  }
  func.func @transform_2(%arg0: i32) -> (i32, i32) {
    %c0_i32 = arith.constant 0 : i32
    %c0_i32_0 = arith.constant 0 : i32
    %c0_i32_1 = arith.constant 0 : i32
    return %c0_i32, %c0_i32_0 : i32, i32
  }
  func.func @transform_3(%arg0: i32) -> (i32, i32) {
    %c0_i32 = arith.constant 0 : i32
    %c0_i32_0 = arith.constant 0 : i32
    %c0_i32_1 = arith.constant 0 : i32
    return %c0_i32, %c0_i32_0 : i32, i32
  }
  func.func @transform_4(%arg0: i32) -> (i32, i32) {
    %c0_i32 = arith.constant 0 : i32
    %c0_i32_0 = arith.constant 0 : i32
    return %arg0, %c0_i32 : i32, i32
  }
}

module attributes {stable_mosaic.version = 11 : i64} {
  func.func @_gemm_stats_kernel(%arg0: i32, %arg1: i32, %arg2: memref<8x1152xbf16, #tpu.memory_space<vmem>>, %arg3: memref<1152x128xbf16, #tpu.memory_space<vmem>>, %arg4: memref<8x128xf32, #tpu.memory_space<vmem>>, %arg5: memref<8x128xf32, #tpu.memory_space<vmem>>, %arg6: memref<8x128xf32, #tpu.memory_space<vmem>>) attributes {dimension_semantics = [#tpu.dimension_semantics<parallel>, #tpu.dimension_semantics<arbitrary>], iteration_bounds = array<i64: 1, 1>, scalar_prefetch = 0 : i64, scratch_operands = 1 : i64, tpu.core_type = #tpu.core_type<tc>, window_params = [{transform_indices = @transform_0, window_bounds = array<i64: 8, 1152>}, {transform_indices = @transform_1, window_bounds = array<i64: 1152, 128>}, {transform_indices = @transform_2, window_bounds = array<i64: 8, 128>}, {transform_indices = @transform_3, window_bounds = array<i64: 8, 128>}]} {
    %c0_i32 = arith.constant 0 : i32
    %0 = arith.cmpi eq, %arg1, %c0_i32 : i32
    %1 = arith.extui %0 : i1 to i32
    %c0_i32_0 = arith.constant 0 : i32
    %2 = arith.cmpi ne, %1, %c0_i32_0 : i32
    scf.if %2 {
      %cst_10 = arith.constant 0.000000e+00 : f32
      %12 = vector.broadcast %cst_10 : f32 to vector<8x128xf32>
      %c0_11 = arith.constant 0 : index
      %c0_12 = arith.constant 0 : index
      %13 = vector.load %arg6[%c0_11, %c0_12] : memref<8x128xf32, #tpu.memory_space<vmem>>, vector<8x128xf32>
      tpu.vector_store %arg6[%c0_11, %c0_12], %12 {strides = array<i32>} : memref<8x128xf32, #tpu.memory_space<vmem>>, vector<8x128xf32>,
    } else {
    }
    %c0 = arith.constant 0 : index
    %c0_1 = arith.constant 0 : index
    %3 = vector.load %arg6[%c0, %c0_1] : memref<8x128xf32, #tpu.memory_space<vmem>>, vector<8x128xf32>
    %c0_2 = arith.constant 0 : index
    %c0_3 = arith.constant 0 : index
    %4 = vector.load %arg2[%c0_2, %c0_3] : memref<8x1152xbf16, #tpu.memory_space<vmem>>, vector<8x1152xbf16>
    %c0_4 = arith.constant 0 : index
    %c0_5 = arith.constant 0 : index
    %5 = vector.load %arg3[%c0_4, %c0_5] : memref<1152x128xbf16, #tpu.memory_space<vmem>>, vector<1152x128xbf16>
    %cst = arith.constant dense<0.000000e+00> : vector<8x128xf32>
    %6 = tpu.matmul %4, %5, %cst {dimension_numbers = #tpu.dot_dimension_numbers<[1], [0], [0], [1], [0, 0, 1, 1], [], []>} : vector<8x1152xbf16>, vector<1152x128xbf16>, vector<8x128xf32> -> vector<8x128xf32>
    %7 = arith.addf %3, %6 : vector<8x128xf32>
    %c0_6 = arith.constant 0 : index
    %c0_7 = arith.constant 0 : index
    %8 = vector.load %arg6[%c0_6, %c0_7] : memref<8x128xf32, #tpu.memory_space<vmem>>, vector<8x128xf32>
    tpu.vector_store %arg6[%c0_6, %c0_7], %7 {strides = array<i32>} : memref<8x128xf32, #tpu.memory_space<vmem>>, vector<8x128xf32>,
    %c0_i32_8 = arith.constant 0 : i32
    %9 = arith.cmpi eq, %arg1, %c0_i32_8 : i32
    %10 = arith.extui %9 : i1 to i32
    %c0_i32_9 = arith.constant 0 : i32
    %11 = arith.cmpi ne, %10, %c0_i32_9 : i32
    scf.if %11 {
      %c0_10 = arith.constant 0 : index
      %c0_11 = arith.constant 0 : index
      %12 = vector.load %arg6[%c0_10, %c0_11] : memref<8x128xf32, #tpu.memory_space<vmem>>, vector<8x128xf32>
      %c0_12 = arith.constant 0 : index
      %c0_13 = arith.constant 0 : index
      %13 = vector.load %arg4[%c0_12, %c0_13] : memref<8x128xf32, #tpu.memory_space<vmem>>, vector<8x128xf32>
      tpu.vector_store %arg4[%c0_12, %c0_13], %12 {strides = array<i32>} : memref<8x128xf32, #tpu.memory_space<vmem>>, vector<8x128xf32>,
      %cst_14 = arith.constant 0.000000e+00 : f32
      %14 = vector.broadcast %cst_14 : f32 to vector<8x128xf32>
      %c0_15 = arith.constant 0 : index
      %c0_16 = arith.constant 0 : index
      %15 = vector.load %arg5[%c0_15, %c0_16] : memref<8x128xf32, #tpu.memory_space<vmem>>, vector<8x128xf32>
      tpu.vector_store %arg5[%c0_15, %c0_16], %14 {strides = array<i32>} : memref<8x128xf32, #tpu.memory_space<vmem>>, vector<8x128xf32>,
      %cst_17 = arith.constant dense<0.000000e+00> : vector<128xf32>
      %16 = vector.multi_reduction <add>, %12, %cst_17 [0] : vector<8x128xf32> to vector<128xf32>
      %17 = vector.shape_cast %16 : vector<128xf32> to vector<1x128xf32>
      %c0_18 = arith.constant 0 : index
      %c0_19 = arith.constant 0 : index
      %18 = vector.load %arg5[%c0_18, %c0_19] : memref<8x128xf32, #tpu.memory_space<vmem>>, vector<1x128xf32>
      tpu.vector_store %arg5[%c0_18, %c0_19], %17 {strides = array<i32>} : memref<8x128xf32, #tpu.memory_space<vmem>>, vector<1x128xf32>,
      %19 = arith.mulf %12, %12 : vector<8x128xf32>
      %cst_20 = arith.constant dense<0.000000e+00> : vector<128xf32>
      %20 = vector.multi_reduction <add>, %19, %cst_20 [0] : vector<8x128xf32> to vector<128xf32>
      %21 = vector.shape_cast %20 : vector<128xf32> to vector<1x128xf32>
      %c1 = arith.constant 1 : index
      %c0_21 = arith.constant 0 : index
      %22 = vector.load %arg5[%c1, %c0_21] : memref<8x128xf32, #tpu.memory_space<vmem>>, vector<1x128xf32>
      tpu.vector_store %arg5[%c1, %c0_21], %21 {strides = array<i32>} : memref<8x128xf32, #tpu.memory_space<vmem>>, vector<1x128xf32>,
    } else {
    }
    return
  }
  func.func @transform_0(%arg0: i32, %arg1: i32) -> (i32, i32) {
    %c0_i32 = arith.constant 0 : i32
    return %arg0, %arg1 : i32, i32
  }
  func.func @transform_1(%arg0: i32, %arg1: i32) -> (i32, i32) {
    %c0_i32 = arith.constant 0 : i32
    %c0_i32_0 = arith.constant 0 : i32
    return %arg1, %c0_i32 : i32, i32
  }
  func.func @transform_2(%arg0: i32, %arg1: i32) -> (i32, i32) {
    %c0_i32 = arith.constant 0 : i32
    %c0_i32_0 = arith.constant 0 : i32
    return %arg0, %c0_i32 : i32, i32
  }
  func.func @transform_3(%arg0: i32, %arg1: i32) -> (i32, i32) {
    %c0_i32 = arith.constant 0 : i32
    %c0_i32_0 = arith.constant 0 : i32
    return %arg0, %c0_i32 : i32, i32
  }
}

module attributes {stable_mosaic.version = 11 : i64} {
  func.func @kernel(%arg0: i32, %arg1: memref<8x128xf32, #tpu.memory_space<vmem>>, %arg2: memref<1x8x128xf32, #tpu.memory_space<vmem>>, %arg3: memref<1x128xf32, #tpu.memory_space<vmem>>, %arg4: memref<1x128xf32, #tpu.memory_space<vmem>>, %arg5: memref<8x128xf32, #tpu.memory_space<vmem>>, %arg6: memref<8x128xf32, #tpu.memory_space<vmem>>) attributes {dimension_semantics = [#tpu.dimension_semantics<parallel>], iteration_bounds = array<i64: 1>, scalar_prefetch = 0 : i64, scratch_operands = 0 : i64, tpu.core_type = #tpu.core_type<tc>, window_params = [{transform_indices = @transform_0, window_bounds = array<i64: 8, 128>}, {pipeline_mode = #tpu.pipeline_mode<synchronous>, transform_indices = @transform_1, window_bounds = array<i64: 1, 8, 128>}, {pipeline_mode = #tpu.pipeline_mode<synchronous>, transform_indices = @transform_2, window_bounds = array<i64: 1, 128>}, {pipeline_mode = #tpu.pipeline_mode<synchronous>, transform_indices = @transform_3, window_bounds = array<i64: 1, 128>}, {transform_indices = @transform_4, window_bounds = array<i64: 8, 128>}, {transform_indices = @transform_5, window_bounds = array<i64: 8, 128>}]} {
    %c0 = arith.constant 0 : index
    %c0_0 = arith.constant 0 : index
    %c0_1 = arith.constant 0 : index
    %0 = vector.load %arg2[%c0, %c0_0, %c0_1] : memref<1x8x128xf32, #tpu.memory_space<vmem>>, vector<1x8x128xf32>
    %1 = vector.extract_strided_slice %0 {offsets = [0, 0, 0], sizes = [1, 1, 128], strides = [1, 1, 1]} : vector<1x8x128xf32> to vector<1x1x128xf32>
    %cst = arith.constant dense<0.000000e+00> : vector<1x128xf32>
    %2 = vector.multi_reduction <add>, %1, %cst [0] : vector<1x1x128xf32> to vector<1x128xf32>
    %3 = vector.extract_strided_slice %0 {offsets = [0, 1, 0], sizes = [1, 1, 128], strides = [1, 1, 1]} : vector<1x8x128xf32> to vector<1x1x128xf32>
    %cst_2 = arith.constant dense<0.000000e+00> : vector<1x128xf32>
    %4 = vector.multi_reduction <add>, %3, %cst_2 [0] : vector<1x1x128xf32> to vector<1x128xf32>
    %cst_3 = arith.constant 1.250000e-01 : f32
    %5 = vector.broadcast %cst_3 : f32 to vector<1x128xf32>
    %6 = arith.mulf %2, %5 : vector<1x128xf32>
    %cst_4 = arith.constant 1.250000e-01 : f32
    %7 = vector.broadcast %cst_4 : f32 to vector<1x128xf32>
    %8 = arith.mulf %4, %7 : vector<1x128xf32>
    %9 = arith.mulf %6, %6 : vector<1x128xf32>
    %10 = arith.subf %8, %9 : vector<1x128xf32>
    %cst_5 = arith.constant 0.000000e+00 : f32
    %11 = vector.broadcast %cst_5 : f32 to vector<1x128xf32>
    %12 = arith.maximumf %10, %11 : vector<1x128xf32>
    %c0_6 = arith.constant 0 : index
    %c0_7 = arith.constant 0 : index
    %13 = vector.load %arg3[%c0_6, %c0_7] : memref<1x128xf32, #tpu.memory_space<vmem>>, vector<1x128xf32>
    %cst_8 = arith.constant 9.99999974E-6 : f32
    %14 = vector.broadcast %cst_8 : f32 to vector<1x128xf32>
    %15 = arith.addf %12, %14 : vector<1x128xf32>
    %16 = math.rsqrt %15 : vector<1x128xf32>
    %17 = arith.mulf %13, %16 : vector<1x128xf32>
    %c0_9 = arith.constant 0 : index
    %c0_10 = arith.constant 0 : index
    %18 = vector.load %arg4[%c0_9, %c0_10] : memref<1x128xf32, #tpu.memory_space<vmem>>, vector<1x128xf32>
    %19 = arith.mulf %6, %17 : vector<1x128xf32>
    %20 = arith.subf %18, %19 : vector<1x128xf32>
    %c0_11 = arith.constant 0 : index
    %c0_12 = arith.constant 0 : index
    %21 = vector.load %arg1[%c0_11, %c0_12] : memref<8x128xf32, #tpu.memory_space<vmem>>, vector<8x128xf32>
    %22 = vector.broadcast %17 : vector<1x128xf32> to vector<8x128xf32>
    %23 = arith.mulf %21, %22 : vector<8x128xf32>
    %24 = vector.broadcast %20 : vector<1x128xf32> to vector<8x128xf32>
    %25 = arith.addf %23, %24 : vector<8x128xf32>
    %c0_13 = arith.constant 0 : index
    %c0_14 = arith.constant 0 : index
    %26 = vector.load %arg5[%c0_13, %c0_14] : memref<8x128xf32, #tpu.memory_space<vmem>>, vector<8x128xf32>
    %27 = arith.addf %25, %26 : vector<8x128xf32>
    %cst_15 = arith.constant 0.000000e+00 : f32
    %28 = vector.broadcast %cst_15 : f32 to vector<8x128xf32>
    %29 = arith.maximumf %27, %28 : vector<8x128xf32>
    %c0_16 = arith.constant 0 : index
    %c0_17 = arith.constant 0 : index
    %30 = vector.load %arg6[%c0_16, %c0_17] : memref<8x128xf32, #tpu.memory_space<vmem>>, vector<8x128xf32>
    tpu.vector_store %arg6[%c0_16, %c0_17], %29 {strides = array<i32>} : memref<8x128xf32, #tpu.memory_space<vmem>>, vector<8x128xf32>,
    return
  }
  func.func @transform_0(%arg0: i32) -> (i32, i32) {
    %c0_i32 = arith.constant 0 : i32
    %c0_i32_0 = arith.constant 0 : i32
    return %arg0, %c0_i32 : i32, i32
  }
  func.func @transform_1(%arg0: i32) -> (i32, i32, i32) {
    %c0_i32 = arith.constant 0 : i32
    %c0_i32_0 = arith.constant 0 : i32
    %c0_i32_1 = arith.constant 0 : i32
    %c0_i32_2 = arith.constant 0 : i32
    return %c0_i32, %c0_i32_0, %c0_i32_1 : i32, i32, i32
  }
  func.func @transform_2(%arg0: i32) -> (i32, i32) {
    %c0_i32 = arith.constant 0 : i32
    %c0_i32_0 = arith.constant 0 : i32
    %c0_i32_1 = arith.constant 0 : i32
    return %c0_i32, %c0_i32_0 : i32, i32
  }
  func.func @transform_3(%arg0: i32) -> (i32, i32) {
    %c0_i32 = arith.constant 0 : i32
    %c0_i32_0 = arith.constant 0 : i32
    %c0_i32_1 = arith.constant 0 : i32
    return %c0_i32, %c0_i32_0 : i32, i32
  }
  func.func @transform_4(%arg0: i32) -> (i32, i32) {
    %c0_i32 = arith.constant 0 : i32
    %c0_i32_0 = arith.constant 0 : i32
    return %arg0, %c0_i32 : i32, i32
  }
  func.func @transform_5(%arg0: i32) -> (i32, i32) {
    %c0_i32 = arith.constant 0 : i32
    %c0_i32_0 = arith.constant 0 : i32
    return %arg0, %c0_i32 : i32, i32
  }
}

module attributes {stable_mosaic.version = 11 : i64} {
  func.func @_gemm_stats_kernel(%arg0: i32, %arg1: i32, %arg2: memref<8x128xbf16, #tpu.memory_space<vmem>>, %arg3: memref<128x256xbf16, #tpu.memory_space<vmem>>, %arg4: memref<8x256xf32, #tpu.memory_space<vmem>>, %arg5: memref<8x256xf32, #tpu.memory_space<vmem>>, %arg6: memref<8x256xf32, #tpu.memory_space<vmem>>) attributes {dimension_semantics = [#tpu.dimension_semantics<parallel>, #tpu.dimension_semantics<arbitrary>], iteration_bounds = array<i64: 1, 1>, scalar_prefetch = 0 : i64, scratch_operands = 1 : i64, tpu.core_type = #tpu.core_type<tc>, window_params = [{transform_indices = @transform_0, window_bounds = array<i64: 8, 128>}, {transform_indices = @transform_1, window_bounds = array<i64: 128, 256>}, {transform_indices = @transform_2, window_bounds = array<i64: 8, 256>}, {transform_indices = @transform_3, window_bounds = array<i64: 8, 256>}]} {
    %c0_i32 = arith.constant 0 : i32
    %0 = arith.cmpi eq, %arg1, %c0_i32 : i32
    %1 = arith.extui %0 : i1 to i32
    %c0_i32_0 = arith.constant 0 : i32
    %2 = arith.cmpi ne, %1, %c0_i32_0 : i32
    scf.if %2 {
      %cst_10 = arith.constant 0.000000e+00 : f32
      %12 = vector.broadcast %cst_10 : f32 to vector<8x256xf32>
      %c0_11 = arith.constant 0 : index
      %c0_12 = arith.constant 0 : index
      %13 = vector.load %arg6[%c0_11, %c0_12] : memref<8x256xf32, #tpu.memory_space<vmem>>, vector<8x256xf32>
      tpu.vector_store %arg6[%c0_11, %c0_12], %12 {strides = array<i32>} : memref<8x256xf32, #tpu.memory_space<vmem>>, vector<8x256xf32>,
    } else {
    }
    %c0 = arith.constant 0 : index
    %c0_1 = arith.constant 0 : index
    %3 = vector.load %arg6[%c0, %c0_1] : memref<8x256xf32, #tpu.memory_space<vmem>>, vector<8x256xf32>
    %c0_2 = arith.constant 0 : index
    %c0_3 = arith.constant 0 : index
    %4 = vector.load %arg2[%c0_2, %c0_3] : memref<8x128xbf16, #tpu.memory_space<vmem>>, vector<8x128xbf16>
    %c0_4 = arith.constant 0 : index
    %c0_5 = arith.constant 0 : index
    %5 = vector.load %arg3[%c0_4, %c0_5] : memref<128x256xbf16, #tpu.memory_space<vmem>>, vector<128x256xbf16>
    %cst = arith.constant dense<0.000000e+00> : vector<8x256xf32>
    %6 = tpu.matmul %4, %5, %cst {dimension_numbers = #tpu.dot_dimension_numbers<[1], [0], [0], [1], [0, 0, 1, 1], [], []>} : vector<8x128xbf16>, vector<128x256xbf16>, vector<8x256xf32> -> vector<8x256xf32>
    %7 = arith.addf %3, %6 : vector<8x256xf32>
    %c0_6 = arith.constant 0 : index
    %c0_7 = arith.constant 0 : index
    %8 = vector.load %arg6[%c0_6, %c0_7] : memref<8x256xf32, #tpu.memory_space<vmem>>, vector<8x256xf32>
    tpu.vector_store %arg6[%c0_6, %c0_7], %7 {strides = array<i32>} : memref<8x256xf32, #tpu.memory_space<vmem>>, vector<8x256xf32>,
    %c0_i32_8 = arith.constant 0 : i32
    %9 = arith.cmpi eq, %arg1, %c0_i32_8 : i32
    %10 = arith.extui %9 : i1 to i32
    %c0_i32_9 = arith.constant 0 : i32
    %11 = arith.cmpi ne, %10, %c0_i32_9 : i32
    scf.if %11 {
      %c0_10 = arith.constant 0 : index
      %c0_11 = arith.constant 0 : index
      %12 = vector.load %arg6[%c0_10, %c0_11] : memref<8x256xf32, #tpu.memory_space<vmem>>, vector<8x256xf32>
      %c0_12 = arith.constant 0 : index
      %c0_13 = arith.constant 0 : index
      %13 = vector.load %arg4[%c0_12, %c0_13] : memref<8x256xf32, #tpu.memory_space<vmem>>, vector<8x256xf32>
      tpu.vector_store %arg4[%c0_12, %c0_13], %12 {strides = array<i32>} : memref<8x256xf32, #tpu.memory_space<vmem>>, vector<8x256xf32>,
      %cst_14 = arith.constant 0.000000e+00 : f32
      %14 = vector.broadcast %cst_14 : f32 to vector<8x256xf32>
      %c0_15 = arith.constant 0 : index
      %c0_16 = arith.constant 0 : index
      %15 = vector.load %arg5[%c0_15, %c0_16] : memref<8x256xf32, #tpu.memory_space<vmem>>, vector<8x256xf32>
      tpu.vector_store %arg5[%c0_15, %c0_16], %14 {strides = array<i32>} : memref<8x256xf32, #tpu.memory_space<vmem>>, vector<8x256xf32>,
      %cst_17 = arith.constant dense<0.000000e+00> : vector<256xf32>
      %16 = vector.multi_reduction <add>, %12, %cst_17 [0] : vector<8x256xf32> to vector<256xf32>
      %17 = vector.shape_cast %16 : vector<256xf32> to vector<1x256xf32>
      %c0_18 = arith.constant 0 : index
      %c0_19 = arith.constant 0 : index
      %18 = vector.load %arg5[%c0_18, %c0_19] : memref<8x256xf32, #tpu.memory_space<vmem>>, vector<1x256xf32>
      tpu.vector_store %arg5[%c0_18, %c0_19], %17 {strides = array<i32>} : memref<8x256xf32, #tpu.memory_space<vmem>>, vector<1x256xf32>,
      %19 = arith.mulf %12, %12 : vector<8x256xf32>
      %cst_20 = arith.constant dense<0.000000e+00> : vector<256xf32>
      %20 = vector.multi_reduction <add>, %19, %cst_20 [0] : vector<8x256xf32> to vector<256xf32>
      %21 = vector.shape_cast %20 : vector<256xf32> to vector<1x256xf32>
      %c1 = arith.constant 1 : index
      %c0_21 = arith.constant 0 : index
      %22 = vector.load %arg5[%c1, %c0_21] : memref<8x256xf32, #tpu.memory_space<vmem>>, vector<1x256xf32>
      tpu.vector_store %arg5[%c1, %c0_21], %21 {strides = array<i32>} : memref<8x256xf32, #tpu.memory_space<vmem>>, vector<1x256xf32>,
    } else {
    }
    return
  }
  func.func @transform_0(%arg0: i32, %arg1: i32) -> (i32, i32) {
    %c0_i32 = arith.constant 0 : i32
    return %arg0, %arg1 : i32, i32
  }
  func.func @transform_1(%arg0: i32, %arg1: i32) -> (i32, i32) {
    %c0_i32 = arith.constant 0 : i32
    %c0_i32_0 = arith.constant 0 : i32
    return %arg1, %c0_i32 : i32, i32
  }
  func.func @transform_2(%arg0: i32, %arg1: i32) -> (i32, i32) {
    %c0_i32 = arith.constant 0 : i32
    %c0_i32_0 = arith.constant 0 : i32
    return %arg0, %c0_i32 : i32, i32
  }
  func.func @transform_3(%arg0: i32, %arg1: i32) -> (i32, i32) {
    %c0_i32 = arith.constant 0 : i32
    %c0_i32_0 = arith.constant 0 : i32
    return %arg0, %c0_i32 : i32, i32
  }
}

module attributes {stable_mosaic.version = 11 : i64} {
  func.func @kernel(%arg0: i32, %arg1: memref<8x256xf32, #tpu.memory_space<vmem>>, %arg2: memref<1x8x256xf32, #tpu.memory_space<vmem>>, %arg3: memref<1x256xf32, #tpu.memory_space<vmem>>, %arg4: memref<1x256xf32, #tpu.memory_space<vmem>>, %arg5: memref<8x256xf32, #tpu.memory_space<vmem>>) attributes {dimension_semantics = [#tpu.dimension_semantics<parallel>], iteration_bounds = array<i64: 1>, scalar_prefetch = 0 : i64, scratch_operands = 0 : i64, tpu.core_type = #tpu.core_type<tc>, window_params = [{transform_indices = @transform_0, window_bounds = array<i64: 8, 256>}, {pipeline_mode = #tpu.pipeline_mode<synchronous>, transform_indices = @transform_1, window_bounds = array<i64: 1, 8, 256>}, {pipeline_mode = #tpu.pipeline_mode<synchronous>, transform_indices = @transform_2, window_bounds = array<i64: 1, 256>}, {pipeline_mode = #tpu.pipeline_mode<synchronous>, transform_indices = @transform_3, window_bounds = array<i64: 1, 256>}, {transform_indices = @transform_4, window_bounds = array<i64: 8, 256>}]} {
    %c0 = arith.constant 0 : index
    %c0_0 = arith.constant 0 : index
    %c0_1 = arith.constant 0 : index
    %0 = vector.load %arg2[%c0, %c0_0, %c0_1] : memref<1x8x256xf32, #tpu.memory_space<vmem>>, vector<1x8x256xf32>
    %1 = vector.extract_strided_slice %0 {offsets = [0, 0, 0], sizes = [1, 1, 256], strides = [1, 1, 1]} : vector<1x8x256xf32> to vector<1x1x256xf32>
    %cst = arith.constant dense<0.000000e+00> : vector<1x256xf32>
    %2 = vector.multi_reduction <add>, %1, %cst [0] : vector<1x1x256xf32> to vector<1x256xf32>
    %3 = vector.extract_strided_slice %0 {offsets = [0, 1, 0], sizes = [1, 1, 256], strides = [1, 1, 1]} : vector<1x8x256xf32> to vector<1x1x256xf32>
    %cst_2 = arith.constant dense<0.000000e+00> : vector<1x256xf32>
    %4 = vector.multi_reduction <add>, %3, %cst_2 [0] : vector<1x1x256xf32> to vector<1x256xf32>
    %cst_3 = arith.constant 5.000000e-01 : f32
    %5 = vector.broadcast %cst_3 : f32 to vector<1x256xf32>
    %6 = arith.mulf %2, %5 : vector<1x256xf32>
    %cst_4 = arith.constant 5.000000e-01 : f32
    %7 = vector.broadcast %cst_4 : f32 to vector<1x256xf32>
    %8 = arith.mulf %4, %7 : vector<1x256xf32>
    %9 = arith.mulf %6, %6 : vector<1x256xf32>
    %10 = arith.subf %8, %9 : vector<1x256xf32>
    %cst_5 = arith.constant 0.000000e+00 : f32
    %11 = vector.broadcast %cst_5 : f32 to vector<1x256xf32>
    %12 = arith.maximumf %10, %11 : vector<1x256xf32>
    %c0_6 = arith.constant 0 : index
    %c0_7 = arith.constant 0 : index
    %13 = vector.load %arg3[%c0_6, %c0_7] : memref<1x256xf32, #tpu.memory_space<vmem>>, vector<1x256xf32>
    %cst_8 = arith.constant 9.99999974E-6 : f32
    %14 = vector.broadcast %cst_8 : f32 to vector<1x256xf32>
    %15 = arith.addf %12, %14 : vector<1x256xf32>
    %16 = math.rsqrt %15 : vector<1x256xf32>
    %17 = arith.mulf %13, %16 : vector<1x256xf32>
    %c0_9 = arith.constant 0 : index
    %c0_10 = arith.constant 0 : index
    %18 = vector.load %arg4[%c0_9, %c0_10] : memref<1x256xf32, #tpu.memory_space<vmem>>, vector<1x256xf32>
    %19 = arith.mulf %6, %17 : vector<1x256xf32>
    %20 = arith.subf %18, %19 : vector<1x256xf32>
    %c0_11 = arith.constant 0 : index
    %c0_12 = arith.constant 0 : index
    %21 = vector.load %arg1[%c0_11, %c0_12] : memref<8x256xf32, #tpu.memory_space<vmem>>, vector<8x256xf32>
    %22 = vector.broadcast %17 : vector<1x256xf32> to vector<8x256xf32>
    %23 = arith.mulf %21, %22 : vector<8x256xf32>
    %24 = vector.broadcast %20 : vector<1x256xf32> to vector<8x256xf32>
    %25 = arith.addf %23, %24 : vector<8x256xf32>
    %c0_13 = arith.constant 0 : index
    %c0_14 = arith.constant 0 : index
    %26 = vector.load %arg5[%c0_13, %c0_14] : memref<8x256xf32, #tpu.memory_space<vmem>>, vector<8x256xf32>
    tpu.vector_store %arg5[%c0_13, %c0_14], %25 {strides = array<i32>} : memref<8x256xf32, #tpu.memory_space<vmem>>, vector<8x256xf32>,
    return
  }
  func.func @transform_0(%arg0: i32) -> (i32, i32) {
    %c0_i32 = arith.constant 0 : i32
    %c0_i32_0 = arith.constant 0 : i32
    return %arg0, %c0_i32 : i32, i32
  }
  func.func @transform_1(%arg0: i32) -> (i32, i32, i32) {
    %c0_i32 = arith.constant 0 : i32
    %c0_i32_0 = arith.constant 0 : i32
    %c0_i32_1 = arith.constant 0 : i32
    %c0_i32_2 = arith.constant 0 : i32
    return %c0_i32, %c0_i32_0, %c0_i32_1 : i32, i32, i32
  }
  func.func @transform_2(%arg0: i32) -> (i32, i32) {
    %c0_i32 = arith.constant 0 : i32
    %c0_i32_0 = arith.constant 0 : i32
    %c0_i32_1 = arith.constant 0 : i32
    return %c0_i32, %c0_i32_0 : i32, i32
  }
  func.func @transform_3(%arg0: i32) -> (i32, i32) {
    %c0_i32 = arith.constant 0 : i32
    %c0_i32_0 = arith.constant 0 : i32
    %c0_i32_1 = arith.constant 0 : i32
    return %c0_i32, %c0_i32_0 : i32, i32
  }
  func.func @transform_4(%arg0: i32) -> (i32, i32) {
    %c0_i32 = arith.constant 0 : i32
    %c0_i32_0 = arith.constant 0 : i32
    return %arg0, %c0_i32 : i32, i32
  }
}

module attributes {stable_mosaic.version = 11 : i64} {
  func.func @_gemm_stats_kernel(%arg0: i32, %arg1: i32, %arg2: memref<8x1152xbf16, #tpu.memory_space<vmem>>, %arg3: memref<1152x256xbf16, #tpu.memory_space<vmem>>, %arg4: memref<8x256xf32, #tpu.memory_space<vmem>>, %arg5: memref<8x256xf32, #tpu.memory_space<vmem>>, %arg6: memref<8x256xf32, #tpu.memory_space<vmem>>) attributes {dimension_semantics = [#tpu.dimension_semantics<parallel>, #tpu.dimension_semantics<arbitrary>], iteration_bounds = array<i64: 1, 1>, scalar_prefetch = 0 : i64, scratch_operands = 1 : i64, tpu.core_type = #tpu.core_type<tc>, window_params = [{transform_indices = @transform_0, window_bounds = array<i64: 8, 1152>}, {transform_indices = @transform_1, window_bounds = array<i64: 1152, 256>}, {transform_indices = @transform_2, window_bounds = array<i64: 8, 256>}, {transform_indices = @transform_3, window_bounds = array<i64: 8, 256>}]} {
    %c0_i32 = arith.constant 0 : i32
    %0 = arith.cmpi eq, %arg1, %c0_i32 : i32
    %1 = arith.extui %0 : i1 to i32
    %c0_i32_0 = arith.constant 0 : i32
    %2 = arith.cmpi ne, %1, %c0_i32_0 : i32
    scf.if %2 {
      %cst_10 = arith.constant 0.000000e+00 : f32
      %12 = vector.broadcast %cst_10 : f32 to vector<8x256xf32>
      %c0_11 = arith.constant 0 : index
      %c0_12 = arith.constant 0 : index
      %13 = vector.load %arg6[%c0_11, %c0_12] : memref<8x256xf32, #tpu.memory_space<vmem>>, vector<8x256xf32>
      tpu.vector_store %arg6[%c0_11, %c0_12], %12 {strides = array<i32>} : memref<8x256xf32, #tpu.memory_space<vmem>>, vector<8x256xf32>,
    } else {
    }
    %c0 = arith.constant 0 : index
    %c0_1 = arith.constant 0 : index
    %3 = vector.load %arg6[%c0, %c0_1] : memref<8x256xf32, #tpu.memory_space<vmem>>, vector<8x256xf32>
    %c0_2 = arith.constant 0 : index
    %c0_3 = arith.constant 0 : index
    %4 = vector.load %arg2[%c0_2, %c0_3] : memref<8x1152xbf16, #tpu.memory_space<vmem>>, vector<8x1152xbf16>
    %c0_4 = arith.constant 0 : index
    %c0_5 = arith.constant 0 : index
    %5 = vector.load %arg3[%c0_4, %c0_5] : memref<1152x256xbf16, #tpu.memory_space<vmem>>, vector<1152x256xbf16>
    %cst = arith.constant dense<0.000000e+00> : vector<8x256xf32>
    %6 = tpu.matmul %4, %5, %cst {dimension_numbers = #tpu.dot_dimension_numbers<[1], [0], [0], [1], [0, 0, 1, 1], [], []>} : vector<8x1152xbf16>, vector<1152x256xbf16>, vector<8x256xf32> -> vector<8x256xf32>
    %7 = arith.addf %3, %6 : vector<8x256xf32>
    %c0_6 = arith.constant 0 : index
    %c0_7 = arith.constant 0 : index
    %8 = vector.load %arg6[%c0_6, %c0_7] : memref<8x256xf32, #tpu.memory_space<vmem>>, vector<8x256xf32>
    tpu.vector_store %arg6[%c0_6, %c0_7], %7 {strides = array<i32>} : memref<8x256xf32, #tpu.memory_space<vmem>>, vector<8x256xf32>,
    %c0_i32_8 = arith.constant 0 : i32
    %9 = arith.cmpi eq, %arg1, %c0_i32_8 : i32
    %10 = arith.extui %9 : i1 to i32
    %c0_i32_9 = arith.constant 0 : i32
    %11 = arith.cmpi ne, %10, %c0_i32_9 : i32
    scf.if %11 {
      %c0_10 = arith.constant 0 : index
      %c0_11 = arith.constant 0 : index
      %12 = vector.load %arg6[%c0_10, %c0_11] : memref<8x256xf32, #tpu.memory_space<vmem>>, vector<8x256xf32>
      %c0_12 = arith.constant 0 : index
      %c0_13 = arith.constant 0 : index
      %13 = vector.load %arg4[%c0_12, %c0_13] : memref<8x256xf32, #tpu.memory_space<vmem>>, vector<8x256xf32>
      tpu.vector_store %arg4[%c0_12, %c0_13], %12 {strides = array<i32>} : memref<8x256xf32, #tpu.memory_space<vmem>>, vector<8x256xf32>,
      %cst_14 = arith.constant 0.000000e+00 : f32
      %14 = vector.broadcast %cst_14 : f32 to vector<8x256xf32>
      %c0_15 = arith.constant 0 : index
      %c0_16 = arith.constant 0 : index
      %15 = vector.load %arg5[%c0_15, %c0_16] : memref<8x256xf32, #tpu.memory_space<vmem>>, vector<8x256xf32>
      tpu.vector_store %arg5[%c0_15, %c0_16], %14 {strides = array<i32>} : memref<8x256xf32, #tpu.memory_space<vmem>>, vector<8x256xf32>,
      %cst_17 = arith.constant dense<0.000000e+00> : vector<256xf32>
      %16 = vector.multi_reduction <add>, %12, %cst_17 [0] : vector<8x256xf32> to vector<256xf32>
      %17 = vector.shape_cast %16 : vector<256xf32> to vector<1x256xf32>
      %c0_18 = arith.constant 0 : index
      %c0_19 = arith.constant 0 : index
      %18 = vector.load %arg5[%c0_18, %c0_19] : memref<8x256xf32, #tpu.memory_space<vmem>>, vector<1x256xf32>
      tpu.vector_store %arg5[%c0_18, %c0_19], %17 {strides = array<i32>} : memref<8x256xf32, #tpu.memory_space<vmem>>, vector<1x256xf32>,
      %19 = arith.mulf %12, %12 : vector<8x256xf32>
      %cst_20 = arith.constant dense<0.000000e+00> : vector<256xf32>
      %20 = vector.multi_reduction <add>, %19, %cst_20 [0] : vector<8x256xf32> to vector<256xf32>
      %21 = vector.shape_cast %20 : vector<256xf32> to vector<1x256xf32>
      %c1 = arith.constant 1 : index
      %c0_21 = arith.constant 0 : index
      %22 = vector.load %arg5[%c1, %c0_21] : memref<8x256xf32, #tpu.memory_space<vmem>>, vector<1x256xf32>
      tpu.vector_store %arg5[%c1, %c0_21], %21 {strides = array<i32>} : memref<8x256xf32, #tpu.memory_space<vmem>>, vector<1x256xf32>,
    } else {
    }
    return
  }
  func.func @transform_0(%arg0: i32, %arg1: i32) -> (i32, i32) {
    %c0_i32 = arith.constant 0 : i32
    return %arg0, %arg1 : i32, i32
  }
  func.func @transform_1(%arg0: i32, %arg1: i32) -> (i32, i32) {
    %c0_i32 = arith.constant 0 : i32
    %c0_i32_0 = arith.constant 0 : i32
    return %arg1, %c0_i32 : i32, i32
  }
  func.func @transform_2(%arg0: i32, %arg1: i32) -> (i32, i32) {
    %c0_i32 = arith.constant 0 : i32
    %c0_i32_0 = arith.constant 0 : i32
    return %arg0, %c0_i32 : i32, i32
  }
  func.func @transform_3(%arg0: i32, %arg1: i32) -> (i32, i32) {
    %c0_i32 = arith.constant 0 : i32
    %c0_i32_0 = arith.constant 0 : i32
    return %arg0, %c0_i32 : i32, i32
  }
}

module attributes {stable_mosaic.version = 11 : i64} {
  func.func @kernel(%arg0: i32, %arg1: memref<8x256xf32, #tpu.memory_space<vmem>>, %arg2: memref<1x8x256xf32, #tpu.memory_space<vmem>>, %arg3: memref<1x256xf32, #tpu.memory_space<vmem>>, %arg4: memref<1x256xf32, #tpu.memory_space<vmem>>, %arg5: memref<8x256xf32, #tpu.memory_space<vmem>>) attributes {dimension_semantics = [#tpu.dimension_semantics<parallel>], iteration_bounds = array<i64: 1>, scalar_prefetch = 0 : i64, scratch_operands = 0 : i64, tpu.core_type = #tpu.core_type<tc>, window_params = [{transform_indices = @transform_0, window_bounds = array<i64: 8, 256>}, {pipeline_mode = #tpu.pipeline_mode<synchronous>, transform_indices = @transform_1, window_bounds = array<i64: 1, 8, 256>}, {pipeline_mode = #tpu.pipeline_mode<synchronous>, transform_indices = @transform_2, window_bounds = array<i64: 1, 256>}, {pipeline_mode = #tpu.pipeline_mode<synchronous>, transform_indices = @transform_3, window_bounds = array<i64: 1, 256>}, {transform_indices = @transform_4, window_bounds = array<i64: 8, 256>}]} {
    %c0 = arith.constant 0 : index
    %c0_0 = arith.constant 0 : index
    %c0_1 = arith.constant 0 : index
    %0 = vector.load %arg2[%c0, %c0_0, %c0_1] : memref<1x8x256xf32, #tpu.memory_space<vmem>>, vector<1x8x256xf32>
    %1 = vector.extract_strided_slice %0 {offsets = [0, 0, 0], sizes = [1, 1, 256], strides = [1, 1, 1]} : vector<1x8x256xf32> to vector<1x1x256xf32>
    %cst = arith.constant dense<0.000000e+00> : vector<1x256xf32>
    %2 = vector.multi_reduction <add>, %1, %cst [0] : vector<1x1x256xf32> to vector<1x256xf32>
    %3 = vector.extract_strided_slice %0 {offsets = [0, 1, 0], sizes = [1, 1, 256], strides = [1, 1, 1]} : vector<1x8x256xf32> to vector<1x1x256xf32>
    %cst_2 = arith.constant dense<0.000000e+00> : vector<1x256xf32>
    %4 = vector.multi_reduction <add>, %3, %cst_2 [0] : vector<1x1x256xf32> to vector<1x256xf32>
    %cst_3 = arith.constant 5.000000e-01 : f32
    %5 = vector.broadcast %cst_3 : f32 to vector<1x256xf32>
    %6 = arith.mulf %2, %5 : vector<1x256xf32>
    %cst_4 = arith.constant 5.000000e-01 : f32
    %7 = vector.broadcast %cst_4 : f32 to vector<1x256xf32>
    %8 = arith.mulf %4, %7 : vector<1x256xf32>
    %9 = arith.mulf %6, %6 : vector<1x256xf32>
    %10 = arith.subf %8, %9 : vector<1x256xf32>
    %cst_5 = arith.constant 0.000000e+00 : f32
    %11 = vector.broadcast %cst_5 : f32 to vector<1x256xf32>
    %12 = arith.maximumf %10, %11 : vector<1x256xf32>
    %c0_6 = arith.constant 0 : index
    %c0_7 = arith.constant 0 : index
    %13 = vector.load %arg3[%c0_6, %c0_7] : memref<1x256xf32, #tpu.memory_space<vmem>>, vector<1x256xf32>
    %cst_8 = arith.constant 9.99999974E-6 : f32
    %14 = vector.broadcast %cst_8 : f32 to vector<1x256xf32>
    %15 = arith.addf %12, %14 : vector<1x256xf32>
    %16 = math.rsqrt %15 : vector<1x256xf32>
    %17 = arith.mulf %13, %16 : vector<1x256xf32>
    %c0_9 = arith.constant 0 : index
    %c0_10 = arith.constant 0 : index
    %18 = vector.load %arg4[%c0_9, %c0_10] : memref<1x256xf32, #tpu.memory_space<vmem>>, vector<1x256xf32>
    %19 = arith.mulf %6, %17 : vector<1x256xf32>
    %20 = arith.subf %18, %19 : vector<1x256xf32>
    %c0_11 = arith.constant 0 : index
    %c0_12 = arith.constant 0 : index
    %21 = vector.load %arg1[%c0_11, %c0_12] : memref<8x256xf32, #tpu.memory_space<vmem>>, vector<8x256xf32>
    %22 = vector.broadcast %17 : vector<1x256xf32> to vector<8x256xf32>
    %23 = arith.mulf %21, %22 : vector<8x256xf32>
    %24 = vector.broadcast %20 : vector<1x256xf32> to vector<8x256xf32>
    %25 = arith.addf %23, %24 : vector<8x256xf32>
    %cst_13 = arith.constant 0.000000e+00 : f32
    %26 = vector.broadcast %cst_13 : f32 to vector<8x256xf32>
    %27 = arith.maximumf %25, %26 : vector<8x256xf32>
    %c0_14 = arith.constant 0 : index
    %c0_15 = arith.constant 0 : index
    %28 = vector.load %arg5[%c0_14, %c0_15] : memref<8x256xf32, #tpu.memory_space<vmem>>, vector<8x256xf32>
    tpu.vector_store %arg5[%c0_14, %c0_15], %27 {strides = array<i32>} : memref<8x256xf32, #tpu.memory_space<vmem>>, vector<8x256xf32>,
    return
  }
  func.func @transform_0(%arg0: i32) -> (i32, i32) {
    %c0_i32 = arith.constant 0 : i32
    %c0_i32_0 = arith.constant 0 : i32
    return %arg0, %c0_i32 : i32, i32
  }
  func.func @transform_1(%arg0: i32) -> (i32, i32, i32) {
    %c0_i32 = arith.constant 0 : i32
    %c0_i32_0 = arith.constant 0 : i32
    %c0_i32_1 = arith.constant 0 : i32
    %c0_i32_2 = arith.constant 0 : i32
    return %c0_i32, %c0_i32_0, %c0_i32_1 : i32, i32, i32
  }
  func.func @transform_2(%arg0: i32) -> (i32, i32) {
    %c0_i32 = arith.constant 0 : i32
    %c0_i32_0 = arith.constant 0 : i32
    %c0_i32_1 = arith.constant 0 : i32
    return %c0_i32, %c0_i32_0 : i32, i32
  }
  func.func @transform_3(%arg0: i32) -> (i32, i32) {
    %c0_i32 = arith.constant 0 : i32
    %c0_i32_0 = arith.constant 0 : i32
    %c0_i32_1 = arith.constant 0 : i32
    return %c0_i32, %c0_i32_0 : i32, i32
  }
  func.func @transform_4(%arg0: i32) -> (i32, i32) {
    %c0_i32 = arith.constant 0 : i32
    %c0_i32_0 = arith.constant 0 : i32
    return %arg0, %c0_i32 : i32, i32
  }
}

module attributes {stable_mosaic.version = 11 : i64} {
  func.func @_gemm_stats_kernel(%arg0: i32, %arg1: i32, %arg2: memref<8x1152xbf16, #tpu.memory_space<vmem>>, %arg3: memref<1152x256xbf16, #tpu.memory_space<vmem>>, %arg4: memref<8x256xf32, #tpu.memory_space<vmem>>, %arg5: memref<8x256xf32, #tpu.memory_space<vmem>>, %arg6: memref<8x256xf32, #tpu.memory_space<vmem>>) attributes {dimension_semantics = [#tpu.dimension_semantics<parallel>, #tpu.dimension_semantics<arbitrary>], iteration_bounds = array<i64: 1, 2>, scalar_prefetch = 0 : i64, scratch_operands = 1 : i64, tpu.core_type = #tpu.core_type<tc>, window_params = [{transform_indices = @transform_0, window_bounds = array<i64: 8, 1152>}, {transform_indices = @transform_1, window_bounds = array<i64: 1152, 256>}, {transform_indices = @transform_2, window_bounds = array<i64: 8, 256>}, {transform_indices = @transform_3, window_bounds = array<i64: 8, 256>}]} {
    %c0_i32 = arith.constant 0 : i32
    %0 = arith.cmpi eq, %arg1, %c0_i32 : i32
    %1 = arith.extui %0 : i1 to i32
    %c0_i32_0 = arith.constant 0 : i32
    %2 = arith.cmpi ne, %1, %c0_i32_0 : i32
    scf.if %2 {
      %cst_9 = arith.constant 0.000000e+00 : f32
      %12 = vector.broadcast %cst_9 : f32 to vector<8x256xf32>
      %c0_10 = arith.constant 0 : index
      %c0_11 = arith.constant 0 : index
      %13 = vector.load %arg6[%c0_10, %c0_11] : memref<8x256xf32, #tpu.memory_space<vmem>>, vector<8x256xf32>
      tpu.vector_store %arg6[%c0_10, %c0_11], %12 {strides = array<i32>} : memref<8x256xf32, #tpu.memory_space<vmem>>, vector<8x256xf32>,
    } else {
    }
    %c0 = arith.constant 0 : index
    %c0_1 = arith.constant 0 : index
    %3 = vector.load %arg6[%c0, %c0_1] : memref<8x256xf32, #tpu.memory_space<vmem>>, vector<8x256xf32>
    %c0_2 = arith.constant 0 : index
    %c0_3 = arith.constant 0 : index
    %4 = vector.load %arg2[%c0_2, %c0_3] : memref<8x1152xbf16, #tpu.memory_space<vmem>>, vector<8x1152xbf16>
    %c0_4 = arith.constant 0 : index
    %c0_5 = arith.constant 0 : index
    %5 = vector.load %arg3[%c0_4, %c0_5] : memref<1152x256xbf16, #tpu.memory_space<vmem>>, vector<1152x256xbf16>
    %cst = arith.constant dense<0.000000e+00> : vector<8x256xf32>
    %6 = tpu.matmul %4, %5, %cst {dimension_numbers = #tpu.dot_dimension_numbers<[1], [0], [0], [1], [0, 0, 1, 1], [], []>} : vector<8x1152xbf16>, vector<1152x256xbf16>, vector<8x256xf32> -> vector<8x256xf32>
    %7 = arith.addf %3, %6 : vector<8x256xf32>
    %c0_6 = arith.constant 0 : index
    %c0_7 = arith.constant 0 : index
    %8 = vector.load %arg6[%c0_6, %c0_7] : memref<8x256xf32, #tpu.memory_space<vmem>>, vector<8x256xf32>
    tpu.vector_store %arg6[%c0_6, %c0_7], %7 {strides = array<i32>} : memref<8x256xf32, #tpu.memory_space<vmem>>, vector<8x256xf32>,
    %c1_i32 = arith.constant 1 : i32
    %9 = arith.cmpi eq, %arg1, %c1_i32 : i32
    %10 = arith.extui %9 : i1 to i32
    %c0_i32_8 = arith.constant 0 : i32
    %11 = arith.cmpi ne, %10, %c0_i32_8 : i32
    scf.if %11 {
      %c0_9 = arith.constant 0 : index
      %c0_10 = arith.constant 0 : index
      %12 = vector.load %arg6[%c0_9, %c0_10] : memref<8x256xf32, #tpu.memory_space<vmem>>, vector<8x256xf32>
      %c0_11 = arith.constant 0 : index
      %c0_12 = arith.constant 0 : index
      %13 = vector.load %arg4[%c0_11, %c0_12] : memref<8x256xf32, #tpu.memory_space<vmem>>, vector<8x256xf32>
      tpu.vector_store %arg4[%c0_11, %c0_12], %12 {strides = array<i32>} : memref<8x256xf32, #tpu.memory_space<vmem>>, vector<8x256xf32>,
      %cst_13 = arith.constant 0.000000e+00 : f32
      %14 = vector.broadcast %cst_13 : f32 to vector<8x256xf32>
      %c0_14 = arith.constant 0 : index
      %c0_15 = arith.constant 0 : index
      %15 = vector.load %arg5[%c0_14, %c0_15] : memref<8x256xf32, #tpu.memory_space<vmem>>, vector<8x256xf32>
      tpu.vector_store %arg5[%c0_14, %c0_15], %14 {strides = array<i32>} : memref<8x256xf32, #tpu.memory_space<vmem>>, vector<8x256xf32>,
      %cst_16 = arith.constant dense<0.000000e+00> : vector<256xf32>
      %16 = vector.multi_reduction <add>, %12, %cst_16 [0] : vector<8x256xf32> to vector<256xf32>
      %17 = vector.shape_cast %16 : vector<256xf32> to vector<1x256xf32>
      %c0_17 = arith.constant 0 : index
      %c0_18 = arith.constant 0 : index
      %18 = vector.load %arg5[%c0_17, %c0_18] : memref<8x256xf32, #tpu.memory_space<vmem>>, vector<1x256xf32>
      tpu.vector_store %arg5[%c0_17, %c0_18], %17 {strides = array<i32>} : memref<8x256xf32, #tpu.memory_space<vmem>>, vector<1x256xf32>,
      %19 = arith.mulf %12, %12 : vector<8x256xf32>
      %cst_19 = arith.constant dense<0.000000e+00> : vector<256xf32>
      %20 = vector.multi_reduction <add>, %19, %cst_19 [0] : vector<8x256xf32> to vector<256xf32>
      %21 = vector.shape_cast %20 : vector<256xf32> to vector<1x256xf32>
      %c1 = arith.constant 1 : index
      %c0_20 = arith.constant 0 : index
      %22 = vector.load %arg5[%c1, %c0_20] : memref<8x256xf32, #tpu.memory_space<vmem>>, vector<1x256xf32>
      tpu.vector_store %arg5[%c1, %c0_20], %21 {strides = array<i32>} : memref<8x256xf32, #tpu.memory_space<vmem>>, vector<1x256xf32>,
    } else {
    }
    return
  }
  func.func @transform_0(%arg0: i32, %arg1: i32) -> (i32, i32) {
    %c0_i32 = arith.constant 0 : i32
    return %arg0, %arg1 : i32, i32
  }
  func.func @transform_1(%arg0: i32, %arg1: i32) -> (i32, i32) {
    %c0_i32 = arith.constant 0 : i32
    %c0_i32_0 = arith.constant 0 : i32
    return %arg1, %c0_i32 : i32, i32
  }
  func.func @transform_2(%arg0: i32, %arg1: i32) -> (i32, i32) {
    %c0_i32 = arith.constant 0 : i32
    %c0_i32_0 = arith.constant 0 : i32
    return %arg0, %c0_i32 : i32, i32
  }
  func.func @transform_3(%arg0: i32, %arg1: i32) -> (i32, i32) {
    %c0_i32 = arith.constant 0 : i32
    %c0_i32_0 = arith.constant 0 : i32
    return %arg0, %c0_i32 : i32, i32
  }
}

module attributes {stable_mosaic.version = 11 : i64} {
  func.func @kernel(%arg0: i32, %arg1: memref<8x256xf32, #tpu.memory_space<vmem>>, %arg2: memref<1x8x256xf32, #tpu.memory_space<vmem>>, %arg3: memref<1x256xf32, #tpu.memory_space<vmem>>, %arg4: memref<1x256xf32, #tpu.memory_space<vmem>>, %arg5: memref<8x256xf32, #tpu.memory_space<vmem>>, %arg6: memref<8x256xf32, #tpu.memory_space<vmem>>) attributes {dimension_semantics = [#tpu.dimension_semantics<parallel>], iteration_bounds = array<i64: 1>, scalar_prefetch = 0 : i64, scratch_operands = 0 : i64, tpu.core_type = #tpu.core_type<tc>, window_params = [{transform_indices = @transform_0, window_bounds = array<i64: 8, 256>}, {pipeline_mode = #tpu.pipeline_mode<synchronous>, transform_indices = @transform_1, window_bounds = array<i64: 1, 8, 256>}, {pipeline_mode = #tpu.pipeline_mode<synchronous>, transform_indices = @transform_2, window_bounds = array<i64: 1, 256>}, {pipeline_mode = #tpu.pipeline_mode<synchronous>, transform_indices = @transform_3, window_bounds = array<i64: 1, 256>}, {transform_indices = @transform_4, window_bounds = array<i64: 8, 256>}, {transform_indices = @transform_5, window_bounds = array<i64: 8, 256>}]} {
    %c0 = arith.constant 0 : index
    %c0_0 = arith.constant 0 : index
    %c0_1 = arith.constant 0 : index
    %0 = vector.load %arg2[%c0, %c0_0, %c0_1] : memref<1x8x256xf32, #tpu.memory_space<vmem>>, vector<1x8x256xf32>
    %1 = vector.extract_strided_slice %0 {offsets = [0, 0, 0], sizes = [1, 1, 256], strides = [1, 1, 1]} : vector<1x8x256xf32> to vector<1x1x256xf32>
    %cst = arith.constant dense<0.000000e+00> : vector<1x256xf32>
    %2 = vector.multi_reduction <add>, %1, %cst [0] : vector<1x1x256xf32> to vector<1x256xf32>
    %3 = vector.extract_strided_slice %0 {offsets = [0, 1, 0], sizes = [1, 1, 256], strides = [1, 1, 1]} : vector<1x8x256xf32> to vector<1x1x256xf32>
    %cst_2 = arith.constant dense<0.000000e+00> : vector<1x256xf32>
    %4 = vector.multi_reduction <add>, %3, %cst_2 [0] : vector<1x1x256xf32> to vector<1x256xf32>
    %cst_3 = arith.constant 5.000000e-01 : f32
    %5 = vector.broadcast %cst_3 : f32 to vector<1x256xf32>
    %6 = arith.mulf %2, %5 : vector<1x256xf32>
    %cst_4 = arith.constant 5.000000e-01 : f32
    %7 = vector.broadcast %cst_4 : f32 to vector<1x256xf32>
    %8 = arith.mulf %4, %7 : vector<1x256xf32>
    %9 = arith.mulf %6, %6 : vector<1x256xf32>
    %10 = arith.subf %8, %9 : vector<1x256xf32>
    %cst_5 = arith.constant 0.000000e+00 : f32
    %11 = vector.broadcast %cst_5 : f32 to vector<1x256xf32>
    %12 = arith.maximumf %10, %11 : vector<1x256xf32>
    %c0_6 = arith.constant 0 : index
    %c0_7 = arith.constant 0 : index
    %13 = vector.load %arg3[%c0_6, %c0_7] : memref<1x256xf32, #tpu.memory_space<vmem>>, vector<1x256xf32>
    %cst_8 = arith.constant 9.99999974E-6 : f32
    %14 = vector.broadcast %cst_8 : f32 to vector<1x256xf32>
    %15 = arith.addf %12, %14 : vector<1x256xf32>
    %16 = math.rsqrt %15 : vector<1x256xf32>
    %17 = arith.mulf %13, %16 : vector<1x256xf32>
    %c0_9 = arith.constant 0 : index
    %c0_10 = arith.constant 0 : index
    %18 = vector.load %arg4[%c0_9, %c0_10] : memref<1x256xf32, #tpu.memory_space<vmem>>, vector<1x256xf32>
    %19 = arith.mulf %6, %17 : vector<1x256xf32>
    %20 = arith.subf %18, %19 : vector<1x256xf32>
    %c0_11 = arith.constant 0 : index
    %c0_12 = arith.constant 0 : index
    %21 = vector.load %arg1[%c0_11, %c0_12] : memref<8x256xf32, #tpu.memory_space<vmem>>, vector<8x256xf32>
    %22 = vector.broadcast %17 : vector<1x256xf32> to vector<8x256xf32>
    %23 = arith.mulf %21, %22 : vector<8x256xf32>
    %24 = vector.broadcast %20 : vector<1x256xf32> to vector<8x256xf32>
    %25 = arith.addf %23, %24 : vector<8x256xf32>
    %c0_13 = arith.constant 0 : index
    %c0_14 = arith.constant 0 : index
    %26 = vector.load %arg5[%c0_13, %c0_14] : memref<8x256xf32, #tpu.memory_space<vmem>>, vector<8x256xf32>
    %27 = arith.addf %25, %26 : vector<8x256xf32>
    %cst_15 = arith.constant 0.000000e+00 : f32
    %28 = vector.broadcast %cst_15 : f32 to vector<8x256xf32>
    %29 = arith.maximumf %27, %28 : vector<8x256xf32>
    %c0_16 = arith.constant 0 : index
    %c0_17 = arith.constant 0 : index
    %30 = vector.load %arg6[%c0_16, %c0_17] : memref<8x256xf32, #tpu.memory_space<vmem>>, vector<8x256xf32>
    tpu.vector_store %arg6[%c0_16, %c0_17], %29 {strides = array<i32>} : memref<8x256xf32, #tpu.memory_space<vmem>>, vector<8x256xf32>,
    return
  }
  func.func @transform_0(%arg0: i32) -> (i32, i32) {
    %c0_i32 = arith.constant 0 : i32
    %c0_i32_0 = arith.constant 0 : i32
    return %arg0, %c0_i32 : i32, i32
  }
  func.func @transform_1(%arg0: i32) -> (i32, i32, i32) {
    %c0_i32 = arith.constant 0 : i32
    %c0_i32_0 = arith.constant 0 : i32
    %c0_i32_1 = arith.constant 0 : i32
    %c0_i32_2 = arith.constant 0 : i32
    return %c0_i32, %c0_i32_0, %c0_i32_1 : i32, i32, i32
  }
  func.func @transform_2(%arg0: i32) -> (i32, i32) {
    %c0_i32 = arith.constant 0 : i32
    %c0_i32_0 = arith.constant 0 : i32
    %c0_i32_1 = arith.constant 0 : i32
    return %c0_i32, %c0_i32_0 : i32, i32
  }
  func.func @transform_3(%arg0: i32) -> (i32, i32) {
    %c0_i32 = arith.constant 0 : i32
    %c0_i32_0 = arith.constant 0 : i32
    %c0_i32_1 = arith.constant 0 : i32
    return %c0_i32, %c0_i32_0 : i32, i32
  }
  func.func @transform_4(%arg0: i32) -> (i32, i32) {
    %c0_i32 = arith.constant 0 : i32
    %c0_i32_0 = arith.constant 0 : i32
    return %arg0, %c0_i32 : i32, i32
  }
  func.func @transform_5(%arg0: i32) -> (i32, i32) {
    %c0_i32 = arith.constant 0 : i32
    %c0_i32_0 = arith.constant 0 : i32
    return %arg0, %c0_i32 : i32, i32
  }
}

module attributes {stable_mosaic.version = 11 : i64} {
  func.func @_gemm_stats_kernel(%arg0: i32, %arg1: i32, %arg2: memref<8x256xbf16, #tpu.memory_space<vmem>>, %arg3: memref<256x512xbf16, #tpu.memory_space<vmem>>, %arg4: memref<8x512xf32, #tpu.memory_space<vmem>>, %arg5: memref<8x512xf32, #tpu.memory_space<vmem>>, %arg6: memref<8x512xf32, #tpu.memory_space<vmem>>) attributes {dimension_semantics = [#tpu.dimension_semantics<parallel>, #tpu.dimension_semantics<arbitrary>], iteration_bounds = array<i64: 1, 1>, scalar_prefetch = 0 : i64, scratch_operands = 1 : i64, tpu.core_type = #tpu.core_type<tc>, window_params = [{transform_indices = @transform_0, window_bounds = array<i64: 8, 256>}, {transform_indices = @transform_1, window_bounds = array<i64: 256, 512>}, {transform_indices = @transform_2, window_bounds = array<i64: 8, 512>}, {transform_indices = @transform_3, window_bounds = array<i64: 8, 512>}]} {
    %c0_i32 = arith.constant 0 : i32
    %0 = arith.cmpi eq, %arg1, %c0_i32 : i32
    %1 = arith.extui %0 : i1 to i32
    %c0_i32_0 = arith.constant 0 : i32
    %2 = arith.cmpi ne, %1, %c0_i32_0 : i32
    scf.if %2 {
      %cst_10 = arith.constant 0.000000e+00 : f32
      %12 = vector.broadcast %cst_10 : f32 to vector<8x512xf32>
      %c0_11 = arith.constant 0 : index
      %c0_12 = arith.constant 0 : index
      %13 = vector.load %arg6[%c0_11, %c0_12] : memref<8x512xf32, #tpu.memory_space<vmem>>, vector<8x512xf32>
      tpu.vector_store %arg6[%c0_11, %c0_12], %12 {strides = array<i32>} : memref<8x512xf32, #tpu.memory_space<vmem>>, vector<8x512xf32>,
    } else {
    }
    %c0 = arith.constant 0 : index
    %c0_1 = arith.constant 0 : index
    %3 = vector.load %arg6[%c0, %c0_1] : memref<8x512xf32, #tpu.memory_space<vmem>>, vector<8x512xf32>
    %c0_2 = arith.constant 0 : index
    %c0_3 = arith.constant 0 : index
    %4 = vector.load %arg2[%c0_2, %c0_3] : memref<8x256xbf16, #tpu.memory_space<vmem>>, vector<8x256xbf16>
    %c0_4 = arith.constant 0 : index
    %c0_5 = arith.constant 0 : index
    %5 = vector.load %arg3[%c0_4, %c0_5] : memref<256x512xbf16, #tpu.memory_space<vmem>>, vector<256x512xbf16>
    %cst = arith.constant dense<0.000000e+00> : vector<8x512xf32>
    %6 = tpu.matmul %4, %5, %cst {dimension_numbers = #tpu.dot_dimension_numbers<[1], [0], [0], [1], [0, 0, 1, 1], [], []>} : vector<8x256xbf16>, vector<256x512xbf16>, vector<8x512xf32> -> vector<8x512xf32>
    %7 = arith.addf %3, %6 : vector<8x512xf32>
    %c0_6 = arith.constant 0 : index
    %c0_7 = arith.constant 0 : index
    %8 = vector.load %arg6[%c0_6, %c0_7] : memref<8x512xf32, #tpu.memory_space<vmem>>, vector<8x512xf32>
    tpu.vector_store %arg6[%c0_6, %c0_7], %7 {strides = array<i32>} : memref<8x512xf32, #tpu.memory_space<vmem>>, vector<8x512xf32>,
    %c0_i32_8 = arith.constant 0 : i32
    %9 = arith.cmpi eq, %arg1, %c0_i32_8 : i32
    %10 = arith.extui %9 : i1 to i32
    %c0_i32_9 = arith.constant 0 : i32
    %11 = arith.cmpi ne, %10, %c0_i32_9 : i32
    scf.if %11 {
      %c0_10 = arith.constant 0 : index
      %c0_11 = arith.constant 0 : index
      %12 = vector.load %arg6[%c0_10, %c0_11] : memref<8x512xf32, #tpu.memory_space<vmem>>, vector<8x512xf32>
      %c0_12 = arith.constant 0 : index
      %c0_13 = arith.constant 0 : index
      %13 = vector.load %arg4[%c0_12, %c0_13] : memref<8x512xf32, #tpu.memory_space<vmem>>, vector<8x512xf32>
      tpu.vector_store %arg4[%c0_12, %c0_13], %12 {strides = array<i32>} : memref<8x512xf32, #tpu.memory_space<vmem>>, vector<8x512xf32>,
      %cst_14 = arith.constant 0.000000e+00 : f32
      %14 = vector.broadcast %cst_14 : f32 to vector<8x512xf32>
      %c0_15 = arith.constant 0 : index
      %c0_16 = arith.constant 0 : index
      %15 = vector.load %arg5[%c0_15, %c0_16] : memref<8x512xf32, #tpu.memory_space<vmem>>, vector<8x512xf32>
      tpu.vector_store %arg5[%c0_15, %c0_16], %14 {strides = array<i32>} : memref<8x512xf32, #tpu.memory_space<vmem>>, vector<8x512xf32>,
      %cst_17 = arith.constant dense<0.000000e+00> : vector<512xf32>
      %16 = vector.multi_reduction <add>, %12, %cst_17 [0] : vector<8x512xf32> to vector<512xf32>
      %17 = vector.shape_cast %16 : vector<512xf32> to vector<1x512xf32>
      %c0_18 = arith.constant 0 : index
      %c0_19 = arith.constant 0 : index
      %18 = vector.load %arg5[%c0_18, %c0_19] : memref<8x512xf32, #tpu.memory_space<vmem>>, vector<1x512xf32>
      tpu.vector_store %arg5[%c0_18, %c0_19], %17 {strides = array<i32>} : memref<8x512xf32, #tpu.memory_space<vmem>>, vector<1x512xf32>,
      %19 = arith.mulf %12, %12 : vector<8x512xf32>
      %cst_20 = arith.constant dense<0.000000e+00> : vector<512xf32>
      %20 = vector.multi_reduction <add>, %19, %cst_20 [0] : vector<8x512xf32> to vector<512xf32>
      %21 = vector.shape_cast %20 : vector<512xf32> to vector<1x512xf32>
      %c1 = arith.constant 1 : index
      %c0_21 = arith.constant 0 : index
      %22 = vector.load %arg5[%c1, %c0_21] : memref<8x512xf32, #tpu.memory_space<vmem>>, vector<1x512xf32>
      tpu.vector_store %arg5[%c1, %c0_21], %21 {strides = array<i32>} : memref<8x512xf32, #tpu.memory_space<vmem>>, vector<1x512xf32>,
    } else {
    }
    return
  }
  func.func @transform_0(%arg0: i32, %arg1: i32) -> (i32, i32) {
    %c0_i32 = arith.constant 0 : i32
    return %arg0, %arg1 : i32, i32
  }
  func.func @transform_1(%arg0: i32, %arg1: i32) -> (i32, i32) {
    %c0_i32 = arith.constant 0 : i32
    %c0_i32_0 = arith.constant 0 : i32
    return %arg1, %c0_i32 : i32, i32
  }
  func.func @transform_2(%arg0: i32, %arg1: i32) -> (i32, i32) {
    %c0_i32 = arith.constant 0 : i32
    %c0_i32_0 = arith.constant 0 : i32
    return %arg0, %c0_i32 : i32, i32
  }
  func.func @transform_3(%arg0: i32, %arg1: i32) -> (i32, i32) {
    %c0_i32 = arith.constant 0 : i32
    %c0_i32_0 = arith.constant 0 : i32
    return %arg0, %c0_i32 : i32, i32
  }
}

module attributes {stable_mosaic.version = 11 : i64} {
  func.func @kernel(%arg0: i32, %arg1: memref<8x512xf32, #tpu.memory_space<vmem>>, %arg2: memref<1x8x512xf32, #tpu.memory_space<vmem>>, %arg3: memref<1x512xf32, #tpu.memory_space<vmem>>, %arg4: memref<1x512xf32, #tpu.memory_space<vmem>>, %arg5: memref<8x512xf32, #tpu.memory_space<vmem>>) attributes {dimension_semantics = [#tpu.dimension_semantics<parallel>], iteration_bounds = array<i64: 1>, scalar_prefetch = 0 : i64, scratch_operands = 0 : i64, tpu.core_type = #tpu.core_type<tc>, window_params = [{transform_indices = @transform_0, window_bounds = array<i64: 8, 512>}, {pipeline_mode = #tpu.pipeline_mode<synchronous>, transform_indices = @transform_1, window_bounds = array<i64: 1, 8, 512>}, {pipeline_mode = #tpu.pipeline_mode<synchronous>, transform_indices = @transform_2, window_bounds = array<i64: 1, 512>}, {pipeline_mode = #tpu.pipeline_mode<synchronous>, transform_indices = @transform_3, window_bounds = array<i64: 1, 512>}, {transform_indices = @transform_4, window_bounds = array<i64: 8, 512>}]} {
    %c0 = arith.constant 0 : index
    %c0_0 = arith.constant 0 : index
    %c0_1 = arith.constant 0 : index
    %0 = vector.load %arg2[%c0, %c0_0, %c0_1] : memref<1x8x512xf32, #tpu.memory_space<vmem>>, vector<1x8x512xf32>
    %1 = vector.extract_strided_slice %0 {offsets = [0, 0, 0], sizes = [1, 1, 512], strides = [1, 1, 1]} : vector<1x8x512xf32> to vector<1x1x512xf32>
    %cst = arith.constant dense<0.000000e+00> : vector<1x512xf32>
    %2 = vector.multi_reduction <add>, %1, %cst [0] : vector<1x1x512xf32> to vector<1x512xf32>
    %3 = vector.extract_strided_slice %0 {offsets = [0, 1, 0], sizes = [1, 1, 512], strides = [1, 1, 1]} : vector<1x8x512xf32> to vector<1x1x512xf32>
    %cst_2 = arith.constant dense<0.000000e+00> : vector<1x512xf32>
    %4 = vector.multi_reduction <add>, %3, %cst_2 [0] : vector<1x1x512xf32> to vector<1x512xf32>
    %cst_3 = arith.constant 5.000000e-01 : f32
    %5 = vector.broadcast %cst_3 : f32 to vector<1x512xf32>
    %6 = arith.mulf %2, %5 : vector<1x512xf32>
    %cst_4 = arith.constant 5.000000e-01 : f32
    %7 = vector.broadcast %cst_4 : f32 to vector<1x512xf32>
    %8 = arith.mulf %4, %7 : vector<1x512xf32>
    %9 = arith.mulf %6, %6 : vector<1x512xf32>
    %10 = arith.subf %8, %9 : vector<1x512xf32>
    %cst_5 = arith.constant 0.000000e+00 : f32
    %11 = vector.broadcast %cst_5 : f32 to vector<1x512xf32>
    %12 = arith.maximumf %10, %11 : vector<1x512xf32>
    %c0_6 = arith.constant 0 : index
    %c0_7 = arith.constant 0 : index
    %13 = vector.load %arg3[%c0_6, %c0_7] : memref<1x512xf32, #tpu.memory_space<vmem>>, vector<1x512xf32>
    %cst_8 = arith.constant 9.99999974E-6 : f32
    %14 = vector.broadcast %cst_8 : f32 to vector<1x512xf32>
    %15 = arith.addf %12, %14 : vector<1x512xf32>
    %16 = math.rsqrt %15 : vector<1x512xf32>
    %17 = arith.mulf %13, %16 : vector<1x512xf32>
    %c0_9 = arith.constant 0 : index
    %c0_10 = arith.constant 0 : index
    %18 = vector.load %arg4[%c0_9, %c0_10] : memref<1x512xf32, #tpu.memory_space<vmem>>, vector<1x512xf32>
    %19 = arith.mulf %6, %17 : vector<1x512xf32>
    %20 = arith.subf %18, %19 : vector<1x512xf32>
    %c0_11 = arith.constant 0 : index
    %c0_12 = arith.constant 0 : index
    %21 = vector.load %arg1[%c0_11, %c0_12] : memref<8x512xf32, #tpu.memory_space<vmem>>, vector<8x512xf32>
    %22 = vector.broadcast %17 : vector<1x512xf32> to vector<8x512xf32>
    %23 = arith.mulf %21, %22 : vector<8x512xf32>
    %24 = vector.broadcast %20 : vector<1x512xf32> to vector<8x512xf32>
    %25 = arith.addf %23, %24 : vector<8x512xf32>
    %c0_13 = arith.constant 0 : index
    %c0_14 = arith.constant 0 : index
    %26 = vector.load %arg5[%c0_13, %c0_14] : memref<8x512xf32, #tpu.memory_space<vmem>>, vector<8x512xf32>
    tpu.vector_store %arg5[%c0_13, %c0_14], %25 {strides = array<i32>} : memref<8x512xf32, #tpu.memory_space<vmem>>, vector<8x512xf32>,
    return
  }
  func.func @transform_0(%arg0: i32) -> (i32, i32) {
    %c0_i32 = arith.constant 0 : i32
    %c0_i32_0 = arith.constant 0 : i32
    return %arg0, %c0_i32 : i32, i32
  }
  func.func @transform_1(%arg0: i32) -> (i32, i32, i32) {
    %c0_i32 = arith.constant 0 : i32
    %c0_i32_0 = arith.constant 0 : i32
    %c0_i32_1 = arith.constant 0 : i32
    %c0_i32_2 = arith.constant 0 : i32
    return %c0_i32, %c0_i32_0, %c0_i32_1 : i32, i32, i32
  }
  func.func @transform_2(%arg0: i32) -> (i32, i32) {
    %c0_i32 = arith.constant 0 : i32
    %c0_i32_0 = arith.constant 0 : i32
    %c0_i32_1 = arith.constant 0 : i32
    return %c0_i32, %c0_i32_0 : i32, i32
  }
  func.func @transform_3(%arg0: i32) -> (i32, i32) {
    %c0_i32 = arith.constant 0 : i32
    %c0_i32_0 = arith.constant 0 : i32
    %c0_i32_1 = arith.constant 0 : i32
    return %c0_i32, %c0_i32_0 : i32, i32
  }
  func.func @transform_4(%arg0: i32) -> (i32, i32) {
    %c0_i32 = arith.constant 0 : i32
    %c0_i32_0 = arith.constant 0 : i32
    return %arg0, %c0_i32 : i32, i32
  }
}

module attributes {stable_mosaic.version = 11 : i64} {
  func.func @kernel(%arg0: i32, %arg1: memref<8x512xf32, #tpu.memory_space<vmem>>, %arg2: memref<1x8x512xf32, #tpu.memory_space<vmem>>, %arg3: memref<1x512xf32, #tpu.memory_space<vmem>>, %arg4: memref<1x512xf32, #tpu.memory_space<vmem>>, %arg5: memref<8x512xf32, #tpu.memory_space<vmem>>) attributes {dimension_semantics = [#tpu.dimension_semantics<parallel>], iteration_bounds = array<i64: 1>, scalar_prefetch = 0 : i64, scratch_operands = 0 : i64, tpu.core_type = #tpu.core_type<tc>, window_params = [{transform_indices = @transform_0, window_bounds = array<i64: 8, 512>}, {pipeline_mode = #tpu.pipeline_mode<synchronous>, transform_indices = @transform_1, window_bounds = array<i64: 1, 8, 512>}, {pipeline_mode = #tpu.pipeline_mode<synchronous>, transform_indices = @transform_2, window_bounds = array<i64: 1, 512>}, {pipeline_mode = #tpu.pipeline_mode<synchronous>, transform_indices = @transform_3, window_bounds = array<i64: 1, 512>}, {transform_indices = @transform_4, window_bounds = array<i64: 8, 512>}]} {
    %c0 = arith.constant 0 : index
    %c0_0 = arith.constant 0 : index
    %c0_1 = arith.constant 0 : index
    %0 = vector.load %arg2[%c0, %c0_0, %c0_1] : memref<1x8x512xf32, #tpu.memory_space<vmem>>, vector<1x8x512xf32>
    %1 = vector.extract_strided_slice %0 {offsets = [0, 0, 0], sizes = [1, 1, 512], strides = [1, 1, 1]} : vector<1x8x512xf32> to vector<1x1x512xf32>
    %cst = arith.constant dense<0.000000e+00> : vector<1x512xf32>
    %2 = vector.multi_reduction <add>, %1, %cst [0] : vector<1x1x512xf32> to vector<1x512xf32>
    %3 = vector.extract_strided_slice %0 {offsets = [0, 1, 0], sizes = [1, 1, 512], strides = [1, 1, 1]} : vector<1x8x512xf32> to vector<1x1x512xf32>
    %cst_2 = arith.constant dense<0.000000e+00> : vector<1x512xf32>
    %4 = vector.multi_reduction <add>, %3, %cst_2 [0] : vector<1x1x512xf32> to vector<1x512xf32>
    %cst_3 = arith.constant 5.000000e-01 : f32
    %5 = vector.broadcast %cst_3 : f32 to vector<1x512xf32>
    %6 = arith.mulf %2, %5 : vector<1x512xf32>
    %cst_4 = arith.constant 5.000000e-01 : f32
    %7 = vector.broadcast %cst_4 : f32 to vector<1x512xf32>
    %8 = arith.mulf %4, %7 : vector<1x512xf32>
    %9 = arith.mulf %6, %6 : vector<1x512xf32>
    %10 = arith.subf %8, %9 : vector<1x512xf32>
    %cst_5 = arith.constant 0.000000e+00 : f32
    %11 = vector.broadcast %cst_5 : f32 to vector<1x512xf32>
    %12 = arith.maximumf %10, %11 : vector<1x512xf32>
    %c0_6 = arith.constant 0 : index
    %c0_7 = arith.constant 0 : index
    %13 = vector.load %arg3[%c0_6, %c0_7] : memref<1x512xf32, #tpu.memory_space<vmem>>, vector<1x512xf32>
    %cst_8 = arith.constant 9.99999974E-6 : f32
    %14 = vector.broadcast %cst_8 : f32 to vector<1x512xf32>
    %15 = arith.addf %12, %14 : vector<1x512xf32>
    %16 = math.rsqrt %15 : vector<1x512xf32>
    %17 = arith.mulf %13, %16 : vector<1x512xf32>
    %c0_9 = arith.constant 0 : index
    %c0_10 = arith.constant 0 : index
    %18 = vector.load %arg4[%c0_9, %c0_10] : memref<1x512xf32, #tpu.memory_space<vmem>>, vector<1x512xf32>
    %19 = arith.mulf %6, %17 : vector<1x512xf32>
    %20 = arith.subf %18, %19 : vector<1x512xf32>
    %c0_11 = arith.constant 0 : index
    %c0_12 = arith.constant 0 : index
    %21 = vector.load %arg1[%c0_11, %c0_12] : memref<8x512xf32, #tpu.memory_space<vmem>>, vector<8x512xf32>
    %22 = vector.broadcast %17 : vector<1x512xf32> to vector<8x512xf32>
    %23 = arith.mulf %21, %22 : vector<8x512xf32>
    %24 = vector.broadcast %20 : vector<1x512xf32> to vector<8x512xf32>
    %25 = arith.addf %23, %24 : vector<8x512xf32>
    %cst_13 = arith.constant 0.000000e+00 : f32
    %26 = vector.broadcast %cst_13 : f32 to vector<8x512xf32>
    %27 = arith.maximumf %25, %26 : vector<8x512xf32>
    %c0_14 = arith.constant 0 : index
    %c0_15 = arith.constant 0 : index
    %28 = vector.load %arg5[%c0_14, %c0_15] : memref<8x512xf32, #tpu.memory_space<vmem>>, vector<8x512xf32>
    tpu.vector_store %arg5[%c0_14, %c0_15], %27 {strides = array<i32>} : memref<8x512xf32, #tpu.memory_space<vmem>>, vector<8x512xf32>,
    return
  }
  func.func @transform_0(%arg0: i32) -> (i32, i32) {
    %c0_i32 = arith.constant 0 : i32
    %c0_i32_0 = arith.constant 0 : i32
    return %arg0, %c0_i32 : i32, i32
  }
  func.func @transform_1(%arg0: i32) -> (i32, i32, i32) {
    %c0_i32 = arith.constant 0 : i32
    %c0_i32_0 = arith.constant 0 : i32
    %c0_i32_1 = arith.constant 0 : i32
    %c0_i32_2 = arith.constant 0 : i32
    return %c0_i32, %c0_i32_0, %c0_i32_1 : i32, i32, i32
  }
  func.func @transform_2(%arg0: i32) -> (i32, i32) {
    %c0_i32 = arith.constant 0 : i32
    %c0_i32_0 = arith.constant 0 : i32
    %c0_i32_1 = arith.constant 0 : i32
    return %c0_i32, %c0_i32_0 : i32, i32
  }
  func.func @transform_3(%arg0: i32) -> (i32, i32) {
    %c0_i32 = arith.constant 0 : i32
    %c0_i32_0 = arith.constant 0 : i32
    %c0_i32_1 = arith.constant 0 : i32
    return %c0_i32, %c0_i32_0 : i32, i32
  }
  func.func @transform_4(%arg0: i32) -> (i32, i32) {
    %c0_i32 = arith.constant 0 : i32
    %c0_i32_0 = arith.constant 0 : i32
    return %arg0, %c0_i32 : i32, i32
  }
}

module attributes {stable_mosaic.version = 11 : i64} {
  func.func @_gemm_stats_kernel(%arg0: i32, %arg1: i32, %arg2: memref<8x1152xbf16, #tpu.memory_space<vmem>>, %arg3: memref<1152x512xbf16, #tpu.memory_space<vmem>>, %arg4: memref<8x512xf32, #tpu.memory_space<vmem>>, %arg5: memref<8x512xf32, #tpu.memory_space<vmem>>, %arg6: memref<8x512xf32, #tpu.memory_space<vmem>>) attributes {dimension_semantics = [#tpu.dimension_semantics<parallel>, #tpu.dimension_semantics<arbitrary>], iteration_bounds = array<i64: 1, 2>, scalar_prefetch = 0 : i64, scratch_operands = 1 : i64, tpu.core_type = #tpu.core_type<tc>, window_params = [{transform_indices = @transform_0, window_bounds = array<i64: 8, 1152>}, {transform_indices = @transform_1, window_bounds = array<i64: 1152, 512>}, {transform_indices = @transform_2, window_bounds = array<i64: 8, 512>}, {transform_indices = @transform_3, window_bounds = array<i64: 8, 512>}]} {
    %c0_i32 = arith.constant 0 : i32
    %0 = arith.cmpi eq, %arg1, %c0_i32 : i32
    %1 = arith.extui %0 : i1 to i32
    %c0_i32_0 = arith.constant 0 : i32
    %2 = arith.cmpi ne, %1, %c0_i32_0 : i32
    scf.if %2 {
      %cst_9 = arith.constant 0.000000e+00 : f32
      %12 = vector.broadcast %cst_9 : f32 to vector<8x512xf32>
      %c0_10 = arith.constant 0 : index
      %c0_11 = arith.constant 0 : index
      %13 = vector.load %arg6[%c0_10, %c0_11] : memref<8x512xf32, #tpu.memory_space<vmem>>, vector<8x512xf32>
      tpu.vector_store %arg6[%c0_10, %c0_11], %12 {strides = array<i32>} : memref<8x512xf32, #tpu.memory_space<vmem>>, vector<8x512xf32>,
    } else {
    }
    %c0 = arith.constant 0 : index
    %c0_1 = arith.constant 0 : index
    %3 = vector.load %arg6[%c0, %c0_1] : memref<8x512xf32, #tpu.memory_space<vmem>>, vector<8x512xf32>
    %c0_2 = arith.constant 0 : index
    %c0_3 = arith.constant 0 : index
    %4 = vector.load %arg2[%c0_2, %c0_3] : memref<8x1152xbf16, #tpu.memory_space<vmem>>, vector<8x1152xbf16>
    %c0_4 = arith.constant 0 : index
    %c0_5 = arith.constant 0 : index
    %5 = vector.load %arg3[%c0_4, %c0_5] : memref<1152x512xbf16, #tpu.memory_space<vmem>>, vector<1152x512xbf16>
    %cst = arith.constant dense<0.000000e+00> : vector<8x512xf32>
    %6 = tpu.matmul %4, %5, %cst {dimension_numbers = #tpu.dot_dimension_numbers<[1], [0], [0], [1], [0, 0, 1, 1], [], []>} : vector<8x1152xbf16>, vector<1152x512xbf16>, vector<8x512xf32> -> vector<8x512xf32>
    %7 = arith.addf %3, %6 : vector<8x512xf32>
    %c0_6 = arith.constant 0 : index
    %c0_7 = arith.constant 0 : index
    %8 = vector.load %arg6[%c0_6, %c0_7] : memref<8x512xf32, #tpu.memory_space<vmem>>, vector<8x512xf32>
    tpu.vector_store %arg6[%c0_6, %c0_7], %7 {strides = array<i32>} : memref<8x512xf32, #tpu.memory_space<vmem>>, vector<8x512xf32>,
    %c1_i32 = arith.constant 1 : i32
    %9 = arith.cmpi eq, %arg1, %c1_i32 : i32
    %10 = arith.extui %9 : i1 to i32
    %c0_i32_8 = arith.constant 0 : i32
    %11 = arith.cmpi ne, %10, %c0_i32_8 : i32
    scf.if %11 {
      %c0_9 = arith.constant 0 : index
      %c0_10 = arith.constant 0 : index
      %12 = vector.load %arg6[%c0_9, %c0_10] : memref<8x512xf32, #tpu.memory_space<vmem>>, vector<8x512xf32>
      %c0_11 = arith.constant 0 : index
      %c0_12 = arith.constant 0 : index
      %13 = vector.load %arg4[%c0_11, %c0_12] : memref<8x512xf32, #tpu.memory_space<vmem>>, vector<8x512xf32>
      tpu.vector_store %arg4[%c0_11, %c0_12], %12 {strides = array<i32>} : memref<8x512xf32, #tpu.memory_space<vmem>>, vector<8x512xf32>,
      %cst_13 = arith.constant 0.000000e+00 : f32
      %14 = vector.broadcast %cst_13 : f32 to vector<8x512xf32>
      %c0_14 = arith.constant 0 : index
      %c0_15 = arith.constant 0 : index
      %15 = vector.load %arg5[%c0_14, %c0_15] : memref<8x512xf32, #tpu.memory_space<vmem>>, vector<8x512xf32>
      tpu.vector_store %arg5[%c0_14, %c0_15], %14 {strides = array<i32>} : memref<8x512xf32, #tpu.memory_space<vmem>>, vector<8x512xf32>,
      %cst_16 = arith.constant dense<0.000000e+00> : vector<512xf32>
      %16 = vector.multi_reduction <add>, %12, %cst_16 [0] : vector<8x512xf32> to vector<512xf32>
      %17 = vector.shape_cast %16 : vector<512xf32> to vector<1x512xf32>
      %c0_17 = arith.constant 0 : index
      %c0_18 = arith.constant 0 : index
      %18 = vector.load %arg5[%c0_17, %c0_18] : memref<8x512xf32, #tpu.memory_space<vmem>>, vector<1x512xf32>
      tpu.vector_store %arg5[%c0_17, %c0_18], %17 {strides = array<i32>} : memref<8x512xf32, #tpu.memory_space<vmem>>, vector<1x512xf32>,
      %19 = arith.mulf %12, %12 : vector<8x512xf32>
      %cst_19 = arith.constant dense<0.000000e+00> : vector<512xf32>
      %20 = vector.multi_reduction <add>, %19, %cst_19 [0] : vector<8x512xf32> to vector<512xf32>
      %21 = vector.shape_cast %20 : vector<512xf32> to vector<1x512xf32>
      %c1 = arith.constant 1 : index
      %c0_20 = arith.constant 0 : index
      %22 = vector.load %arg5[%c1, %c0_20] : memref<8x512xf32, #tpu.memory_space<vmem>>, vector<1x512xf32>
      tpu.vector_store %arg5[%c1, %c0_20], %21 {strides = array<i32>} : memref<8x512xf32, #tpu.memory_space<vmem>>, vector<1x512xf32>,
    } else {
    }
    return
  }
  func.func @transform_0(%arg0: i32, %arg1: i32) -> (i32, i32) {
    %c0_i32 = arith.constant 0 : i32
    return %arg0, %arg1 : i32, i32
  }
  func.func @transform_1(%arg0: i32, %arg1: i32) -> (i32, i32) {
    %c0_i32 = arith.constant 0 : i32
    %c0_i32_0 = arith.constant 0 : i32
    return %arg1, %c0_i32 : i32, i32
  }
  func.func @transform_2(%arg0: i32, %arg1: i32) -> (i32, i32) {
    %c0_i32 = arith.constant 0 : i32
    %c0_i32_0 = arith.constant 0 : i32
    return %arg0, %c0_i32 : i32, i32
  }
  func.func @transform_3(%arg0: i32, %arg1: i32) -> (i32, i32) {
    %c0_i32 = arith.constant 0 : i32
    %c0_i32_0 = arith.constant 0 : i32
    return %arg0, %c0_i32 : i32, i32
  }
}

module attributes {stable_mosaic.version = 11 : i64} {
  func.func @_gemm_stats_kernel(%arg0: i32, %arg1: i32, %arg2: memref<8x1536xbf16, #tpu.memory_space<vmem>>, %arg3: memref<1536x512xbf16, #tpu.memory_space<vmem>>, %arg4: memref<8x512xf32, #tpu.memory_space<vmem>>, %arg5: memref<8x512xf32, #tpu.memory_space<vmem>>, %arg6: memref<8x512xf32, #tpu.memory_space<vmem>>) attributes {dimension_semantics = [#tpu.dimension_semantics<parallel>, #tpu.dimension_semantics<arbitrary>], iteration_bounds = array<i64: 1, 3>, scalar_prefetch = 0 : i64, scratch_operands = 1 : i64, tpu.core_type = #tpu.core_type<tc>, window_params = [{transform_indices = @transform_0, window_bounds = array<i64: 8, 1536>}, {transform_indices = @transform_1, window_bounds = array<i64: 1536, 512>}, {transform_indices = @transform_2, window_bounds = array<i64: 8, 512>}, {transform_indices = @transform_3, window_bounds = array<i64: 8, 512>}]} {
    %c0_i32 = arith.constant 0 : i32
    %0 = arith.cmpi eq, %arg1, %c0_i32 : i32
    %1 = arith.extui %0 : i1 to i32
    %c0_i32_0 = arith.constant 0 : i32
    %2 = arith.cmpi ne, %1, %c0_i32_0 : i32
    scf.if %2 {
      %cst_9 = arith.constant 0.000000e+00 : f32
      %12 = vector.broadcast %cst_9 : f32 to vector<8x512xf32>
      %c0_10 = arith.constant 0 : index
      %c0_11 = arith.constant 0 : index
      %13 = vector.load %arg6[%c0_10, %c0_11] : memref<8x512xf32, #tpu.memory_space<vmem>>, vector<8x512xf32>
      tpu.vector_store %arg6[%c0_10, %c0_11], %12 {strides = array<i32>} : memref<8x512xf32, #tpu.memory_space<vmem>>, vector<8x512xf32>,
    } else {
    }
    %c0 = arith.constant 0 : index
    %c0_1 = arith.constant 0 : index
    %3 = vector.load %arg6[%c0, %c0_1] : memref<8x512xf32, #tpu.memory_space<vmem>>, vector<8x512xf32>
    %c0_2 = arith.constant 0 : index
    %c0_3 = arith.constant 0 : index
    %4 = vector.load %arg2[%c0_2, %c0_3] : memref<8x1536xbf16, #tpu.memory_space<vmem>>, vector<8x1536xbf16>
    %c0_4 = arith.constant 0 : index
    %c0_5 = arith.constant 0 : index
    %5 = vector.load %arg3[%c0_4, %c0_5] : memref<1536x512xbf16, #tpu.memory_space<vmem>>, vector<1536x512xbf16>
    %cst = arith.constant dense<0.000000e+00> : vector<8x512xf32>
    %6 = tpu.matmul %4, %5, %cst {dimension_numbers = #tpu.dot_dimension_numbers<[1], [0], [0], [1], [0, 0, 1, 1], [], []>} : vector<8x1536xbf16>, vector<1536x512xbf16>, vector<8x512xf32> -> vector<8x512xf32>
    %7 = arith.addf %3, %6 : vector<8x512xf32>
    %c0_6 = arith.constant 0 : index
    %c0_7 = arith.constant 0 : index
    %8 = vector.load %arg6[%c0_6, %c0_7] : memref<8x512xf32, #tpu.memory_space<vmem>>, vector<8x512xf32>
    tpu.vector_store %arg6[%c0_6, %c0_7], %7 {strides = array<i32>} : memref<8x512xf32, #tpu.memory_space<vmem>>, vector<8x512xf32>,
    %c2_i32 = arith.constant 2 : i32
    %9 = arith.cmpi eq, %arg1, %c2_i32 : i32
    %10 = arith.extui %9 : i1 to i32
    %c0_i32_8 = arith.constant 0 : i32
    %11 = arith.cmpi ne, %10, %c0_i32_8 : i32
    scf.if %11 {
      %c0_9 = arith.constant 0 : index
      %c0_10 = arith.constant 0 : index
      %12 = vector.load %arg6[%c0_9, %c0_10] : memref<8x512xf32, #tpu.memory_space<vmem>>, vector<8x512xf32>
      %c0_11 = arith.constant 0 : index
      %c0_12 = arith.constant 0 : index
      %13 = vector.load %arg4[%c0_11, %c0_12] : memref<8x512xf32, #tpu.memory_space<vmem>>, vector<8x512xf32>
      tpu.vector_store %arg4[%c0_11, %c0_12], %12 {strides = array<i32>} : memref<8x512xf32, #tpu.memory_space<vmem>>, vector<8x512xf32>,
      %cst_13 = arith.constant 0.000000e+00 : f32
      %14 = vector.broadcast %cst_13 : f32 to vector<8x512xf32>
      %c0_14 = arith.constant 0 : index
      %c0_15 = arith.constant 0 : index
      %15 = vector.load %arg5[%c0_14, %c0_15] : memref<8x512xf32, #tpu.memory_space<vmem>>, vector<8x512xf32>
      tpu.vector_store %arg5[%c0_14, %c0_15], %14 {strides = array<i32>} : memref<8x512xf32, #tpu.memory_space<vmem>>, vector<8x512xf32>,
      %cst_16 = arith.constant dense<0.000000e+00> : vector<512xf32>
      %16 = vector.multi_reduction <add>, %12, %cst_16 [0] : vector<8x512xf32> to vector<512xf32>
      %17 = vector.shape_cast %16 : vector<512xf32> to vector<1x512xf32>
      %c0_17 = arith.constant 0 : index
      %c0_18 = arith.constant 0 : index
      %18 = vector.load %arg5[%c0_17, %c0_18] : memref<8x512xf32, #tpu.memory_space<vmem>>, vector<1x512xf32>
      tpu.vector_store %arg5[%c0_17, %c0_18], %17 {strides = array<i32>} : memref<8x512xf32, #tpu.memory_space<vmem>>, vector<1x512xf32>,
      %19 = arith.mulf %12, %12 : vector<8x512xf32>
      %cst_19 = arith.constant dense<0.000000e+00> : vector<512xf32>
      %20 = vector.multi_reduction <add>, %19, %cst_19 [0] : vector<8x512xf32> to vector<512xf32>
      %21 = vector.shape_cast %20 : vector<512xf32> to vector<1x512xf32>
      %c1 = arith.constant 1 : index
      %c0_20 = arith.constant 0 : index
      %22 = vector.load %arg5[%c1, %c0_20] : memref<8x512xf32, #tpu.memory_space<vmem>>, vector<1x512xf32>
      tpu.vector_store %arg5[%c1, %c0_20], %21 {strides = array<i32>} : memref<8x512xf32, #tpu.memory_space<vmem>>, vector<1x512xf32>,
    } else {
    }
    return
  }
  func.func @transform_0(%arg0: i32, %arg1: i32) -> (i32, i32) {
    %c0_i32 = arith.constant 0 : i32
    return %arg0, %arg1 : i32, i32
  }
  func.func @transform_1(%arg0: i32, %arg1: i32) -> (i32, i32) {
    %c0_i32 = arith.constant 0 : i32
    %c0_i32_0 = arith.constant 0 : i32
    return %arg1, %c0_i32 : i32, i32
  }
  func.func @transform_2(%arg0: i32, %arg1: i32) -> (i32, i32) {
    %c0_i32 = arith.constant 0 : i32
    %c0_i32_0 = arith.constant 0 : i32
    return %arg0, %c0_i32 : i32, i32
  }
  func.func @transform_3(%arg0: i32, %arg1: i32) -> (i32, i32) {
    %c0_i32 = arith.constant 0 : i32
    %c0_i32_0 = arith.constant 0 : i32
    return %arg0, %c0_i32 : i32, i32
  }
}

module attributes {stable_mosaic.version = 11 : i64} {
  func.func @kernel(%arg0: i32, %arg1: memref<8x512xf32, #tpu.memory_space<vmem>>, %arg2: memref<1x8x512xf32, #tpu.memory_space<vmem>>, %arg3: memref<1x512xf32, #tpu.memory_space<vmem>>, %arg4: memref<1x512xf32, #tpu.memory_space<vmem>>, %arg5: memref<8x512xf32, #tpu.memory_space<vmem>>, %arg6: memref<8x512xf32, #tpu.memory_space<vmem>>) attributes {dimension_semantics = [#tpu.dimension_semantics<parallel>], iteration_bounds = array<i64: 1>, scalar_prefetch = 0 : i64, scratch_operands = 0 : i64, tpu.core_type = #tpu.core_type<tc>, window_params = [{transform_indices = @transform_0, window_bounds = array<i64: 8, 512>}, {pipeline_mode = #tpu.pipeline_mode<synchronous>, transform_indices = @transform_1, window_bounds = array<i64: 1, 8, 512>}, {pipeline_mode = #tpu.pipeline_mode<synchronous>, transform_indices = @transform_2, window_bounds = array<i64: 1, 512>}, {pipeline_mode = #tpu.pipeline_mode<synchronous>, transform_indices = @transform_3, window_bounds = array<i64: 1, 512>}, {transform_indices = @transform_4, window_bounds = array<i64: 8, 512>}, {transform_indices = @transform_5, window_bounds = array<i64: 8, 512>}]} {
    %c0 = arith.constant 0 : index
    %c0_0 = arith.constant 0 : index
    %c0_1 = arith.constant 0 : index
    %0 = vector.load %arg2[%c0, %c0_0, %c0_1] : memref<1x8x512xf32, #tpu.memory_space<vmem>>, vector<1x8x512xf32>
    %1 = vector.extract_strided_slice %0 {offsets = [0, 0, 0], sizes = [1, 1, 512], strides = [1, 1, 1]} : vector<1x8x512xf32> to vector<1x1x512xf32>
    %cst = arith.constant dense<0.000000e+00> : vector<1x512xf32>
    %2 = vector.multi_reduction <add>, %1, %cst [0] : vector<1x1x512xf32> to vector<1x512xf32>
    %3 = vector.extract_strided_slice %0 {offsets = [0, 1, 0], sizes = [1, 1, 512], strides = [1, 1, 1]} : vector<1x8x512xf32> to vector<1x1x512xf32>
    %cst_2 = arith.constant dense<0.000000e+00> : vector<1x512xf32>
    %4 = vector.multi_reduction <add>, %3, %cst_2 [0] : vector<1x1x512xf32> to vector<1x512xf32>
    %cst_3 = arith.constant 5.000000e-01 : f32
    %5 = vector.broadcast %cst_3 : f32 to vector<1x512xf32>
    %6 = arith.mulf %2, %5 : vector<1x512xf32>
    %cst_4 = arith.constant 5.000000e-01 : f32
    %7 = vector.broadcast %cst_4 : f32 to vector<1x512xf32>
    %8 = arith.mulf %4, %7 : vector<1x512xf32>
    %9 = arith.mulf %6, %6 : vector<1x512xf32>
    %10 = arith.subf %8, %9 : vector<1x512xf32>
    %cst_5 = arith.constant 0.000000e+00 : f32
    %11 = vector.broadcast %cst_5 : f32 to vector<1x512xf32>
    %12 = arith.maximumf %10, %11 : vector<1x512xf32>
    %c0_6 = arith.constant 0 : index
    %c0_7 = arith.constant 0 : index
    %13 = vector.load %arg3[%c0_6, %c0_7] : memref<1x512xf32, #tpu.memory_space<vmem>>, vector<1x512xf32>
    %cst_8 = arith.constant 9.99999974E-6 : f32
    %14 = vector.broadcast %cst_8 : f32 to vector<1x512xf32>
    %15 = arith.addf %12, %14 : vector<1x512xf32>
    %16 = math.rsqrt %15 : vector<1x512xf32>
    %17 = arith.mulf %13, %16 : vector<1x512xf32>
    %c0_9 = arith.constant 0 : index
    %c0_10 = arith.constant 0 : index
    %18 = vector.load %arg4[%c0_9, %c0_10] : memref<1x512xf32, #tpu.memory_space<vmem>>, vector<1x512xf32>
    %19 = arith.mulf %6, %17 : vector<1x512xf32>
    %20 = arith.subf %18, %19 : vector<1x512xf32>
    %c0_11 = arith.constant 0 : index
    %c0_12 = arith.constant 0 : index
    %21 = vector.load %arg1[%c0_11, %c0_12] : memref<8x512xf32, #tpu.memory_space<vmem>>, vector<8x512xf32>
    %22 = vector.broadcast %17 : vector<1x512xf32> to vector<8x512xf32>
    %23 = arith.mulf %21, %22 : vector<8x512xf32>
    %24 = vector.broadcast %20 : vector<1x512xf32> to vector<8x512xf32>
    %25 = arith.addf %23, %24 : vector<8x512xf32>
    %c0_13 = arith.constant 0 : index
    %c0_14 = arith.constant 0 : index
    %26 = vector.load %arg5[%c0_13, %c0_14] : memref<8x512xf32, #tpu.memory_space<vmem>>, vector<8x512xf32>
    %27 = arith.addf %25, %26 : vector<8x512xf32>
    %cst_15 = arith.constant 0.000000e+00 : f32
    %28 = vector.broadcast %cst_15 : f32 to vector<8x512xf32>
    %29 = arith.maximumf %27, %28 : vector<8x512xf32>
    %c0_16 = arith.constant 0 : index
    %c0_17 = arith.constant 0 : index
    %30 = vector.load %arg6[%c0_16, %c0_17] : memref<8x512xf32, #tpu.memory_space<vmem>>, vector<8x512xf32>
    tpu.vector_store %arg6[%c0_16, %c0_17], %29 {strides = array<i32>} : memref<8x512xf32, #tpu.memory_space<vmem>>, vector<8x512xf32>,
    return
  }
  func.func @transform_0(%arg0: i32) -> (i32, i32) {
    %c0_i32 = arith.constant 0 : i32
    %c0_i32_0 = arith.constant 0 : i32
    return %arg0, %c0_i32 : i32, i32
  }
  func.func @transform_1(%arg0: i32) -> (i32, i32, i32) {
    %c0_i32 = arith.constant 0 : i32
    %c0_i32_0 = arith.constant 0 : i32
    %c0_i32_1 = arith.constant 0 : i32
    %c0_i32_2 = arith.constant 0 : i32
    return %c0_i32, %c0_i32_0, %c0_i32_1 : i32, i32, i32
  }
  func.func @transform_2(%arg0: i32) -> (i32, i32) {
    %c0_i32 = arith.constant 0 : i32
    %c0_i32_0 = arith.constant 0 : i32
    %c0_i32_1 = arith.constant 0 : i32
    return %c0_i32, %c0_i32_0 : i32, i32
  }
  func.func @transform_3(%arg0: i32) -> (i32, i32) {
    %c0_i32 = arith.constant 0 : i32
    %c0_i32_0 = arith.constant 0 : i32
    %c0_i32_1 = arith.constant 0 : i32
    return %c0_i32, %c0_i32_0 : i32, i32
  }
  func.func @transform_4(%arg0: i32) -> (i32, i32) {
    %c0_i32 = arith.constant 0 : i32
    %c0_i32_0 = arith.constant 0 : i32
    return %arg0, %c0_i32 : i32, i32
  }
  func.func @transform_5(%arg0: i32) -> (i32, i32) {
    %c0_i32 = arith.constant 0 : i32
    %c0_i32_0 = arith.constant 0 : i32
    return %arg0, %c0_i32 : i32, i32
  }
}

module attributes {stable_mosaic.version = 11 : i64} {
  func.func @_head_kernel(%arg0: i32, %arg1: memref<8x1x512xf32, #tpu.memory_space<vmem>>, %arg2: memref<512x128xf32, #tpu.memory_space<vmem>>, %arg3: memref<1x128xf32, #tpu.memory_space<vmem>>, %arg4: memref<8x128xf32, #tpu.memory_space<vmem>>) attributes {dimension_semantics = [#tpu.dimension_semantics<parallel>], iteration_bounds = array<i64: 1>, scalar_prefetch = 0 : i64, scratch_operands = 0 : i64, tpu.core_type = #tpu.core_type<tc>, window_params = [{transform_indices = @transform_0, window_bounds = array<i64: 8, 1, 512>}, {pipeline_mode = #tpu.pipeline_mode<synchronous>, transform_indices = @transform_1, window_bounds = array<i64: 512, 128>}, {pipeline_mode = #tpu.pipeline_mode<synchronous>, transform_indices = @transform_2, window_bounds = array<i64: 1, 128>}, {transform_indices = @transform_3, window_bounds = array<i64: 8, 128>}]} {
    %c0 = arith.constant 0 : index
    %c0_0 = arith.constant 0 : index
    %c0_1 = arith.constant 0 : index
    %0 = vector.load %arg1[%c0, %c0_0, %c0_1] : memref<8x1x512xf32, #tpu.memory_space<vmem>>, vector<8x1x512xf32>
    %cst = arith.constant dense<0.000000e+00> : vector<8x512xf32>
    %1 = vector.multi_reduction <add>, %0, %cst [1] : vector<8x1x512xf32> to vector<8x512xf32>
    %cst_2 = arith.constant 1.000000e+00 : f32
    %2 = vector.broadcast %cst_2 : f32 to vector<8x512xf32>
    %3 = arith.divf %1, %2 : vector<8x512xf32>
    %c0_3 = arith.constant 0 : index
    %c0_4 = arith.constant 0 : index
    %4 = vector.load %arg2[%c0_3, %c0_4] : memref<512x128xf32, #tpu.memory_space<vmem>>, vector<512x128xf32>
    %cst_5 = arith.constant dense<0.000000e+00> : vector<8x128xf32>
    %5 = tpu.matmul %3, %4, %cst_5 {dimension_numbers = #tpu.dot_dimension_numbers<[1], [0], [0], [1], [0, 0, 1, 1], [], []>} : vector<8x512xf32>, vector<512x128xf32>, vector<8x128xf32> -> vector<8x128xf32>
    %c0_6 = arith.constant 0 : index
    %c0_7 = arith.constant 0 : index
    %6 = vector.load %arg3[%c0_6, %c0_7] : memref<1x128xf32, #tpu.memory_space<vmem>>, vector<1x128xf32>
    %7 = vector.broadcast %6 : vector<1x128xf32> to vector<8x128xf32>
    %8 = arith.addf %5, %7 : vector<8x128xf32>
    %c0_8 = arith.constant 0 : index
    %c0_9 = arith.constant 0 : index
    %9 = vector.load %arg4[%c0_8, %c0_9] : memref<8x128xf32, #tpu.memory_space<vmem>>, vector<8x128xf32>
    tpu.vector_store %arg4[%c0_8, %c0_9], %8 {strides = array<i32>} : memref<8x128xf32, #tpu.memory_space<vmem>>, vector<8x128xf32>,
    return
  }
  func.func @transform_0(%arg0: i32) -> (i32, i32, i32) {
    %c0_i32 = arith.constant 0 : i32
    %c0_i32_0 = arith.constant 0 : i32
    %c0_i32_1 = arith.constant 0 : i32
    return %arg0, %c0_i32, %c0_i32_0 : i32, i32, i32
  }
  func.func @transform_1(%arg0: i32) -> (i32, i32) {
    %c0_i32 = arith.constant 0 : i32
    %c0_i32_0 = arith.constant 0 : i32
    %c0_i32_1 = arith.constant 0 : i32
    return %c0_i32, %c0_i32_0 : i32, i32
  }
  func.func @transform_2(%arg0: i32) -> (i32, i32) {
    %c0_i32 = arith.constant 0 : i32
    %c0_i32_0 = arith.constant 0 : i32
    %c0_i32_1 = arith.constant 0 : i32
    return %c0_i32, %c0_i32_0 : i32, i32
  }
  func.func @transform_3(%arg0: i32) -> (i32, i32) {
    %c0_i32 = arith.constant 0 : i32
    %c0_i32_0 = arith.constant 0 : i32
    return %arg0, %c0_i32 : i32, i32
  }
}

</mosaic_0001>

<bundles_post_ra>
// kernel: modified_resnet18_forward.43
= control target key start
LH: loop header
LB: loop body
LE: loop exit
PB: predicated region body
PF: predicated region fallthrough
CT: control target
= control target key end

     0   :  { %v149_v7 = vmov 1966171168   ;;  %v33_v9 = vlaneseq  ;;  %s280_s1 = inlined_call_operand.vmem [shape: f32[1,8,128], index: 1, kind: input, shape index: {}]   ;;  %s281_s2 = inlined_call_operand.vmem [shape: f32[1,128], index: 2, kind: input, shape index: {}]   ;;  %s282_s0 = inlined_call_operand.vmem [shape: f32[128,128], index: 0, kind: input, shape index: {}]   ;;  %s283_s3 = inlined_call_operand.vmem [shape: f32[1,128], index: 3, kind: input, shape index: {}]   ;;  %s284_s4 = inlined_call_operand.vmem [shape: f32[128,128], index: 4, kind: output, shape index: {}]  }
   0x1   :  { %v17_v0 = vld [vmem:[%s280_s1] sm:$0xff]  ;;  %v31_v8 = vunpack.c.l.s4 %v149_v7  ;;  %v51_v22 = vld [vmem:[%s282_s0 + $0x8] sm:$0xff]  ;;  %v52_v23 = vld [vmem:[%s282_s0 + $0x10] sm:$0xff] }
   0x2   :  { %v19_v1 = vmul.f32 0.0078125, %v17_v0  ;;  %v34_v11 = vshrl.u32 %v33_v9, 7  ;;  %v26_v16 = vld [vmem:[%s281_s2] sm:$0x1]  ;;  %v53_v24 = vld [vmem:[%s282_s0 + $0x18] sm:$0xff]  ;;  %v55_v28 = vld [vmem:[%s282_s0 + $0x28] sm:$0xff] }
   0x3   :  { %v32_v10 = vunpack.c.0.s8 %v31_v8  ;;  %v47_v20 = vld [vmem:[%s283_s3] sm:$0x1]  ;;  %v56_v29 = vld [vmem:[%s282_s0 + $0x30] sm:$0xff]  ;;  %v57_v30 = vld [vmem:[%s282_s0 + $0x38] sm:$0xff] }
   0x4   :  { %v20_v2 = vmul.f32 %v19_v1, %v19_v1  ;;  %v69_v18 = vsub.s32 0, %v34_v11  ;;  %v50_v21 = vld [vmem:[%s282_s0] sm:$0xff]  ;;  %v59_v32 = vld [vmem:[%s282_s0 + $0x48] sm:$0xff]  ;;  %v60_v33 = vld [vmem:[%s282_s0 + $0x50] sm:$0xff] }
   0x5   :  { %v35_v12 = vsub.s32 %v32_v10, %v34_v11  ;;  %v54_v25 = vld [vmem:[%s282_s0 + $0x20] sm:$0xff]  ;;  %v61_v38 = vld [vmem:[%s282_s0 + $0x58] sm:$0xff]  ;;  %v63_v40 = vld [vmem:[%s282_s0 + $0x68] sm:$0xff] }
   0x6   :  { %v22_v3 = vrot.slane %v20_v2, 7  ;;  %v58_v31 = vld [vmem:[%s282_s0 + $0x40] sm:$0xff]  ;;  %v65_v2 = vld [vmem:[%s282_s0 + $0x78] sm:$0xff] }
   0x7   :  { %v62_v39 = vld [vmem:[%s282_s0 + $0x60] sm:$0xff] }
   0x8   :  { %v24_v4 = vsub.f32 %v19_v1, %v22_v3 }
   0xa   :  { %v25_v5 = vmax.f32 %v24_v4, 0.0 }
   0xc   :  { %v27_v6 = vadd.f32 1e-05, %v25_v5 }
   0xe   :  { %147 = vrsqrt.f32 %v27_v6 }
  0x18   :  { %v148_v13 = vpop.eup %147 }
  0x19   :  { %v36_v14 = vrot.slane %v148_v13, %v35_v12 }
  0x1b   :  { %v37_v15 = vcombine.high %v36_v14, %v36_v14 }
  0x1d   :  { %v44_v17 = vrot.slane %v37_v15, %v35_v12 }
  0x1f   :  { %v46_v19 = vmul.f32 %v44_v17, %v26_v16 }
  0x21   :  { %v48_v26 = vmul.f32 %v46_v19, %v19_v1  ;;  %v70_v27 = vrot.slane %v46_v19, %v69_v18  ;;  %v64_v1 = vld [vmem:[%s282_s0 + $0x70] sm:$0xff] }
  0x23   :  { %v49_v34 = vsub.f32 %v47_v20, %v48_v26  ;;  %v72_v35 = vmul.f32 %v70_v27, %v50_v21  ;;  %v73_v36 = vmul.f32 %v70_v27, %v51_v22  ;;  %v74_v37 = vmul.f32 %v70_v27, %v52_v23 }
  0x24   :  { %v75_v41 = vmul.f32 %v70_v27, %v53_v24  ;;  %v76_v42 = vmul.f32 %v70_v27, %v54_v25  ;;  %v77_v43 = vmul.f32 %v70_v27, %v55_v28  ;;  %v78_v44 = vmul.f32 %v70_v27, %v56_v29 }
  0x25   :  { %v92_v45 = vrot.slane %v49_v34, %v69_v18  ;;  %v79_v46 = vmul.f32 %v70_v27, %v57_v30  ;;  %v80_v47 = vmul.f32 %v70_v27, %v58_v31  ;;  %v81_v48 = vmul.f32 %v70_v27, %v59_v32 }
  0x26   :  { %v82_v49 = vmul.f32 %v70_v27, %v60_v33  ;;  %v83_v50 = vmul.f32 %v70_v27, %v61_v38  ;;  %v84_v51 = vmul.f32 %v70_v27, %v62_v39  ;;  %v85_v52 = vmul.f32 %v70_v27, %v63_v40 }
  0x27   :  { %v94_v53 = vadd.f32 %v92_v45, %v72_v35  ;;  %v95_v54 = vadd.f32 %v92_v45, %v73_v36  ;;  %v96_v55 = vadd.f32 %v92_v45, %v74_v37  ;;  %v97_v56 = vadd.f32 %v92_v45, %v75_v41 }
  0x28   :  { %v98_v57 = vadd.f32 %v92_v45, %v76_v42  ;;  %v99_v58 = vadd.f32 %v92_v45, %v77_v43  ;;  %v100_v59 = vadd.f32 %v92_v45, %v78_v44  ;;  %v101_v60 = vadd.f32 %v92_v45, %v79_v46 }
  0x29   :  { %v110_v61 = vmax.f32 %v94_v53, 0.0  ;;  %v111_v62 = vmax.f32 %v95_v54, 0.0  ;;  %v112_v63 = vmax.f32 %v96_v55, 0.0  ;;  %v113_v0 = vmax.f32 %v97_v56, 0.0 }
  0x2a   :  { %v114_v3 = vmax.f32 %v98_v57, 0.0  ;;  %v115_v4 = vmax.f32 %v99_v58, 0.0  ;;  %v116_v5 = vmax.f32 %v100_v59, 0.0  ;;  %v117_v6 = vmax.f32 %v101_v60, 0.0 }
  0x2b   :  { %126 = vst [vmem:[%s284_s4] sm:$0xff] %v110_v61  ;;  %127 = vst [vmem:[%s284_s4 + $0x8] sm:$0xff] %v111_v62  ;;  %v102_v7 = vadd.f32 %v92_v45, %v80_v47  ;;  %v103_v8 = vadd.f32 %v92_v45, %v81_v48  ;;  %v104_v9 = vadd.f32 %v92_v45, %v82_v49 }
  0x2c   :  { %128 = vst [vmem:[%s284_s4 + $0x10] sm:$0xff] %v112_v63  ;;  %129 = vst [vmem:[%s284_s4 + $0x18] sm:$0xff] %v113_v0  ;;  %v105_v10 = vadd.f32 %v92_v45, %v83_v50  ;;  %v106_v11 = vadd.f32 %v92_v45, %v84_v51  ;;  %v107_v12 = vadd.f32 %v92_v45, %v85_v52 }
  0x2d   :  { %130 = vst [vmem:[%s284_s4 + $0x20] sm:$0xff] %v114_v3  ;;  %131 = vst [vmem:[%s284_s4 + $0x28] sm:$0xff] %v115_v4  ;;  %v86_v13 = vmul.f32 %v70_v27, %v64_v1  ;;  %v87_v14 = vmul.f32 %v70_v27, %v65_v2  ;;  %v118_v15 = vmax.f32 %v102_v7, 0.0  ;;  %v119_v16 = vmax.f32 %v103_v8, 0.0 }
  0x2e   :  { %132 = vst [vmem:[%s284_s4 + $0x30] sm:$0xff] %v116_v5  ;;  %133 = vst [vmem:[%s284_s4 + $0x38] sm:$0xff] %v117_v6  ;;  %v120_v17 = vmax.f32 %v104_v9, 0.0  ;;  %v121_v18 = vmax.f32 %v105_v10, 0.0  ;;  %v122_v19 = vmax.f32 %v106_v11, 0.0  ;;  %v123_v20 = vmax.f32 %v107_v12, 0.0 }
  0x2f   :  { %v108_v21 = vadd.f32 %v92_v45, %v86_v13  ;;  %v109_v22 = vadd.f32 %v92_v45, %v87_v14  ;;  %134 = vst [vmem:[%s284_s4 + $0x40] sm:$0xff] %v118_v15  ;;  %135 = vst [vmem:[%s284_s4 + $0x48] sm:$0xff] %v119_v16 }
  0x30   :  { %136 = vst [vmem:[%s284_s4 + $0x50] sm:$0xff] %v120_v17  ;;  %137 = vst [vmem:[%s284_s4 + $0x58] sm:$0xff] %v121_v18 }
  0x31   :  { %138 = vst [vmem:[%s284_s4 + $0x60] sm:$0xff] %v122_v19  ;;  %139 = vst [vmem:[%s284_s4 + $0x68] sm:$0xff] %v123_v20  ;;  %v124_v23 = vmax.f32 %v108_v21, 0.0  ;;  %v125_v24 = vmax.f32 %v109_v22, 0.0 }
  0x33   :  { %140 = vst [vmem:[%s284_s4 + $0x70] sm:$0xff] %v124_v23  ;;  %141 = vst [vmem:[%s284_s4 + $0x78] sm:$0xff] %v125_v24 }

// kernel: modified_resnet18_forward.44
= control target key start
LH: loop header
LB: loop body
LE: loop exit
PB: predicated region body
PF: predicated region fallthrough
CT: control target
= control target key end

     0   :  { %vm44_vm0 = vcmask 523264   ;;  %s291_s0 = inlined_call_operand.vmem [shape: f32[9,32,64], index: 0, kind: input, shape index: {}]   ;;  %s292_s1 = inlined_call_operand.vmem [shape: f32[32,64], index: 1, kind: output, shape index: {}]  }
   0x1   :  { %v8_v0 = vld [vmem:[%s291_s0] sm:$0xff]  ;;  %v9_v11 = vld [vmem:[%s291_s0 + $0x8] sm:$0xff]  ;;  %v10_v27 = vld [vmem:[%s291_s0 + $0x10] sm:$0xff] }
   0x2   :  { %v12_v1 = vld [vmem:[%s291_s0 + $0x20] sm:$0xff]  ;;  %v45_v4 = vsel %vm44_vm0, %v8_v0, -inf  ;;  %v13_v12 = vld [vmem:[%s291_s0 + $0x28] sm:$0xff]  ;;  %v62_v16 = vsel %vm44_vm0, %v9_v11, -inf  ;;  %v14_v28 = vld [vmem:[%s291_s0 + $0x30] sm:$0xff]  ;;  %v79_v33 = vsel %vm44_vm0, %v10_v27, -inf }
   0x3   :  { %v16_v2 = vld [vmem:[%s291_s0 + $0x40] sm:$0xff]  ;;  %v46_v5 = vsel %vm44_vm0, %v12_v1, -inf  ;;  %v17_v13 = vld [vmem:[%s291_s0 + $0x48] sm:$0xff]  ;;  %v63_v17 = vsel %vm44_vm0, %v13_v12, -inf  ;;  %v18_v29 = vld [vmem:[%s291_s0 + $0x50] sm:$0xff]  ;;  %v80_v34 = vsel %vm44_vm0, %v14_v28, -inf }
   0x4   :  { %v20_v3 = vld [vmem:[%s291_s0 + $0x60] sm:$0xff]  ;;  %v48_v6 = vsel %vm44_vm0, %v16_v2, -inf  ;;  %v47_v9 = vmax.f32 %v45_v4, %v46_v5  ;;  %v21_v15 = vld [vmem:[%s291_s0 + $0x68] sm:$0xff]  ;;  %v65_v18 = vsel %vm44_vm0, %v17_v13, -inf  ;;  %v64_v23 = vmax.f32 %v62_v16, %v63_v17  ;;  %v22_v32 = vld [vmem:[%s291_s0 + $0x70] sm:$0xff] }
   0x5   :  { %v24_v7 = vld [vmem:[%s291_s0 + $0x80] sm:$0xff]  ;;  %v50_v10 = vsel %vm44_vm0, %v20_v3, -inf  ;;  %v25_v22 = vld [vmem:[%s291_s0 + $0x88] sm:$0xff]  ;;  %v67_v26 = vsel %vm44_vm0, %v21_v15, -inf  ;;  %v82_v35 = vsel %vm44_vm0, %v18_v29, -inf  ;;  %v26_v39 = vld [vmem:[%s291_s0 + $0x90] sm:$0xff]  ;;  %v81_v40 = vmax.f32 %v79_v33, %v80_v34 }
   0x6   :  { %v28_v8 = vld [vmem:[%s291_s0 + $0xa0] sm:$0xff]  ;;  %v49_v14 = vmax.f32 %v47_v9, %v48_v6  ;;  %v52_v21 = vsel %vm44_vm0, %v24_v7, -inf  ;;  %v29_v30 = vld [vmem:[%s291_s0 + $0xa8] sm:$0xff]  ;;  %v66_v31 = vmax.f32 %v64_v23, %v65_v18  ;;  %v69_v38 = vsel %vm44_vm0, %v25_v22, -inf  ;;  %v11_v45 = vld [vmem:[%s291_s0 + $0x18] sm:$0xff] }
   0x7   :  { %v32_v19 = vld [vmem:[%s291_s0 + $0xc0] sm:$0xff]  ;;  %v54_v25 = vsel %vm44_vm0, %v28_v8, -inf  ;;  %v33_v37 = vld [vmem:[%s291_s0 + $0xc8] sm:$0xff]  ;;  %v84_v44 = vsel %vm44_vm0, %v22_v32, -inf  ;;  %v15_v46 = vld [vmem:[%s291_s0 + $0x38] sm:$0xff]  ;;  %v71_v50 = vsel %vm44_vm0, %v29_v30, -inf  ;;  %v83_v52 = vmax.f32 %v81_v40, %v82_v35 }
   0x8   :  { %v36_v20 = vld [vmem:[%s291_s0 + $0xe0] sm:$0xff]  ;;  %v51_v24 = vmax.f32 %v49_v14, %v50_v10  ;;  %v56_v41 = vsel %vm44_vm0, %v32_v19, -inf  ;;  %v68_v43 = vmax.f32 %v66_v31, %v67_v26  ;;  %v19_v47 = vld [vmem:[%s291_s0 + $0x58] sm:$0xff]  ;;  %v30_v51 = vld [vmem:[%s291_s0 + $0xb0] sm:$0xff]  ;;  %v96_v54 = vsel %vm44_vm0, %v11_v45, -inf }
   0x9   :  { %v58_v42 = vsel %vm44_vm0, %v36_v20, -inf  ;;  %v40_v48 = vld [vmem:[%s291_s0 + $0x100] sm:$0xff]  ;;  %v23_v53 = vld [vmem:[%s291_s0 + $0x78] sm:$0xff]  ;;  %v37_v55 = vld [vmem:[%s291_s0 + $0xe8] sm:$0xff]  ;;  %v86_v57 = vsel %vm44_vm0, %v26_v39, -inf  ;;  %v97_v58 = vsel %vm44_vm0, %v15_v46, -inf  ;;  %v85_v63 = vmax.f32 %v83_v52, %v84_v44 }
   0xa   :  { %v53_v36 = vmax.f32 %v51_v24, %v52_v21  ;;  %v70_v56 = vmax.f32 %v68_v43, %v69_v38  ;;  %v99_v59 = vsel %vm44_vm0, %v19_v47, -inf  ;;  %v73_v61 = vsel %vm44_vm0, %v33_v37, -inf  ;;  %v34_v62 = vld [vmem:[%s291_s0 + $0xd0] sm:$0xff]  ;;  %v27_v0 = vld [vmem:[%s291_s0 + $0x98] sm:$0xff]  ;;  %v41_v3 = vld [vmem:[%s291_s0 + $0x108] sm:$0xff] }
   0xb   :  { %v98_v1 = vmax.f32 %v96_v54, %v97_v58  ;;  %v60_v2 = vsel %vm44_vm0, %v40_v48, -inf  ;;  %v88_v5 = vsel %vm44_vm0, %v30_v51, -inf  ;;  %v101_v6 = vsel %vm44_vm0, %v23_v53, -inf  ;;  %v38_v9 = vld [vmem:[%s291_s0 + $0xf0] sm:$0xff]  ;;  %v31_v11 = vld [vmem:[%s291_s0 + $0xb8] sm:$0xff] }
   0xc   :  { %v55_v49 = vmax.f32 %v53_v36, %v54_v25  ;;  %v72_v4 = vmax.f32 %v70_v56, %v71_v50  ;;  %v75_v8 = vsel %vm44_vm0, %v37_v55, -inf  ;;  %v87_v10 = vmax.f32 %v85_v63, %v86_v57  ;;  %v42_v18 = vld [vmem:[%s291_s0 + $0x110] sm:$0xff]  ;;  %v35_v20 = vld [vmem:[%s291_s0 + $0xd8] sm:$0xff] }
   0xd   :  { %v100_v12 = vmax.f32 %v98_v1, %v99_v59  ;;  %v90_v14 = vsel %vm44_vm0, %v34_v62, -inf  ;;  %v103_v15 = vsel %vm44_vm0, %v27_v0, -inf  ;;  %v77_v17 = vsel %vm44_vm0, %v41_v3, -inf  ;;  %v39_v26 = vld [vmem:[%s291_s0 + $0xf8] sm:$0xff] }
   0xe   :  { %v57_v60 = vmax.f32 %v55_v49, %v56_v41  ;;  %v74_v13 = vmax.f32 %v72_v4, %v73_v61  ;;  %v89_v19 = vmax.f32 %v87_v10, %v88_v5  ;;  %v92_v23 = vsel %vm44_vm0, %v38_v9, -inf  ;;  %v43_v32 = vld [vmem:[%s291_s0 + $0x118] sm:$0xff] }
   0xf   :  { %v102_v21 = vmax.f32 %v100_v12, %v101_v6  ;;  %v105_v24 = vsel %vm44_vm0, %v31_v11, -inf  ;;  %v94_v29 = vsel %vm44_vm0, %v42_v18, -inf  ;;  %v107_v30 = vsel %vm44_vm0, %v35_v20, -inf }
  0x10   :  { %v59_v7 = vmax.f32 %v57_v60, %v58_v42  ;;  %v76_v22 = vmax.f32 %v74_v13, %v75_v8  ;;  %v91_v25 = vmax.f32 %v89_v19, %v90_v14  ;;  %v109_v34 = vsel %vm44_vm0, %v39_v26, -inf }
  0x11   :  { %v104_v27 = vmax.f32 %v102_v21, %v103_v15  ;;  %v111_v37 = vsel %vm44_vm0, %v43_v32, -inf }
  0x12   :  { %v61_v16 = vmax.f32 %v59_v7, %v60_v2  ;;  %v78_v28 = vmax.f32 %v76_v22, %v77_v17  ;;  %v93_v31 = vmax.f32 %v91_v25, %v92_v23 }
  0x13   :  { %v106_v33 = vmax.f32 %v104_v27, %v105_v24 }
  0x14   :  { %113 = vst.msk [vmem:[%s292_s1] sm:$0xff] %vm44_vm0, %v61_v16  ;;  %114 = vst.msk [vmem:[%s292_s1 + $0x8] sm:$0xff] %vm44_vm0, %v78_v28  ;;  %v95_v35 = vmax.f32 %v93_v31, %v94_v29 }
  0x15   :  { %v108_v36 = vmax.f32 %v106_v33, %v107_v30 }
  0x16   :  { %115 = vst.msk [vmem:[%s292_s1 + $0x10] sm:$0xff] %vm44_vm0, %v95_v35 }
  0x17   :  { %v110_v38 = vmax.f32 %v108_v36, %v109_v34 }
  0x19   :  { %v112_v39 = vmax.f32 %v110_v38, %v111_v37 }
  0x1b   :  { %116 = vst.msk [vmem:[%s292_s1 + $0x18] sm:$0xff] %vm44_vm0, %v112_v39 }

// kernel: modified_resnet18_forward.42
= control target key start
LH: loop header
LB: loop body
LE: loop exit
PB: predicated region body
PF: predicated region fallthrough
CT: control target
= control target key end

     0   :  { %vm134_vm0 = vcmask 457728   ;;  %vm159_vm1 = vcmask 1043456   ;;  %v475_v13 = vmov 0.0   ;;  %s597_s1 = inlined_call_operand.vmem [shape: bf16[56,128], index: 1, kind: input, shape index: {}]   ;;  %s598_s0 = inlined_call_operand.vmem [shape: bf16[128,56], index: 0, kind: input, shape index: {}]   ;;  %s599_s3 = inlined_call_operand.vmem [shape: f32[8,128], index: 3, kind: output, shape index: {1}]   ;;  %s600_s2 = inlined_call_operand.vmem [shape: f32[128,128], index: 2, kind: output, shape index: {0}]  }
   0x1   :  { %v463_v0 = vld [vmem:[%s597_s1] sm:$0xff]   ;;  %v464_v1 = vld [vmem:[%s597_s1 + $0x8] sm:$0xff]   ;;  %v465_v2 = vld [vmem:[%s597_s1 + $0x10] sm:$0xff]   ;;  %327 = vst [vmem:[%s599_s3] sm:$0xff] %v475_v13 }
   0x2   :  { %428 = vmatprep.subr.bf16.mxu0 %v463_v0  ;;  %452 = vmatprep.subr.bf16.mxu1 %v463_v0  ;;  %v467_v3 = vld [vmem:[%s598_s0] sm:$0xff]   ;;  %v466_v4 = vld [vmem:[%s597_s1 + $0x18] ss:$0 sps:$4 sm:$0xff]   ;;  %v468_v7 = vld [vmem:[%s598_s0 + $0x8] sm:$0xff]  }
   0x3   :  { %429 = vmatpush3.bf16.msra.mxu0 %v463_v0  ;;  %456 = vmatpush3.bf16.msra.mxu1 %v463_v0  ;;  %v471_v5 = vld [vmem:[%s598_s0 + $0x20] sm:$0xff]   ;;  %v161_v6 = vsel %vm159_vm1, %v466_v4, 0  ;;  %v472_v8 = vld [vmem:[%s598_s0 + $0x28] sm:$0xff]   ;;  %v469_v9 = vld [vmem:[%s598_s0 + $0x10] sm:$0xff]  }
   0x4   :  { %430 = vmatprep.subr.bf16.mxu0 %v464_v1  ;;  %453 = vmatprep.subr.bf16.mxu1 %v464_v1  ;;  %v473_v10 = vld [vmem:[%s598_s0 + $0x30] sm:$0xff]   ;;  %v470_v11 = vld [vmem:[%s598_s0 + $0x18] sm:$0xff]  }
   0x5   :  { %436 = vmatprep.mubr.msk.bf16.mxu0 %vm134_vm0, %v467_v3  ;;  %444 = vmatprep.mubr.msk.bf16.mxu1 %vm134_vm0, %v471_v5  ;;  %v474_v12 = vld [vmem:[%s598_s0 + $0x38] sm:$0xff]  }
   0x7   :  { %431 = vmatpush3.bf16.msra.mxu0 %v464_v1  ;;  %457 = vmatpush3.bf16.msra.mxu1 %v464_v1 }
   0x8   :  { %432 = vmatprep.subr.bf16.mxu0 %v465_v2  ;;  %454 = vmatprep.subr.bf16.mxu1 %v465_v2 }
   0xb   :  { %433 = vmatpush3.bf16.msra.mxu0 %v465_v2  ;;  %458 = vmatpush3.bf16.msra.mxu1 %v465_v2 }
   0xc   :  { %460 = vmatprep.subr.msk.bf16.mxu0 %vm159_vm1, %v466_v4  ;;  %461 = vmatprep.subr.msk.bf16.mxu1 %vm159_vm1, %v466_v4 }
   0xf   :  { %435 = vmatpush3.bf16.msra.mxu0 %v161_v6  ;;  %459 = vmatpush3.bf16.msra.mxu1 %v161_v6 }
  0x12   :  { %437 = vmatmul.mubr.msk.bf16.vlgmr.msra.gmra.mrb[0].mxu0 %vm134_vm0, %v468_v7  ;;  %445 = vmatmul.mubr.msk.bf16.vlgmr.msra.gmra.mrb[0].mxu1 %vm134_vm0, %v472_v8 }
  0x13   :  { %440 = vmatprep.mubr.msk.bf16.mxu0 %vm134_vm0, %v469_v9  ;;  %448 = vmatprep.mubr.msk.bf16.mxu1 %vm134_vm0, %v473_v10 }
  0x1a   :  { %441 = vmatmul.mubr.msk.bf16.gmra.mrb[4].mxu0 %vm134_vm0, %v470_v11  ;;  %449 = vmatmul.mubr.msk.bf16.gmra.mrb[4].mxu1 %vm134_vm0, %v474_v12 }
  0xe5   :  { %v438_v14 = vpop.f32.mrb[0].mxu0  ;;  %v446_v15 = vpop.f32.mrb[0].mxu1 }
  0xe6   :  { %313 = vst [vmem:[%s600_s2 + $0x10] sm:$0xff] %v438_v14  ;;  %v197_v16 = vpop.f32.mrb[1].mxu0  ;;  %321 = vst [vmem:[%s600_s2 + $0x50] sm:$0xff] %v446_v15  ;;  %v229_v17 = vpop.f32.mrb[1].mxu1  ;;  %v352_v25 = vmul.f32 %v438_v14, %v438_v14  ;;  %v360_v57 = vmul.f32 %v446_v15, %v446_v15 }
  0xe7   :  { %311 = vst [vmem:[%s600_s2] sm:$0xff] %v197_v16  ;;  %v439_v18 = vpop.f32.mrb[2].mxu0  ;;  %319 = vst [vmem:[%s600_s2 + $0x40] sm:$0xff] %v229_v17  ;;  %v447_v19 = vpop.f32.mrb[2].mxu1  ;;  %v350_v22 = vmul.f32 %v197_v16, %v197_v16  ;;  %v358_v51 = vmul.f32 %v229_v17, %v229_v17 }
  0xe8   :  { %314 = vst [vmem:[%s600_s2 + $0x18] sm:$0xff] %v439_v18  ;;  %v200_v20 = vpop.f32.mrb[3].mxu0  ;;  %322 = vst [vmem:[%s600_s2 + $0x58] sm:$0xff] %v447_v19  ;;  %v232_v21 = vpop.f32.mrb[3].mxu1  ;;  %v353_v28 = vmul.f32 %v439_v18, %v439_v18  ;;  %v361_v60 = vmul.f32 %v447_v19, %v447_v19 }
  0xe9   :  { %312 = vst [vmem:[%s600_s2 + $0x8] sm:$0xff] %v200_v20  ;;  %v328_v23 = vadd.f32 %v200_v20, %v197_v16  ;;  %v351_v24 = vmul.f32 %v200_v20, %v200_v20  ;;  %320 = vst [vmem:[%s600_s2 + $0x48] sm:$0xff] %v232_v21  ;;  %v359_v56 = vmul.f32 %v232_v21, %v232_v21 }
  0xeb   :  { %v329_v26 = vadd.f32 %v438_v14, %v328_v23  ;;  %v366_v27 = vadd.f32 %v351_v24, %v350_v22 }
  0xed   :  { %v367_v29 = vadd.f32 %v366_v27, %v352_v25  ;;  %v442_v30 = vpop.f32.mrb[4].mxu0  ;;  %v330_v31 = vadd.f32 %v439_v18, %v329_v26  ;;  %v450_v32 = vpop.f32.mrb[4].mxu1 }
  0xee   :  { %317 = vst [vmem:[%s600_s2 + $0x30] sm:$0xff] %v442_v30  ;;  %v213_v33 = vpop.f32.mrb[5].mxu0  ;;  %325 = vst [vmem:[%s600_s2 + $0x70] sm:$0xff] %v450_v32  ;;  %v245_v34 = vpop.f32.mrb[5].mxu1  ;;  %v356_v45 = vmul.f32 %v442_v30, %v442_v30  ;;  %v364_v5 = vmul.f32 %v450_v32, %v450_v32 }
  0xef   :  { %315 = vst [vmem:[%s600_s2 + $0x20] sm:$0xff] %v213_v33  ;;  %v331_v35 = vadd.f32 %v330_v31, %v213_v33  ;;  %v354_v36 = vmul.f32 %v213_v33, %v213_v33  ;;  %v368_v37 = vadd.f32 %v367_v29, %v353_v28  ;;  %v443_v38 = vpop.f32.mrb[6].mxu0  ;;  %323 = vst [vmem:[%s600_s2 + $0x60] sm:$0xff] %v245_v34  ;;  %v451_v39 = vpop.f32.mrb[6].mxu1 }
  0xf0   :  { %318 = vst [vmem:[%s600_s2 + $0x38] sm:$0xff] %v443_v38  ;;  %v216_v40 = vpop.f32.mrb[7].mxu0  ;;  %326 = vst [vmem:[%s600_s2 + $0x78] sm:$0xff] %v451_v39  ;;  %v248_v41 = vpop.f32.mrb[7].mxu1  ;;  %v357_v48 = vmul.f32 %v443_v38, %v443_v38  ;;  %v362_v63 = vmul.f32 %v245_v34, %v245_v34  ;;  %v365_v8 = vmul.f32 %v451_v39, %v451_v39 }
  0xf1   :  { %v369_v42 = vadd.f32 %v368_v37, %v354_v36  ;;  %316 = vst [vmem:[%s600_s2 + $0x28] sm:$0xff] %v216_v40  ;;  %v332_v43 = vadd.f32 %v331_v35, %v216_v40  ;;  %v355_v44 = vmul.f32 %v216_v40, %v216_v40  ;;  %324 = vst [vmem:[%s600_s2 + $0x68] sm:$0xff] %v248_v41 }
  0xf2   :  { %v363_v4 = vmul.f32 %v248_v41, %v248_v41 }
  0xf3   :  { %v333_v46 = vadd.f32 %v442_v30, %v332_v43  ;;  %v370_v47 = vadd.f32 %v369_v42, %v355_v44 }
  0xf5   :  { %v371_v49 = vadd.f32 %v370_v47, %v356_v45  ;;  %v334_v50 = vadd.f32 %v443_v38, %v333_v46 }
  0xf7   :  { %v335_v52 = vadd.f32 %v334_v50, %v229_v17  ;;  %v372_v53 = vadd.f32 %v371_v49, %v357_v48 }
  0xf9   :  { %v373_v54 = vadd.f32 %v372_v53, %v358_v51  ;;  %v336_v55 = vadd.f32 %v335_v52, %v232_v21 }
  0xfb   :  { %v337_v58 = vadd.f32 %v446_v15, %v336_v55  ;;  %v374_v59 = vadd.f32 %v373_v54, %v359_v56 }
  0xfd   :  { %v375_v61 = vadd.f32 %v374_v59, %v360_v57  ;;  %v338_v62 = vadd.f32 %v447_v19, %v337_v58 }
  0xff   :  { %v339_v0 = vadd.f32 %v338_v62, %v245_v34  ;;  %v376_v1 = vadd.f32 %v375_v61, %v361_v60 }
 0x101   :  { %v377_v2 = vadd.f32 %v376_v1, %v362_v63  ;;  %v340_v3 = vadd.f32 %v339_v0, %v248_v41 }
 0x103   :  { %v341_v6 = vadd.f32 %v450_v32, %v340_v3  ;;  %v378_v7 = vadd.f32 %v377_v2, %v363_v4 }
 0x105   :  { %v342_v9 = vadd.f32 %v451_v39, %v341_v6  ;;  %v379_v10 = vadd.f32 %v378_v7, %v364_v5 }
 0x107   :  { %v343_v11 = vrot.slane %v342_v9, 4  ;;  %v380_v12 = vadd.f32 %v379_v10, %v365_v8 }
 0x109   :  { %v344_v13 = vadd.f32 %v343_v11, %v342_v9  ;;  %v381_v14 = vrot.slane %v380_v12, 4 }
 0x10b   :  { %v345_v15 = vrot.slane %v344_v13, 2  ;;  %v382_v16 = vadd.f32 %v381_v14, %v380_v12 }
 0x10d   :  { %v346_v17 = vadd.f32 %v345_v15, %v344_v13  ;;  %v383_v18 = vrot.slane %v382_v16, 2 }
 0x10f   :  { %v347_v19 = vrot.slane %v346_v17, 1  ;;  %v384_v20 = vadd.f32 %v383_v18, %v382_v16 }
 0x111   :  { %v348_v21 = vadd.f32 %v347_v19, %v346_v17  ;;  %v385_v22 = vrot.slane %v384_v20, 1 }
 0x113   :  { %349 = vst [vmem:[%s599_s3] sm:$0x1] %v348_v21  ;;  %v386_v23 = vadd.f32 %v385_v22, %v384_v20 }
 0x115   :  { %387 = vst [vmem:[%s599_s3 + $0x1] sm:$0x1] %v386_v23 }

// kernel: modified_resnet18_forward.45
= control target key start
LH: loop header
LB: loop body
LE: loop exit
PB: predicated region body
PF: predicated region fallthrough
CT: control target
= control target key end

     0   :  { %vm376_vm0 = vcmask 523264   ;;  %v755_v46 = vmov 0.0   ;;  %s935_s1 = inlined_call_operand.vmem [shape: bf16[576,128], index: 1, kind: input, shape index: {}]   ;;  %s936_s0 = inlined_call_operand.vmem [shape: bf16[32,576], index: 0, kind: input, shape index: {}]   ;;  %s937_s3 = inlined_call_operand.vmem [shape: f32[8,128], index: 3, kind: output, shape index: {1}]   ;;  %s938_s2 = inlined_call_operand.vmem [shape: f32[32,128], index: 2, kind: output, shape index: {0}]  }
   0x1   :  { %v705_v0 = vld [vmem:[%s935_s1 + $0x40] sm:$0xff]   ;;  %v709_v4 = vld [vmem:[%s935_s1 + $0x48] sm:$0xff]   ;;  %v713_v8 = vld [vmem:[%s935_s1 + $0x50] sm:$0xff]   ;;  %549 = vst [vmem:[%s937_s3] sm:$0xff] %v755_v46 }
   0x2   :  { %v706_v1 = vld [vmem:[%s935_s1 + $0xc0] sm:$0xff]   ;;  %630 = vmatprep.subr.bf16.mxu0 %v705_v0  ;;  %v710_v5 = vld [vmem:[%s935_s1 + $0xc8] sm:$0xff]   ;;  %v714_v9 = vld [vmem:[%s935_s1 + $0xd0] sm:$0xff]  }
   0x3   :  { %v707_v2 = vld [vmem:[%s935_s1] sm:$0xff]   ;;  %658 = vmatprep.subr.bf16.mxu1 %v706_v1  ;;  %v711_v6 = vld [vmem:[%s935_s1 + $0x8] sm:$0xff]   ;;  %v715_v10 = vld [vmem:[%s935_s1 + $0x10] sm:$0xff]  }
   0x4   :  { %v708_v3 = vld [vmem:[%s935_s1 + $0x80] sm:$0xff]   ;;  %631 = vmatpush3.bf16.msra.mxu0 %v707_v2  ;;  %v712_v7 = vld [vmem:[%s935_s1 + $0x88] sm:$0xff]   ;;  %v716_v11 = vld [vmem:[%s935_s1 + $0x90] sm:$0xff]  }
   0x5   :  { %659 = vmatpush3.bf16.msra.mxu1 %v708_v3  ;;  %632 = vmatprep.subr.bf16.mxu0 %v709_v4  ;;  %v717_v12 = vld [vmem:[%s935_s1 + $0x58] sm:$0xff]   ;;  %v721_v16 = vld [vmem:[%s935_s1 + $0x60] sm:$0xff]   ;;  %v725_v20 = vld [vmem:[%s935_s1 + $0x68] sm:$0xff]  }
   0x6   :  { %660 = vmatprep.subr.bf16.mxu1 %v710_v5  ;;  %v718_v13 = vld [vmem:[%s935_s1 + $0xd8] sm:$0xff]   ;;  %v722_v17 = vld [vmem:[%s935_s1 + $0xe0] sm:$0xff]   ;;  %v726_v21 = vld [vmem:[%s935_s1 + $0xe8] sm:$0xff]  }
   0x7   :  { %v719_v14 = vld [vmem:[%s935_s1 + $0x18] sm:$0xff]   ;;  %v723_v18 = vld [vmem:[%s935_s1 + $0x20] sm:$0xff]   ;;  %v727_v22 = vld [vmem:[%s935_s1 + $0x28] sm:$0xff]  }
   0x8   :  { %633 = vmatpush3.bf16.msra.mxu0 %v711_v6  ;;  %v720_v15 = vld [vmem:[%s935_s1 + $0x98] sm:$0xff]   ;;  %v724_v19 = vld [vmem:[%s935_s1 + $0xa0] sm:$0xff]   ;;  %v728_v23 = vld [vmem:[%s935_s1 + $0xa8] sm:$0xff]  }
   0x9   :  { %661 = vmatpush3.bf16.msra.mxu1 %v712_v7  ;;  %634 = vmatprep.subr.bf16.mxu0 %v713_v8  ;;  %v729_v24 = vld [vmem:[%s935_s1 + $0x70] sm:$0xff]   ;;  %v733_v28 = vld [vmem:[%s935_s1 + $0x78] sm:$0xff]   ;;  %v742_v35 = vld [vmem:[%s936_s0 + $0xc] ss:$20 sps:$4 sm:$0xff]  }
   0xa   :  { %662 = vmatprep.subr.bf16.mxu1 %v714_v9  ;;  %v730_v25 = vld [vmem:[%s935_s1 + $0xf0] sm:$0xff]   ;;  %v734_v29 = vld [vmem:[%s935_s1 + $0xf8] sm:$0xff]   ;;  %v743_v36 = vld [vmem:[%s935_s1 + $0x100] sm:$0xff]   ;;  %464 = vmatprep.mubr.bf16.mxu1 %v742_v35 }
   0xb   :  { %v731_v26 = vld [vmem:[%s935_s1 + $0x30] sm:$0xff]   ;;  %v735_v30 = vld [vmem:[%s935_s1 + $0x38] sm:$0xff]   ;;  %v744_v37 = vld [vmem:[%s935_s1 + $0x108] sm:$0xff]  }
   0xc   :  { %635 = vmatpush3.bf16.msra.mxu0 %v715_v10  ;;  %v732_v27 = vld [vmem:[%s935_s1 + $0xb0] sm:$0xff]   ;;  %v736_v31 = vld [vmem:[%s935_s1 + $0xb8] sm:$0xff]   ;;  %v745_v38 = vld [vmem:[%s936_s0 + $0x2c] ss:$20 sps:$4 sm:$0xff]  }
   0xd   :  { %663 = vmatpush3.bf16.msra.mxu1 %v716_v11  ;;  %636 = vmatprep.subr.bf16.mxu0 %v717_v12  ;;  %v737_v32 = vld [vmem:[%s936_s0] ss:$20 sps:$4 sm:$0xff]   ;;  %v739_v33 = vld [vmem:[%s936_s0 + $0x4] ss:$20 sps:$4 sm:$0xff]   ;;  %v740_v34 = vld [vmem:[%s936_s0 + $0x8] ss:$20 sps:$4 sm:$0xff]  }
   0xe   :  { %664 = vmatprep.subr.bf16.mxu1 %v718_v13  ;;  %415 = vmatprep.mubr.bf16.mxu0 %v739_v33  ;;  %v747_v39 = vld [vmem:[%s936_s0 + $0x34] ss:$20 sps:$4 sm:$0xff]   ;;  %v750_v42 = vld [vmem:[%s936_s0 + $0x30] ss:$20 sps:$4 sm:$0xff]   ;;  %v752_v44 = vld [vmem:[%s935_s1 + $0x118] sm:$0xff]  }
   0xf   :  { %v749_v40 = vld [vmem:[%s936_s0 + $0x28] ss:$20 sps:$4 sm:$0xff]   ;;  %v751_v41 = vld [vmem:[%s935_s1 + $0x110] sm:$0xff]   ;;  %v754_v45 = vld [vmem:[%s936_s0 + $0x38] ss:$20 sps:$4 sm:$0xff]  }
  0x10   :  { %637 = vmatpush3.bf16.msra.mxu0 %v719_v14  ;;  %v753_v43 = vld [vmem:[%s936_s0 + $0x10] ss:$20 sps:$4 sm:$0xff]  }
  0x11   :  { %665 = vmatpush3.bf16.msra.mxu1 %v720_v15  ;;  %638 = vmatprep.subr.bf16.mxu0 %v721_v16 }
  0x12   :  { %666 = vmatprep.subr.bf16.mxu1 %v722_v17 }
  0x14   :  { %639 = vmatpush3.bf16.msra.mxu0 %v723_v18 }
  0x15   :  { %667 = vmatpush3.bf16.msra.mxu1 %v724_v19  ;;  %640 = vmatprep.subr.bf16.mxu0 %v725_v20 }
  0x16   :  { %668 = vmatprep.subr.bf16.mxu1 %v726_v21 }
  0x18   :  { %641 = vmatpush3.bf16.msra.mxu0 %v727_v22 }
  0x19   :  { %669 = vmatpush3.bf16.msra.mxu1 %v728_v23  ;;  %642 = vmatprep.subr.bf16.mxu0 %v729_v24 }
  0x1a   :  { %670 = vmatprep.subr.bf16.mxu1 %v730_v25 }
  0x1c   :  { %643 = vmatpush3.bf16.msra.mxu0 %v731_v26 }
  0x1d   :  { %671 = vmatpush3.bf16.msra.mxu1 %v732_v27  ;;  %644 = vmatprep.subr.bf16.mxu0 %v733_v28 }
  0x1e   :  { %672 = vmatprep.subr.bf16.mxu1 %v734_v29 }
  0x20   :  { %645 = vmatpush3.bf16.msra.mxu0 %v735_v30 }
  0x21   :  { %673 = vmatpush3.bf16.msra.mxu1 %v736_v31  ;;  %692 = vmatprep.subr.bf16.mxu0 %v743_v36 }
  0x23   :  { %416 = vmatmul.mubr.bf16.vlgmr.msra.gmra.mrb[0].mxu0 %v737_v32 }
  0x24   :  { %465 = vmatmul.mubr.bf16.vlgmr.msra.gmra.mrb[0].mxu1 %v740_v34  ;;  %693 = vmatpush3.bf16.msra.mxu0 %v743_v36 }
  0x25   :  { %694 = vmatprep.subr.bf16.mxu0 %v744_v37  ;;  %423 = vmatprep.mubr.bf16.mxu0 %v745_v38 }
  0x26   :  { %472 = vmatprep.mubr.bf16.mxu1 %v747_v39 }
  0x28   :  { %695 = vmatpush3.bf16.msra.mxu0 %v744_v37 }
  0x29   :  { %696 = vmatprep.subr.bf16.mxu0 %v751_v41 }
  0x2b   :  { %424 = vmatmul.mubr.bf16.gmra.mrb[4].mxu0 %v749_v40 }
  0x2c   :  { %473 = vmatmul.mubr.bf16.gmra.mrb[4].mxu1 %v750_v42  ;;  %700 = vmatprep.mubr.msk.bf16.mxu0 %vm376_vm0, %v753_v43 }
  0x2d   :  { %697 = vmatpush3.bf16.msra.mxu0 %v751_v41 }
  0x2e   :  { %698 = vmatprep.subr.bf16.mxu0 %v752_v44 }
  0x31   :  { %699 = vmatpush3.bf16.msra.mxu0 %v752_v44 }
  0x34   :  { %701 = vmatmul.mubr.msk.bf16.vlgmr.msra.gmra.mrb[8].mxu0 %vm376_vm0, %v754_v45 }
  0xf6   :  { %v646_v47 = vpop.f32.mrb[0].mxu0 }
  0xf7   :  { %v674_v48 = vpop.f32.mrb[0].mxu1  ;;  %v647_v49 = vpop.f32.mrb[1].mxu0 }
  0xf8   :  { %v648_v50 = vadd.f32 %v647_v49, %v646_v47  ;;  %v675_v51 = vpop.f32.mrb[1].mxu1  ;;  %v649_v52 = vpop.f32.mrb[2].mxu0 }
  0xf9   :  { %v676_v53 = vadd.f32 %v675_v51, %v674_v48  ;;  %v677_v54 = vpop.f32.mrb[2].mxu1  ;;  %v650_v55 = vpop.f32.mrb[3].mxu0 }
  0xfa   :  { %v651_v56 = vadd.f32 %v650_v55, %v649_v52  ;;  %v678_v57 = vpop.f32.mrb[3].mxu1 }
  0xfb   :  { %v679_v58 = vadd.f32 %v678_v57, %v677_v54  ;;  %v467_v59 = vadd.f32 %v676_v53, %v648_v50 }
  0xfd   :  { %v470_v60 = vadd.f32 %v679_v58, %v651_v56 }
  0xfe   :  { %v652_v61 = vpop.f32.mrb[4].mxu0 }
  0xff   :  { %v680_v62 = vpop.f32.mrb[4].mxu1  ;;  %v653_v63 = vpop.f32.mrb[5].mxu0 }
 0x100   :  { %v654_v0 = vadd.f32 %v653_v63, %v652_v61  ;;  %v681_v1 = vpop.f32.mrb[5].mxu1  ;;  %v655_v2 = vpop.f32.mrb[6].mxu0 }
 0x101   :  { %v682_v3 = vadd.f32 %v681_v1, %v680_v62  ;;  %v683_v4 = vpop.f32.mrb[6].mxu1  ;;  %v656_v5 = vpop.f32.mrb[7].mxu0 }
 0x102   :  { %v657_v6 = vadd.f32 %v656_v5, %v655_v2  ;;  %v684_v7 = vpop.f32.mrb[7].mxu1 }
 0x103   :  { %v685_v8 = vadd.f32 %v684_v7, %v683_v4  ;;  %v475_v9 = vadd.f32 %v682_v3, %v654_v0 }
 0x105   :  { %v478_v10 = vadd.f32 %v685_v8, %v657_v6 }
 0x107   :  { %v702_v11 = vpop.f32.mrb[8].mxu0 }
 0x108   :  { %v524_v12 = vadd.f32 %v702_v11, %v475_v9  ;;  %v515_v13 = vpop.f32.mrb[9].mxu0 }
 0x109   :  { %v516_v14 = vadd.f32 %v515_v13, %v467_v59  ;;  %v703_v15 = vpop.f32.mrb[10].mxu0 }
 0x10a   :  { %547 = vst [vmem:[%s938_s2 + $0x10] sm:$0xff] %v524_v12  ;;  %v527_v16 = vadd.f32 %v703_v15, %v478_v10  ;;  %v518_v17 = vpop.f32.mrb[11].mxu0  ;;  %v562_v22 = vmul.f32 %v524_v12, %v524_v12 }
 0x10b   :  { %545 = vst [vmem:[%s938_s2] sm:$0xff] %v516_v14  ;;  %v519_v18 = vadd.f32 %v518_v17, %v470_v60  ;;  %v560_v19 = vmul.f32 %v516_v14, %v516_v14 }
 0x10c   :  { %548 = vst [vmem:[%s938_s2 + $0x18] sm:$0xff] %v527_v16  ;;  %v563_v25 = vmul.f32 %v527_v16, %v527_v16 }
 0x10d   :  { %546 = vst [vmem:[%s938_s2 + $0x8] sm:$0xff] %v519_v18  ;;  %v550_v20 = vadd.f32 %v519_v18, %v516_v14  ;;  %v561_v21 = vmul.f32 %v519_v18, %v519_v18 }
 0x10f   :  { %v551_v23 = vadd.f32 %v550_v20, %v524_v12  ;;  %v564_v24 = vadd.f32 %v561_v21, %v560_v19 }
 0x111   :  { %v552_v26 = vadd.f32 %v551_v23, %v527_v16  ;;  %v565_v27 = vadd.f32 %v564_v24, %v562_v22 }
 0x113   :  { %v553_v28 = vrot.slane %v552_v26, 4  ;;  %v566_v29 = vadd.f32 %v565_v27, %v563_v25 }
 0x115   :  { %v554_v30 = vadd.f32 %v553_v28, %v552_v26  ;;  %v567_v31 = vrot.slane %v566_v29, 4 }
 0x117   :  { %v555_v32 = vrot.slane %v554_v30, 2  ;;  %v568_v33 = vadd.f32 %v567_v31, %v566_v29 }
 0x119   :  { %v556_v34 = vadd.f32 %v555_v32, %v554_v30  ;;  %v569_v35 = vrot.slane %v568_v33, 2 }
 0x11b   :  { %v557_v36 = vrot.slane %v556_v34, 1  ;;  %v570_v37 = vadd.f32 %v569_v35, %v568_v33 }
 0x11d   :  { %v558_v38 = vadd.f32 %v557_v36, %v556_v34  ;;  %v571_v39 = vrot.slane %v570_v37, 1 }
 0x11f   :  { %559 = vst [vmem:[%s937_s3] sm:$0x1] %v558_v38  ;;  %v572_v40 = vadd.f32 %v571_v39, %v570_v37 }
 0x121   :  { %573 = vst [vmem:[%s937_s3 + $0x1] sm:$0x1] %v572_v40 }

// kernel: modified_resnet18_forward.46
= control target key start
LH: loop header
LB: loop body
LE: loop exit
PB: predicated region body
PF: predicated region fallthrough
CT: control target
= control target key end

     0   :  { %v89_v7 = vmov 1966171168   ;;  %v33_v9 = vlaneseq  ;;  %s148_s1 = inlined_call_operand.vmem [shape: f32[1,8,128], index: 1, kind: input, shape index: {}]   ;;  %s149_s2 = inlined_call_operand.vmem [shape: f32[1,128], index: 2, kind: input, shape index: {}]   ;;  %s150_s3 = inlined_call_operand.vmem [shape: f32[1,128], index: 3, kind: input, shape index: {}]   ;;  %s151_s0 = inlined_call_operand.vmem [shape: f32[32,128], index: 0, kind: input, shape index: {}]   ;;  %s152_s4 = inlined_call_operand.vmem [shape: f32[32,128], index: 4, kind: output, shape index: {}]  }
   0x1   :  { %v17_v0 = vld [vmem:[%s148_s1] sm:$0xff]  ;;  %v31_v8 = vunpack.c.l.s4 %v89_v7  ;;  %v51_v22 = vld [vmem:[%s151_s0 + $0x8] sm:$0xff]  ;;  %v52_v23 = vld [vmem:[%s151_s0 + $0x10] sm:$0xff] }
   0x2   :  { %v19_v1 = vmul.f32 0.03125, %v17_v0  ;;  %v34_v11 = vshrl.u32 %v33_v9, 7  ;;  %v26_v16 = vld [vmem:[%s149_s2] sm:$0x1]  ;;  %v53_v26 = vld [vmem:[%s151_s0 + $0x18] sm:$0xff] }
   0x3   :  { %v32_v10 = vunpack.c.0.s8 %v31_v8  ;;  %v47_v20 = vld [vmem:[%s150_s3] sm:$0x1] }
   0x4   :  { %v20_v2 = vmul.f32 %v19_v1, %v19_v1  ;;  %v57_v18 = vsub.s32 0, %v34_v11  ;;  %v50_v21 = vld [vmem:[%s151_s0] sm:$0xff] }
   0x5   :  { %v35_v12 = vsub.s32 %v32_v10, %v34_v11 }
   0x6   :  { %v22_v3 = vrot.slane %v20_v2, 7 }
   0x8   :  { %v24_v4 = vsub.f32 %v19_v1, %v22_v3 }
   0xa   :  { %v25_v5 = vmax.f32 %v24_v4, 0.0 }
   0xc   :  { %v27_v6 = vadd.f32 1e-05, %v25_v5 }
   0xe   :  { %87 = vrsqrt.f32 %v27_v6 }
  0x18   :  { %v88_v13 = vpop.eup %87 }
  0x19   :  { %v36_v14 = vrot.slane %v88_v13, %v35_v12 }
  0x1b   :  { %v37_v15 = vcombine.high %v36_v14, %v36_v14 }
  0x1d   :  { %v44_v17 = vrot.slane %v37_v15, %v35_v12 }
  0x1f   :  { %v46_v19 = vmul.f32 %v44_v17, %v26_v16 }
  0x21   :  { %v48_v24 = vmul.f32 %v46_v19, %v19_v1  ;;  %v58_v25 = vrot.slane %v46_v19, %v57_v18 }
  0x23   :  { %v49_v27 = vsub.f32 %v47_v20, %v48_v24  ;;  %v60_v28 = vmul.f32 %v58_v25, %v50_v21  ;;  %v61_v29 = vmul.f32 %v58_v25, %v51_v22  ;;  %v62_v30 = vmul.f32 %v58_v25, %v52_v23 }
  0x24   :  { %v63_v31 = vmul.f32 %v58_v25, %v53_v26 }
  0x25   :  { %v68_v32 = vrot.slane %v49_v27, %v57_v18 }
  0x27   :  { %v70_v33 = vadd.f32 %v68_v32, %v60_v28  ;;  %v71_v34 = vadd.f32 %v68_v32, %v61_v29  ;;  %v72_v35 = vadd.f32 %v68_v32, %v62_v30  ;;  %v73_v36 = vadd.f32 %v68_v32, %v63_v31 }
  0x29   :  { %v74_v37 = vmax.f32 %v70_v33, 0.0  ;;  %v75_v38 = vmax.f32 %v71_v34, 0.0  ;;  %v76_v39 = vmax.f32 %v72_v35, 0.0  ;;  %v77_v40 = vmax.f32 %v73_v36, 0.0 }
  0x2b   :  { %78 = vst [vmem:[%s152_s4] sm:$0xff] %v74_v37  ;;  %79 = vst [vmem:[%s152_s4 + $0x8] sm:$0xff] %v75_v38 }
  0x2c   :  { %80 = vst [vmem:[%s152_s4 + $0x10] sm:$0xff] %v76_v39  ;;  %81 = vst [vmem:[%s152_s4 + $0x18] sm:$0xff] %v77_v40 }

// kernel: modified_resnet18_forward.48
= control target key start
LH: loop header
LB: loop body
LE: loop exit
PB: predicated region body
PF: predicated region fallthrough
CT: control target
= control target key end

     0   :  { %v100_v7 = vmov 1966171168   ;;  %v36_v9 = vlaneseq  ;;  %s176_s1 = inlined_call_operand.vmem [shape: f32[1,8,128], index: 1, kind: input, shape index: {}]   ;;  %s177_s2 = inlined_call_operand.vmem [shape: f32[1,128], index: 2, kind: input, shape index: {}]   ;;  %s178_s3 = inlined_call_operand.vmem [shape: f32[1,128], index: 3, kind: input, shape index: {}]   ;;  %s179_s0 = inlined_call_operand.vmem [shape: f32[32,128], index: 0, kind: input, shape index: {}]   ;;  %s180_s4 = inlined_call_operand.vmem [shape: f32[32,128], index: 4, kind: input, shape index: {}]   ;;  %s181_s5 = inlined_call_operand.vmem [shape: f32[32,128], index: 5, kind: output, shape index: {}]  }
   0x1   :  { %v20_v0 = vld [vmem:[%s176_s1] sm:$0xff]  ;;  %v34_v8 = vunpack.c.l.s4 %v100_v7  ;;  %v54_v22 = vld [vmem:[%s179_s0 + $0x8] sm:$0xff]  ;;  %v55_v23 = vld [vmem:[%s179_s0 + $0x10] sm:$0xff] }
   0x2   :  { %v22_v1 = vmul.f32 0.03125, %v20_v0  ;;  %v37_v11 = vshrl.u32 %v36_v9, 7  ;;  %v29_v16 = vld [vmem:[%s177_s2] sm:$0x1]  ;;  %v56_v26 = vld [vmem:[%s179_s0 + $0x18] sm:$0xff]  ;;  %v78_v34 = vld [vmem:[%s180_s4 + $0x8] sm:$0xff] }
   0x3   :  { %v35_v10 = vunpack.c.0.s8 %v34_v8  ;;  %v50_v20 = vld [vmem:[%s178_s3] sm:$0x1]  ;;  %v79_v35 = vld [vmem:[%s180_s4 + $0x10] sm:$0xff]  ;;  %v80_v36 = vld [vmem:[%s180_s4 + $0x18] sm:$0xff] }
   0x4   :  { %v23_v2 = vmul.f32 %v22_v1, %v22_v1  ;;  %v60_v18 = vsub.s32 0, %v37_v11  ;;  %v53_v21 = vld [vmem:[%s179_s0] sm:$0xff] }
   0x5   :  { %v38_v12 = vsub.s32 %v35_v10, %v37_v11  ;;  %v77_v33 = vld [vmem:[%s180_s4] sm:$0xff] }
   0x6   :  { %v25_v3 = vrot.slane %v23_v2, 7 }
   0x8   :  { %v27_v4 = vsub.f32 %v22_v1, %v25_v3 }
   0xa   :  { %v28_v5 = vmax.f32 %v27_v4, 0.0 }
   0xc   :  { %v30_v6 = vadd.f32 1e-05, %v28_v5 }
   0xe   :  { %98 = vrsqrt.f32 %v30_v6 }
  0x18   :  { %v99_v13 = vpop.eup %98 }
  0x19   :  { %v39_v14 = vrot.slane %v99_v13, %v38_v12 }
  0x1b   :  { %v40_v15 = vcombine.high %v39_v14, %v39_v14 }
  0x1d   :  { %v47_v17 = vrot.slane %v40_v15, %v38_v12 }
  0x1f   :  { %v49_v19 = vmul.f32 %v47_v17, %v29_v16 }
  0x21   :  { %v51_v24 = vmul.f32 %v49_v19, %v22_v1  ;;  %v61_v25 = vrot.slane %v49_v19, %v60_v18 }
  0x23   :  { %v52_v27 = vsub.f32 %v50_v20, %v51_v24  ;;  %v63_v28 = vmul.f32 %v61_v25, %v53_v21  ;;  %v64_v29 = vmul.f32 %v61_v25, %v54_v22  ;;  %v65_v30 = vmul.f32 %v61_v25, %v55_v23 }
  0x24   :  { %v66_v31 = vmul.f32 %v61_v25, %v56_v26 }
  0x25   :  { %v71_v32 = vrot.slane %v52_v27, %v60_v18 }
  0x27   :  { %v73_v37 = vadd.f32 %v71_v32, %v63_v28  ;;  %v74_v38 = vadd.f32 %v71_v32, %v64_v29  ;;  %v75_v39 = vadd.f32 %v71_v32, %v65_v30  ;;  %v76_v40 = vadd.f32 %v71_v32, %v66_v31 }
  0x29   :  { %v81_v41 = vadd.f32 %v77_v33, %v73_v37  ;;  %v82_v42 = vadd.f32 %v78_v34, %v74_v38  ;;  %v83_v43 = vadd.f32 %v79_v35, %v75_v39  ;;  %v84_v44 = vadd.f32 %v80_v36, %v76_v40 }
  0x2b   :  { %v85_v45 = vmax.f32 %v81_v41, 0.0  ;;  %v86_v46 = vmax.f32 %v82_v42, 0.0  ;;  %v87_v47 = vmax.f32 %v83_v43, 0.0  ;;  %v88_v48 = vmax.f32 %v84_v44, 0.0 }
  0x2d   :  { %89 = vst [vmem:[%s181_s5] sm:$0xff] %v85_v45  ;;  %90 = vst [vmem:[%s181_s5 + $0x8] sm:$0xff] %v86_v46 }
  0x2e   :  { %91 = vst [vmem:[%s181_s5 + $0x10] sm:$0xff] %v87_v47  ;;  %92 = vst [vmem:[%s181_s5 + $0x18] sm:$0xff] %v88_v48 }

// kernel: modified_resnet18_forward.53
= control target key start
LH: loop header
LB: loop body
LE: loop exit
PB: predicated region body
PF: predicated region fallthrough
CT: control target
= control target key end

     0   :  { %v156_v0 = vmov 0.0   ;;  %vm157_vm0 = vmmov 0   ;;  %vm53_vm1 = vcmask 523264   ;;  %s205_s1 = inlined_call_operand.vmem [shape: bf16[64,128], index: 1, kind: input, shape index: {}]   ;;  %s206_s3 = inlined_call_operand.vmem [shape: f32[8,128], index: 3, kind: output, shape index: {1}]   ;;  %s207_s0 = inlined_call_operand.vmem [shape: bf16[8,64], index: 0, kind: input, shape index: {}]   ;;  %s208_s2 = inlined_call_operand.vmem [shape: f32[8,128], index: 2, kind: output, shape index: {0}]  }
   0x1   :  { %138 = vmatprep.subr.bf16.mxu0 %v156_v0  ;;  %v152_v1 = vld [vmem:[%s205_s1] sm:$0xff]   ;;  %146 = vmatprep.mubr.msk.bf16.mxu0 %vm157_vm0, %v156_v0  ;;  %104 = vst [vmem:[%s206_s3] sm:$0xff] %v156_v0  ;;  %v153_v2 = vld [vmem:[%s205_s1 + $0x8] sm:$0xff]   ;;  %v154_v3 = vld [vmem:[%s205_s1 + $0x10] sm:$0xff]  }
   0x2   :  { %139 = vmatpush3.bf16.msra.mxu0 %v152_v1  ;;  %v155_v4 = vld [vmem:[%s205_s1 + $0x18] sm:$0xff]   ;;  %v20_v5 = vld [vmem:[%s207_s0] sm:$0xf] }
   0x3   :  { %140 = vmatprep.subr.bf16.mxu0 %v156_v0 }
   0x6   :  { %141 = vmatpush3.bf16.msra.mxu0 %v153_v2 }
   0x7   :  { %142 = vmatprep.subr.bf16.mxu0 %v156_v0 }
   0xa   :  { %143 = vmatpush3.bf16.msra.mxu0 %v154_v3 }
   0xb   :  { %144 = vmatprep.subr.bf16.mxu0 %v156_v0 }
   0xe   :  { %145 = vmatpush3.bf16.msra.mxu0 %v155_v4 }
  0x11   :  { %147 = vmatmul.mubr.msk.bf16.vlgmr.msra.gmra.mrb[0].mxu0 %vm53_vm1, %v20_v5 }
  0xe4   :  { %v91_v6 = vpop.f32.mrb[0].mxu0 }
  0xe5   :  { %103 = vst [vmem:[%s208_s2] sm:$0xff] %v91_v6  ;;  %v105_v7 = vrot.slane %v91_v6, 4  ;;  %v112_v8 = vmul.f32 %v91_v6, %v91_v6  ;;  %v148_v9 = vpop.f32.mrb[1].mxu0 }
  0xe6   :  { %v94_v10 = vpop.f32.mrb[2].mxu0 }
  0xe7   :  { %v106_v11 = vadd.f32 %v105_v7, %v91_v6  ;;  %v113_v12 = vrot.slane %v112_v8, 4  ;;  %v149_v13 = vpop.f32.mrb[3].mxu0 }
  0xe9   :  { %v107_v14 = vrot.slane %v106_v11, 2  ;;  %v114_v15 = vadd.f32 %v113_v12, %v112_v8 }
  0xeb   :  { %v108_v16 = vadd.f32 %v107_v14, %v106_v11  ;;  %v115_v17 = vrot.slane %v114_v15, 2 }
  0xed   :  { %v109_v18 = vrot.slane %v108_v16, 1  ;;  %v116_v19 = vadd.f32 %v115_v17, %v114_v15 }
  0xef   :  { %v110_v20 = vadd.f32 %v109_v18, %v108_v16  ;;  %v117_v21 = vrot.slane %v116_v19, 1 }
  0xf1   :  { %111 = vst [vmem:[%s206_s3] sm:$0x1] %v110_v20  ;;  %v118_v22 = vadd.f32 %v117_v21, %v116_v19 }
  0xf3   :  { %119 = vst [vmem:[%s206_s3 + $0x1] sm:$0x1] %v118_v22 }

// kernel: modified_resnet18_forward.54
= control target key start
LH: loop header
LB: loop body
LE: loop exit
PB: predicated region body
PF: predicated region fallthrough
CT: control target
= control target key end

     0   :  { %v73_v7 = vmov 1966171168   ;;  %v33_v9 = vlaneseq  ;;  %s114_s1 = inlined_call_operand.vmem [shape: f32[1,8,128], index: 1, kind: input, shape index: {}]   ;;  %s115_s2 = inlined_call_operand.vmem [shape: f32[1,128], index: 2, kind: input, shape index: {}]   ;;  %s116_s0 = inlined_call_operand.vmem [shape: f32[8,128], index: 0, kind: input, shape index: {}]   ;;  %s117_s3 = inlined_call_operand.vmem [shape: f32[1,128], index: 3, kind: input, shape index: {}]   ;;  %s118_s4 = inlined_call_operand.vmem [shape: f32[8,128], index: 4, kind: output, shape index: {}]  }
   0x1   :  { %v17_v0 = vld [vmem:[%s114_s1] sm:$0xff]  ;;  %v31_v8 = vunpack.c.l.s4 %v73_v7 }
   0x2   :  { %v19_v1 = vmul.f32 0.125, %v17_v0  ;;  %v34_v11 = vshrl.u32 %v33_v9, 7  ;;  %v26_v16 = vld [vmem:[%s115_s2] sm:$0x1] }
   0x3   :  { %v32_v10 = vunpack.c.0.s8 %v31_v8  ;;  %v47_v20 = vld [vmem:[%s117_s3] sm:$0x1] }
   0x4   :  { %v20_v2 = vmul.f32 %v19_v1, %v19_v1  ;;  %v54_v18 = vsub.s32 0, %v34_v11  ;;  %v50_v21 = vld [vmem:[%s116_s0] sm:$0xff] }
   0x5   :  { %v35_v12 = vsub.s32 %v32_v10, %v34_v11 }
   0x6   :  { %v22_v3 = vrot.slane %v20_v2, 7 }
   0x8   :  { %v24_v4 = vsub.f32 %v19_v1, %v22_v3 }
   0xa   :  { %v25_v5 = vmax.f32 %v24_v4, 0.0 }
   0xc   :  { %v27_v6 = vadd.f32 1e-05, %v25_v5 }
   0xe   :  { %71 = vrsqrt.f32 %v27_v6 }
  0x18   :  { %v72_v13 = vpop.eup %71 }
  0x19   :  { %v36_v14 = vrot.slane %v72_v13, %v35_v12 }
  0x1b   :  { %v37_v15 = vcombine.high %v36_v14, %v36_v14 }
  0x1d   :  { %v44_v17 = vrot.slane %v37_v15, %v35_v12 }
  0x1f   :  { %v46_v19 = vmul.f32 %v44_v17, %v26_v16 }
  0x21   :  { %v48_v22 = vmul.f32 %v46_v19, %v19_v1  ;;  %v55_v23 = vrot.slane %v46_v19, %v54_v18 }
  0x23   :  { %v49_v24 = vsub.f32 %v47_v20, %v48_v22  ;;  %v57_v25 = vmul.f32 %v55_v23, %v50_v21 }
  0x25   :  { %v62_v26 = vrot.slane %v49_v24, %v54_v18 }
  0x27   :  { %v64_v27 = vadd.f32 %v62_v26, %v57_v25 }
  0x29   :  { %65 = vst [vmem:[%s118_s4] sm:$0xff] %v64_v27 }

// kernel: modified_resnet18_forward.55
= control target key start
LH: loop header
LB: loop body
LE: loop exit
PB: predicated region body
PF: predicated region fallthrough
CT: control target
= control target key end

     0   :  { %v629_v1 = vmov 0.0   ;;  %vm630_vm0 = vmmov 0   ;;  %vm328_vm1 = vcmask 523264   ;;  %s786_s1 = inlined_call_operand.vmem [shape: bf16[576,128], index: 1, kind: input, shape index: {}]   ;;  %s787_s3 = inlined_call_operand.vmem [shape: f32[8,128], index: 3, kind: output, shape index: {1}]   ;;  %s788_s0 = inlined_call_operand.vmem [shape: bf16[8,576], index: 0, kind: input, shape index: {}]   ;;  %s789_s2 = inlined_call_operand.vmem [shape: f32[8,128], index: 2, kind: output, shape index: {0}]  }
   0x1   :  { %v588_v0 = vld [vmem:[%s786_s1 + $0x40] sm:$0xff]   ;;  %459 = vst [vmem:[%s787_s3] sm:$0xff] %v629_v1  ;;  %v592_v5 = vld [vmem:[%s786_s1 + $0x48] sm:$0xff]   ;;  %v596_v9 = vld [vmem:[%s786_s1 + $0x50] sm:$0xff]  }
   0x2   :  { %v589_v2 = vld [vmem:[%s786_s1 + $0xc0] sm:$0xff]   ;;  %525 = vmatprep.subr.bf16.mxu0 %v588_v0  ;;  %v593_v6 = vld [vmem:[%s786_s1 + $0xc8] sm:$0xff]   ;;  %v597_v10 = vld [vmem:[%s786_s1 + $0xd0] sm:$0xff]  }
   0x3   :  { %v590_v3 = vld [vmem:[%s786_s1] sm:$0xff]   ;;  %547 = vmatprep.subr.bf16.mxu1 %v589_v2  ;;  %v594_v7 = vld [vmem:[%s786_s1 + $0x8] sm:$0xff]   ;;  %v598_v11 = vld [vmem:[%s786_s1 + $0x10] sm:$0xff]  }
   0x4   :  { %v591_v4 = vld [vmem:[%s786_s1 + $0x80] sm:$0xff]   ;;  %526 = vmatpush3.bf16.msra.mxu0 %v590_v3  ;;  %v595_v8 = vld [vmem:[%s786_s1 + $0x88] sm:$0xff]   ;;  %v599_v12 = vld [vmem:[%s786_s1 + $0x90] sm:$0xff]  }
   0x5   :  { %548 = vmatpush3.bf16.msra.mxu1 %v591_v4  ;;  %527 = vmatprep.subr.bf16.mxu0 %v592_v5  ;;  %v600_v13 = vld [vmem:[%s786_s1 + $0x58] sm:$0xff]   ;;  %v604_v17 = vld [vmem:[%s786_s1 + $0x60] sm:$0xff]   ;;  %v608_v21 = vld [vmem:[%s786_s1 + $0x68] sm:$0xff]  }
   0x6   :  { %549 = vmatprep.subr.bf16.mxu1 %v593_v6  ;;  %v601_v14 = vld [vmem:[%s786_s1 + $0xd8] sm:$0xff]   ;;  %v605_v18 = vld [vmem:[%s786_s1 + $0xe0] sm:$0xff]   ;;  %v609_v22 = vld [vmem:[%s786_s1 + $0xe8] sm:$0xff]  }
   0x7   :  { %v602_v15 = vld [vmem:[%s786_s1 + $0x18] sm:$0xff]   ;;  %v606_v19 = vld [vmem:[%s786_s1 + $0x20] sm:$0xff]   ;;  %v610_v23 = vld [vmem:[%s786_s1 + $0x28] sm:$0xff]  }
   0x8   :  { %528 = vmatpush3.bf16.msra.mxu0 %v594_v7  ;;  %v603_v16 = vld [vmem:[%s786_s1 + $0x98] sm:$0xff]   ;;  %v607_v20 = vld [vmem:[%s786_s1 + $0xa0] sm:$0xff]   ;;  %v611_v24 = vld [vmem:[%s786_s1 + $0xa8] sm:$0xff]  }
   0x9   :  { %550 = vmatpush3.bf16.msra.mxu1 %v595_v8  ;;  %529 = vmatprep.subr.bf16.mxu0 %v596_v9  ;;  %v612_v25 = vld [vmem:[%s786_s1 + $0x70] sm:$0xff]   ;;  %v616_v29 = vld [vmem:[%s786_s1 + $0x78] sm:$0xff]   ;;  %v20_v33 = vld [vmem:[%s788_s0] sm:$0xff] }
   0xa   :  { %551 = vmatprep.subr.bf16.mxu1 %v597_v10  ;;  %v613_v26 = vld [vmem:[%s786_s1 + $0xf0] sm:$0xff]   ;;  %v617_v30 = vld [vmem:[%s786_s1 + $0xf8] sm:$0xff]   ;;  %v483_v34 = vcombine.low %v20_v33, %v20_v33  ;;  %v484_v35 = vcombine.high %v20_v33, %v20_v33  ;;  %v21_v36 = vld [vmem:[%s788_s0 + $0x8] sm:$0xff] }
   0xb   :  { %v614_v27 = vld [vmem:[%s786_s1 + $0x30] sm:$0xff]   ;;  %v618_v31 = vld [vmem:[%s786_s1 + $0x38] sm:$0xff]   ;;  %v485_v37 = vcombine.low %v21_v36, %v21_v36  ;;  %v486_v38 = vcombine.high %v21_v36, %v21_v36  ;;  %v625_v39 = vld [vmem:[%s786_s1 + $0x100] sm:$0xff]  }
   0xc   :  { %530 = vmatpush3.bf16.msra.mxu0 %v598_v11  ;;  %v615_v28 = vld [vmem:[%s786_s1 + $0xb0] sm:$0xff]   ;;  %v619_v32 = vld [vmem:[%s786_s1 + $0xb8] sm:$0xff]   ;;  %364 = vmatprep.mubr.bf16.mxu0 %v484_v35  ;;  %v626_v40 = vld [vmem:[%s786_s1 + $0x108] sm:$0xff]  }
   0xd   :  { %552 = vmatpush3.bf16.msra.mxu1 %v599_v12  ;;  %531 = vmatprep.subr.bf16.mxu0 %v600_v13  ;;  %v627_v41 = vld [vmem:[%s786_s1 + $0x110] sm:$0xff]   ;;  %v628_v42 = vld [vmem:[%s786_s1 + $0x118] sm:$0xff]  }
   0xe   :  { %553 = vmatprep.subr.bf16.mxu1 %v601_v14  ;;  %404 = vmatprep.mubr.bf16.mxu1 %v486_v38  ;;  %v622_v43 = vld [vmem:[%s788_s0 + $0x10] ss:$0 sps:$4 sm:$0xff]  }
  0x10   :  { %532 = vmatpush3.bf16.msra.mxu0 %v602_v15 }
  0x11   :  { %554 = vmatpush3.bf16.msra.mxu1 %v603_v16  ;;  %533 = vmatprep.subr.bf16.mxu0 %v604_v17 }
  0x12   :  { %555 = vmatprep.subr.bf16.mxu1 %v605_v18 }
  0x14   :  { %534 = vmatpush3.bf16.msra.mxu0 %v606_v19 }
  0x15   :  { %556 = vmatpush3.bf16.msra.mxu1 %v607_v20  ;;  %535 = vmatprep.subr.bf16.mxu0 %v608_v21 }
  0x16   :  { %557 = vmatprep.subr.bf16.mxu1 %v609_v22 }
  0x18   :  { %536 = vmatpush3.bf16.msra.mxu0 %v610_v23 }
  0x19   :  { %558 = vmatpush3.bf16.msra.mxu1 %v611_v24  ;;  %537 = vmatprep.subr.bf16.mxu0 %v612_v25 }
  0x1a   :  { %559 = vmatprep.subr.bf16.mxu1 %v613_v26 }
  0x1c   :  { %538 = vmatpush3.bf16.msra.mxu0 %v614_v27 }
  0x1d   :  { %560 = vmatpush3.bf16.msra.mxu1 %v615_v28  ;;  %539 = vmatprep.subr.bf16.mxu0 %v616_v29 }
  0x1e   :  { %561 = vmatprep.subr.bf16.mxu1 %v617_v30 }
  0x20   :  { %540 = vmatpush3.bf16.msra.mxu0 %v618_v31 }
  0x21   :  { %562 = vmatpush3.bf16.msra.mxu1 %v619_v32  ;;  %574 = vmatprep.subr.bf16.mxu0 %v629_v1 }
  0x23   :  { %365 = vmatmul.mubr.bf16.vlgmr.msra.gmra.mrb[0].mxu0 %v483_v34 }
  0x24   :  { %405 = vmatmul.mubr.bf16.vlgmr.msra.gmra.mrb[0].mxu1 %v485_v37  ;;  %575 = vmatpush3.bf16.msra.mxu0 %v625_v39 }
  0x25   :  { %576 = vmatprep.subr.bf16.mxu0 %v629_v1  ;;  %582 = vmatprep.mubr.msk.bf16.mxu0 %vm630_vm0, %v629_v1 }
  0x28   :  { %577 = vmatpush3.bf16.msra.mxu0 %v626_v40 }
  0x29   :  { %578 = vmatprep.subr.bf16.mxu0 %v629_v1 }
  0x2c   :  { %579 = vmatpush3.bf16.msra.mxu0 %v627_v41 }
  0x2d   :  { %580 = vmatprep.subr.bf16.mxu0 %v629_v1 }
  0x30   :  { %581 = vmatpush3.bf16.msra.mxu0 %v628_v42 }
  0x33   :  { %583 = vmatmul.mubr.msk.bf16.vlgmr.msra.gmra.mrb[4].mxu0 %vm328_vm1, %v622_v43 }
  0xf6   :  { %v541_v44 = vpop.f32.mrb[0].mxu0 }
  0xf7   :  { %v563_v45 = vpop.f32.mrb[0].mxu1  ;;  %v542_v46 = vpop.f32.mrb[1].mxu0 }
  0xf8   :  { %v543_v47 = vadd.f32 %v542_v46, %v541_v44  ;;  %v564_v48 = vpop.f32.mrb[1].mxu1  ;;  %v544_v49 = vpop.f32.mrb[2].mxu0 }
  0xf9   :  { %v565_v50 = vadd.f32 %v564_v48, %v563_v45  ;;  %v545_v51 = vpop.f32.mrb[3].mxu0  ;;  %v566_v52 = vpop.f32.mrb[2].mxu1 }
  0xfa   :  { %v567_v53 = vpop.f32.mrb[3].mxu1 }
  0xfb   :  { %v407_v54 = vadd.f32 %v565_v50, %v543_v47 }
 0x106   :  { %v446_v55 = vpop.f32.mrb[4].mxu0 }
 0x107   :  { %v447_v56 = vadd.f32 %v446_v55, %v407_v54  ;;  %v584_v57 = vpop.f32.mrb[5].mxu0 }
 0x108   :  { %v449_v58 = vpop.f32.mrb[6].mxu0 }
 0x109   :  { %458 = vst [vmem:[%s789_s2] sm:$0xff] %v447_v56  ;;  %v460_v59 = vrot.slane %v447_v56, 4  ;;  %v467_v60 = vmul.f32 %v447_v56, %v447_v56  ;;  %v585_v61 = vpop.f32.mrb[7].mxu0 }
 0x10b   :  { %v461_v62 = vadd.f32 %v460_v59, %v447_v56  ;;  %v468_v63 = vrot.slane %v467_v60, 4 }
 0x10d   :  { %v462_v0 = vrot.slane %v461_v62, 2  ;;  %v469_v1 = vadd.f32 %v468_v63, %v467_v60 }
 0x10f   :  { %v463_v2 = vadd.f32 %v462_v0, %v461_v62  ;;  %v470_v3 = vrot.slane %v469_v1, 2 }
 0x111   :  { %v464_v4 = vrot.slane %v463_v2, 1  ;;  %v471_v5 = vadd.f32 %v470_v3, %v469_v1 }
 0x113   :  { %v465_v6 = vadd.f32 %v464_v4, %v463_v2  ;;  %v472_v7 = vrot.slane %v471_v5, 1 }
 0x115   :  { %466 = vst [vmem:[%s787_s3] sm:$0x1] %v465_v6  ;;  %v473_v8 = vadd.f32 %v472_v7, %v471_v5 }
 0x117   :  { %474 = vst [vmem:[%s787_s3 + $0x1] sm:$0x1] %v473_v8 }

// kernel: modified_resnet18_forward.56
= control target key start
LH: loop header
LB: loop body
LE: loop exit
PB: predicated region body
PF: predicated region fallthrough
CT: control target
= control target key end

     0   :  { %v74_v7 = vmov 1966171168   ;;  %v33_v9 = vlaneseq  ;;  %s115_s1 = inlined_call_operand.vmem [shape: f32[1,8,128], index: 1, kind: input, shape index: {}]   ;;  %s116_s2 = inlined_call_operand.vmem [shape: f32[1,128], index: 2, kind: input, shape index: {}]   ;;  %s117_s0 = inlined_call_operand.vmem [shape: f32[8,128], index: 0, kind: input, shape index: {}]   ;;  %s118_s3 = inlined_call_operand.vmem [shape: f32[1,128], index: 3, kind: input, shape index: {}]   ;;  %s119_s4 = inlined_call_operand.vmem [shape: f32[8,128], index: 4, kind: output, shape index: {}]  }
   0x1   :  { %v17_v0 = vld [vmem:[%s115_s1] sm:$0xff]  ;;  %v31_v8 = vunpack.c.l.s4 %v74_v7 }
   0x2   :  { %v19_v1 = vmul.f32 0.125, %v17_v0  ;;  %v34_v11 = vshrl.u32 %v33_v9, 7  ;;  %v26_v16 = vld [vmem:[%s116_s2] sm:$0x1] }
   0x3   :  { %v32_v10 = vunpack.c.0.s8 %v31_v8  ;;  %v47_v20 = vld [vmem:[%s118_s3] sm:$0x1] }
   0x4   :  { %v20_v2 = vmul.f32 %v19_v1, %v19_v1  ;;  %v54_v18 = vsub.s32 0, %v34_v11  ;;  %v50_v21 = vld [vmem:[%s117_s0] sm:$0xff] }
   0x5   :  { %v35_v12 = vsub.s32 %v32_v10, %v34_v11 }
   0x6   :  { %v22_v3 = vrot.slane %v20_v2, 7 }
   0x8   :  { %v24_v4 = vsub.f32 %v19_v1, %v22_v3 }
   0xa   :  { %v25_v5 = vmax.f32 %v24_v4, 0.0 }
   0xc   :  { %v27_v6 = vadd.f32 1e-05, %v25_v5 }
   0xe   :  { %72 = vrsqrt.f32 %v27_v6 }
  0x18   :  { %v73_v13 = vpop.eup %72 }
  0x19   :  { %v36_v14 = vrot.slane %v73_v13, %v35_v12 }
  0x1b   :  { %v37_v15 = vcombine.high %v36_v14, %v36_v14 }
  0x1d   :  { %v44_v17 = vrot.slane %v37_v15, %v35_v12 }
  0x1f   :  { %v46_v19 = vmul.f32 %v44_v17, %v26_v16 }
  0x21   :  { %v48_v22 = vmul.f32 %v46_v19, %v19_v1  ;;  %v55_v23 = vrot.slane %v46_v19, %v54_v18 }
  0x23   :  { %v49_v24 = vsub.f32 %v47_v20, %v48_v22  ;;  %v57_v25 = vmul.f32 %v55_v23, %v50_v21 }
  0x25   :  { %v62_v26 = vrot.slane %v49_v24, %v54_v18 }
  0x27   :  { %v64_v27 = vadd.f32 %v62_v26, %v57_v25 }
  0x29   :  { %v65_v28 = vmax.f32 %v64_v27, 0.0 }
  0x2b   :  { %66 = vst [vmem:[%s119_s4] sm:$0xff] %v65_v28 }

// kernel: modified_resnet18_forward.58
= control target key start
LH: loop header
LB: loop body
LE: loop exit
PB: predicated region body
PF: predicated region fallthrough
CT: control target
= control target key end

     0   :  { %v79_v7 = vmov 1966171168   ;;  %v36_v9 = vlaneseq  ;;  %s128_s1 = inlined_call_operand.vmem [shape: f32[1,8,128], index: 1, kind: input, shape index: {}]   ;;  %s129_s2 = inlined_call_operand.vmem [shape: f32[1,128], index: 2, kind: input, shape index: {}]   ;;  %s130_s0 = inlined_call_operand.vmem [shape: f32[8,128], index: 0, kind: input, shape index: {}]   ;;  %s131_s3 = inlined_call_operand.vmem [shape: f32[1,128], index: 3, kind: input, shape index: {}]   ;;  %s132_s4 = inlined_call_operand.vmem [shape: f32[8,128], index: 4, kind: input, shape index: {}]   ;;  %s133_s5 = inlined_call_operand.vmem [shape: f32[8,128], index: 5, kind: output, shape index: {}]  }
   0x1   :  { %v20_v0 = vld [vmem:[%s128_s1] sm:$0xff]  ;;  %v34_v8 = vunpack.c.l.s4 %v79_v7 }
   0x2   :  { %v22_v1 = vmul.f32 0.125, %v20_v0  ;;  %v37_v11 = vshrl.u32 %v36_v9, 7  ;;  %v29_v16 = vld [vmem:[%s129_s2] sm:$0x1] }
   0x3   :  { %v35_v10 = vunpack.c.0.s8 %v34_v8  ;;  %v50_v20 = vld [vmem:[%s131_s3] sm:$0x1] }
   0x4   :  { %v23_v2 = vmul.f32 %v22_v1, %v22_v1  ;;  %v57_v18 = vsub.s32 0, %v37_v11  ;;  %v53_v21 = vld [vmem:[%s130_s0] sm:$0xff] }
   0x5   :  { %v38_v12 = vsub.s32 %v35_v10, %v37_v11  ;;  %v68_v27 = vld [vmem:[%s132_s4] sm:$0xff] }
   0x6   :  { %v25_v3 = vrot.slane %v23_v2, 7 }
   0x8   :  { %v27_v4 = vsub.f32 %v22_v1, %v25_v3 }
   0xa   :  { %v28_v5 = vmax.f32 %v27_v4, 0.0 }
   0xc   :  { %v30_v6 = vadd.f32 1e-05, %v28_v5 }
   0xe   :  { %77 = vrsqrt.f32 %v30_v6 }
  0x18   :  { %v78_v13 = vpop.eup %77 }
  0x19   :  { %v39_v14 = vrot.slane %v78_v13, %v38_v12 }
  0x1b   :  { %v40_v15 = vcombine.high %v39_v14, %v39_v14 }
  0x1d   :  { %v47_v17 = vrot.slane %v40_v15, %v38_v12 }
  0x1f   :  { %v49_v19 = vmul.f32 %v47_v17, %v29_v16 }
  0x21   :  { %v51_v22 = vmul.f32 %v49_v19, %v22_v1  ;;  %v58_v23 = vrot.slane %v49_v19, %v57_v18 }
  0x23   :  { %v52_v24 = vsub.f32 %v50_v20, %v51_v22  ;;  %v60_v25 = vmul.f32 %v58_v23, %v53_v21 }
  0x25   :  { %v65_v26 = vrot.slane %v52_v24, %v57_v18 }
  0x27   :  { %v67_v28 = vadd.f32 %v65_v26, %v60_v25 }
  0x29   :  { %v69_v29 = vadd.f32 %v68_v27, %v67_v28 }
  0x2b   :  { %v70_v30 = vmax.f32 %v69_v29, 0.0 }
  0x2d   :  { %71 = vst [vmem:[%s133_s5] sm:$0xff] %v70_v30 }

// kernel: modified_resnet18_forward.57
= control target key start
LH: loop header
LB: loop body
LE: loop exit
PB: predicated region body
PF: predicated region fallthrough
CT: control target
= control target key end

     0   :  { %vm1146_vm0 = vmmov 0   ;;  %s1410_s1 = inlined_call_operand.vmem [shape: bf16[1152,128], index: 1, kind: input, shape index: {}]   ;;  %s1411_s0 = inlined_call_operand.vmem [shape: bf16[8,1152], index: 0, kind: input, shape index: {}]   ;;  %s1412_s3 = inlined_call_operand.vmem [shape: f32[8,128], index: 3, kind: output, shape index: {1}]   ;;  %s1413_s2 = inlined_call_operand.vmem [shape: f32[8,128], index: 2, kind: output, shape index: {0}]  }
   0x1   :  { %v1064_v0 = vld [vmem:[%s1410_s1 + $0x40] sm:$0xff]   ;;  %v1068_v4 = vld [vmem:[%s1410_s1 + $0x48] sm:$0xff]   ;;  %v1072_v8 = vld [vmem:[%s1410_s1 + $0x50] sm:$0xff]  }
   0x2   :  { %v1065_v1 = vld [vmem:[%s1410_s1 + $0xc0] sm:$0xff]   ;;  %945 = vmatprep.subr.bf16.mxu0 %v1064_v0  ;;  %v1069_v5 = vld [vmem:[%s1410_s1 + $0xc8] sm:$0xff]   ;;  %v1073_v9 = vld [vmem:[%s1410_s1 + $0xd0] sm:$0xff]  }
   0x3   :  { %v1066_v2 = vld [vmem:[%s1410_s1] sm:$0xff]   ;;  %967 = vmatprep.subr.bf16.mxu1 %v1065_v1  ;;  %v1070_v6 = vld [vmem:[%s1410_s1 + $0x8] sm:$0xff]   ;;  %v1074_v10 = vld [vmem:[%s1410_s1 + $0x10] sm:$0xff]  }
   0x4   :  { %v1067_v3 = vld [vmem:[%s1410_s1 + $0x80] sm:$0xff]   ;;  %946 = vmatpush3.bf16.msra.mxu0 %v1066_v2  ;;  %v1071_v7 = vld [vmem:[%s1410_s1 + $0x88] sm:$0xff]   ;;  %v1075_v11 = vld [vmem:[%s1410_s1 + $0x90] sm:$0xff]  }
   0x5   :  { %968 = vmatpush3.bf16.msra.mxu1 %v1067_v3  ;;  %947 = vmatprep.subr.bf16.mxu0 %v1068_v4  ;;  %v1076_v12 = vld [vmem:[%s1410_s1 + $0x58] sm:$0xff]   ;;  %v1080_v16 = vld [vmem:[%s1410_s1 + $0x60] sm:$0xff]   ;;  %v1084_v20 = vld [vmem:[%s1410_s1 + $0x68] sm:$0xff]  }
   0x6   :  { %969 = vmatprep.subr.bf16.mxu1 %v1069_v5  ;;  %v1077_v13 = vld [vmem:[%s1410_s1 + $0xd8] sm:$0xff]   ;;  %v1081_v17 = vld [vmem:[%s1410_s1 + $0xe0] sm:$0xff]   ;;  %v1085_v21 = vld [vmem:[%s1410_s1 + $0xe8] sm:$0xff]  }
   0x7   :  { %v1078_v14 = vld [vmem:[%s1410_s1 + $0x18] sm:$0xff]   ;;  %v1082_v18 = vld [vmem:[%s1410_s1 + $0x20] sm:$0xff]   ;;  %v1086_v22 = vld [vmem:[%s1410_s1 + $0x28] sm:$0xff]  }
   0x8   :  { %948 = vmatpush3.bf16.msra.mxu0 %v1070_v6  ;;  %v1079_v15 = vld [vmem:[%s1410_s1 + $0x98] sm:$0xff]   ;;  %v1083_v19 = vld [vmem:[%s1410_s1 + $0xa0] sm:$0xff]   ;;  %v1087_v23 = vld [vmem:[%s1410_s1 + $0xa8] sm:$0xff]  }
   0x9   :  { %970 = vmatpush3.bf16.msra.mxu1 %v1071_v7  ;;  %949 = vmatprep.subr.bf16.mxu0 %v1072_v8  ;;  %v1088_v24 = vld [vmem:[%s1410_s1 + $0x70] sm:$0xff]   ;;  %v1092_v28 = vld [vmem:[%s1410_s1 + $0x78] sm:$0xff]   ;;  %v20_v32 = vld [vmem:[%s1411_s0] sm:$0xff] }
   0xa   :  { %971 = vmatprep.subr.bf16.mxu1 %v1073_v9  ;;  %v1089_v25 = vld [vmem:[%s1410_s1 + $0xf0] sm:$0xff]   ;;  %v1093_v29 = vld [vmem:[%s1410_s1 + $0xf8] sm:$0xff]   ;;  %v21_v33 = vld [vmem:[%s1411_s0 + $0x8] sm:$0xff]  ;;  %v864_v34 = vcombine.low %v20_v32, %v20_v32  ;;  %v865_v35 = vcombine.high %v20_v32, %v20_v32 }
   0xb   :  { %v1090_v26 = vld [vmem:[%s1410_s1 + $0x30] sm:$0xff]   ;;  %v1094_v30 = vld [vmem:[%s1410_s1 + $0x38] sm:$0xff]   ;;  %v866_v36 = vcombine.low %v21_v33, %v21_v33  ;;  %v867_v37 = vcombine.high %v21_v33, %v21_v33  ;;  %v1100_v38 = vld [vmem:[%s1410_s1 + $0x140] sm:$0xff]  }
   0xc   :  { %950 = vmatpush3.bf16.msra.mxu0 %v1074_v10  ;;  %v1091_v27 = vld [vmem:[%s1410_s1 + $0xb0] sm:$0xff]   ;;  %v1095_v31 = vld [vmem:[%s1410_s1 + $0xb8] sm:$0xff]   ;;  %v1101_v39 = vld [vmem:[%s1410_s1 + $0x100] sm:$0xff]   ;;  %665 = vmatprep.mubr.bf16.mxu0 %v865_v35 }
   0xd   :  { %972 = vmatpush3.bf16.msra.mxu1 %v1075_v11  ;;  %951 = vmatprep.subr.bf16.mxu0 %v1076_v12  ;;  %v1102_v40 = vld [vmem:[%s1410_s1 + $0x1c0] sm:$0xff]   ;;  %v1104_v42 = vld [vmem:[%s1410_s1 + $0x148] sm:$0xff]   ;;  %v1108_v46 = vld [vmem:[%s1410_s1 + $0x150] sm:$0xff]  }
   0xe   :  { %973 = vmatprep.subr.bf16.mxu1 %v1077_v13  ;;  %705 = vmatprep.mubr.bf16.mxu1 %v867_v37  ;;  %v1103_v41 = vld [vmem:[%s1410_s1 + $0x180] sm:$0xff]   ;;  %v1105_v43 = vld [vmem:[%s1410_s1 + $0x108] sm:$0xff]   ;;  %v1109_v47 = vld [vmem:[%s1410_s1 + $0x110] sm:$0xff]   ;;  %v1145_v13 = vmov 0.0  }
   0xf   :  { %v1106_v44 = vld [vmem:[%s1410_s1 + $0x1c8] sm:$0xff]   ;;  %v1110_v48 = vld [vmem:[%s1410_s1 + $0x1d0] sm:$0xff]   ;;  %v1112_v50 = vld [vmem:[%s1410_s1 + $0x158] sm:$0xff]   ;;  %840 = vst [vmem:[%s1412_s3] sm:$0xff] %v1145_v13 }
  0x10   :  { %952 = vmatpush3.bf16.msra.mxu0 %v1078_v14  ;;  %v1107_v45 = vld [vmem:[%s1410_s1 + $0x188] sm:$0xff]   ;;  %v1111_v49 = vld [vmem:[%s1410_s1 + $0x190] sm:$0xff]   ;;  %v1113_v51 = vld [vmem:[%s1410_s1 + $0x118] sm:$0xff]  }
  0x11   :  { %974 = vmatpush3.bf16.msra.mxu1 %v1079_v15  ;;  %953 = vmatprep.subr.bf16.mxu0 %v1080_v16  ;;  %v1114_v52 = vld [vmem:[%s1410_s1 + $0x1d8] sm:$0xff]   ;;  %v1116_v54 = vld [vmem:[%s1410_s1 + $0x160] sm:$0xff]   ;;  %v1120_v58 = vld [vmem:[%s1410_s1 + $0x168] sm:$0xff]  }
  0x12   :  { %975 = vmatprep.subr.bf16.mxu1 %v1081_v17  ;;  %v1115_v53 = vld [vmem:[%s1410_s1 + $0x198] sm:$0xff]   ;;  %v1117_v55 = vld [vmem:[%s1410_s1 + $0x120] sm:$0xff]   ;;  %v1121_v59 = vld [vmem:[%s1410_s1 + $0x128] sm:$0xff]  }
  0x13   :  { %v1118_v56 = vld [vmem:[%s1410_s1 + $0x1e0] sm:$0xff]   ;;  %v1122_v60 = vld [vmem:[%s1410_s1 + $0x1e8] sm:$0xff]   ;;  %v1124_v62 = vld [vmem:[%s1410_s1 + $0x170] sm:$0xff]  }
  0x14   :  { %954 = vmatpush3.bf16.msra.mxu0 %v1082_v18  ;;  %v1119_v57 = vld [vmem:[%s1410_s1 + $0x1a0] sm:$0xff]   ;;  %v1123_v61 = vld [vmem:[%s1410_s1 + $0x1a8] sm:$0xff]   ;;  %v1125_v63 = vld [vmem:[%s1410_s1 + $0x130] sm:$0xff]  }
  0x15   :  { %976 = vmatpush3.bf16.msra.mxu1 %v1083_v19  ;;  %955 = vmatprep.subr.bf16.mxu0 %v1084_v20  ;;  %v1126_v0 = vld [vmem:[%s1410_s1 + $0x1f0] sm:$0xff]   ;;  %v1128_v2 = vld [vmem:[%s1410_s1 + $0x178] sm:$0xff]   ;;  %v1136_v12 = vld [vmem:[%s1410_s1 + $0x200] sm:$0xff]  }
  0x16   :  { %977 = vmatprep.subr.bf16.mxu1 %v1085_v21  ;;  %v1127_v1 = vld [vmem:[%s1410_s1 + $0x1b0] sm:$0xff]   ;;  %v1129_v3 = vld [vmem:[%s1410_s1 + $0x138] sm:$0xff]   ;;  %v1137_v14 = vld [vmem:[%s1410_s1 + $0x208] sm:$0xff]  }
  0x17   :  { %v1130_v4 = vld [vmem:[%s1410_s1 + $0x1f8] sm:$0xff]   ;;  %v22_v5 = vld [vmem:[%s1411_s0 + $0x10] sm:$0xff]  ;;  %v1140_v17 = vld [vmem:[%s1410_s1 + $0x220] sm:$0xff]  }
  0x18   :  { %956 = vmatpush3.bf16.msra.mxu0 %v1086_v22  ;;  %v869_v6 = vcombine.high %v22_v5, %v22_v5  ;;  %v1133_v7 = vld [vmem:[%s1410_s1 + $0x1b8] sm:$0xff]   ;;  %v868_v8 = vcombine.low %v22_v5, %v22_v5  ;;  %v1138_v15 = vld [vmem:[%s1410_s1 + $0x210] sm:$0xff]   ;;  %v1141_v18 = vld [vmem:[%s1410_s1 + $0x228] sm:$0xff]  }
  0x19   :  { %978 = vmatpush3.bf16.msra.mxu1 %v1087_v23  ;;  %957 = vmatprep.subr.bf16.mxu0 %v1088_v24  ;;  %v23_v9 = vld [vmem:[%s1411_s0 + $0x18] sm:$0xff]  ;;  %v1142_v19 = vld [vmem:[%s1410_s1 + $0x230] sm:$0xff]   ;;  %v1144_v21 = vld [vmem:[%s1411_s0 + $0x20] ss:$0 sps:$4 sm:$0xff]  }
  0x1a   :  { %979 = vmatprep.subr.bf16.mxu1 %v1089_v25  ;;  %v870_v10 = vcombine.low %v23_v9, %v23_v9  ;;  %v871_v11 = vcombine.high %v23_v9, %v23_v9  ;;  %v1139_v16 = vld [vmem:[%s1410_s1 + $0x218] sm:$0xff]  }
  0x1b   :  { %v1143_v20 = vld [vmem:[%s1410_s1 + $0x238] sm:$0xff]  }
  0x1c   :  { %958 = vmatpush3.bf16.msra.mxu0 %v1090_v26 }
  0x1d   :  { %980 = vmatpush3.bf16.msra.mxu1 %v1091_v27  ;;  %959 = vmatprep.subr.bf16.mxu0 %v1092_v28 }
  0x1e   :  { %981 = vmatprep.subr.bf16.mxu1 %v1093_v29 }
  0x20   :  { %960 = vmatpush3.bf16.msra.mxu0 %v1094_v30 }
  0x21   :  { %982 = vmatpush3.bf16.msra.mxu1 %v1095_v31  ;;  %989 = vmatprep.subr.bf16.mxu0 %v1100_v38 }
  0x22   :  { %1011 = vmatprep.subr.bf16.mxu1 %v1102_v40 }
  0x23   :  { %666 = vmatmul.mubr.bf16.vlgmr.msra.gmra.mrb[0].mxu0 %v864_v34 }
  0x24   :  { %706 = vmatmul.mubr.bf16.vlgmr.msra.gmra.mrb[0].mxu1 %v866_v36  ;;  %990 = vmatpush3.bf16.msra.mxu0 %v1101_v39 }
  0x25   :  { %1012 = vmatpush3.bf16.msra.mxu1 %v1103_v41  ;;  %991 = vmatprep.subr.bf16.mxu0 %v1104_v42 }
  0x26   :  { %1013 = vmatprep.subr.bf16.mxu1 %v1106_v44  ;;  %745 = vmatprep.mubr.bf16.mxu0 %v869_v6 }
  0x27   :  { %785 = vmatprep.mubr.bf16.mxu1 %v871_v11 }
  0x28   :  { %992 = vmatpush3.bf16.msra.mxu0 %v1105_v43 }
  0x29   :  { %1014 = vmatpush3.bf16.msra.mxu1 %v1107_v45  ;;  %993 = vmatprep.subr.bf16.mxu0 %v1108_v46 }
  0x2a   :  { %1015 = vmatprep.subr.bf16.mxu1 %v1110_v48 }
  0x2c   :  { %994 = vmatpush3.bf16.msra.mxu0 %v1109_v47 }
  0x2d   :  { %1016 = vmatpush3.bf16.msra.mxu1 %v1111_v49  ;;  %995 = vmatprep.subr.bf16.mxu0 %v1112_v50 }
  0x2e   :  { %1017 = vmatprep.subr.bf16.mxu1 %v1114_v52 }
  0x30   :  { %996 = vmatpush3.bf16.msra.mxu0 %v1113_v51 }
  0x31   :  { %1018 = vmatpush3.bf16.msra.mxu1 %v1115_v53  ;;  %997 = vmatprep.subr.bf16.mxu0 %v1116_v54 }
  0x32   :  { %1019 = vmatprep.subr.bf16.mxu1 %v1118_v56 }
  0x34   :  { %998 = vmatpush3.bf16.msra.mxu0 %v1117_v55 }
  0x35   :  { %1020 = vmatpush3.bf16.msra.mxu1 %v1119_v57  ;;  %999 = vmatprep.subr.bf16.mxu0 %v1120_v58 }
  0x36   :  { %1021 = vmatprep.subr.bf16.mxu1 %v1122_v60 }
  0x38   :  { %1000 = vmatpush3.bf16.msra.mxu0 %v1121_v59 }
  0x39   :  { %1022 = vmatpush3.bf16.msra.mxu1 %v1123_v61  ;;  %1001 = vmatprep.subr.bf16.mxu0 %v1124_v62 }
  0x3a   :  { %1023 = vmatprep.subr.bf16.mxu1 %v1126_v0 }
  0x3c   :  { %1002 = vmatpush3.bf16.msra.mxu0 %v1125_v63 }
  0x3d   :  { %1024 = vmatpush3.bf16.msra.mxu1 %v1127_v1  ;;  %1003 = vmatprep.subr.bf16.mxu0 %v1128_v2 }
  0x3e   :  { %1025 = vmatprep.subr.bf16.mxu1 %v1130_v4 }
  0x40   :  { %1004 = vmatpush3.bf16.msra.mxu0 %v1129_v3 }
  0x41   :  { %1026 = vmatpush3.bf16.msra.mxu1 %v1133_v7  ;;  %1042 = vmatprep.subr.bf16.mxu0 %v1145_v13 }
  0x43   :  { %746 = vmatmul.mubr.bf16.vlgmr.msra.gmra.mrb[4].mxu0 %v868_v8 }
  0x44   :  { %1043 = vmatpush3.bf16.msra.mxu0 %v1136_v12  ;;  %786 = vmatmul.mubr.bf16.vlgmr.msra.gmra.mrb[4].mxu1 %v870_v10 }
  0x45   :  { %1044 = vmatprep.subr.bf16.mxu0 %v1145_v13  ;;  %1058 = vmatprep.mubr.msk.bf16.mxu0 %vm1146_vm0, %v1145_v13 }
  0x48   :  { %1045 = vmatpush3.bf16.msra.mxu0 %v1137_v14 }
  0x49   :  { %1046 = vmatprep.subr.bf16.mxu0 %v1145_v13 }
  0x4c   :  { %1047 = vmatpush3.bf16.msra.mxu0 %v1138_v15 }
  0x4d   :  { %1048 = vmatprep.subr.bf16.mxu0 %v1145_v13 }
  0x50   :  { %1049 = vmatpush3.bf16.msra.mxu0 %v1139_v16 }
  0x51   :  { %1050 = vmatprep.subr.bf16.mxu0 %v1145_v13 }
  0x54   :  { %1051 = vmatpush3.bf16.msra.mxu0 %v1140_v17 }
  0x55   :  { %1052 = vmatprep.subr.bf16.mxu0 %v1145_v13 }
  0x58   :  { %1053 = vmatpush3.bf16.msra.mxu0 %v1141_v18 }
  0x59   :  { %1054 = vmatprep.subr.bf16.mxu0 %v1145_v13 }
  0x5c   :  { %1055 = vmatpush3.bf16.msra.mxu0 %v1142_v19 }
  0x5d   :  { %1056 = vmatprep.subr.bf16.mxu0 %v1145_v13 }
  0x60   :  { %1057 = vmatpush3.bf16.msra.mxu0 %v1143_v20 }
  0x63   :  { %1059 = vmatmul.mubr.bf16.vlgmr.msra.gmra.mrb[8].mxu0 %v1144_v21 }
  0xf6   :  { %v961_v22 = vpop.f32.mrb[0].mxu0 }
  0xf7   :  { %v983_v23 = vpop.f32.mrb[0].mxu1  ;;  %v962_v24 = vpop.f32.mrb[1].mxu0 }
  0xf8   :  { %v984_v25 = vpop.f32.mrb[1].mxu1  ;;  %v963_v26 = vadd.f32 %v962_v24, %v961_v22  ;;  %v964_v28 = vpop.f32.mrb[2].mxu0 }
  0xf9   :  { %v985_v27 = vadd.f32 %v984_v25, %v983_v23  ;;  %v986_v29 = vpop.f32.mrb[2].mxu1  ;;  %v965_v30 = vpop.f32.mrb[3].mxu0 }
  0xfa   :  { %v987_v31 = vpop.f32.mrb[3].mxu1 }
  0xfb   :  { %v708_v32 = vadd.f32 %v985_v27, %v963_v26 }
 0x116   :  { %v1005_v33 = vpop.f32.mrb[4].mxu0 }
 0x117   :  { %v1006_v34 = vpop.f32.mrb[5].mxu0  ;;  %v1027_v35 = vpop.f32.mrb[4].mxu1 }
 0x118   :  { %v1007_v36 = vadd.f32 %v1006_v34, %v1005_v33  ;;  %v1008_v37 = vpop.f32.mrb[6].mxu0  ;;  %v1028_v38 = vpop.f32.mrb[5].mxu1 }
 0x119   :  { %v1009_v39 = vpop.f32.mrb[7].mxu0  ;;  %v1029_v40 = vadd.f32 %v1028_v38, %v1027_v35  ;;  %v1030_v41 = vpop.f32.mrb[6].mxu1 }
 0x11a   :  { %v748_v42 = vadd.f32 %v1007_v36, %v708_v32  ;;  %v1031_v43 = vpop.f32.mrb[7].mxu1 }
 0x11c   :  { %v788_v44 = vadd.f32 %v1029_v40, %v748_v42 }
 0x136   :  { %v827_v45 = vpop.f32.mrb[8].mxu0 }
 0x137   :  { %v828_v46 = vadd.f32 %v827_v45, %v788_v44  ;;  %v1060_v47 = vpop.f32.mrb[9].mxu0 }
 0x138   :  { %v830_v48 = vpop.f32.mrb[10].mxu0 }
 0x139   :  { %839 = vst [vmem:[%s1413_s2] sm:$0xff] %v828_v46  ;;  %v841_v49 = vrot.slane %v828_v46, 4  ;;  %v848_v50 = vmul.f32 %v828_v46, %v828_v46  ;;  %v1061_v51 = vpop.f32.mrb[11].mxu0 }
 0x13b   :  { %v842_v52 = vadd.f32 %v841_v49, %v828_v46  ;;  %v849_v53 = vrot.slane %v848_v50, 4 }
 0x13d   :  { %v843_v54 = vrot.slane %v842_v52, 2  ;;  %v850_v55 = vadd.f32 %v849_v53, %v848_v50 }
 0x13f   :  { %v844_v56 = vadd.f32 %v843_v54, %v842_v52  ;;  %v851_v57 = vrot.slane %v850_v55, 2 }
 0x141   :  { %v845_v58 = vrot.slane %v844_v56, 1  ;;  %v852_v59 = vadd.f32 %v851_v57, %v850_v55 }
 0x143   :  { %v846_v60 = vadd.f32 %v845_v58, %v844_v56  ;;  %v853_v61 = vrot.slane %v852_v59, 1 }
 0x145   :  { %847 = vst [vmem:[%s1412_s3] sm:$0x1] %v846_v60  ;;  %v854_v62 = vadd.f32 %v853_v61, %v852_v59 }
 0x147   :  { %855 = vst [vmem:[%s1412_s3 + $0x1] sm:$0x1] %v854_v62 }

// kernel: modified_resnet18_forward.63
= control target key start
LH: loop header
LB: loop body
LE: loop exit
PB: predicated region body
PF: predicated region fallthrough
CT: control target
= control target key end

     0   :  { %v296_v1 = vmov 0   ;;  %v297_v18 = vmov 0.0   ;;  %v298_v30 = vmov 1966171168   ;;  %v191_v32 = vlaneseq  ;;  %s388_s1 = inlined_call_operand.vmem [shape: bf16[128,256], index: 1, kind: input, shape index: {}]   ;;  %s389_s0 = inlined_call_operand.vmem [shape: bf16[8,128], index: 0, kind: input, shape index: {}]   ;;  %s390_s3 = inlined_call_operand.vmem [shape: f32[8,256], index: 3, kind: output, shape index: {1}]   ;;  %s391_s2 = inlined_call_operand.vmem [shape: f32[8,256], index: 2, kind: output, shape index: {0}]  }
   0x1   :  { %v272_v0 = vld [vmem:[%s388_s1 + $0x4] ss:$8 sps:$4 sm:$0xff]   ;;  %151 = vmatprep.mubr.bf16.mxu0 %v296_v1  ;;  %v274_v2 = vld [vmem:[%s388_s1] ss:$8 sps:$4 sm:$0xff]   ;;  %v275_v3 = vld [vmem:[%s388_s1 + $0x14] ss:$8 sps:$4 sm:$0xff]   ;;  %171 = vst [vmem:[%s390_s3] sm:$0xff] %v297_v18  ;;  %v189_v31 = vunpack.c.l.s4 %v298_v30 }
   0x2   :  { %119 = vmatprep.subr.bf16.mxu0 %v272_v0  ;;  %v277_v4 = vld [vmem:[%s388_s1 + $0x10] ss:$8 sps:$4 sm:$0xff]   ;;  %v278_v5 = vld [vmem:[%s388_s1 + $0x24] ss:$8 sps:$4 sm:$0xff]   ;;  %v280_v6 = vld [vmem:[%s388_s1 + $0x20] ss:$8 sps:$4 sm:$0xff]  }
   0x3   :  { %120 = vmatpush1.bf16.msra.mxu0 %v274_v2  ;;  %v281_v7 = vld [vmem:[%s388_s1 + $0x34] ss:$8 sps:$4 sm:$0xff]   ;;  %v283_v8 = vld [vmem:[%s388_s1 + $0x30] ss:$8 sps:$4 sm:$0xff]   ;;  %v284_v9 = vld [vmem:[%s388_s1 + $0x44] ss:$8 sps:$4 sm:$0xff]   ;;  %v190_v41 = vunpack.c.0.s8 %v189_v31 }
   0x4   :  { %121 = vmatprep.subr.bf16.mxu0 %v275_v3  ;;  %v286_v10 = vld [vmem:[%s388_s1 + $0x40] ss:$8 sps:$4 sm:$0xff]   ;;  %v287_v11 = vld [vmem:[%s388_s1 + $0x54] ss:$8 sps:$4 sm:$0xff]   ;;  %v289_v12 = vld [vmem:[%s388_s1 + $0x50] ss:$8 sps:$4 sm:$0xff]  }
   0x5   :  { %v290_v13 = vld [vmem:[%s388_s1 + $0x64] ss:$8 sps:$4 sm:$0xff]   ;;  %v292_v14 = vld [vmem:[%s388_s1 + $0x60] ss:$8 sps:$4 sm:$0xff]   ;;  %v293_v15 = vld [vmem:[%s388_s1 + $0x74] ss:$8 sps:$4 sm:$0xff]  }
   0x6   :  { %v295_v16 = vld [vmem:[%s388_s1 + $0x70] ss:$8 sps:$4 sm:$0xff]   ;;  %v22_v17 = vld [vmem:[%s389_s0] sm:$0xf]  ;;  %172 = vst [vmem:[%s390_s3 + $0x8] sm:$0xff] %v297_v18  ;;  %v192_v42 = vshrl.u32 %v191_v32, 7 }
   0x7   :  { %122 = vmatpush1.bf16.msra.mxu0 %v277_v4  ;;  %vm205_vm0 = vcmp.lt.s32.totalorder %v191_v32, 256 }
   0x8   :  { %123 = vmatprep.subr.bf16.mxu0 %v278_v5  ;;  %v193_v51 = vsub.s32 %v190_v41, %v192_v42 }
   0xb   :  { %124 = vmatpush1.bf16.msra.mxu0 %v280_v6 }
   0xc   :  { %125 = vmatprep.subr.bf16.mxu0 %v281_v7 }
   0xf   :  { %126 = vmatpush1.bf16.msra.mxu0 %v283_v8 }
  0x10   :  { %127 = vmatprep.subr.bf16.mxu0 %v284_v9 }
  0x13   :  { %128 = vmatpush1.bf16.msra.mxu0 %v286_v10 }
  0x14   :  { %129 = vmatprep.subr.bf16.mxu0 %v287_v11 }
  0x17   :  { %130 = vmatpush1.bf16.msra.mxu0 %v289_v12 }
  0x18   :  { %131 = vmatprep.subr.bf16.mxu0 %v290_v13 }
  0x1b   :  { %132 = vmatpush1.bf16.msra.mxu0 %v292_v14 }
  0x1c   :  { %133 = vmatprep.subr.bf16.mxu0 %v293_v15 }
  0x1f   :  { %134 = vmatpush1.bf16.msra.mxu0 %v295_v16 }
  0x22   :  { %152 = vmatmul.mubr.bf16.vlgmr.msra.gmra.mrb[0].mxu0 %v22_v17 }
  0xf5   :  { %v153_v19 = vpop.f32.mrb[0].mxu0 }
  0xf6   :  { %169 = vst [vmem:[%s391_s2] sm:$0xff] %v153_v19  ;;  %v173_v20 = vrot.slane %v153_v19, 4  ;;  %v209_v21 = vmul.f32 %v153_v19, %v153_v19  ;;  %v155_v22 = vpop.f32.mrb[1].mxu0 }
  0xf7   :  { %170 = vst [vmem:[%s391_s2 + $0x8] sm:$0xff] %v155_v22  ;;  %v179_v23 = vrot.slane %v155_v22, 4  ;;  %v210_v24 = vmul.f32 %v155_v22, %v155_v22  ;;  %v157_v25 = vpop.f32.mrb[2].mxu0 }
  0xf8   :  { %v174_v26 = vadd.f32 %v173_v20, %v153_v19  ;;  %v211_v27 = vrot.slane %v209_v21, 4  ;;  %v158_v28 = vpop.f32.mrb[3].mxu0 }
  0xf9   :  { %v180_v29 = vadd.f32 %v179_v23, %v155_v22  ;;  %v217_v33 = vrot.slane %v210_v24, 4 }
  0xfa   :  { %v175_v34 = vrot.slane %v174_v26, 2  ;;  %v212_v35 = vadd.f32 %v211_v27, %v209_v21 }
  0xfb   :  { %v181_v36 = vrot.slane %v180_v29, 2  ;;  %v218_v37 = vadd.f32 %v217_v33, %v210_v24 }
  0xfc   :  { %v176_v38 = vadd.f32 %v175_v34, %v174_v26  ;;  %v213_v39 = vrot.slane %v212_v35, 2 }
  0xfd   :  { %v182_v40 = vadd.f32 %v181_v36, %v180_v29  ;;  %v219_v43 = vrot.slane %v218_v37, 2 }
  0xfe   :  { %v177_v44 = vrot.slane %v176_v38, 1  ;;  %v214_v45 = vadd.f32 %v213_v39, %v212_v35 }
  0xff   :  { %v183_v46 = vrot.slane %v182_v40, 1  ;;  %v220_v47 = vadd.f32 %v219_v43, %v218_v37 }
 0x100   :  { %v178_v48 = vadd.f32 %v177_v44, %v176_v38  ;;  %v215_v49 = vrot.slane %v214_v45, 1 }
 0x101   :  { %v184_v50 = vadd.f32 %v183_v46, %v182_v40  ;;  %v221_v52 = vrot.slane %v220_v47, 1 }
 0x102   :  { %v216_v53 = vadd.f32 %v215_v49, %v214_v45 }
 0x103   :  { %v187_v54 = vcombine.low %v178_v48, %v184_v50  ;;  %v222_v55 = vadd.f32 %v221_v52, %v220_v47 }
 0x105   :  { %v194_v56 = vrot.slane %v187_v54, %v193_v51  ;;  %v225_v57 = vcombine.low %v216_v53, %v222_v55 }
 0x107   :  { %v201_v58 = vrot.slane %v194_v56, %v193_v51  ;;  %v232_v59 = vrot.slane %v225_v57, %v193_v51 }
 0x109   :  { %207 = vst.msk [vmem:[%s390_s3] ss:$8 sm:$0x3] %vm205_vm0, %v201_v58  ;;  %v239_v60 = vrot.slane %v232_v59, %v193_v51 }
 0x10b   :  { %268 = vst.msk [vmem:[%s390_s3 + $0x1] ss:$8 sm:$0x3] %vm205_vm0, %v239_v60 }

// kernel: modified_resnet18_forward.64
= control target key start
LH: loop header
LB: loop body
LE: loop exit
PB: predicated region body
PF: predicated region fallthrough
CT: control target
= control target key end

     0   :  { %v121_v14 = vmov 1966171168   ;;  %v46_v16 = vlaneseq  ;;  %s171_s1 = inlined_call_operand.vmem [shape: f32[1,8,256], index: 1, kind: input, shape index: {}]   ;;  %s172_s2 = inlined_call_operand.vmem [shape: f32[1,256], index: 2, kind: input, shape index: {}]   ;;  %s173_s0 = inlined_call_operand.vmem [shape: f32[8,256], index: 0, kind: input, shape index: {}]   ;;  %s174_s3 = inlined_call_operand.vmem [shape: f32[1,256], index: 3, kind: input, shape index: {}]   ;;  %s175_s4 = inlined_call_operand.vmem [shape: f32[8,256], index: 4, kind: output, shape index: {}]  }
   0x1   :  { %v17_v0 = vld [vmem:[%s171_s1] sm:$0xff]  ;;  %v18_v1 = vld [vmem:[%s171_s1 + $0x8] sm:$0xff]  ;;  %v44_v15 = vunpack.c.l.s4 %v121_v14 }
   0x2   :  { %v21_v2 = vmul.f32 0.5, %v17_v0  ;;  %v22_v3 = vmul.f32 0.5, %v18_v1  ;;  %v47_v18 = vshrl.u32 %v46_v16, 7  ;;  %v35_v25 = vld [vmem:[%s172_s2] sm:$0x3]  ;;  %v94_v38 = vld [vmem:[%s173_s0 + $0x8] sm:$0xff] }
   0x3   :  { %v45_v17 = vunpack.c.0.s8 %v44_v15  ;;  %v60_v36 = vld [vmem:[%s174_s3] sm:$0x3] }
   0x4   :  { %v23_v4 = vmul.f32 %v21_v2, %v21_v2  ;;  %v24_v5 = vmul.f32 %v22_v3, %v22_v3  ;;  %v64_v27 = vsub.s32 0, %v47_v18  ;;  %v68_v28 = vsub.s32 1, %v47_v18  ;;  %v93_v37 = vld [vmem:[%s173_s0] sm:$0xff] }
   0x5   :  { %v48_v20 = vsub.s32 %v45_v17, %v47_v18 }
   0x6   :  { %v27_v6 = vrot.slane %v23_v4, 7  ;;  %v28_v7 = vrot.slane %v24_v5, 7 }
   0x8   :  { %v31_v8 = vsub.f32 %v21_v2, %v27_v6  ;;  %v32_v9 = vsub.f32 %v22_v3, %v28_v7 }
   0xa   :  { %v33_v10 = vmax.f32 %v31_v8, 0.0  ;;  %v34_v11 = vmax.f32 %v32_v9, 0.0 }
   0xc   :  { %v36_v12 = vadd.f32 1e-05, %v33_v10  ;;  %v37_v13 = vadd.f32 1e-05, %v34_v11 }
   0xe   :  { %117 = vrsqrt.f32 %v36_v12 }
   0xf   :  { %119 = vrsqrt.f32 %v37_v13 }
  0x18   :  { %v118_v19 = vpop.eup %117 }
  0x19   :  { %v120_v21 = vpop.eup %119 }
  0x1a   :  { %v42_v22 = vcombine.low %v118_v19, %v120_v21 }
  0x1c   :  { %v49_v23 = vrot.slane %v42_v22, %v48_v20 }
  0x1e   :  { %v50_v24 = vcombine.high %v49_v23, %v49_v23 }
  0x20   :  { %v57_v26 = vrot.slane %v50_v24, %v48_v20 }
  0x22   :  { %v59_v29 = vmul.f32 %v57_v26, %v35_v25 }
  0x24   :  { %v65_v30 = vrot.slane %v59_v29, %v64_v27  ;;  %v69_v31 = vrot.slane %v59_v29, %v68_v28 }
  0x26   :  { %v72_v32 = vmul.f32 %v65_v30, %v21_v2  ;;  %v73_v33 = vmul.f32 %v69_v31, %v22_v3  ;;  %v95_v41 = vmul.f32 %v93_v37, %v65_v30  ;;  %v96_v42 = vmul.f32 %v94_v38, %v69_v31 }
  0x28   :  { %v76_v34 = vcombine.low %v72_v32, %v73_v33 }
  0x2a   :  { %v83_v35 = vrot.slane %v76_v34, %v48_v20 }
  0x2c   :  { %v90_v39 = vrot.slane %v83_v35, %v48_v20 }
  0x2e   :  { %v92_v40 = vsub.f32 %v60_v36, %v90_v39 }
  0x30   :  { %v101_v43 = vrot.slane %v92_v40, %v64_v27  ;;  %v105_v44 = vrot.slane %v92_v40, %v68_v28 }
  0x32   :  { %v108_v45 = vadd.f32 %v101_v43, %v95_v41  ;;  %v109_v46 = vadd.f32 %v105_v44, %v96_v42 }
  0x34   :  { %110 = vst [vmem:[%s175_s4] sm:$0xff] %v108_v45  ;;  %111 = vst [vmem:[%s175_s4 + $0x8] sm:$0xff] %v109_v46 }

// kernel: modified_resnet18_forward.66
= control target key start
LH: loop header
LB: loop body
LE: loop exit
PB: predicated region body
PF: predicated region fallthrough
CT: control target
= control target key end

     0   :  { %v123_v14 = vmov 1966171168   ;;  %v46_v16 = vlaneseq  ;;  %s173_s1 = inlined_call_operand.vmem [shape: f32[1,8,256], index: 1, kind: input, shape index: {}]   ;;  %s174_s2 = inlined_call_operand.vmem [shape: f32[1,256], index: 2, kind: input, shape index: {}]   ;;  %s175_s0 = inlined_call_operand.vmem [shape: f32[8,256], index: 0, kind: input, shape index: {}]   ;;  %s176_s3 = inlined_call_operand.vmem [shape: f32[1,256], index: 3, kind: input, shape index: {}]   ;;  %s177_s4 = inlined_call_operand.vmem [shape: f32[8,256], index: 4, kind: output, shape index: {}]  }
   0x1   :  { %v17_v0 = vld [vmem:[%s173_s1] sm:$0xff]  ;;  %v18_v1 = vld [vmem:[%s173_s1 + $0x8] sm:$0xff]  ;;  %v44_v15 = vunpack.c.l.s4 %v123_v14 }
   0x2   :  { %v21_v2 = vmul.f32 0.5, %v17_v0  ;;  %v22_v3 = vmul.f32 0.5, %v18_v1  ;;  %v47_v18 = vshrl.u32 %v46_v16, 7  ;;  %v35_v25 = vld [vmem:[%s174_s2] sm:$0x3]  ;;  %v94_v38 = vld [vmem:[%s175_s0 + $0x8] sm:$0xff] }
   0x3   :  { %v45_v17 = vunpack.c.0.s8 %v44_v15  ;;  %v60_v36 = vld [vmem:[%s176_s3] sm:$0x3] }
   0x4   :  { %v23_v4 = vmul.f32 %v21_v2, %v21_v2  ;;  %v24_v5 = vmul.f32 %v22_v3, %v22_v3  ;;  %v64_v27 = vsub.s32 0, %v47_v18  ;;  %v68_v28 = vsub.s32 1, %v47_v18  ;;  %v93_v37 = vld [vmem:[%s175_s0] sm:$0xff] }
   0x5   :  { %v48_v20 = vsub.s32 %v45_v17, %v47_v18 }
   0x6   :  { %v27_v6 = vrot.slane %v23_v4, 7  ;;  %v28_v7 = vrot.slane %v24_v5, 7 }
   0x8   :  { %v31_v8 = vsub.f32 %v21_v2, %v27_v6  ;;  %v32_v9 = vsub.f32 %v22_v3, %v28_v7 }
   0xa   :  { %v33_v10 = vmax.f32 %v31_v8, 0.0  ;;  %v34_v11 = vmax.f32 %v32_v9, 0.0 }
   0xc   :  { %v36_v12 = vadd.f32 1e-05, %v33_v10  ;;  %v37_v13 = vadd.f32 1e-05, %v34_v11 }
   0xe   :  { %119 = vrsqrt.f32 %v36_v12 }
   0xf   :  { %121 = vrsqrt.f32 %v37_v13 }
  0x18   :  { %v120_v19 = vpop.eup %119 }
  0x19   :  { %v122_v21 = vpop.eup %121 }
  0x1a   :  { %v42_v22 = vcombine.low %v120_v19, %v122_v21 }
  0x1c   :  { %v49_v23 = vrot.slane %v42_v22, %v48_v20 }
  0x1e   :  { %v50_v24 = vcombine.high %v49_v23, %v49_v23 }
  0x20   :  { %v57_v26 = vrot.slane %v50_v24, %v48_v20 }
  0x22   :  { %v59_v29 = vmul.f32 %v57_v26, %v35_v25 }
  0x24   :  { %v65_v30 = vrot.slane %v59_v29, %v64_v27  ;;  %v69_v31 = vrot.slane %v59_v29, %v68_v28 }
  0x26   :  { %v72_v32 = vmul.f32 %v65_v30, %v21_v2  ;;  %v73_v33 = vmul.f32 %v69_v31, %v22_v3  ;;  %v95_v41 = vmul.f32 %v93_v37, %v65_v30  ;;  %v96_v42 = vmul.f32 %v94_v38, %v69_v31 }
  0x28   :  { %v76_v34 = vcombine.low %v72_v32, %v73_v33 }
  0x2a   :  { %v83_v35 = vrot.slane %v76_v34, %v48_v20 }
  0x2c   :  { %v90_v39 = vrot.slane %v83_v35, %v48_v20 }
  0x2e   :  { %v92_v40 = vsub.f32 %v60_v36, %v90_v39 }
  0x30   :  { %v101_v43 = vrot.slane %v92_v40, %v64_v27  ;;  %v105_v44 = vrot.slane %v92_v40, %v68_v28 }
  0x32   :  { %v108_v45 = vadd.f32 %v101_v43, %v95_v41  ;;  %v109_v46 = vadd.f32 %v105_v44, %v96_v42 }
  0x34   :  { %v110_v47 = vmax.f32 %v108_v45, 0.0  ;;  %v111_v48 = vmax.f32 %v109_v46, 0.0 }
  0x36   :  { %112 = vst [vmem:[%s177_s4] sm:$0xff] %v110_v47  ;;  %113 = vst [vmem:[%s177_s4 + $0x8] sm:$0xff] %v111_v48 }

// kernel: modified_resnet18_forward.65
= control target key start
LH: loop header
LB: loop body
LE: loop exit
PB: predicated region body
PF: predicated region fallthrough
CT: control target
= control target key end

     0   :  { %s2116_s1 = inlined_call_operand.vmem [shape: bf16[1152,256], index: 1, kind: input, shape index: {}]   ;;  %s2117_s0 = inlined_call_operand.vmem [shape: bf16[8,1152], index: 0, kind: input, shape index: {}]   ;;  %s2118_s3 = inlined_call_operand.vmem [shape: f32[8,256], index: 3, kind: output, shape index: {1}]   ;;  %s2119_s2 = inlined_call_operand.vmem [shape: f32[8,256], index: 2, kind: output, shape index: {0}]  }
   0x1   :  { %v1391_v0 = vld [vmem:[%s2116_s1 + $0x4] ss:$8 sps:$4 sm:$0xff]   ;;  %v1395_v2 = vld [vmem:[%s2116_s1] ss:$8 sps:$4 sm:$0xff]   ;;  %v1397_v4 = vld [vmem:[%s2116_s1 + $0x14] ss:$8 sps:$4 sm:$0xff]  }
   0x2   :  { %v1393_v1 = vld [vmem:[%s2116_s1 + $0x204] ss:$8 sps:$4 sm:$0xff]   ;;  %923 = vmatprep.subr.bf16.mxu1 %v1391_v0  ;;  %v1396_v3 = vld [vmem:[%s2116_s1 + $0x200] ss:$8 sps:$4 sm:$0xff]   ;;  %v1399_v5 = vld [vmem:[%s2116_s1 + $0x214] ss:$8 sps:$4 sm:$0xff]  }
   0x3   :  { %1005 = vmatprep.subr.bf16.mxu0 %v1393_v1  ;;  %924 = vmatpush1.bf16.msra.mxu1 %v1395_v2  ;;  %v1401_v6 = vld [vmem:[%s2116_s1 + $0x10] ss:$8 sps:$4 sm:$0xff]   ;;  %v1403_v8 = vld [vmem:[%s2116_s1 + $0x24] ss:$8 sps:$4 sm:$0xff]   ;;  %v1407_v10 = vld [vmem:[%s2116_s1 + $0x20] ss:$8 sps:$4 sm:$0xff]  }
   0x4   :  { %1006 = vmatpush1.bf16.msra.mxu0 %v1396_v3  ;;  %925 = vmatprep.subr.bf16.mxu1 %v1397_v4  ;;  %v1402_v7 = vld [vmem:[%s2116_s1 + $0x210] ss:$8 sps:$4 sm:$0xff]   ;;  %v1405_v9 = vld [vmem:[%s2116_s1 + $0x224] ss:$8 sps:$4 sm:$0xff]   ;;  %v1408_v11 = vld [vmem:[%s2116_s1 + $0x220] ss:$8 sps:$4 sm:$0xff]  }
   0x5   :  { %1007 = vmatprep.subr.bf16.mxu0 %v1399_v5  ;;  %v1409_v12 = vld [vmem:[%s2116_s1 + $0x34] ss:$8 sps:$4 sm:$0xff]   ;;  %v1413_v14 = vld [vmem:[%s2116_s1 + $0x30] ss:$8 sps:$4 sm:$0xff]   ;;  %v1415_v16 = vld [vmem:[%s2116_s1 + $0x44] ss:$8 sps:$4 sm:$0xff]  }
   0x6   :  { %v1411_v13 = vld [vmem:[%s2116_s1 + $0x234] ss:$8 sps:$4 sm:$0xff]   ;;  %v1414_v15 = vld [vmem:[%s2116_s1 + $0x230] ss:$8 sps:$4 sm:$0xff]   ;;  %v1417_v17 = vld [vmem:[%s2116_s1 + $0x244] ss:$8 sps:$4 sm:$0xff]  }
   0x7   :  { %926 = vmatpush1.bf16.msra.mxu1 %v1401_v6  ;;  %v1419_v18 = vld [vmem:[%s2116_s1 + $0x40] ss:$8 sps:$4 sm:$0xff]   ;;  %v1421_v20 = vld [vmem:[%s2116_s1 + $0x54] ss:$8 sps:$4 sm:$0xff]   ;;  %v1425_v22 = vld [vmem:[%s2116_s1 + $0x50] ss:$8 sps:$4 sm:$0xff]  }
   0x8   :  { %1008 = vmatpush1.bf16.msra.mxu0 %v1402_v7  ;;  %927 = vmatprep.subr.bf16.mxu1 %v1403_v8  ;;  %v1420_v19 = vld [vmem:[%s2116_s1 + $0x240] ss:$8 sps:$4 sm:$0xff]   ;;  %v1423_v21 = vld [vmem:[%s2116_s1 + $0x254] ss:$8 sps:$4 sm:$0xff]   ;;  %v1426_v23 = vld [vmem:[%s2116_s1 + $0x250] ss:$8 sps:$4 sm:$0xff]  }
   0x9   :  { %1009 = vmatprep.subr.bf16.mxu0 %v1405_v9  ;;  %v1427_v24 = vld [vmem:[%s2116_s1 + $0x64] ss:$8 sps:$4 sm:$0xff]   ;;  %v1431_v26 = vld [vmem:[%s2116_s1 + $0x60] ss:$8 sps:$4 sm:$0xff]   ;;  %v1433_v28 = vld [vmem:[%s2116_s1 + $0x74] ss:$8 sps:$4 sm:$0xff]  }
   0xa   :  { %v1429_v25 = vld [vmem:[%s2116_s1 + $0x264] ss:$8 sps:$4 sm:$0xff]   ;;  %v1432_v27 = vld [vmem:[%s2116_s1 + $0x260] ss:$8 sps:$4 sm:$0xff]   ;;  %v1435_v29 = vld [vmem:[%s2116_s1 + $0x274] ss:$8 sps:$4 sm:$0xff]  }
   0xb   :  { %928 = vmatpush1.bf16.msra.mxu1 %v1407_v10  ;;  %v1437_v30 = vld [vmem:[%s2116_s1 + $0x70] ss:$8 sps:$4 sm:$0xff]   ;;  %v1439_v32 = vld [vmem:[%s2116_s1 + $0x84] ss:$8 sps:$4 sm:$0xff]   ;;  %v1443_v34 = vld [vmem:[%s2116_s1 + $0x80] ss:$8 sps:$4 sm:$0xff]  }
   0xc   :  { %1010 = vmatpush1.bf16.msra.mxu0 %v1408_v11  ;;  %929 = vmatprep.subr.bf16.mxu1 %v1409_v12  ;;  %v1438_v31 = vld [vmem:[%s2116_s1 + $0x270] ss:$8 sps:$4 sm:$0xff]   ;;  %v1441_v33 = vld [vmem:[%s2116_s1 + $0x284] ss:$8 sps:$4 sm:$0xff]   ;;  %v1444_v35 = vld [vmem:[%s2116_s1 + $0x280] ss:$8 sps:$4 sm:$0xff]  }
   0xd   :  { %1011 = vmatprep.subr.bf16.mxu0 %v1411_v13  ;;  %v1445_v36 = vld [vmem:[%s2116_s1 + $0x94] ss:$8 sps:$4 sm:$0xff]   ;;  %v1449_v38 = vld [vmem:[%s2116_s1 + $0x90] ss:$8 sps:$4 sm:$0xff]   ;;  %v1451_v40 = vld [vmem:[%s2116_s1 + $0xa4] ss:$8 sps:$4 sm:$0xff]  }
   0xe   :  { %v1447_v37 = vld [vmem:[%s2116_s1 + $0x294] ss:$8 sps:$4 sm:$0xff]   ;;  %v1450_v39 = vld [vmem:[%s2116_s1 + $0x290] ss:$8 sps:$4 sm:$0xff]   ;;  %v1453_v41 = vld [vmem:[%s2116_s1 + $0x2a4] ss:$8 sps:$4 sm:$0xff]  }
   0xf   :  { %930 = vmatpush1.bf16.msra.mxu1 %v1413_v14  ;;  %v1455_v42 = vld [vmem:[%s2116_s1 + $0xa0] ss:$8 sps:$4 sm:$0xff]   ;;  %v1457_v44 = vld [vmem:[%s2116_s1 + $0xb4] ss:$8 sps:$4 sm:$0xff]   ;;  %v1461_v47 = vld [vmem:[%s2116_s1 + $0xb0] ss:$8 sps:$4 sm:$0xff]  }
  0x10   :  { %1012 = vmatpush1.bf16.msra.mxu0 %v1414_v15  ;;  %931 = vmatprep.subr.bf16.mxu1 %v1415_v16  ;;  %v1456_v43 = vld [vmem:[%s2116_s1 + $0x2a0] ss:$8 sps:$4 sm:$0xff]   ;;  %v1459_v45 = vld [vmem:[%s2116_s1 + $0x2b4] ss:$8 sps:$4 sm:$0xff]   ;;  %v1462_v49 = vld [vmem:[%s2116_s1 + $0x2b0] ss:$8 sps:$4 sm:$0xff]  }
  0x11   :  { %1013 = vmatprep.subr.bf16.mxu0 %v1417_v17  ;;  %v22_v46 = vld [vmem:[%s2117_s0] sm:$0xff]  ;;  %v24_v50 = vld [vmem:[%s2117_s0 + $0x10] sm:$0xff] }
  0x12   :  { %v1221_v48 = vcombine.high %v22_v46, %v22_v46  ;;  %v1463_v51 = vld [vmem:[%s2116_s1 + $0xc4] ss:$8 sps:$4 sm:$0xff]   ;;  %v1225_v53 = vcombine.high %v24_v50, %v24_v50  ;;  %v1467_v54 = vld [vmem:[%s2116_s1 + $0xc0] ss:$8 sps:$4 sm:$0xff]   ;;  %v1469_v56 = vld [vmem:[%s2116_s1 + $0xd4] ss:$8 sps:$4 sm:$0xff]   ;;  %v1220_v6 = vcombine.low %v22_v46, %v22_v46  ;;  %v1224_v7 = vcombine.low %v24_v50, %v24_v50 }
  0x13   :  { %932 = vmatpush1.bf16.msra.mxu1 %v1419_v18  ;;  %v1465_v52 = vld [vmem:[%s2116_s1 + $0x2c4] ss:$8 sps:$4 sm:$0xff]   ;;  %v1468_v55 = vld [vmem:[%s2116_s1 + $0x2c0] ss:$8 sps:$4 sm:$0xff]   ;;  %v1471_v57 = vld [vmem:[%s2116_s1 + $0x2d4] ss:$8 sps:$4 sm:$0xff]  }
  0x14   :  { %1014 = vmatpush1.bf16.msra.mxu0 %v1420_v19  ;;  %933 = vmatprep.subr.bf16.mxu1 %v1421_v20  ;;  %v1473_v58 = vld [vmem:[%s2116_s1 + $0xd0] ss:$8 sps:$4 sm:$0xff]   ;;  %v1475_v60 = vld [vmem:[%s2116_s1 + $0xe4] ss:$8 sps:$4 sm:$0xff]   ;;  %v1479_v62 = vld [vmem:[%s2116_s1 + $0xe0] ss:$8 sps:$4 sm:$0xff]  }
  0x15   :  { %1015 = vmatprep.subr.bf16.mxu0 %v1423_v21  ;;  %955 = vmatprep.mubr.bf16.mxu1 %v1221_v48  ;;  %v1474_v59 = vld [vmem:[%s2116_s1 + $0x2d0] ss:$8 sps:$4 sm:$0xff]   ;;  %v1477_v61 = vld [vmem:[%s2116_s1 + $0x2e4] ss:$8 sps:$4 sm:$0xff]   ;;  %v1480_v63 = vld [vmem:[%s2116_s1 + $0x2e0] ss:$8 sps:$4 sm:$0xff]  }
  0x16   :  { %1037 = vmatprep.mubr.bf16.mxu0 %v1225_v53  ;;  %v1481_v0 = vld [vmem:[%s2116_s1 + $0xf4] ss:$8 sps:$4 sm:$0xff]   ;;  %v1485_v2 = vld [vmem:[%s2116_s1 + $0xf0] ss:$8 sps:$4 sm:$0xff]   ;;  %v1491_v4 = vld [vmem:[%s2116_s1 + $0x104] ss:$8 sps:$4 sm:$0xff]  }
  0x17   :  { %934 = vmatpush1.bf16.msra.mxu1 %v1425_v22  ;;  %v1483_v1 = vld [vmem:[%s2116_s1 + $0x2f4] ss:$8 sps:$4 sm:$0xff]   ;;  %v1486_v3 = vld [vmem:[%s2116_s1 + $0x2f0] ss:$8 sps:$4 sm:$0xff]   ;;  %v1496_v5 = vld [vmem:[%s2116_s1 + $0x304] ss:$8 sps:$4 sm:$0xff]  }
  0x18   :  { %1016 = vmatpush1.bf16.msra.mxu0 %v1426_v23  ;;  %935 = vmatprep.subr.bf16.mxu1 %v1427_v24  ;;  %v1489_v8 = vld [vmem:[%s2116_s1 + $0x100] ss:$8 sps:$4 sm:$0xff]   ;;  %v1499_v10 = vld [vmem:[%s2116_s1 + $0x114] ss:$8 sps:$4 sm:$0xff]   ;;  %v1497_v12 = vld [vmem:[%s2116_s1 + $0x110] ss:$8 sps:$4 sm:$0xff]  }
  0x19   :  { %1017 = vmatprep.subr.bf16.mxu0 %v1429_v25  ;;  %v1494_v9 = vld [vmem:[%s2116_s1 + $0x300] ss:$8 sps:$4 sm:$0xff]   ;;  %v1502_v11 = vld [vmem:[%s2116_s1 + $0x314] ss:$8 sps:$4 sm:$0xff]   ;;  %v1500_v13 = vld [vmem:[%s2116_s1 + $0x310] ss:$8 sps:$4 sm:$0xff]  }
  0x1a   :  { %v1505_v14 = vld [vmem:[%s2116_s1 + $0x124] ss:$8 sps:$4 sm:$0xff]   ;;  %v1503_v16 = vld [vmem:[%s2116_s1 + $0x120] ss:$8 sps:$4 sm:$0xff]   ;;  %v1511_v18 = vld [vmem:[%s2116_s1 + $0x134] ss:$8 sps:$4 sm:$0xff]  }
  0x1b   :  { %936 = vmatpush1.bf16.msra.mxu1 %v1431_v26  ;;  %v1508_v15 = vld [vmem:[%s2116_s1 + $0x324] ss:$8 sps:$4 sm:$0xff]   ;;  %v1506_v17 = vld [vmem:[%s2116_s1 + $0x320] ss:$8 sps:$4 sm:$0xff]   ;;  %v1514_v19 = vld [vmem:[%s2116_s1 + $0x334] ss:$8 sps:$4 sm:$0xff]  }
  0x1c   :  { %1018 = vmatpush1.bf16.msra.mxu0 %v1432_v27  ;;  %937 = vmatprep.subr.bf16.mxu1 %v1433_v28  ;;  %v1509_v20 = vld [vmem:[%s2116_s1 + $0x130] ss:$8 sps:$4 sm:$0xff]   ;;  %v1517_v22 = vld [vmem:[%s2116_s1 + $0x144] ss:$8 sps:$4 sm:$0xff]   ;;  %v1515_v24 = vld [vmem:[%s2116_s1 + $0x140] ss:$8 sps:$4 sm:$0xff]  }
  0x1d   :  { %1019 = vmatprep.subr.bf16.mxu0 %v1435_v29  ;;  %v1512_v21 = vld [vmem:[%s2116_s1 + $0x330] ss:$8 sps:$4 sm:$0xff]   ;;  %v1520_v23 = vld [vmem:[%s2116_s1 + $0x344] ss:$8 sps:$4 sm:$0xff]   ;;  %v1518_v25 = vld [vmem:[%s2116_s1 + $0x340] ss:$8 sps:$4 sm:$0xff]  }
  0x1e   :  { %v1523_v26 = vld [vmem:[%s2116_s1 + $0x154] ss:$8 sps:$4 sm:$0xff]   ;;  %v1521_v28 = vld [vmem:[%s2116_s1 + $0x150] ss:$8 sps:$4 sm:$0xff]   ;;  %v1553_v50 = vld [vmem:[%s2116_s1 + $0x1a4] ss:$8 sps:$4 sm:$0xff]  }
  0x1f   :  { %938 = vmatpush1.bf16.msra.mxu1 %v1437_v30  ;;  %v1526_v27 = vld [vmem:[%s2116_s1 + $0x354] ss:$8 sps:$4 sm:$0xff]   ;;  %v1524_v29 = vld [vmem:[%s2116_s1 + $0x350] ss:$8 sps:$4 sm:$0xff]   ;;  %v1529_v30 = vld [vmem:[%s2116_s1 + $0x164] ss:$8 sps:$4 sm:$0xff]  }
  0x20   :  { %1020 = vmatpush1.bf16.msra.mxu0 %v1438_v31  ;;  %939 = vmatprep.subr.bf16.mxu1 %v1439_v32  ;;  %v1532_v31 = vld [vmem:[%s2116_s1 + $0x364] ss:$8 sps:$4 sm:$0xff]   ;;  %v1547_v46 = vld [vmem:[%s2116_s1 + $0x194] ss:$8 sps:$4 sm:$0xff]   ;;  %v1545_v48 = vld [vmem:[%s2116_s1 + $0x190] ss:$8 sps:$4 sm:$0xff]  }
  0x21   :  { %1021 = vmatprep.subr.bf16.mxu0 %v1441_v33  ;;  %v1918_v32 = vld [vmem:[%s2117_s0 + $0x8] sm:$0xff]  ;;  %v1923_v33 = vld [vmem:[%s2117_s0 + $0x18] sm:$0xff] }
  0x22   :  { %v1554_v53 = vld [vmem:[%s2116_s1 + $0x3a0] ss:$8 sps:$4 sm:$0xff]  }
  0x23   :  { %940 = vmatpush1.bf16.msra.mxu1 %v1443_v34  ;;  %v1527_v34 = vld [vmem:[%s2116_s1 + $0x160] ss:$8 sps:$4 sm:$0xff]  }
  0x24   :  { %1022 = vmatpush1.bf16.msra.mxu0 %v1444_v35  ;;  %941 = vmatprep.subr.bf16.mxu1 %v1445_v36  ;;  %v1530_v35 = vld [vmem:[%s2116_s1 + $0x360] ss:$8 sps:$4 sm:$0xff]   ;;  %v1223_v36 = vcombine.high %v1918_v32, %v1918_v32 }
  0x25   :  { %1023 = vmatprep.subr.bf16.mxu0 %v1447_v37  ;;  %v1227_v37 = vcombine.high %v1923_v33, %v1923_v33 }
  0x27   :  { %942 = vmatpush1.bf16.msra.mxu1 %v1449_v38  ;;  %v1535_v38 = vld [vmem:[%s2116_s1 + $0x174] ss:$8 sps:$4 sm:$0xff]  }
  0x28   :  { %1024 = vmatpush1.bf16.msra.mxu0 %v1450_v39  ;;  %943 = vmatprep.subr.bf16.mxu1 %v1451_v40  ;;  %v1538_v39 = vld [vmem:[%s2116_s1 + $0x374] ss:$8 sps:$4 sm:$0xff]   ;;  %v1533_v40 = vld [vmem:[%s2116_s1 + $0x170] ss:$8 sps:$4 sm:$0xff]  }
  0x29   :  { %1025 = vmatprep.subr.bf16.mxu0 %v1453_v41  ;;  %v1536_v41 = vld [vmem:[%s2116_s1 + $0x370] ss:$8 sps:$4 sm:$0xff]  }
  0x2b   :  { %944 = vmatpush1.bf16.msra.mxu1 %v1455_v42  ;;  %v1541_v42 = vld [vmem:[%s2116_s1 + $0x184] ss:$8 sps:$4 sm:$0xff]  }
  0x2c   :  { %1026 = vmatpush1.bf16.msra.mxu0 %v1456_v43  ;;  %945 = vmatprep.subr.bf16.mxu1 %v1457_v44  ;;  %v1544_v43 = vld [vmem:[%s2116_s1 + $0x384] ss:$8 sps:$4 sm:$0xff]   ;;  %v1539_v44 = vld [vmem:[%s2116_s1 + $0x180] ss:$8 sps:$4 sm:$0xff]  }
  0x2d   :  { %1027 = vmatprep.subr.bf16.mxu0 %v1459_v45  ;;  %v1542_v45 = vld [vmem:[%s2116_s1 + $0x380] ss:$8 sps:$4 sm:$0xff]  }
  0x2f   :  { %946 = vmatpush1.bf16.msra.mxu1 %v1461_v47  ;;  %v1550_v47 = vld [vmem:[%s2116_s1 + $0x394] ss:$8 sps:$4 sm:$0xff]  }
  0x30   :  { %1028 = vmatpush1.bf16.msra.mxu0 %v1462_v49  ;;  %947 = vmatprep.subr.bf16.mxu1 %v1463_v51  ;;  %v1548_v49 = vld [vmem:[%s2116_s1 + $0x390] ss:$8 sps:$4 sm:$0xff]   ;;  %v1556_v51 = vld [vmem:[%s2116_s1 + $0x3a4] ss:$8 sps:$4 sm:$0xff]  }
  0x31   :  { %1029 = vmatprep.subr.bf16.mxu0 %v1465_v52  ;;  %v1551_v52 = vld [vmem:[%s2116_s1 + $0x1a0] ss:$8 sps:$4 sm:$0xff]  }
  0x33   :  { %948 = vmatpush1.bf16.msra.mxu1 %v1467_v54  ;;  %v1559_v54 = vld [vmem:[%s2116_s1 + $0x1b4] ss:$8 sps:$4 sm:$0xff]  }
  0x34   :  { %1030 = vmatpush1.bf16.msra.mxu0 %v1468_v55  ;;  %949 = vmatprep.subr.bf16.mxu1 %v1469_v56  ;;  %v1562_v55 = vld [vmem:[%s2116_s1 + $0x3b4] ss:$8 sps:$4 sm:$0xff]   ;;  %v1557_v56 = vld [vmem:[%s2116_s1 + $0x1b0] ss:$8 sps:$4 sm:$0xff]  }
  0x35   :  { %1031 = vmatprep.subr.bf16.mxu0 %v1471_v57  ;;  %v1560_v57 = vld [vmem:[%s2116_s1 + $0x3b0] ss:$8 sps:$4 sm:$0xff]  }
  0x37   :  { %950 = vmatpush1.bf16.msra.mxu1 %v1473_v58  ;;  %v1565_v58 = vld [vmem:[%s2116_s1 + $0x1c4] ss:$8 sps:$4 sm:$0xff]  }
  0x38   :  { %1032 = vmatpush1.bf16.msra.mxu0 %v1474_v59  ;;  %951 = vmatprep.subr.bf16.mxu1 %v1475_v60  ;;  %v1568_v59 = vld [vmem:[%s2116_s1 + $0x3c4] ss:$8 sps:$4 sm:$0xff]   ;;  %v1563_v60 = vld [vmem:[%s2116_s1 + $0x1c0] ss:$8 sps:$4 sm:$0xff]  }
  0x39   :  { %1033 = vmatprep.subr.bf16.mxu0 %v1477_v61  ;;  %v1566_v61 = vld [vmem:[%s2116_s1 + $0x3c0] ss:$8 sps:$4 sm:$0xff]  }
  0x3b   :  { %952 = vmatpush1.bf16.msra.mxu1 %v1479_v62  ;;  %v1571_v62 = vld [vmem:[%s2116_s1 + $0x1d4] ss:$8 sps:$4 sm:$0xff]  }
  0x3c   :  { %1034 = vmatpush1.bf16.msra.mxu0 %v1480_v63  ;;  %953 = vmatprep.subr.bf16.mxu1 %v1481_v0  ;;  %v1574_v63 = vld [vmem:[%s2116_s1 + $0x3d4] ss:$8 sps:$4 sm:$0xff]   ;;  %v1569_v0 = vld [vmem:[%s2116_s1 + $0x1d0] ss:$8 sps:$4 sm:$0xff]  }
  0x3d   :  { %1035 = vmatprep.subr.bf16.mxu0 %v1483_v1  ;;  %v1572_v1 = vld [vmem:[%s2116_s1 + $0x3d0] ss:$8 sps:$4 sm:$0xff]  }
  0x3f   :  { %954 = vmatpush1.bf16.msra.mxu1 %v1485_v2  ;;  %v1577_v2 = vld [vmem:[%s2116_s1 + $0x1e4] ss:$8 sps:$4 sm:$0xff]  }
  0x40   :  { %1036 = vmatpush1.bf16.msra.mxu0 %v1486_v3  ;;  %964 = vmatprep.subr.bf16.mxu1 %v1491_v4  ;;  %v1580_v3 = vld [vmem:[%s2116_s1 + $0x3e4] ss:$8 sps:$4 sm:$0xff]   ;;  %v1575_v4 = vld [vmem:[%s2116_s1 + $0x1e0] ss:$8 sps:$4 sm:$0xff]  }
  0x41   :  { %1046 = vmatprep.subr.bf16.mxu0 %v1496_v5  ;;  %v1578_v5 = vld [vmem:[%s2116_s1 + $0x3e0] ss:$8 sps:$4 sm:$0xff]  }
  0x42   :  { %956 = vmatmul.mubr.bf16.vlgmr.msra.gmra.mrb[0].mxu1 %v1220_v6  ;;  %v1583_v6 = vld [vmem:[%s2116_s1 + $0x1f4] ss:$8 sps:$4 sm:$0xff]  }
  0x43   :  { %1038 = vmatmul.mubr.bf16.vlgmr.msra.gmra.mrb[0].mxu0 %v1224_v7  ;;  %965 = vmatpush1.bf16.msra.mxu1 %v1489_v8  ;;  %v1586_v7 = vld [vmem:[%s2116_s1 + $0x3f4] ss:$8 sps:$4 sm:$0xff]   ;;  %v1581_v8 = vld [vmem:[%s2116_s1 + $0x1f0] ss:$8 sps:$4 sm:$0xff]  }
  0x44   :  { %1047 = vmatpush1.bf16.msra.mxu0 %v1494_v9  ;;  %966 = vmatprep.subr.bf16.mxu1 %v1499_v10  ;;  %v1584_v9 = vld [vmem:[%s2116_s1 + $0x3f0] ss:$8 sps:$4 sm:$0xff]   ;;  %v1593_v10 = vld [vmem:[%s2116_s1 + $0x404] ss:$8 sps:$4 sm:$0xff]  }
  0x45   :  { %1048 = vmatprep.subr.bf16.mxu0 %v1502_v11  ;;  %996 = vmatprep.mubr.bf16.mxu1 %v1223_v36  ;;  %v1222_v11 = vcombine.low %v1918_v32, %v1918_v32 }
  0x46   :  { %1078 = vmatprep.mubr.bf16.mxu0 %v1227_v37 }
  0x47   :  { %967 = vmatpush1.bf16.msra.mxu1 %v1497_v12  ;;  %v1226_v12 = vcombine.low %v1923_v33, %v1923_v33 }
  0x48   :  { %1049 = vmatpush1.bf16.msra.mxu0 %v1500_v13  ;;  %968 = vmatprep.subr.bf16.mxu1 %v1505_v14  ;;  %v1591_v13 = vld [vmem:[%s2116_s1 + $0x400] ss:$8 sps:$4 sm:$0xff]   ;;  %v1596_v14 = vld [vmem:[%s2116_s1 + $0x414] ss:$8 sps:$4 sm:$0xff]  }
  0x49   :  { %1050 = vmatprep.subr.bf16.mxu0 %v1508_v15  ;;  %v1594_v15 = vld [vmem:[%s2116_s1 + $0x410] ss:$8 sps:$4 sm:$0xff]  }
  0x4b   :  { %969 = vmatpush1.bf16.msra.mxu1 %v1503_v16  ;;  %v1616_v16 = vmov 0  }
  0x4c   :  { %1051 = vmatpush1.bf16.msra.mxu0 %v1506_v17  ;;  %970 = vmatprep.subr.bf16.mxu1 %v1511_v18  ;;  %v1599_v17 = vld [vmem:[%s2116_s1 + $0x424] ss:$8 sps:$4 sm:$0xff]   ;;  %v1597_v18 = vld [vmem:[%s2116_s1 + $0x420] ss:$8 sps:$4 sm:$0xff]  }
  0x4d   :  { %1052 = vmatprep.subr.bf16.mxu0 %v1514_v19  ;;  %v1602_v19 = vld [vmem:[%s2116_s1 + $0x434] ss:$8 sps:$4 sm:$0xff]  }
  0x4f   :  { %971 = vmatpush1.bf16.msra.mxu1 %v1509_v20  ;;  %v1600_v20 = vld [vmem:[%s2116_s1 + $0x430] ss:$8 sps:$4 sm:$0xff]  }
  0x50   :  { %1053 = vmatpush1.bf16.msra.mxu0 %v1512_v21  ;;  %972 = vmatprep.subr.bf16.mxu1 %v1517_v22  ;;  %v1605_v21 = vld [vmem:[%s2116_s1 + $0x444] ss:$8 sps:$4 sm:$0xff]   ;;  %v1603_v22 = vld [vmem:[%s2116_s1 + $0x440] ss:$8 sps:$4 sm:$0xff]  }
  0x51   :  { %1054 = vmatprep.subr.bf16.mxu0 %v1520_v23  ;;  %v1608_v23 = vld [vmem:[%s2116_s1 + $0x454] ss:$8 sps:$4 sm:$0xff]  }
  0x53   :  { %973 = vmatpush1.bf16.msra.mxu1 %v1515_v24  ;;  %v1606_v24 = vld [vmem:[%s2116_s1 + $0x450] ss:$8 sps:$4 sm:$0xff]  }
  0x54   :  { %1055 = vmatpush1.bf16.msra.mxu0 %v1518_v25  ;;  %974 = vmatprep.subr.bf16.mxu1 %v1523_v26  ;;  %v1611_v25 = vld [vmem:[%s2116_s1 + $0x464] ss:$8 sps:$4 sm:$0xff]   ;;  %v1609_v26 = vld [vmem:[%s2116_s1 + $0x460] ss:$8 sps:$4 sm:$0xff]  }
  0x55   :  { %1056 = vmatprep.subr.bf16.mxu0 %v1526_v27  ;;  %v1614_v27 = vld [vmem:[%s2116_s1 + $0x474] ss:$8 sps:$4 sm:$0xff]  }
  0x57   :  { %975 = vmatpush1.bf16.msra.mxu1 %v1521_v28  ;;  %v1612_v28 = vld [vmem:[%s2116_s1 + $0x470] ss:$8 sps:$4 sm:$0xff]  }
  0x58   :  { %1057 = vmatpush1.bf16.msra.mxu0 %v1524_v29  ;;  %976 = vmatprep.subr.bf16.mxu1 %v1529_v30  ;;  %v1615_v29 = vld [vmem:[%s2117_s0 + $0x20] ss:$0 sps:$4 sm:$0xff]   ;;  %v1617_v30 = vmov 0.0  }
  0x59   :  { %1058 = vmatprep.subr.bf16.mxu0 %v1532_v31  ;;  %1139 = vst [vmem:[%s2118_s3] sm:$0xff] %v1617_v30  ;;  %1140 = vst [vmem:[%s2118_s3 + $0x8] sm:$0xff] %v1617_v30 }
  0x5b   :  { %977 = vmatpush1.bf16.msra.mxu1 %v1527_v34 }
  0x5c   :  { %1059 = vmatpush1.bf16.msra.mxu0 %v1530_v35  ;;  %978 = vmatprep.subr.bf16.mxu1 %v1535_v38 }
  0x5d   :  { %1060 = vmatprep.subr.bf16.mxu0 %v1538_v39 }
  0x5f   :  { %979 = vmatpush1.bf16.msra.mxu1 %v1533_v40 }
  0x60   :  { %1061 = vmatpush1.bf16.msra.mxu0 %v1536_v41  ;;  %980 = vmatprep.subr.bf16.mxu1 %v1541_v42 }
  0x61   :  { %1062 = vmatprep.subr.bf16.mxu0 %v1544_v43 }
  0x63   :  { %981 = vmatpush1.bf16.msra.mxu1 %v1539_v44 }
  0x64   :  { %1063 = vmatpush1.bf16.msra.mxu0 %v1542_v45  ;;  %982 = vmatprep.subr.bf16.mxu1 %v1547_v46 }
  0x65   :  { %1064 = vmatprep.subr.bf16.mxu0 %v1550_v47 }
  0x67   :  { %983 = vmatpush1.bf16.msra.mxu1 %v1545_v48  ;;  %v1618_v48 = vmov 1966171168  }
  0x68   :  { %1065 = vmatpush1.bf16.msra.mxu0 %v1548_v49  ;;  %984 = vmatprep.subr.bf16.mxu1 %v1553_v50  ;;  %v1157_v49 = vunpack.c.l.s4 %v1618_v48  ;;  %v1159_v50 = vlaneseq }
  0x69   :  { %1066 = vmatprep.subr.bf16.mxu0 %v1556_v51 }
  0x6a   :  { %vm1173_vm0 = vcmp.lt.s32.totalorder %v1159_v50, 256 }
  0x6b   :  { %985 = vmatpush1.bf16.msra.mxu1 %v1551_v52 }
  0x6c   :  { %1067 = vmatpush1.bf16.msra.mxu0 %v1554_v53  ;;  %986 = vmatprep.subr.bf16.mxu1 %v1559_v54 }
  0x6d   :  { %1068 = vmatprep.subr.bf16.mxu0 %v1562_v55 }
  0x6f   :  { %987 = vmatpush1.bf16.msra.mxu1 %v1557_v56 }
  0x70   :  { %1069 = vmatpush1.bf16.msra.mxu0 %v1560_v57  ;;  %988 = vmatprep.subr.bf16.mxu1 %v1565_v58 }
  0x71   :  { %1070 = vmatprep.subr.bf16.mxu0 %v1568_v59  ;;  %v1158_v59 = vunpack.c.0.s8 %v1157_v49 }
  0x73   :  { %989 = vmatpush1.bf16.msra.mxu1 %v1563_v60  ;;  %v1160_v60 = vshrl.u32 %v1159_v50, 7 }
  0x74   :  { %1071 = vmatpush1.bf16.msra.mxu0 %v1566_v61  ;;  %990 = vmatprep.subr.bf16.mxu1 %v1571_v62 }
  0x75   :  { %1072 = vmatprep.subr.bf16.mxu0 %v1574_v63 }
  0x77   :  { %991 = vmatpush1.bf16.msra.mxu1 %v1569_v0 }
  0x78   :  { %1073 = vmatpush1.bf16.msra.mxu0 %v1572_v1  ;;  %992 = vmatprep.subr.bf16.mxu1 %v1577_v2 }
  0x79   :  { %1074 = vmatprep.subr.bf16.mxu0 %v1580_v3 }
  0x7b   :  { %993 = vmatpush1.bf16.msra.mxu1 %v1575_v4 }
  0x7c   :  { %1075 = vmatpush1.bf16.msra.mxu0 %v1578_v5  ;;  %994 = vmatprep.subr.bf16.mxu1 %v1583_v6  ;;  %v1161_v5 = vsub.s32 %v1158_v59, %v1160_v60 }
  0x7d   :  { %1076 = vmatprep.subr.bf16.mxu0 %v1586_v7 }
  0x7f   :  { %995 = vmatpush1.bf16.msra.mxu1 %v1581_v8 }
  0x80   :  { %1077 = vmatpush1.bf16.msra.mxu0 %v1584_v9 }
  0x81   :  { %1087 = vmatprep.subr.bf16.mxu0 %v1593_v10 }
  0x82   :  { %997 = vmatmul.mubr.bf16.vlgmr.msra.gmra.mrb[0].mxu1 %v1222_v11 }
  0x83   :  { %1079 = vmatmul.mubr.bf16.vlgmr.msra.gmra.mrb[0].mxu0 %v1226_v12 }
  0x84   :  { %1088 = vmatpush1.bf16.msra.mxu0 %v1591_v13  ;;  %1119 = vmatprep.mubr.bf16.mxu0 %v1616_v16 }
  0x85   :  { %1089 = vmatprep.subr.bf16.mxu0 %v1596_v14 }
  0x88   :  { %1090 = vmatpush1.bf16.msra.mxu0 %v1594_v15 }
  0x89   :  { %1091 = vmatprep.subr.bf16.mxu0 %v1599_v17 }
  0x8c   :  { %1092 = vmatpush1.bf16.msra.mxu0 %v1597_v18 }
  0x8d   :  { %1093 = vmatprep.subr.bf16.mxu0 %v1602_v19 }
  0x90   :  { %1094 = vmatpush1.bf16.msra.mxu0 %v1600_v20 }
  0x91   :  { %1095 = vmatprep.subr.bf16.mxu0 %v1605_v21 }
  0x94   :  { %1096 = vmatpush1.bf16.msra.mxu0 %v1603_v22 }
  0x95   :  { %1097 = vmatprep.subr.bf16.mxu0 %v1608_v23 }
  0x98   :  { %1098 = vmatpush1.bf16.msra.mxu0 %v1606_v24 }
  0x99   :  { %1099 = vmatprep.subr.bf16.mxu0 %v1611_v25 }
  0x9c   :  { %1100 = vmatpush1.bf16.msra.mxu0 %v1609_v26 }
  0x9d   :  { %1101 = vmatprep.subr.bf16.mxu0 %v1614_v27 }
  0xa0   :  { %1102 = vmatpush1.bf16.msra.mxu0 %v1612_v28 }
  0xa3   :  { %1120 = vmatmul.mubr.bf16.vlgmr.msra.gmra.mrb[0].mxu0 %v1615_v29 }
 0x155   :  { %v998_v31 = vpop.f32.mrb[0].mxu1 }
 0x156   :  { %v1000_v32 = vpop.f32.mrb[1].mxu1 }
 0x157   :  { %v1002_v33 = vpop.f32.mrb[2].mxu1 }
 0x158   :  { %v1003_v34 = vpop.f32.mrb[3].mxu1 }
 0x176   :  { %v1121_v35 = vpop.f32.mrb[0].mxu0 }
 0x177   :  { %v1374_v36 = vadd.f32 %v1121_v35, %v998_v31  ;;  %v1123_v37 = vpop.f32.mrb[1].mxu0 }
 0x178   :  { %v1375_v38 = vadd.f32 %v1123_v37, %v1000_v32  ;;  %v1125_v39 = vpop.f32.mrb[2].mxu0 }
 0x179   :  { %1137 = vst [vmem:[%s2119_s2] sm:$0xff] %v1374_v36  ;;  %v1141_v40 = vrot.slane %v1374_v36, 4  ;;  %v1177_v41 = vmul.f32 %v1374_v36, %v1374_v36  ;;  %v1126_v42 = vpop.f32.mrb[3].mxu0 }
 0x17a   :  { %1138 = vst [vmem:[%s2119_s2 + $0x8] sm:$0xff] %v1375_v38  ;;  %v1147_v43 = vrot.slane %v1375_v38, 4  ;;  %v1178_v44 = vmul.f32 %v1375_v38, %v1375_v38 }
 0x17b   :  { %v1142_v45 = vadd.f32 %v1374_v36, %v1141_v40  ;;  %v1179_v46 = vrot.slane %v1177_v41, 4 }
 0x17c   :  { %v1148_v47 = vadd.f32 %v1375_v38, %v1147_v43  ;;  %v1185_v51 = vrot.slane %v1178_v44, 4 }
 0x17d   :  { %v1143_v52 = vrot.slane %v1142_v45, 2  ;;  %v1180_v53 = vadd.f32 %v1179_v46, %v1177_v41 }
 0x17e   :  { %v1149_v54 = vrot.slane %v1148_v47, 2  ;;  %v1186_v55 = vadd.f32 %v1185_v51, %v1178_v44 }
 0x17f   :  { %v1144_v56 = vadd.f32 %v1143_v52, %v1142_v45  ;;  %v1181_v57 = vrot.slane %v1180_v53, 2 }
 0x180   :  { %v1150_v58 = vadd.f32 %v1149_v54, %v1148_v47  ;;  %v1187_v61 = vrot.slane %v1186_v55, 2 }
 0x181   :  { %v1145_v62 = vrot.slane %v1144_v56, 1  ;;  %v1182_v63 = vadd.f32 %v1181_v57, %v1180_v53 }
 0x182   :  { %v1151_v0 = vrot.slane %v1150_v58, 1  ;;  %v1188_v1 = vadd.f32 %v1187_v61, %v1186_v55 }
 0x183   :  { %v1146_v2 = vadd.f32 %v1145_v62, %v1144_v56  ;;  %v1183_v3 = vrot.slane %v1182_v63, 1 }
 0x184   :  { %v1152_v4 = vadd.f32 %v1151_v0, %v1150_v58  ;;  %v1189_v6 = vrot.slane %v1188_v1, 1 }
 0x185   :  { %v1184_v7 = vadd.f32 %v1183_v3, %v1182_v63 }
 0x186   :  { %v1155_v8 = vcombine.low %v1146_v2, %v1152_v4  ;;  %v1190_v9 = vadd.f32 %v1189_v6, %v1188_v1 }
 0x188   :  { %v1162_v10 = vrot.slane %v1155_v8, %v1161_v5  ;;  %v1193_v11 = vcombine.low %v1184_v7, %v1190_v9 }
 0x18a   :  { %v1169_v12 = vrot.slane %v1162_v10, %v1161_v5  ;;  %v1200_v13 = vrot.slane %v1193_v11, %v1161_v5 }
 0x18c   :  { %1175 = vst.msk [vmem:[%s2118_s3] ss:$8 sm:$0x3] %vm1173_vm0, %v1169_v12  ;;  %v1207_v14 = vrot.slane %v1200_v13, %v1161_v5 }
 0x18e   :  { %1373 = vst.msk [vmem:[%s2118_s3 + $0x1] ss:$8 sm:$0x3] %vm1173_vm0, %v1207_v14 }

// kernel: modified_resnet18_forward.68
= control target key start
LH: loop header
LB: loop body
LE: loop exit
PB: predicated region body
PF: predicated region fallthrough
CT: control target
= control target key end

     0   :  { %v130_v14 = vmov 1966171168   ;;  %v49_v16 = vlaneseq  ;;  %s191_s1 = inlined_call_operand.vmem [shape: f32[1,8,256], index: 1, kind: input, shape index: {}]   ;;  %s192_s2 = inlined_call_operand.vmem [shape: f32[1,256], index: 2, kind: input, shape index: {}]   ;;  %s193_s0 = inlined_call_operand.vmem [shape: f32[8,256], index: 0, kind: input, shape index: {}]   ;;  %s194_s3 = inlined_call_operand.vmem [shape: f32[1,256], index: 3, kind: input, shape index: {}]   ;;  %s195_s4 = inlined_call_operand.vmem [shape: f32[8,256], index: 4, kind: input, shape index: {}]   ;;  %s196_s5 = inlined_call_operand.vmem [shape: f32[8,256], index: 5, kind: output, shape index: {}]  }
   0x1   :  { %v20_v0 = vld [vmem:[%s191_s1] sm:$0xff]  ;;  %v21_v1 = vld [vmem:[%s191_s1 + $0x8] sm:$0xff]  ;;  %v47_v15 = vunpack.c.l.s4 %v130_v14 }
   0x2   :  { %v24_v2 = vmul.f32 0.5, %v20_v0  ;;  %v25_v3 = vmul.f32 0.5, %v21_v1  ;;  %v50_v18 = vshrl.u32 %v49_v16, 7  ;;  %v38_v25 = vld [vmem:[%s192_s2] sm:$0x3]  ;;  %v97_v38 = vld [vmem:[%s193_s0 + $0x8] sm:$0xff] }
   0x3   :  { %v48_v17 = vunpack.c.0.s8 %v47_v15  ;;  %v63_v36 = vld [vmem:[%s194_s3] sm:$0x3]  ;;  %v114_v46 = vld [vmem:[%s195_s4 + $0x8] sm:$0xff] }
   0x4   :  { %v26_v4 = vmul.f32 %v24_v2, %v24_v2  ;;  %v27_v5 = vmul.f32 %v25_v3, %v25_v3  ;;  %v67_v27 = vsub.s32 0, %v50_v18  ;;  %v71_v28 = vsub.s32 1, %v50_v18  ;;  %v96_v37 = vld [vmem:[%s193_s0] sm:$0xff] }
   0x5   :  { %v51_v20 = vsub.s32 %v48_v17, %v50_v18  ;;  %v113_v45 = vld [vmem:[%s195_s4] sm:$0xff] }
   0x6   :  { %v30_v6 = vrot.slane %v26_v4, 7  ;;  %v31_v7 = vrot.slane %v27_v5, 7 }
   0x8   :  { %v34_v8 = vsub.f32 %v24_v2, %v30_v6  ;;  %v35_v9 = vsub.f32 %v25_v3, %v31_v7 }
   0xa   :  { %v36_v10 = vmax.f32 %v34_v8, 0.0  ;;  %v37_v11 = vmax.f32 %v35_v9, 0.0 }
   0xc   :  { %v39_v12 = vadd.f32 1e-05, %v36_v10  ;;  %v40_v13 = vadd.f32 1e-05, %v37_v11 }
   0xe   :  { %126 = vrsqrt.f32 %v39_v12 }
   0xf   :  { %128 = vrsqrt.f32 %v40_v13 }
  0x18   :  { %v127_v19 = vpop.eup %126 }
  0x19   :  { %v129_v21 = vpop.eup %128 }
  0x1a   :  { %v45_v22 = vcombine.low %v127_v19, %v129_v21 }
  0x1c   :  { %v52_v23 = vrot.slane %v45_v22, %v51_v20 }
  0x1e   :  { %v53_v24 = vcombine.high %v52_v23, %v52_v23 }
  0x20   :  { %v60_v26 = vrot.slane %v53_v24, %v51_v20 }
  0x22   :  { %v62_v29 = vmul.f32 %v60_v26, %v38_v25 }
  0x24   :  { %v68_v30 = vrot.slane %v62_v29, %v67_v27  ;;  %v72_v31 = vrot.slane %v62_v29, %v71_v28 }
  0x26   :  { %v75_v32 = vmul.f32 %v68_v30, %v24_v2  ;;  %v76_v33 = vmul.f32 %v72_v31, %v25_v3  ;;  %v98_v41 = vmul.f32 %v96_v37, %v68_v30  ;;  %v99_v42 = vmul.f32 %v97_v38, %v72_v31 }
  0x28   :  { %v79_v34 = vcombine.low %v75_v32, %v76_v33 }
  0x2a   :  { %v86_v35 = vrot.slane %v79_v34, %v51_v20 }
  0x2c   :  { %v93_v39 = vrot.slane %v86_v35, %v51_v20 }
  0x2e   :  { %v95_v40 = vsub.f32 %v63_v36, %v93_v39 }
  0x30   :  { %v104_v43 = vrot.slane %v95_v40, %v67_v27  ;;  %v108_v44 = vrot.slane %v95_v40, %v71_v28 }
  0x32   :  { %v111_v47 = vadd.f32 %v104_v43, %v98_v41  ;;  %v112_v48 = vadd.f32 %v108_v44, %v99_v42 }
  0x34   :  { %v115_v49 = vadd.f32 %v113_v45, %v111_v47  ;;  %v116_v50 = vadd.f32 %v114_v46, %v112_v48 }
  0x36   :  { %v117_v51 = vmax.f32 %v115_v49, 0.0  ;;  %v118_v52 = vmax.f32 %v116_v50, 0.0 }
  0x38   :  { %119 = vst [vmem:[%s196_s5] sm:$0xff] %v117_v51  ;;  %120 = vst [vmem:[%s196_s5 + $0x8] sm:$0xff] %v118_v52 }

// kernel: modified_resnet18_forward.67
= control target key start
LH: loop header
LB: loop body
LE: loop exit
PB: predicated region body
PF: predicated region fallthrough
CT: control target
= control target key end

     0   :  { %s2015_s12 = smov 0   ;;  %s2017_s13 = smov 0   ;;  %s2237_s0 = inlined_call_operand.vmem [shape: bf16[8,2304], index: 0, kind: input, shape index: {}]   ;;  %s2238_s1 = inlined_call_operand.vmem [shape: bf16[2304,256], index: 1, kind: input, shape index: {}]   ;;  %s2239_s2 = inlined_call_operand.vmem [shape: f32[8,256], index: 2, kind: output, shape index: {0}]   ;;  %s2240_s3 = inlined_call_operand.vmem [shape: f32[8,256], index: 3, kind: output, shape index: {1}]  }
   0x1   :  { %s2019_s14 = smov 0  }
   0x2 LB: > { %s23_s15 = sadd.s32 1, %s1985_s13  ;;  %p1549_p0 = scmp.ge.s32.totalorder %s1989_s14, 1  ;;  %s1989_s14 = sphi %s2019_s14, %s14_s14   ;;  %s1985_s13 = sphi %s2017_s13, %s2242_s13   ;;  %s1981_s12 = sphi %s2015_s12, %s2241_s12  }
   0x3   : > { %p24_p1 = scmp.ge.s32.totalorder %s23_s15, 2  ;;  %p171_p2 = scmp.lt.s32.totalorder %s1989_s14, 3 }
   0x5   : > { %s2244_s15 = smov (%p24_p1, %s23_s15), 0  ;;  %p172_p3 = pnand %p1549_p0, %p171_p2 }
   0x6   : > { %s210_s16 = smul.u32 (!%p172_p3), 9, %s1981_s12  ;;  %p1553_p6 = scmp.ne.s32.totalorder (!%p172_p3), %s1981_s12, 0 }
   0x7   : > { %175 = sbr.rel (%p172_p3) target bundleno = 431 (0x1af), region = 28 }
   0x8   : > { %s220_s17 = smul.u32 (!%p172_p3), 144, %s1981_s12  ;;  %p213_p4 = scmp.lt.s32.totalorder (!%p172_p3), %s210_s16, 17 }
   0xa   : > { %p221_p5 = scmp.lt.s32.totalorder (!%p172_p3), %s220_s17, 287 }
   0xe   : > { %s2246_s16 = smov (!%p213_p4, %s210_s16), 17  ;;  %s2248_s17 = smov (!%p221_p5, %s220_s17), 287 }
   0xf   : > { %s1550_s18 = sshll.u32 %s2246_s16, 2  ;;  %s1713_s22 = sshll.u32 %s2248_s17, 3  ;;  %v1991_v0 = vmov (!%p1553_p6), 0.0  }
  0x10   : > { %s2040_s21 = scalar_lea.vmem %s2237_s0, %s1550_s18  ;;  %s2045_s25 = scalar_lea.vmem %s2238_s1, %s1713_s22  ;;  %242 = vst [vmem:[#allocation2] sm:$0xff] (!%p1553_p6), %v1991_v0  ;;  %243 = vst [vmem:[#allocation2 + $0x8] sm:$0xff] (!%p1553_p6), %v1991_v0 }
  0x11   : > { %241 = sbr.rel (%p1553_p6) target bundleno = 24 (0x18), region = 32 }
  0x18 PF: > { %v1742_v1 = vld [vmem:[%s2045_s25 + $0x4] ss:$8 sps:$4 sm:$0xff]   ;;  %v1746_v3 = vld [vmem:[%s2045_s25] ss:$8 sps:$4 sm:$0xff]   ;;  %v1748_v5 = vld [vmem:[%s2045_s25 + $0x14] ss:$8 sps:$4 sm:$0xff]  }
  0x19   : > { %v1744_v2 = vld [vmem:[%s2045_s25 + $0x104] ss:$8 sps:$4 sm:$0xff]   ;;  %1147 = vmatprep.subr.bf16.mxu0 %v1742_v1  ;;  %v1747_v4 = vld [vmem:[%s2045_s25 + $0x100] ss:$8 sps:$4 sm:$0xff]   ;;  %v1750_v6 = vld [vmem:[%s2045_s25 + $0x114] ss:$8 sps:$4 sm:$0xff]  }
  0x1a   : > { %1188 = vmatprep.subr.bf16.mxu1 %v1744_v2  ;;  %1148 = vmatpush1.bf16.msra.mxu0 %v1746_v3  ;;  %v1752_v7 = vld [vmem:[%s2045_s25 + $0x10] ss:$8 sps:$4 sm:$0xff]   ;;  %v1754_v9 = vld [vmem:[%s2045_s25 + $0x24] ss:$8 sps:$4 sm:$0xff]   ;;  %v1758_v11 = vld [vmem:[%s2045_s25 + $0x20] ss:$8 sps:$4 sm:$0xff]  }
  0x1b   : > { %1189 = vmatpush1.bf16.msra.mxu1 %v1747_v4  ;;  %1149 = vmatprep.subr.bf16.mxu0 %v1748_v5  ;;  %v1753_v8 = vld [vmem:[%s2045_s25 + $0x110] ss:$8 sps:$4 sm:$0xff]   ;;  %v1756_v10 = vld [vmem:[%s2045_s25 + $0x124] ss:$8 sps:$4 sm:$0xff]   ;;  %v1759_v12 = vld [vmem:[%s2045_s25 + $0x120] ss:$8 sps:$4 sm:$0xff]  }
  0x1c   : > { %1190 = vmatprep.subr.bf16.mxu1 %v1750_v6  ;;  %v1760_v13 = vld [vmem:[%s2045_s25 + $0x34] ss:$8 sps:$4 sm:$0xff]   ;;  %v1764_v15 = vld [vmem:[%s2045_s25 + $0x30] ss:$8 sps:$4 sm:$0xff]   ;;  %v1766_v17 = vld [vmem:[%s2045_s25 + $0x44] ss:$8 sps:$4 sm:$0xff]  }
  0x1d   : > { %v1762_v14 = vld [vmem:[%s2045_s25 + $0x134] ss:$8 sps:$4 sm:$0xff]   ;;  %v1765_v16 = vld [vmem:[%s2045_s25 + $0x130] ss:$8 sps:$4 sm:$0xff]   ;;  %v1768_v18 = vld [vmem:[%s2045_s25 + $0x144] ss:$8 sps:$4 sm:$0xff]  }
  0x1e   : > { %1150 = vmatpush1.bf16.msra.mxu0 %v1752_v7  ;;  %v1770_v19 = vld [vmem:[%s2045_s25 + $0x40] ss:$8 sps:$4 sm:$0xff]   ;;  %v1772_v21 = vld [vmem:[%s2045_s25 + $0x54] ss:$8 sps:$4 sm:$0xff]   ;;  %v1776_v23 = vld [vmem:[%s2045_s25 + $0x50] ss:$8 sps:$4 sm:$0xff]  }
  0x1f   : > { %1191 = vmatpush1.bf16.msra.mxu1 %v1753_v8  ;;  %1151 = vmatprep.subr.bf16.mxu0 %v1754_v9  ;;  %v1771_v20 = vld [vmem:[%s2045_s25 + $0x140] ss:$8 sps:$4 sm:$0xff]   ;;  %v1774_v22 = vld [vmem:[%s2045_s25 + $0x154] ss:$8 sps:$4 sm:$0xff]   ;;  %v1777_v24 = vld [vmem:[%s2045_s25 + $0x150] ss:$8 sps:$4 sm:$0xff]  }
  0x20   : > { %1192 = vmatprep.subr.bf16.mxu1 %v1756_v10  ;;  %v1778_v25 = vld [vmem:[%s2045_s25 + $0x64] ss:$8 sps:$4 sm:$0xff]   ;;  %v1782_v27 = vld [vmem:[%s2045_s25 + $0x60] ss:$8 sps:$4 sm:$0xff]   ;;  %v1784_v29 = vld [vmem:[%s2045_s25 + $0x74] ss:$8 sps:$4 sm:$0xff]  }
  0x21   : > { %v1780_v26 = vld [vmem:[%s2045_s25 + $0x164] ss:$8 sps:$4 sm:$0xff]   ;;  %v1783_v28 = vld [vmem:[%s2045_s25 + $0x160] ss:$8 sps:$4 sm:$0xff]   ;;  %v1786_v30 = vld [vmem:[%s2045_s25 + $0x174] ss:$8 sps:$4 sm:$0xff]  }
  0x22   : > { %1152 = vmatpush1.bf16.msra.mxu0 %v1758_v11  ;;  %v1788_v31 = vld [vmem:[%s2045_s25 + $0x70] ss:$8 sps:$4 sm:$0xff]   ;;  %v1790_v33 = vld [vmem:[%s2045_s25 + $0x84] ss:$8 sps:$4 sm:$0xff]   ;;  %v1794_v35 = vld [vmem:[%s2045_s25 + $0x80] ss:$8 sps:$4 sm:$0xff]  }
  0x23   : > { %1193 = vmatpush1.bf16.msra.mxu1 %v1759_v12  ;;  %1153 = vmatprep.subr.bf16.mxu0 %v1760_v13  ;;  %v1789_v32 = vld [vmem:[%s2045_s25 + $0x170] ss:$8 sps:$4 sm:$0xff]   ;;  %v1792_v34 = vld [vmem:[%s2045_s25 + $0x184] ss:$8 sps:$4 sm:$0xff]   ;;  %v1795_v36 = vld [vmem:[%s2045_s25 + $0x180] ss:$8 sps:$4 sm:$0xff]  }
  0x24   : > { %1194 = vmatprep.subr.bf16.mxu1 %v1762_v14  ;;  %v1796_v37 = vld [vmem:[%s2045_s25 + $0x94] ss:$8 sps:$4 sm:$0xff]   ;;  %v1800_v39 = vld [vmem:[%s2045_s25 + $0x90] ss:$8 sps:$4 sm:$0xff]   ;;  %v1802_v41 = vld [vmem:[%s2045_s25 + $0xa4] ss:$8 sps:$4 sm:$0xff]  }
  0x25   : > { %v1798_v38 = vld [vmem:[%s2045_s25 + $0x194] ss:$8 sps:$4 sm:$0xff]   ;;  %v1801_v40 = vld [vmem:[%s2045_s25 + $0x190] ss:$8 sps:$4 sm:$0xff]   ;;  %v1804_v42 = vld [vmem:[%s2045_s25 + $0x1a4] ss:$8 sps:$4 sm:$0xff]  }
  0x26   : > { %1154 = vmatpush1.bf16.msra.mxu0 %v1764_v15  ;;  %v1806_v43 = vld [vmem:[%s2045_s25 + $0xa0] ss:$8 sps:$4 sm:$0xff]   ;;  %v1808_v45 = vld [vmem:[%s2045_s25 + $0xb4] ss:$8 sps:$4 sm:$0xff]   ;;  %v1812_v50 = vld [vmem:[%s2045_s25 + $0xb0] ss:$8 sps:$4 sm:$0xff]  }
  0x27   : > { %1195 = vmatpush1.bf16.msra.mxu1 %v1765_v16  ;;  %1155 = vmatprep.subr.bf16.mxu0 %v1766_v17  ;;  %v1807_v44 = vld [vmem:[%s2045_s25 + $0x1a0] ss:$8 sps:$4 sm:$0xff]   ;;  %v1810_v46 = vld [vmem:[%s2045_s25 + $0x1b4] ss:$8 sps:$4 sm:$0xff]   ;;  %v1813_v51 = vld [vmem:[%s2045_s25 + $0x1b0] ss:$8 sps:$4 sm:$0xff]  }
  0x28   : > { %1196 = vmatprep.subr.bf16.mxu1 %v1768_v18  ;;  %v246_v47 = vld [vmem:[%s2040_s21] sm:$0xff]  ;;  %v247_v49 = vld [vmem:[%s2040_s21 + $0x8] sm:$0xff]  ;;  %v1820_v57 = vld [vmem:[%s2045_s25 + $0xd4] ss:$8 sps:$4 sm:$0xff]   ;;  %p1707_p7 = scmp.ne.s32.totalorder %s1981_s12, 1 }
  0x29   : > { %v1555_v48 = vcombine.high %v246_v47, %v246_v47  ;;  %v1557_v52 = vcombine.high %v247_v49, %v247_v49  ;;  %v1814_v53 = vld [vmem:[%s2045_s25 + $0xc4] ss:$8 sps:$4 sm:$0xff]   ;;  %v1818_v55 = vld [vmem:[%s2045_s25 + $0xc0] ss:$8 sps:$4 sm:$0xff]   ;;  %v1822_v58 = vld [vmem:[%s2045_s25 + $0x1d4] ss:$8 sps:$4 sm:$0xff]   ;;  %v1554_v7 = vcombine.low %v246_v47, %v246_v47  ;;  %v1556_v8 = vcombine.low %v247_v49, %v247_v49 }
  0x2a   : > { %1156 = vmatpush1.bf16.msra.mxu0 %v1770_v19  ;;  %v1816_v54 = vld [vmem:[%s2045_s25 + $0x1c4] ss:$8 sps:$4 sm:$0xff]   ;;  %v1819_v56 = vld [vmem:[%s2045_s25 + $0x1c0] ss:$8 sps:$4 sm:$0xff]   ;;  %v1824_v59 = vld [vmem:[%s2045_s25 + $0xd0] ss:$8 sps:$4 sm:$0xff]  }
  0x2b   : > { %1197 = vmatpush1.bf16.msra.mxu1 %v1771_v20  ;;  %1157 = vmatprep.subr.bf16.mxu0 %v1772_v21  ;;  %v1825_v60 = vld [vmem:[%s2045_s25 + $0x1d0] ss:$8 sps:$4 sm:$0xff]   ;;  %v1826_v61 = vld [vmem:[%s2045_s25 + $0xe4] ss:$8 sps:$4 sm:$0xff]   ;;  %v1830_v63 = vld [vmem:[%s2045_s25 + $0xe0] ss:$8 sps:$4 sm:$0xff]  }
  0x2c   : > { %1198 = vmatprep.subr.bf16.mxu1 %v1774_v22  ;;  %1179 = vmatprep.mubr.bf16.mxu0 %v1555_v48  ;;  %v1828_v62 = vld [vmem:[%s2045_s25 + $0x1e4] ss:$8 sps:$4 sm:$0xff]   ;;  %v1831_v0 = vld [vmem:[%s2045_s25 + $0x1e0] ss:$8 sps:$4 sm:$0xff]   ;;  %v1832_v1 = vld [vmem:[%s2045_s25 + $0xf4] ss:$8 sps:$4 sm:$0xff]  }
  0x2d   : > { %1220 = vmatprep.mubr.bf16.mxu1 %v1557_v52  ;;  %v1834_v2 = vld [vmem:[%s2045_s25 + $0x1f4] ss:$8 sps:$4 sm:$0xff]   ;;  %v1836_v3 = vld [vmem:[%s2045_s25 + $0xf0] ss:$8 sps:$4 sm:$0xff]   ;;  %v1844_v5 = vld [vmem:[%s2045_s25 + $0x204] ss:$8 sps:$4 sm:$0xff]  }
  0x2e   : > { %1158 = vmatpush1.bf16.msra.mxu0 %v1776_v23  ;;  %v1837_v4 = vld [vmem:[%s2045_s25 + $0x1f0] ss:$8 sps:$4 sm:$0xff]   ;;  %v1847_v6 = vld [vmem:[%s2045_s25 + $0x304] ss:$8 sps:$4 sm:$0xff]   ;;  %v1842_v9 = vld [vmem:[%s2045_s25 + $0x200] ss:$8 sps:$4 sm:$0xff]  }
  0x2f   : > { %1199 = vmatpush1.bf16.msra.mxu1 %v1777_v24  ;;  %1159 = vmatprep.subr.bf16.mxu0 %v1778_v25  ;;  %v1845_v10 = vld [vmem:[%s2045_s25 + $0x300] ss:$8 sps:$4 sm:$0xff]   ;;  %v1850_v11 = vld [vmem:[%s2045_s25 + $0x214] ss:$8 sps:$4 sm:$0xff]   ;;  %v1848_v13 = vld [vmem:[%s2045_s25 + $0x210] ss:$8 sps:$4 sm:$0xff]  }
  0x30   : > { %1200 = vmatprep.subr.bf16.mxu1 %v1780_v26  ;;  %v1853_v12 = vld [vmem:[%s2045_s25 + $0x314] ss:$8 sps:$4 sm:$0xff]   ;;  %v1851_v14 = vld [vmem:[%s2045_s25 + $0x310] ss:$8 sps:$4 sm:$0xff]   ;;  %v1856_v15 = vld [vmem:[%s2045_s25 + $0x224] ss:$8 sps:$4 sm:$0xff]  }
  0x31   : > { %v1859_v16 = vld [vmem:[%s2045_s25 + $0x324] ss:$8 sps:$4 sm:$0xff]   ;;  %v1854_v17 = vld [vmem:[%s2045_s25 + $0x220] ss:$8 sps:$4 sm:$0xff]   ;;  %v1862_v19 = vld [vmem:[%s2045_s25 + $0x234] ss:$8 sps:$4 sm:$0xff]  }
  0x32   : > { %1160 = vmatpush1.bf16.msra.mxu0 %v1782_v27  ;;  %v1857_v18 = vld [vmem:[%s2045_s25 + $0x320] ss:$8 sps:$4 sm:$0xff]   ;;  %v1865_v20 = vld [vmem:[%s2045_s25 + $0x334] ss:$8 sps:$4 sm:$0xff]   ;;  %v1860_v21 = vld [vmem:[%s2045_s25 + $0x230] ss:$8 sps:$4 sm:$0xff]  }
  0x33   : > { %1201 = vmatpush1.bf16.msra.mxu1 %v1783_v28  ;;  %1161 = vmatprep.subr.bf16.mxu0 %v1784_v29  ;;  %v1863_v22 = vld [vmem:[%s2045_s25 + $0x330] ss:$8 sps:$4 sm:$0xff]   ;;  %v1868_v23 = vld [vmem:[%s2045_s25 + $0x244] ss:$8 sps:$4 sm:$0xff]   ;;  %v1866_v25 = vld [vmem:[%s2045_s25 + $0x240] ss:$8 sps:$4 sm:$0xff]  }
  0x34   : > { %1202 = vmatprep.subr.bf16.mxu1 %v1786_v30  ;;  %v1871_v24 = vld [vmem:[%s2045_s25 + $0x344] ss:$8 sps:$4 sm:$0xff]   ;;  %v1869_v26 = vld [vmem:[%s2045_s25 + $0x340] ss:$8 sps:$4 sm:$0xff]   ;;  %v1874_v27 = vld [vmem:[%s2045_s25 + $0x254] ss:$8 sps:$4 sm:$0xff]  }
  0x35   : > { %v1877_v28 = vld [vmem:[%s2045_s25 + $0x354] ss:$8 sps:$4 sm:$0xff]   ;;  %v1872_v29 = vld [vmem:[%s2045_s25 + $0x250] ss:$8 sps:$4 sm:$0xff]   ;;  %v1907_v52 = vld [vmem:[%s2045_s25 + $0x3a4] ss:$8 sps:$4 sm:$0xff]  }
  0x36   : > { %1162 = vmatpush1.bf16.msra.mxu0 %v1788_v31  ;;  %v1875_v30 = vld [vmem:[%s2045_s25 + $0x350] ss:$8 sps:$4 sm:$0xff]   ;;  %v1880_v31 = vld [vmem:[%s2045_s25 + $0x264] ss:$8 sps:$4 sm:$0xff]   ;;  %v1898_v47 = vld [vmem:[%s2045_s25 + $0x294] ss:$8 sps:$4 sm:$0xff]  }
  0x37   : > { %1203 = vmatpush1.bf16.msra.mxu1 %v1789_v32  ;;  %1163 = vmatprep.subr.bf16.mxu0 %v1790_v33  ;;  %v1883_v32 = vld [vmem:[%s2045_s25 + $0x364] ss:$8 sps:$4 sm:$0xff]   ;;  %v2141_v33 = vld [vmem:[%s2040_s21 + $0x10] sm:$0xff] }
  0x38   : > { %1204 = vmatprep.subr.bf16.mxu1 %v1792_v34  ;;  %v1878_v34 = vld [vmem:[%s2045_s25 + $0x260] ss:$8 sps:$4 sm:$0xff]   ;;  %v1901_v48 = vld [vmem:[%s2045_s25 + $0x394] ss:$8 sps:$4 sm:$0xff]   ;;  %v1896_v49 = vld [vmem:[%s2045_s25 + $0x290] ss:$8 sps:$4 sm:$0xff]  }
  0x3a   : > { %1164 = vmatpush1.bf16.msra.mxu0 %v1794_v35  ;;  %v1881_v35 = vld [vmem:[%s2045_s25 + $0x360] ss:$8 sps:$4 sm:$0xff]  }
  0x3b   : > { %1205 = vmatpush1.bf16.msra.mxu1 %v1795_v36  ;;  %1165 = vmatprep.subr.bf16.mxu0 %v1796_v37  ;;  %v1559_v36 = vcombine.high %v2141_v33, %v2141_v33  ;;  %v2148_v37 = vld [vmem:[%s2040_s21 + $0x18] sm:$0xff] }
  0x3c   : > { %1206 = vmatprep.subr.bf16.mxu1 %v1798_v38  ;;  %v1886_v38 = vld [vmem:[%s2045_s25 + $0x274] ss:$8 sps:$4 sm:$0xff]  }
  0x3e   : > { %1166 = vmatpush1.bf16.msra.mxu0 %v1800_v39  ;;  %v1561_v39 = vcombine.high %v2148_v37, %v2148_v37 }
  0x3f   : > { %1207 = vmatpush1.bf16.msra.mxu1 %v1801_v40  ;;  %1167 = vmatprep.subr.bf16.mxu0 %v1802_v41  ;;  %v1889_v40 = vld [vmem:[%s2045_s25 + $0x374] ss:$8 sps:$4 sm:$0xff]   ;;  %v1884_v41 = vld [vmem:[%s2045_s25 + $0x270] ss:$8 sps:$4 sm:$0xff]  }
  0x40   : > { %1208 = vmatprep.subr.bf16.mxu1 %v1804_v42  ;;  %v1887_v42 = vld [vmem:[%s2045_s25 + $0x370] ss:$8 sps:$4 sm:$0xff]  }
  0x42   : > { %1168 = vmatpush1.bf16.msra.mxu0 %v1806_v43  ;;  %v1892_v43 = vld [vmem:[%s2045_s25 + $0x284] ss:$8 sps:$4 sm:$0xff]  }
  0x43   : > { %1209 = vmatpush1.bf16.msra.mxu1 %v1807_v44  ;;  %1169 = vmatprep.subr.bf16.mxu0 %v1808_v45  ;;  %v1895_v44 = vld [vmem:[%s2045_s25 + $0x384] ss:$8 sps:$4 sm:$0xff]   ;;  %v1890_v45 = vld [vmem:[%s2045_s25 + $0x280] ss:$8 sps:$4 sm:$0xff]  }
  0x44   : > { %1210 = vmatprep.subr.bf16.mxu1 %v1810_v46  ;;  %v1893_v46 = vld [vmem:[%s2045_s25 + $0x380] ss:$8 sps:$4 sm:$0xff]  }
  0x46   : > { %1170 = vmatpush1.bf16.msra.mxu0 %v1812_v50  ;;  %v1899_v50 = vld [vmem:[%s2045_s25 + $0x390] ss:$8 sps:$4 sm:$0xff]  }
  0x47   : > { %1211 = vmatpush1.bf16.msra.mxu1 %v1813_v51  ;;  %1171 = vmatprep.subr.bf16.mxu0 %v1814_v53  ;;  %v1904_v51 = vld [vmem:[%s2045_s25 + $0x2a4] ss:$8 sps:$4 sm:$0xff]   ;;  %v1902_v53 = vld [vmem:[%s2045_s25 + $0x2a0] ss:$8 sps:$4 sm:$0xff]  }
  0x48   : > { %1212 = vmatprep.subr.bf16.mxu1 %v1816_v54  ;;  %v1905_v54 = vld [vmem:[%s2045_s25 + $0x3a0] ss:$8 sps:$4 sm:$0xff]  }
  0x4a   : > { %1172 = vmatpush1.bf16.msra.mxu0 %v1818_v55  ;;  %v1910_v55 = vld [vmem:[%s2045_s25 + $0x2b4] ss:$8 sps:$4 sm:$0xff]  }
  0x4b   : > { %1213 = vmatpush1.bf16.msra.mxu1 %v1819_v56  ;;  %1173 = vmatprep.subr.bf16.mxu0 %v1820_v57  ;;  %v1913_v56 = vld [vmem:[%s2045_s25 + $0x3b4] ss:$8 sps:$4 sm:$0xff]   ;;  %v1908_v57 = vld [vmem:[%s2045_s25 + $0x2b0] ss:$8 sps:$4 sm:$0xff]  }
  0x4c   : > { %1214 = vmatprep.subr.bf16.mxu1 %v1822_v58  ;;  %v1911_v58 = vld [vmem:[%s2045_s25 + $0x3b0] ss:$8 sps:$4 sm:$0xff]  }
  0x4e   : > { %1174 = vmatpush1.bf16.msra.mxu0 %v1824_v59  ;;  %v1916_v59 = vld [vmem:[%s2045_s25 + $0x2c4] ss:$8 sps:$4 sm:$0xff]  }
  0x4f   : > { %1215 = vmatpush1.bf16.msra.mxu1 %v1825_v60  ;;  %1175 = vmatprep.subr.bf16.mxu0 %v1826_v61  ;;  %v1919_v60 = vld [vmem:[%s2045_s25 + $0x3c4] ss:$8 sps:$4 sm:$0xff]   ;;  %v1914_v61 = vld [vmem:[%s2045_s25 + $0x2c0] ss:$8 sps:$4 sm:$0xff]  }
  0x50   : > { %1216 = vmatprep.subr.bf16.mxu1 %v1828_v62  ;;  %v1917_v62 = vld [vmem:[%s2045_s25 + $0x3c0] ss:$8 sps:$4 sm:$0xff]  }
  0x52   : > { %1176 = vmatpush1.bf16.msra.mxu0 %v1830_v63  ;;  %v1922_v63 = vld [vmem:[%s2045_s25 + $0x2d4] ss:$8 sps:$4 sm:$0xff]  }
  0x53   : > { %1217 = vmatpush1.bf16.msra.mxu1 %v1831_v0  ;;  %1177 = vmatprep.subr.bf16.mxu0 %v1832_v1  ;;  %v1925_v0 = vld [vmem:[%s2045_s25 + $0x3d4] ss:$8 sps:$4 sm:$0xff]   ;;  %v1920_v1 = vld [vmem:[%s2045_s25 + $0x2d0] ss:$8 sps:$4 sm:$0xff]  }
  0x54   : > { %1218 = vmatprep.subr.bf16.mxu1 %v1834_v2  ;;  %v1923_v2 = vld [vmem:[%s2045_s25 + $0x3d0] ss:$8 sps:$4 sm:$0xff]  }
  0x56   : > { %1178 = vmatpush1.bf16.msra.mxu0 %v1836_v3  ;;  %v1928_v3 = vld [vmem:[%s2045_s25 + $0x2e4] ss:$8 sps:$4 sm:$0xff]  }
  0x57   : > { %1219 = vmatpush1.bf16.msra.mxu1 %v1837_v4  ;;  %1229 = vmatprep.subr.bf16.mxu0 %v1844_v5  ;;  %v1931_v4 = vld [vmem:[%s2045_s25 + $0x3e4] ss:$8 sps:$4 sm:$0xff]   ;;  %v1926_v5 = vld [vmem:[%s2045_s25 + $0x2e0] ss:$8 sps:$4 sm:$0xff]  }
  0x58   : > { %1270 = vmatprep.subr.bf16.mxu1 %v1847_v6  ;;  %v1929_v6 = vld [vmem:[%s2045_s25 + $0x3e0] ss:$8 sps:$4 sm:$0xff]  }
  0x59   : > { %1180 = vmatmul.mubr.bf16.vlgmr.msra.gmra.mrb[0].mxu0 %v1554_v7  ;;  %v1934_v7 = vld [vmem:[%s2045_s25 + $0x2f4] ss:$8 sps:$4 sm:$0xff]  }
  0x5a   : > { %1221 = vmatmul.mubr.bf16.vlgmr.msra.gmra.mrb[0].mxu1 %v1556_v8  ;;  %1230 = vmatpush1.bf16.msra.mxu0 %v1842_v9  ;;  %v1937_v8 = vld [vmem:[%s2045_s25 + $0x3f4] ss:$8 sps:$4 sm:$0xff]   ;;  %v1932_v9 = vld [vmem:[%s2045_s25 + $0x2f0] ss:$8 sps:$4 sm:$0xff]  }
  0x5b   : > { %1271 = vmatpush1.bf16.msra.mxu1 %v1845_v10  ;;  %1231 = vmatprep.subr.bf16.mxu0 %v1850_v11  ;;  %v1935_v10 = vld [vmem:[%s2045_s25 + $0x3f0] ss:$8 sps:$4 sm:$0xff]   ;;  %v1942_v11 = vld [vmem:[%s2045_s25 + $0x404] ss:$8 sps:$4 sm:$0xff]  }
  0x5c   : > { %1272 = vmatprep.subr.bf16.mxu1 %v1853_v12  ;;  %1261 = vmatprep.mubr.bf16.mxu0 %v1559_v36  ;;  %v1558_v12 = vcombine.low %v2141_v33, %v2141_v33 }
  0x5d   : > { %1302 = vmatprep.mubr.bf16.mxu1 %v1561_v39 }
  0x5e   : > { %1232 = vmatpush1.bf16.msra.mxu0 %v1848_v13  ;;  %v1560_v13 = vcombine.low %v2148_v37, %v2148_v37 }
  0x5f   : > { %1273 = vmatpush1.bf16.msra.mxu1 %v1851_v14  ;;  %1233 = vmatprep.subr.bf16.mxu0 %v1856_v15  ;;  %v1940_v14 = vld [vmem:[%s2045_s25 + $0x400] ss:$8 sps:$4 sm:$0xff]   ;;  %v1947_v15 = vld [vmem:[%s2045_s25 + $0x414] ss:$8 sps:$4 sm:$0xff]  }
  0x60   : > { %1274 = vmatprep.subr.bf16.mxu1 %v1859_v16  ;;  %v1945_v16 = vld [vmem:[%s2045_s25 + $0x410] ss:$8 sps:$4 sm:$0xff]  }
  0x62   : > { %1234 = vmatpush1.bf16.msra.mxu0 %v1854_v17  ;;  %v1992_v17 = vmov 0  }
  0x63   : > { %1275 = vmatpush1.bf16.msra.mxu1 %v1857_v18  ;;  %1235 = vmatprep.subr.bf16.mxu0 %v1862_v19  ;;  %v1950_v18 = vld [vmem:[%s2045_s25 + $0x424] ss:$8 sps:$4 sm:$0xff]   ;;  %v1948_v19 = vld [vmem:[%s2045_s25 + $0x420] ss:$8 sps:$4 sm:$0xff]  }
  0x64   : > { %1276 = vmatprep.subr.bf16.mxu1 %v1865_v20  ;;  %v1953_v20 = vld [vmem:[%s2045_s25 + $0x434] ss:$8 sps:$4 sm:$0xff]  }
  0x66   : > { %1236 = vmatpush1.bf16.msra.mxu0 %v1860_v21  ;;  %v1951_v21 = vld [vmem:[%s2045_s25 + $0x430] ss:$8 sps:$4 sm:$0xff]  }
  0x67   : > { %1277 = vmatpush1.bf16.msra.mxu1 %v1863_v22  ;;  %1237 = vmatprep.subr.bf16.mxu0 %v1868_v23  ;;  %v1956_v22 = vld [vmem:[%s2045_s25 + $0x444] ss:$8 sps:$4 sm:$0xff]   ;;  %v1954_v23 = vld [vmem:[%s2045_s25 + $0x440] ss:$8 sps:$4 sm:$0xff]  }
  0x68   : > { %1278 = vmatprep.subr.bf16.mxu1 %v1871_v24  ;;  %v1959_v24 = vld [vmem:[%s2045_s25 + $0x454] ss:$8 sps:$4 sm:$0xff]  }
  0x6a   : > { %1238 = vmatpush1.bf16.msra.mxu0 %v1866_v25  ;;  %v1957_v25 = vld [vmem:[%s2045_s25 + $0x450] ss:$8 sps:$4 sm:$0xff]  }
  0x6b   : > { %1279 = vmatpush1.bf16.msra.mxu1 %v1869_v26  ;;  %1239 = vmatprep.subr.bf16.mxu0 %v1874_v27  ;;  %v1962_v26 = vld [vmem:[%s2045_s25 + $0x464] ss:$8 sps:$4 sm:$0xff]   ;;  %v1960_v27 = vld [vmem:[%s2045_s25 + $0x460] ss:$8 sps:$4 sm:$0xff]  }
  0x6c   : > { %1280 = vmatprep.subr.bf16.mxu1 %v1877_v28  ;;  %v1965_v28 = vld [vmem:[%s2045_s25 + $0x474] ss:$8 sps:$4 sm:$0xff]  }
  0x6e   : > { %1240 = vmatpush1.bf16.msra.mxu0 %v1872_v29  ;;  %v1963_v29 = vld [vmem:[%s2045_s25 + $0x470] ss:$8 sps:$4 sm:$0xff]  }
  0x6f   : > { %1281 = vmatpush1.bf16.msra.mxu1 %v1875_v30  ;;  %1241 = vmatprep.subr.bf16.mxu0 %v1880_v31  ;;  %v1966_v30 = vld [vmem:[%s2040_s21 + $0x20] ss:$0 sps:$4 sm:$0xff]  }
  0x70   : > { %1282 = vmatprep.subr.bf16.mxu1 %v1883_v32 }
  0x72   : > { %1242 = vmatpush1.bf16.msra.mxu0 %v1878_v34 }
  0x73   : > { %1283 = vmatpush1.bf16.msra.mxu1 %v1881_v35  ;;  %1243 = vmatprep.subr.bf16.mxu0 %v1886_v38 }
  0x74   : > { %1284 = vmatprep.subr.bf16.mxu1 %v1889_v40 }
  0x76   : > { %1244 = vmatpush1.bf16.msra.mxu0 %v1884_v41 }
  0x77   : > { %1285 = vmatpush1.bf16.msra.mxu1 %v1887_v42  ;;  %1245 = vmatprep.subr.bf16.mxu0 %v1892_v43 }
  0x78   : > { %1286 = vmatprep.subr.bf16.mxu1 %v1895_v44 }
  0x7a   : > { %1246 = vmatpush1.bf16.msra.mxu0 %v1890_v45 }
  0x7b   : > { %1287 = vmatpush1.bf16.msra.mxu1 %v1893_v46  ;;  %1247 = vmatprep.subr.bf16.mxu0 %v1898_v47 }
  0x7c   : > { %1288 = vmatprep.subr.bf16.mxu1 %v1901_v48 }
  0x7e   : > { %1248 = vmatpush1.bf16.msra.mxu0 %v1896_v49 }
  0x7f   : > { %1289 = vmatpush1.bf16.msra.mxu1 %v1899_v50  ;;  %1249 = vmatprep.subr.bf16.mxu0 %v1904_v51 }
  0x80   : > { %1290 = vmatprep.subr.bf16.mxu1 %v1907_v52 }
  0x82   : > { %1250 = vmatpush1.bf16.msra.mxu0 %v1902_v53  ;;  %v244_v53 = vld [vmem:[#allocation2] sm:$0xff] }
  0x83   : > { %1291 = vmatpush1.bf16.msra.mxu1 %v1905_v54  ;;  %1251 = vmatprep.subr.bf16.mxu0 %v1910_v55 }
  0x84   : > { %1292 = vmatprep.subr.bf16.mxu1 %v1913_v56  ;;  %v245_v56 = vld [vmem:[#allocation2 + $0x8] sm:$0xff] }
  0x86   : > { %1252 = vmatpush1.bf16.msra.mxu0 %v1908_v57 }
  0x87   : > { %1293 = vmatpush1.bf16.msra.mxu1 %v1911_v58  ;;  %1253 = vmatprep.subr.bf16.mxu0 %v1916_v59 }
  0x88   : > { %1294 = vmatprep.subr.bf16.mxu1 %v1919_v60 }
  0x8a   : > { %1254 = vmatpush1.bf16.msra.mxu0 %v1914_v61 }
  0x8b   : > { %1295 = vmatpush1.bf16.msra.mxu1 %v1917_v62  ;;  %1255 = vmatprep.subr.bf16.mxu0 %v1922_v63 }
  0x8c   : > { %1296 = vmatprep.subr.bf16.mxu1 %v1925_v0 }
  0x8e   : > { %1256 = vmatpush1.bf16.msra.mxu0 %v1920_v1  ;;  %v1993_v1 = vmov (!%p1707_p7), 0.0  }
  0x8f   : > { %1297 = vmatpush1.bf16.msra.mxu1 %v1923_v2  ;;  %1257 = vmatprep.subr.bf16.mxu0 %v1928_v3  ;;  %1364 = vst [vmem:[%s2240_s3] sm:$0xff] (!%p1707_p7), %v1993_v1  ;;  %1365 = vst [vmem:[%s2240_s3 + $0x8] sm:$0xff] (!%p1707_p7), %v1993_v1 }
  0x90   : > { %1298 = vmatprep.subr.bf16.mxu1 %v1931_v4 }
  0x92   : > { %1258 = vmatpush1.bf16.msra.mxu0 %v1926_v5 }
  0x93   : > { %1299 = vmatpush1.bf16.msra.mxu1 %v1929_v6  ;;  %1259 = vmatprep.subr.bf16.mxu0 %v1934_v7  ;;  %v1994_v6 = vmov (!%p1707_p7), 1966171168  }
  0x94   : > { %1300 = vmatprep.subr.bf16.mxu1 %v1937_v8  ;;  %v1382_v7 = vunpack.c.l.s4 (!%p1707_p7), %v1994_v6  ;;  %v1384_v8 = vlaneseq (!%p1707_p7) }
  0x96   : > { %1260 = vmatpush1.bf16.msra.mxu0 %v1932_v9  ;;  %vm1398_vm0 = vcmp.lt.s32.totalorder (!%p1707_p7), %v1384_v8, 256 }
  0x97   : > { %1301 = vmatpush1.bf16.msra.mxu1 %v1935_v10  ;;  %1311 = vmatprep.subr.bf16.mxu0 %v1942_v11 }
  0x99   : > { %1262 = vmatmul.mubr.bf16.vlgmr.msra.gmra.mrb[4].mxu0 %v1558_v12 }
  0x9a   : > { %1303 = vmatmul.mubr.bf16.vlgmr.msra.gmra.mrb[4].mxu1 %v1560_v13  ;;  %1312 = vmatpush1.bf16.msra.mxu0 %v1940_v14 }
  0x9b   : > { %1343 = vmatprep.mubr.bf16.mxu0 %v1992_v17  ;;  %1313 = vmatprep.subr.bf16.mxu0 %v1947_v15  ;;  %v1383_v17 = vunpack.c.0.s8 (!%p1707_p7), %v1382_v7 }
  0x9e   : > { %1314 = vmatpush1.bf16.msra.mxu0 %v1945_v16 }
  0x9f   : > { %1315 = vmatprep.subr.bf16.mxu0 %v1950_v18  ;;  %v1385_v18 = vshrl.u32 (!%p1707_p7), %v1384_v8, 7 }
  0xa2   : > { %1316 = vmatpush1.bf16.msra.mxu0 %v1948_v19 }
  0xa3   : > { %1317 = vmatprep.subr.bf16.mxu0 %v1953_v20 }
  0xa6   : > { %1318 = vmatpush1.bf16.msra.mxu0 %v1951_v21 }
  0xa7   : > { %1319 = vmatprep.subr.bf16.mxu0 %v1956_v22 }
  0xaa   : > { %1320 = vmatpush1.bf16.msra.mxu0 %v1954_v23 }
  0xab   : > { %1321 = vmatprep.subr.bf16.mxu0 %v1959_v24 }
  0xae   : > { %1322 = vmatpush1.bf16.msra.mxu0 %v1957_v25 }
  0xaf   : > { %1323 = vmatprep.subr.bf16.mxu0 %v1962_v26 }
  0xb2   : > { %1324 = vmatpush1.bf16.msra.mxu0 %v1960_v27  ;;  %v1386_v27 = vsub.s32 (!%p1707_p7), %v1383_v17, %v1385_v18 }
  0xb3   : > { %1325 = vmatprep.subr.bf16.mxu0 %v1965_v28 }
  0xb6   : > { %1326 = vmatpush1.bf16.msra.mxu0 %v1963_v29 }
  0xb9   : > { %1344 = vmatmul.mubr.bf16.vlgmr.msra.gmra.mrb[8].mxu0 %v1966_v30 }
 0x12c   : > { %v1181_v31 = vpop.f32.mrb[0].mxu0 }
 0x12d   : > { %v1222_v32 = vpop.f32.mrb[0].mxu1  ;;  %v1183_v34 = vpop.f32.mrb[1].mxu0 }
 0x12e   : > { %v1223_v33 = vadd.f32 %v1222_v32, %v1181_v31  ;;  %v1224_v35 = vpop.f32.mrb[1].mxu1  ;;  %v1185_v37 = vpop.f32.mrb[2].mxu0 }
 0x12f   : > { %v1225_v36 = vadd.f32 %v1224_v35, %v1183_v34  ;;  %v1226_v38 = vpop.f32.mrb[2].mxu1  ;;  %v1186_v39 = vpop.f32.mrb[3].mxu0 }
 0x130   : > { %v1227_v40 = vpop.f32.mrb[3].mxu1 }
 0x16c   : > { %v1263_v41 = vpop.f32.mrb[4].mxu0 }
 0x16d   : > { %v1304_v42 = vpop.f32.mrb[4].mxu1  ;;  %v1264_v43 = vadd.f32 %v1263_v41, %v1223_v33  ;;  %v1265_v44 = vpop.f32.mrb[5].mxu0 }
 0x16e   : > { %v1306_v45 = vpop.f32.mrb[5].mxu1  ;;  %v1266_v46 = vadd.f32 %v1265_v44, %v1225_v36  ;;  %v1267_v47 = vpop.f32.mrb[6].mxu0 }
 0x16f   : > { %v1308_v48 = vpop.f32.mrb[6].mxu1  ;;  %v1305_v49 = vadd.f32 %v1304_v42, %v1264_v43  ;;  %v1268_v50 = vpop.f32.mrb[7].mxu0 }
 0x170   : > { %v1309_v51 = vpop.f32.mrb[7].mxu1  ;;  %v1307_v52 = vadd.f32 %v1306_v45, %v1266_v46 }
 0x18c   : > { %v1345_v54 = vpop.f32.mrb[8].mxu0  ;;  %1359 = sbr.rel (%p1707_p7) target bundleno = 431 (0x1af), region = 36 }
 0x18d   : > { %v1346_v55 = vadd.f32 %v1345_v54, %v1305_v49  ;;  %v1347_v57 = vpop.f32.mrb[9].mxu0 }
 0x18e   : > { %v1348_v58 = vadd.f32 %v1347_v57, %v1307_v52  ;;  %v1349_v59 = vpop.f32.mrb[10].mxu0 }
 0x18f   : > { %v1352_v60 = vadd.f32 %v1346_v55, %v244_v53  ;;  %v1350_v61 = vpop.f32.mrb[11].mxu0 }
 0x190   : > { %v1353_v62 = vadd.f32 %v1348_v58, %v245_v56 }
 0x191   : > { %1354 = vst [vmem:[#allocation2] sm:$0xff] %v1352_v60 }
 0x192   : > { %1355 = vst [vmem:[#allocation2 + $0x8] sm:$0xff] %v1353_v62 }
 0x198   : > { %v1360_v63 = vld [vmem:[#allocation2] sm:$0xff] }
 0x199   : > { %v1361_v0 = vld [vmem:[#allocation2 + $0x8] sm:$0xff]  ;;  %1362 = vst [vmem:[%s2239_s2] sm:$0xff] %v1360_v63  ;;  %v1366_v2 = vrot.slane %v1360_v63, 4  ;;  %v1402_v3 = vmul.f32 %v1360_v63, %v1360_v63 }
 0x19a   : > { %1363 = vst [vmem:[%s2239_s2 + $0x8] sm:$0xff] %v1361_v0  ;;  %v1372_v4 = vrot.slane %v1361_v0, 4  ;;  %v1403_v5 = vmul.f32 %v1361_v0, %v1361_v0 }
 0x19b   : > { %v1367_v9 = vadd.f32 %v1366_v2, %v1360_v63  ;;  %v1404_v10 = vrot.slane %v1402_v3, 4 }
 0x19c   : > { %v1373_v11 = vadd.f32 %v1372_v4, %v1361_v0  ;;  %v1410_v12 = vrot.slane %v1403_v5, 4 }
 0x19d   : > { %v1368_v13 = vrot.slane %v1367_v9, 2  ;;  %v1405_v14 = vadd.f32 %v1404_v10, %v1402_v3 }
 0x19e   : > { %v1374_v15 = vrot.slane %v1373_v11, 2  ;;  %v1411_v16 = vadd.f32 %v1410_v12, %v1403_v5 }
 0x19f   : > { %v1369_v19 = vadd.f32 %v1368_v13, %v1367_v9  ;;  %v1406_v20 = vrot.slane %v1405_v14, 2 }
 0x1a0   : > { %v1375_v21 = vadd.f32 %v1374_v15, %v1373_v11  ;;  %v1412_v22 = vrot.slane %v1411_v16, 2 }
 0x1a1   : > { %v1370_v23 = vrot.slane %v1369_v19, 1  ;;  %v1407_v24 = vadd.f32 %v1406_v20, %v1405_v14 }
 0x1a2   : > { %v1376_v25 = vrot.slane %v1375_v21, 1  ;;  %v1413_v26 = vadd.f32 %v1412_v22, %v1411_v16 }
 0x1a3   : > { %v1371_v28 = vadd.f32 %v1370_v23, %v1369_v19  ;;  %v1408_v29 = vrot.slane %v1407_v24, 1 }
 0x1a4   : > { %v1377_v30 = vadd.f32 %v1376_v25, %v1375_v21  ;;  %v1414_v31 = vrot.slane %v1413_v26, 1 }
 0x1a5   : > { %v1409_v33 = vadd.f32 %v1408_v29, %v1407_v24 }
 0x1a6   : > { %v1380_v32 = vcombine.low %v1371_v28, %v1377_v30  ;;  %v1415_v34 = vadd.f32 %v1414_v31, %v1413_v26 }
 0x1a8   : > { %v1387_v35 = vrot.slane %v1380_v32, %v1386_v27  ;;  %v1418_v36 = vcombine.low %v1409_v33, %v1415_v34 }
 0x1aa   : > { %v1394_v37 = vrot.slane %v1387_v35, %v1386_v27  ;;  %v1425_v38 = vrot.slane %v1418_v36, %v1386_v27 }
 0x1ac   : > { %1400 = vst.msk [vmem:[%s2240_s3] ss:$8 sm:$0x3] %vm1398_vm0, %v1394_v37  ;;  %v1432_v39 = vrot.slane %v1425_v38, %v1386_v27 }
 0x1ae   : > { %1708 = vst.msk [vmem:[%s2240_s3 + $0x1] ss:$8 sm:$0x3] %vm1398_vm0, %v1432_v39 }
 0x1af PF: > { %s14_s14 = sadd.s32 1, %s1989_s14   ;;  %s2241_s12 = smov %s1985_s13 }
 0x1b0   : > { %p11_p8 = scmp.ge.s32.totalorder %s14_s14, 4   ;;  %s2242_s13 = smov %s2244_s15 }
 0x1b2   :  { %13 = sbr.rel (!%p11_p8) target bundleno = 2 (0x2), region = 82 }

// kernel: modified_resnet18_forward.74
= control target key start
LH: loop header
LB: loop body
LE: loop exit
PB: predicated region body
PF: predicated region fallthrough
CT: control target
= control target key end

     0   :  { %v198_v28 = vmov 1966171168   ;;  %v71_v30 = vlaneseq  ;;  %s266_s1 = inlined_call_operand.vmem [shape: f32[1,8,512], index: 1, kind: input, shape index: {}]   ;;  %s267_s2 = inlined_call_operand.vmem [shape: f32[1,512], index: 2, kind: input, shape index: {}]   ;;  %s268_s0 = inlined_call_operand.vmem [shape: f32[8,512], index: 0, kind: input, shape index: {}]   ;;  %s269_s3 = inlined_call_operand.vmem [shape: f32[1,512], index: 3, kind: input, shape index: {}]   ;;  %s270_s4 = inlined_call_operand.vmem [shape: f32[8,512], index: 4, kind: output, shape index: {}]  }
   0x1   :  { %v17_v0 = vld [vmem:[%s266_s1] sm:$0xff]  ;;  %v18_v1 = vld [vmem:[%s266_s1 + $0x8] sm:$0xff]  ;;  %v19_v2 = vld [vmem:[%s266_s1 + $0x10] sm:$0xff]  ;;  %v69_v29 = vunpack.c.l.s4 %v198_v28 }
   0x2   :  { %v20_v3 = vld [vmem:[%s266_s1 + $0x18] sm:$0xff]  ;;  %v25_v4 = vmul.f32 0.5, %v17_v0  ;;  %v26_v5 = vmul.f32 0.5, %v18_v1  ;;  %v27_v6 = vmul.f32 0.5, %v19_v2  ;;  %v72_v32 = vshrl.u32 %v71_v30, 7  ;;  %v148_v0 = vld [vmem:[%s268_s0] sm:$0xff] }
   0x3   :  { %v28_v7 = vmul.f32 0.5, %v20_v3  ;;  %v70_v31 = vunpack.c.0.s8 %v69_v29  ;;  %v53_v43 = vld [vmem:[%s267_s2] sm:$0xf]  ;;  %v149_v1 = vld [vmem:[%s268_s0 + $0x8] sm:$0xff]  ;;  %v150_v2 = vld [vmem:[%s268_s0 + $0x10] sm:$0xff] }
   0x4   :  { %v29_v8 = vmul.f32 %v25_v4, %v25_v4  ;;  %v30_v9 = vmul.f32 %v26_v5, %v26_v5  ;;  %v31_v10 = vmul.f32 %v27_v6, %v27_v6  ;;  %v96_v44 = vsub.s32 0, %v72_v32  ;;  %v92_v62 = vld [vmem:[%s269_s3] sm:$0xf]  ;;  %v151_v3 = vld [vmem:[%s268_s0 + $0x18] sm:$0xff] }
   0x5   :  { %v32_v11 = vmul.f32 %v28_v7, %v28_v7  ;;  %v73_v34 = vsub.s32 %v70_v31, %v72_v32  ;;  %v100_v46 = vsub.s32 1, %v72_v32  ;;  %v104_v47 = vsub.s32 2, %v72_v32 }
   0x6   :  { %v37_v12 = vrot.slane %v29_v8, 7  ;;  %v38_v13 = vrot.slane %v30_v9, 7  ;;  %v39_v14 = vrot.slane %v31_v10, 7  ;;  %v108_v48 = vsub.s32 3, %v72_v32 }
   0x7   :  { %v40_v15 = vrot.slane %v32_v11, 7 }
   0x8   :  { %v45_v16 = vsub.f32 %v25_v4, %v37_v12  ;;  %v46_v17 = vsub.f32 %v26_v5, %v38_v13  ;;  %v47_v18 = vsub.f32 %v27_v6, %v39_v14 }
   0x9   :  { %v48_v19 = vsub.f32 %v28_v7, %v40_v15 }
   0xa   :  { %v49_v20 = vmax.f32 %v45_v16, 0.0  ;;  %v50_v21 = vmax.f32 %v46_v17, 0.0  ;;  %v51_v22 = vmax.f32 %v47_v18, 0.0 }
   0xb   :  { %v52_v23 = vmax.f32 %v48_v19, 0.0 }
   0xc   :  { %v54_v24 = vadd.f32 1e-05, %v49_v20  ;;  %v55_v25 = vadd.f32 1e-05, %v50_v21  ;;  %v56_v26 = vadd.f32 1e-05, %v51_v22 }
   0xd   :  { %v57_v27 = vadd.f32 1e-05, %v52_v23 }
   0xe   :  { %190 = vrsqrt.f32 %v54_v24 }
   0xf   :  { %192 = vrsqrt.f32 %v55_v25 }
  0x10   :  { %194 = vrsqrt.f32 %v56_v26 }
  0x11   :  { %196 = vrsqrt.f32 %v57_v27 }
  0x18   :  { %v191_v33 = vpop.eup %190 }
  0x19   :  { %v193_v35 = vpop.eup %192 }
  0x1a   :  { %v195_v36 = vpop.eup %194  ;;  %v66_v37 = vcombine.low %v191_v33, %v193_v35 }
  0x1b   :  { %v197_v38 = vpop.eup %196 }
  0x1c   :  { %v67_v39 = vcombine.low %v195_v36, %v197_v38  ;;  %v74_v40 = vrot.slane %v66_v37, %v73_v34 }
  0x1e   :  { %v81_v41 = vrot.slane %v67_v39, %v73_v34 }
  0x20   :  { %v82_v42 = vcombine.high %v74_v40, %v81_v41 }
  0x22   :  { %v89_v45 = vrot.slane %v82_v42, %v73_v34 }
  0x24   :  { %v91_v49 = vmul.f32 %v89_v45, %v53_v43 }
  0x26   :  { %v97_v50 = vrot.slane %v91_v49, %v96_v44  ;;  %v101_v51 = vrot.slane %v91_v49, %v100_v46  ;;  %v105_v52 = vrot.slane %v91_v49, %v104_v47  ;;  %v109_v53 = vrot.slane %v91_v49, %v108_v48 }
  0x28   :  { %v114_v54 = vmul.f32 %v97_v50, %v25_v4  ;;  %v115_v55 = vmul.f32 %v101_v51, %v26_v5  ;;  %v116_v56 = vmul.f32 %v105_v52, %v27_v6  ;;  %v117_v57 = vmul.f32 %v109_v53, %v28_v7 }
  0x29   :  { %v152_v5 = vmul.f32 %v148_v0, %v97_v50  ;;  %v153_v7 = vmul.f32 %v149_v1, %v101_v51  ;;  %v154_v8 = vmul.f32 %v150_v2, %v105_v52  ;;  %v155_v9 = vmul.f32 %v151_v3, %v109_v53 }
  0x2a   :  { %v122_v58 = vcombine.low %v114_v54, %v115_v55  ;;  %v123_v59 = vcombine.low %v116_v56, %v117_v57 }
  0x2c   :  { %v130_v60 = vrot.slane %v122_v58, %v73_v34  ;;  %v137_v61 = vrot.slane %v123_v59, %v73_v34 }
  0x2e   :  { %v138_v63 = vcombine.low %v130_v60, %v137_v61 }
  0x30   :  { %v145_v4 = vrot.slane %v138_v63, %v73_v34 }
  0x32   :  { %v147_v6 = vsub.f32 %v92_v62, %v145_v4 }
  0x34   :  { %v160_v10 = vrot.slane %v147_v6, %v96_v44  ;;  %v164_v11 = vrot.slane %v147_v6, %v100_v46  ;;  %v168_v12 = vrot.slane %v147_v6, %v104_v47  ;;  %v172_v13 = vrot.slane %v147_v6, %v108_v48 }
  0x36   :  { %v177_v14 = vadd.f32 %v160_v10, %v152_v5  ;;  %v178_v15 = vadd.f32 %v164_v11, %v153_v7  ;;  %v179_v16 = vadd.f32 %v168_v12, %v154_v8  ;;  %v180_v17 = vadd.f32 %v172_v13, %v155_v9 }
  0x38   :  { %181 = vst [vmem:[%s270_s4] sm:$0xff] %v177_v14  ;;  %182 = vst [vmem:[%s270_s4 + $0x8] sm:$0xff] %v178_v15 }
  0x39   :  { %183 = vst [vmem:[%s270_s4 + $0x10] sm:$0xff] %v179_v16  ;;  %184 = vst [vmem:[%s270_s4 + $0x18] sm:$0xff] %v180_v17 }

// kernel: modified_resnet18_forward.73
= control target key start
LH: loop header
LB: loop body
LE: loop exit
PB: predicated region body
PF: predicated region fallthrough
CT: control target
= control target key end

     0   :  { %s1073_s1 = inlined_call_operand.vmem [shape: bf16[256,512], index: 1, kind: input, shape index: {}]   ;;  %s1074_s0 = inlined_call_operand.vmem [shape: bf16[8,256], index: 0, kind: input, shape index: {}]   ;;  %s1075_s3 = inlined_call_operand.vmem [shape: f32[8,512], index: 3, kind: output, shape index: {1}]   ;;  %s1076_s2 = inlined_call_operand.vmem [shape: f32[8,512], index: 2, kind: output, shape index: {0}]  }
   0x1   :  { %v718_v0 = vld [vmem:[%s1073_s1 + $0x4] ss:$16 sps:$4 sm:$0xff]   ;;  %v720_v1 = vld [vmem:[%s1073_s1 + $0xc] ss:$16 sps:$4 sm:$0xff]   ;;  %v722_v2 = vld [vmem:[%s1073_s1] ss:$16 sps:$4 sm:$0xff]  }
   0x2   :  { %417 = vmatprep.subr.bf16.mxu0 %v718_v0  ;;  %v723_v3 = vld [vmem:[%s1073_s1 + $0x8] ss:$16 sps:$4 sm:$0xff]   ;;  %458 = vmatprep.subr.bf16.mxu1 %v720_v1  ;;  %v724_v4 = vld [vmem:[%s1073_s1 + $0x24] ss:$16 sps:$4 sm:$0xff]   ;;  %v726_v5 = vld [vmem:[%s1073_s1 + $0x2c] ss:$16 sps:$4 sm:$0xff]  }
   0x3   :  { %418 = vmatpush1.bf16.msra.mxu0 %v722_v2  ;;  %459 = vmatpush1.bf16.msra.mxu1 %v723_v3  ;;  %v728_v6 = vld [vmem:[%s1073_s1 + $0x20] ss:$16 sps:$4 sm:$0xff]   ;;  %v729_v7 = vld [vmem:[%s1073_s1 + $0x28] ss:$16 sps:$4 sm:$0xff]   ;;  %v730_v8 = vld [vmem:[%s1073_s1 + $0x44] ss:$16 sps:$4 sm:$0xff]  }
   0x4   :  { %419 = vmatprep.subr.bf16.mxu0 %v724_v4  ;;  %460 = vmatprep.subr.bf16.mxu1 %v726_v5  ;;  %v732_v9 = vld [vmem:[%s1073_s1 + $0x4c] ss:$16 sps:$4 sm:$0xff]   ;;  %v734_v10 = vld [vmem:[%s1073_s1 + $0x40] ss:$16 sps:$4 sm:$0xff]   ;;  %v735_v11 = vld [vmem:[%s1073_s1 + $0x48] ss:$16 sps:$4 sm:$0xff]  }
   0x5   :  { %v736_v12 = vld [vmem:[%s1073_s1 + $0x64] ss:$16 sps:$4 sm:$0xff]   ;;  %v738_v13 = vld [vmem:[%s1073_s1 + $0x6c] ss:$16 sps:$4 sm:$0xff]   ;;  %v740_v14 = vld [vmem:[%s1073_s1 + $0x60] ss:$16 sps:$4 sm:$0xff]  }
   0x6   :  { %v741_v15 = vld [vmem:[%s1073_s1 + $0x68] ss:$16 sps:$4 sm:$0xff]   ;;  %v742_v16 = vld [vmem:[%s1073_s1 + $0x84] ss:$16 sps:$4 sm:$0xff]   ;;  %v744_v17 = vld [vmem:[%s1073_s1 + $0x8c] ss:$16 sps:$4 sm:$0xff]  }
   0x7   :  { %420 = vmatpush1.bf16.msra.mxu0 %v728_v6  ;;  %461 = vmatpush1.bf16.msra.mxu1 %v729_v7  ;;  %v746_v18 = vld [vmem:[%s1073_s1 + $0x80] ss:$16 sps:$4 sm:$0xff]   ;;  %v747_v19 = vld [vmem:[%s1073_s1 + $0x88] ss:$16 sps:$4 sm:$0xff]   ;;  %v748_v20 = vld [vmem:[%s1073_s1 + $0xa4] ss:$16 sps:$4 sm:$0xff]   ;;  %v555_v6 = vlaneseq }
   0x8   :  { %421 = vmatprep.subr.bf16.mxu0 %v730_v8  ;;  %462 = vmatprep.subr.bf16.mxu1 %v732_v9  ;;  %v750_v21 = vld [vmem:[%s1073_s1 + $0xac] ss:$16 sps:$4 sm:$0xff]   ;;  %v752_v22 = vld [vmem:[%s1073_s1 + $0xa0] ss:$16 sps:$4 sm:$0xff]   ;;  %v753_v23 = vld [vmem:[%s1073_s1 + $0xa8] ss:$16 sps:$4 sm:$0xff]  }
   0x9   :  { %v754_v24 = vld [vmem:[%s1073_s1 + $0xc4] ss:$16 sps:$4 sm:$0xff]   ;;  %v756_v25 = vld [vmem:[%s1073_s1 + $0xcc] ss:$16 sps:$4 sm:$0xff]   ;;  %v758_v26 = vld [vmem:[%s1073_s1 + $0xc0] ss:$16 sps:$4 sm:$0xff]  }
   0xa   :  { %v759_v27 = vld [vmem:[%s1073_s1 + $0xc8] ss:$16 sps:$4 sm:$0xff]   ;;  %v760_v28 = vld [vmem:[%s1073_s1 + $0xe4] ss:$16 sps:$4 sm:$0xff]   ;;  %v762_v29 = vld [vmem:[%s1073_s1 + $0xec] ss:$16 sps:$4 sm:$0xff]  }
   0xb   :  { %422 = vmatpush1.bf16.msra.mxu0 %v734_v10  ;;  %463 = vmatpush1.bf16.msra.mxu1 %v735_v11  ;;  %v764_v30 = vld [vmem:[%s1073_s1 + $0xe0] ss:$16 sps:$4 sm:$0xff]   ;;  %v765_v31 = vld [vmem:[%s1073_s1 + $0xe8] ss:$16 sps:$4 sm:$0xff]   ;;  %v766_v32 = vld [vmem:[%s1073_s1 + $0x104] ss:$16 sps:$4 sm:$0xff]  }
   0xc   :  { %423 = vmatprep.subr.bf16.mxu0 %v736_v12  ;;  %464 = vmatprep.subr.bf16.mxu1 %v738_v13  ;;  %v768_v33 = vld [vmem:[%s1073_s1 + $0x10c] ss:$16 sps:$4 sm:$0xff]   ;;  %v770_v34 = vld [vmem:[%s1073_s1 + $0x100] ss:$16 sps:$4 sm:$0xff]   ;;  %v771_v35 = vld [vmem:[%s1073_s1 + $0x108] ss:$16 sps:$4 sm:$0xff]  }
   0xd   :  { %v772_v36 = vld [vmem:[%s1073_s1 + $0x124] ss:$16 sps:$4 sm:$0xff]   ;;  %v774_v37 = vld [vmem:[%s1073_s1 + $0x12c] ss:$16 sps:$4 sm:$0xff]   ;;  %v776_v38 = vld [vmem:[%s1073_s1 + $0x120] ss:$16 sps:$4 sm:$0xff]  }
   0xe   :  { %v777_v39 = vld [vmem:[%s1073_s1 + $0x128] ss:$16 sps:$4 sm:$0xff]   ;;  %v778_v40 = vld [vmem:[%s1073_s1 + $0x144] ss:$16 sps:$4 sm:$0xff]   ;;  %v780_v41 = vld [vmem:[%s1073_s1 + $0x14c] ss:$16 sps:$4 sm:$0xff]  }
   0xf   :  { %424 = vmatpush1.bf16.msra.mxu0 %v740_v14  ;;  %465 = vmatpush1.bf16.msra.mxu1 %v741_v15  ;;  %v782_v42 = vld [vmem:[%s1073_s1 + $0x140] ss:$16 sps:$4 sm:$0xff]   ;;  %v783_v43 = vld [vmem:[%s1073_s1 + $0x148] ss:$16 sps:$4 sm:$0xff]   ;;  %v784_v44 = vld [vmem:[%s1073_s1 + $0x164] ss:$16 sps:$4 sm:$0xff]  }
  0x10   :  { %425 = vmatprep.subr.bf16.mxu0 %v742_v16  ;;  %466 = vmatprep.subr.bf16.mxu1 %v744_v17  ;;  %v786_v45 = vld [vmem:[%s1073_s1 + $0x16c] ss:$16 sps:$4 sm:$0xff]   ;;  %v25_v46 = vld [vmem:[%s1074_s0] sm:$0xff]  ;;  %v789_v49 = vld [vmem:[%s1073_s1 + $0x168] ss:$16 sps:$4 sm:$0xff]   ;;  %v816_v3 = vmov 0.0  }
  0x11   :  { %v650_v47 = vcombine.high %v25_v46, %v25_v46  ;;  %v788_v48 = vld [vmem:[%s1073_s1 + $0x160] ss:$16 sps:$4 sm:$0xff]   ;;  %v790_v50 = vld [vmem:[%s1073_s1 + $0x184] ss:$16 sps:$4 sm:$0xff]   ;;  %v792_v51 = vld [vmem:[%s1073_s1 + $0x18c] ss:$16 sps:$4 sm:$0xff]   ;;  %v649_v2 = vcombine.low %v25_v46, %v25_v46  ;;  %518 = vst [vmem:[%s1075_s3] sm:$0xff] %v816_v3 }
  0x12   :  { %v794_v52 = vld [vmem:[%s1073_s1 + $0x180] ss:$16 sps:$4 sm:$0xff]   ;;  %v795_v53 = vld [vmem:[%s1073_s1 + $0x188] ss:$16 sps:$4 sm:$0xff]   ;;  %v796_v54 = vld [vmem:[%s1073_s1 + $0x1a4] ss:$16 sps:$4 sm:$0xff]  }
  0x13   :  { %426 = vmatpush1.bf16.msra.mxu0 %v746_v18  ;;  %467 = vmatpush1.bf16.msra.mxu1 %v747_v19  ;;  %v798_v55 = vld [vmem:[%s1073_s1 + $0x1ac] ss:$16 sps:$4 sm:$0xff]   ;;  %v800_v56 = vld [vmem:[%s1073_s1 + $0x1a0] ss:$16 sps:$4 sm:$0xff]   ;;  %v801_v57 = vld [vmem:[%s1073_s1 + $0x1a8] ss:$16 sps:$4 sm:$0xff]  }
  0x14   :  { %427 = vmatprep.subr.bf16.mxu0 %v748_v20  ;;  %468 = vmatprep.subr.bf16.mxu1 %v750_v21  ;;  %v802_v58 = vld [vmem:[%s1073_s1 + $0x1c4] ss:$16 sps:$4 sm:$0xff]   ;;  %v804_v59 = vld [vmem:[%s1073_s1 + $0x1cc] ss:$16 sps:$4 sm:$0xff]   ;;  %v806_v60 = vld [vmem:[%s1073_s1 + $0x1c0] ss:$16 sps:$4 sm:$0xff]  }
  0x15   :  { %449 = vmatprep.mubr.bf16.mxu0 %v650_v47  ;;  %490 = vmatprep.mubr.bf16.mxu1 %v650_v47  ;;  %v807_v61 = vld [vmem:[%s1073_s1 + $0x1c8] ss:$16 sps:$4 sm:$0xff]   ;;  %v808_v62 = vld [vmem:[%s1073_s1 + $0x1e4] ss:$16 sps:$4 sm:$0xff]   ;;  %v810_v63 = vld [vmem:[%s1073_s1 + $0x1ec] ss:$16 sps:$4 sm:$0xff]  }
  0x16   :  { %v812_v0 = vld [vmem:[%s1073_s1 + $0x1e0] ss:$16 sps:$4 sm:$0xff]   ;;  %v813_v1 = vld [vmem:[%s1073_s1 + $0x1e8] ss:$16 sps:$4 sm:$0xff]   ;;  %519 = vst [vmem:[%s1075_s3 + $0x8] sm:$0xff] %v816_v3  ;;  %520 = vst [vmem:[%s1075_s3 + $0x10] sm:$0xff] %v816_v3 }
  0x17   :  { %428 = vmatpush1.bf16.msra.mxu0 %v752_v22  ;;  %469 = vmatpush1.bf16.msra.mxu1 %v753_v23  ;;  %521 = vst [vmem:[%s1075_s3 + $0x18] sm:$0xff] %v816_v3  ;;  %v817_v4 = vmov 1966171168   ;;  %v556_v8 = vshrl.u32 %v555_v6, 7  ;;  %vm577_vm0 = vcmp.lt.s32.totalorder %v555_v6, 512 }
  0x18   :  { %429 = vmatprep.subr.bf16.mxu0 %v754_v24  ;;  %470 = vmatprep.subr.bf16.mxu1 %v756_v25  ;;  %v553_v5 = vunpack.c.l.s4 %v817_v4 }
  0x1a   :  { %v554_v7 = vunpack.c.0.s8 %v553_v5 }
  0x1b   :  { %430 = vmatpush1.bf16.msra.mxu0 %v758_v26  ;;  %471 = vmatpush1.bf16.msra.mxu1 %v759_v27 }
  0x1c   :  { %431 = vmatprep.subr.bf16.mxu0 %v760_v28  ;;  %472 = vmatprep.subr.bf16.mxu1 %v762_v29  ;;  %v1046_v11 = vsub.s32 %v554_v7, %v556_v8 }
  0x1f   :  { %432 = vmatpush1.bf16.msra.mxu0 %v764_v30  ;;  %473 = vmatpush1.bf16.msra.mxu1 %v765_v31 }
  0x20   :  { %433 = vmatprep.subr.bf16.mxu0 %v766_v32  ;;  %474 = vmatprep.subr.bf16.mxu1 %v768_v33 }
  0x23   :  { %434 = vmatpush1.bf16.msra.mxu0 %v770_v34  ;;  %475 = vmatpush1.bf16.msra.mxu1 %v771_v35 }
  0x24   :  { %435 = vmatprep.subr.bf16.mxu0 %v772_v36  ;;  %476 = vmatprep.subr.bf16.mxu1 %v774_v37 }
  0x27   :  { %436 = vmatpush1.bf16.msra.mxu0 %v776_v38  ;;  %477 = vmatpush1.bf16.msra.mxu1 %v777_v39 }
  0x28   :  { %437 = vmatprep.subr.bf16.mxu0 %v778_v40  ;;  %478 = vmatprep.subr.bf16.mxu1 %v780_v41 }
  0x2b   :  { %438 = vmatpush1.bf16.msra.mxu0 %v782_v42  ;;  %479 = vmatpush1.bf16.msra.mxu1 %v783_v43 }
  0x2c   :  { %439 = vmatprep.subr.bf16.mxu0 %v784_v44  ;;  %480 = vmatprep.subr.bf16.mxu1 %v786_v45 }
  0x2f   :  { %440 = vmatpush1.bf16.msra.mxu0 %v788_v48  ;;  %481 = vmatpush1.bf16.msra.mxu1 %v789_v49 }
  0x30   :  { %441 = vmatprep.subr.bf16.mxu0 %v790_v50  ;;  %482 = vmatprep.subr.bf16.mxu1 %v792_v51 }
  0x33   :  { %442 = vmatpush1.bf16.msra.mxu0 %v794_v52  ;;  %483 = vmatpush1.bf16.msra.mxu1 %v795_v53 }
  0x34   :  { %443 = vmatprep.subr.bf16.mxu0 %v796_v54  ;;  %484 = vmatprep.subr.bf16.mxu1 %v798_v55 }
  0x37   :  { %444 = vmatpush1.bf16.msra.mxu0 %v800_v56  ;;  %485 = vmatpush1.bf16.msra.mxu1 %v801_v57 }
  0x38   :  { %445 = vmatprep.subr.bf16.mxu0 %v802_v58  ;;  %486 = vmatprep.subr.bf16.mxu1 %v804_v59 }
  0x3b   :  { %446 = vmatpush1.bf16.msra.mxu0 %v806_v60  ;;  %487 = vmatpush1.bf16.msra.mxu1 %v807_v61 }
  0x3c   :  { %447 = vmatprep.subr.bf16.mxu0 %v808_v62  ;;  %488 = vmatprep.subr.bf16.mxu1 %v810_v63 }
  0x3f   :  { %448 = vmatpush1.bf16.msra.mxu0 %v812_v0  ;;  %489 = vmatpush1.bf16.msra.mxu1 %v813_v1 }
  0x42   :  { %450 = vmatmul.mubr.bf16.vlgmr.msra.gmra.mrb[0].mxu0 %v649_v2  ;;  %491 = vmatmul.mubr.bf16.vlgmr.msra.gmra.mrb[0].mxu1 %v649_v2 }
 0x115   :  { %v451_v9 = vpop.f32.mrb[0].mxu0  ;;  %v492_v10 = vpop.f32.mrb[0].mxu1 }
 0x116   :  { %514 = vst [vmem:[%s1076_s2] sm:$0xff] %v451_v9  ;;  %v522_v12 = vrot.slane %v451_v9, 4  ;;  %v581_v13 = vmul.f32 %v451_v9, %v451_v9  ;;  %516 = vst [vmem:[%s1076_s2 + $0x10] sm:$0xff] %v492_v10  ;;  %v534_v14 = vrot.slane %v492_v10, 4  ;;  %v583_v15 = vmul.f32 %v492_v10, %v492_v10  ;;  %v453_v16 = vpop.f32.mrb[1].mxu0  ;;  %v494_v17 = vpop.f32.mrb[1].mxu1 }
 0x117   :  { %515 = vst [vmem:[%s1076_s2 + $0x8] sm:$0xff] %v453_v16  ;;  %v528_v18 = vrot.slane %v453_v16, 4  ;;  %v582_v19 = vmul.f32 %v453_v16, %v453_v16  ;;  %517 = vst [vmem:[%s1076_s2 + $0x18] sm:$0xff] %v494_v17  ;;  %v540_v20 = vrot.slane %v494_v17, 4  ;;  %v584_v21 = vmul.f32 %v494_v17, %v494_v17  ;;  %v455_v22 = vpop.f32.mrb[2].mxu0  ;;  %v496_v23 = vpop.f32.mrb[2].mxu1 }
 0x118   :  { %v523_v24 = vadd.f32 %v522_v12, %v451_v9  ;;  %v585_v25 = vrot.slane %v581_v13, 4  ;;  %v535_v26 = vadd.f32 %v534_v14, %v492_v10  ;;  %v597_v27 = vrot.slane %v583_v15, 4  ;;  %v456_v28 = vpop.f32.mrb[3].mxu0  ;;  %v497_v29 = vpop.f32.mrb[3].mxu1 }
 0x119   :  { %v529_v30 = vadd.f32 %v528_v18, %v453_v16  ;;  %v591_v31 = vrot.slane %v582_v19, 4  ;;  %v541_v32 = vadd.f32 %v540_v20, %v494_v17  ;;  %v603_v33 = vrot.slane %v584_v21, 4 }
 0x11a   :  { %v524_v34 = vrot.slane %v523_v24, 2  ;;  %v586_v35 = vadd.f32 %v585_v25, %v581_v13  ;;  %v536_v36 = vrot.slane %v535_v26, 2  ;;  %v598_v37 = vadd.f32 %v597_v27, %v583_v15 }
 0x11b   :  { %v530_v38 = vrot.slane %v529_v30, 2  ;;  %v592_v39 = vadd.f32 %v591_v31, %v582_v19  ;;  %v542_v40 = vrot.slane %v541_v32, 2  ;;  %v604_v41 = vadd.f32 %v603_v33, %v584_v21 }
 0x11c   :  { %v525_v42 = vadd.f32 %v524_v34, %v523_v24  ;;  %v587_v43 = vrot.slane %v586_v35, 2  ;;  %v537_v44 = vadd.f32 %v536_v36, %v535_v26  ;;  %v599_v45 = vrot.slane %v598_v37, 2 }
 0x11d   :  { %v531_v46 = vadd.f32 %v530_v38, %v529_v30  ;;  %v593_v47 = vrot.slane %v592_v39, 2  ;;  %v543_v48 = vadd.f32 %v542_v40, %v541_v32  ;;  %v605_v49 = vrot.slane %v604_v41, 2 }
 0x11e   :  { %v526_v50 = vrot.slane %v525_v42, 1  ;;  %v588_v51 = vadd.f32 %v587_v43, %v586_v35  ;;  %v538_v52 = vrot.slane %v537_v44, 1  ;;  %v600_v53 = vadd.f32 %v599_v45, %v598_v37 }
 0x11f   :  { %v532_v54 = vrot.slane %v531_v46, 1  ;;  %v594_v55 = vadd.f32 %v593_v47, %v592_v39  ;;  %v544_v56 = vrot.slane %v543_v48, 1  ;;  %v606_v57 = vadd.f32 %v605_v49, %v604_v41 }
 0x120   :  { %v527_v58 = vadd.f32 %v526_v50, %v525_v42  ;;  %v589_v59 = vrot.slane %v588_v51, 1  ;;  %v539_v60 = vadd.f32 %v538_v52, %v537_v44  ;;  %v601_v61 = vrot.slane %v600_v53, 1 }
 0x121   :  { %v533_v62 = vadd.f32 %v532_v54, %v531_v46  ;;  %v595_v63 = vrot.slane %v594_v55, 1  ;;  %v545_v0 = vadd.f32 %v544_v56, %v543_v48  ;;  %v607_v1 = vrot.slane %v606_v57, 1 }
 0x122   :  { %v590_v2 = vadd.f32 %v589_v59, %v588_v51  ;;  %v602_v3 = vadd.f32 %v601_v61, %v600_v53 }
 0x123   :  { %v550_v4 = vcombine.low %v527_v58, %v533_v62  ;;  %v596_v5 = vadd.f32 %v595_v63, %v594_v55  ;;  %v551_v7 = vcombine.low %v539_v60, %v545_v0  ;;  %v608_v8 = vadd.f32 %v607_v1, %v606_v57 }
 0x125   :  { %v558_v9 = vrot.slane %v550_v4, %v1046_v11  ;;  %v613_v10 = vcombine.low %v590_v2, %v596_v5  ;;  %v565_v12 = vrot.slane %v551_v7, %v1046_v11  ;;  %v614_v13 = vcombine.low %v602_v3, %v608_v8 }
 0x127   :  { %v621_v14 = vrot.slane %v613_v10, %v1046_v11  ;;  %v566_v15 = vcombine.low %v558_v9, %v565_v12  ;;  %v628_v16 = vrot.slane %v614_v13, %v1046_v11 }
 0x129   :  { %v573_v17 = vrot.slane %v566_v15, %v1046_v11  ;;  %v629_v18 = vcombine.low %v621_v14, %v628_v16 }
 0x12b   :  { %579 = vst.msk [vmem:[%s1075_s3] ss:$8 sm:$0xf] %vm577_vm0, %v573_v17  ;;  %v636_v19 = vrot.slane %v629_v18, %v1046_v11 }
 0x12d   :  { %715 = vst.msk [vmem:[%s1075_s3 + $0x1] ss:$8 sm:$0xf] %vm577_vm0, %v636_v19 }

// kernel: modified_resnet18_forward.76
= control target key start
LH: loop header
LB: loop body
LE: loop exit
PB: predicated region body
PF: predicated region fallthrough
CT: control target
= control target key end

     0   :  { %v202_v28 = vmov 1966171168   ;;  %v71_v30 = vlaneseq  ;;  %s270_s1 = inlined_call_operand.vmem [shape: f32[1,8,512], index: 1, kind: input, shape index: {}]   ;;  %s271_s2 = inlined_call_operand.vmem [shape: f32[1,512], index: 2, kind: input, shape index: {}]   ;;  %s272_s0 = inlined_call_operand.vmem [shape: f32[8,512], index: 0, kind: input, shape index: {}]   ;;  %s273_s3 = inlined_call_operand.vmem [shape: f32[1,512], index: 3, kind: input, shape index: {}]   ;;  %s274_s4 = inlined_call_operand.vmem [shape: f32[8,512], index: 4, kind: output, shape index: {}]  }
   0x1   :  { %v17_v0 = vld [vmem:[%s270_s1] sm:$0xff]  ;;  %v18_v1 = vld [vmem:[%s270_s1 + $0x8] sm:$0xff]  ;;  %v19_v2 = vld [vmem:[%s270_s1 + $0x10] sm:$0xff]  ;;  %v69_v29 = vunpack.c.l.s4 %v202_v28 }
   0x2   :  { %v20_v3 = vld [vmem:[%s270_s1 + $0x18] sm:$0xff]  ;;  %v25_v4 = vmul.f32 0.5, %v17_v0  ;;  %v26_v5 = vmul.f32 0.5, %v18_v1  ;;  %v27_v6 = vmul.f32 0.5, %v19_v2  ;;  %v72_v32 = vshrl.u32 %v71_v30, 7  ;;  %v148_v0 = vld [vmem:[%s272_s0] sm:$0xff] }
   0x3   :  { %v28_v7 = vmul.f32 0.5, %v20_v3  ;;  %v70_v31 = vunpack.c.0.s8 %v69_v29  ;;  %v53_v43 = vld [vmem:[%s271_s2] sm:$0xf]  ;;  %v149_v1 = vld [vmem:[%s272_s0 + $0x8] sm:$0xff]  ;;  %v150_v2 = vld [vmem:[%s272_s0 + $0x10] sm:$0xff] }
   0x4   :  { %v29_v8 = vmul.f32 %v25_v4, %v25_v4  ;;  %v30_v9 = vmul.f32 %v26_v5, %v26_v5  ;;  %v31_v10 = vmul.f32 %v27_v6, %v27_v6  ;;  %v96_v44 = vsub.s32 0, %v72_v32  ;;  %v92_v62 = vld [vmem:[%s273_s3] sm:$0xf]  ;;  %v151_v3 = vld [vmem:[%s272_s0 + $0x18] sm:$0xff] }
   0x5   :  { %v32_v11 = vmul.f32 %v28_v7, %v28_v7  ;;  %v73_v34 = vsub.s32 %v70_v31, %v72_v32  ;;  %v100_v46 = vsub.s32 1, %v72_v32  ;;  %v104_v47 = vsub.s32 2, %v72_v32 }
   0x6   :  { %v37_v12 = vrot.slane %v29_v8, 7  ;;  %v38_v13 = vrot.slane %v30_v9, 7  ;;  %v39_v14 = vrot.slane %v31_v10, 7  ;;  %v108_v48 = vsub.s32 3, %v72_v32 }
   0x7   :  { %v40_v15 = vrot.slane %v32_v11, 7 }
   0x8   :  { %v45_v16 = vsub.f32 %v25_v4, %v37_v12  ;;  %v46_v17 = vsub.f32 %v26_v5, %v38_v13  ;;  %v47_v18 = vsub.f32 %v27_v6, %v39_v14 }
   0x9   :  { %v48_v19 = vsub.f32 %v28_v7, %v40_v15 }
   0xa   :  { %v49_v20 = vmax.f32 %v45_v16, 0.0  ;;  %v50_v21 = vmax.f32 %v46_v17, 0.0  ;;  %v51_v22 = vmax.f32 %v47_v18, 0.0 }
   0xb   :  { %v52_v23 = vmax.f32 %v48_v19, 0.0 }
   0xc   :  { %v54_v24 = vadd.f32 1e-05, %v49_v20  ;;  %v55_v25 = vadd.f32 1e-05, %v50_v21  ;;  %v56_v26 = vadd.f32 1e-05, %v51_v22 }
   0xd   :  { %v57_v27 = vadd.f32 1e-05, %v52_v23 }
   0xe   :  { %194 = vrsqrt.f32 %v54_v24 }
   0xf   :  { %196 = vrsqrt.f32 %v55_v25 }
  0x10   :  { %198 = vrsqrt.f32 %v56_v26 }
  0x11   :  { %200 = vrsqrt.f32 %v57_v27 }
  0x18   :  { %v195_v33 = vpop.eup %194 }
  0x19   :  { %v197_v35 = vpop.eup %196 }
  0x1a   :  { %v199_v36 = vpop.eup %198  ;;  %v66_v37 = vcombine.low %v195_v33, %v197_v35 }
  0x1b   :  { %v201_v38 = vpop.eup %200 }
  0x1c   :  { %v67_v39 = vcombine.low %v199_v36, %v201_v38  ;;  %v74_v40 = vrot.slane %v66_v37, %v73_v34 }
  0x1e   :  { %v81_v41 = vrot.slane %v67_v39, %v73_v34 }
  0x20   :  { %v82_v42 = vcombine.high %v74_v40, %v81_v41 }
  0x22   :  { %v89_v45 = vrot.slane %v82_v42, %v73_v34 }
  0x24   :  { %v91_v49 = vmul.f32 %v89_v45, %v53_v43 }
  0x26   :  { %v97_v50 = vrot.slane %v91_v49, %v96_v44  ;;  %v101_v51 = vrot.slane %v91_v49, %v100_v46  ;;  %v105_v52 = vrot.slane %v91_v49, %v104_v47  ;;  %v109_v53 = vrot.slane %v91_v49, %v108_v48 }
  0x28   :  { %v114_v54 = vmul.f32 %v97_v50, %v25_v4  ;;  %v115_v55 = vmul.f32 %v101_v51, %v26_v5  ;;  %v116_v56 = vmul.f32 %v105_v52, %v27_v6  ;;  %v117_v57 = vmul.f32 %v109_v53, %v28_v7 }
  0x29   :  { %v152_v5 = vmul.f32 %v148_v0, %v97_v50  ;;  %v153_v7 = vmul.f32 %v149_v1, %v101_v51  ;;  %v154_v8 = vmul.f32 %v150_v2, %v105_v52  ;;  %v155_v9 = vmul.f32 %v151_v3, %v109_v53 }
  0x2a   :  { %v122_v58 = vcombine.low %v114_v54, %v115_v55  ;;  %v123_v59 = vcombine.low %v116_v56, %v117_v57 }
  0x2c   :  { %v130_v60 = vrot.slane %v122_v58, %v73_v34  ;;  %v137_v61 = vrot.slane %v123_v59, %v73_v34 }
  0x2e   :  { %v138_v63 = vcombine.low %v130_v60, %v137_v61 }
  0x30   :  { %v145_v4 = vrot.slane %v138_v63, %v73_v34 }
  0x32   :  { %v147_v6 = vsub.f32 %v92_v62, %v145_v4 }
  0x34   :  { %v160_v10 = vrot.slane %v147_v6, %v96_v44  ;;  %v164_v11 = vrot.slane %v147_v6, %v100_v46  ;;  %v168_v12 = vrot.slane %v147_v6, %v104_v47  ;;  %v172_v13 = vrot.slane %v147_v6, %v108_v48 }
  0x36   :  { %v177_v14 = vadd.f32 %v160_v10, %v152_v5  ;;  %v178_v15 = vadd.f32 %v164_v11, %v153_v7  ;;  %v179_v16 = vadd.f32 %v168_v12, %v154_v8  ;;  %v180_v17 = vadd.f32 %v172_v13, %v155_v9 }
  0x38   :  { %v181_v18 = vmax.f32 %v177_v14, 0.0  ;;  %v182_v19 = vmax.f32 %v178_v15, 0.0  ;;  %v183_v20 = vmax.f32 %v179_v16, 0.0  ;;  %v184_v21 = vmax.f32 %v180_v17, 0.0 }
  0x3a   :  { %185 = vst [vmem:[%s274_s4] sm:$0xff] %v181_v18  ;;  %186 = vst [vmem:[%s274_s4 + $0x8] sm:$0xff] %v182_v19 }
  0x3b   :  { %187 = vst [vmem:[%s274_s4 + $0x10] sm:$0xff] %v183_v20  ;;  %188 = vst [vmem:[%s274_s4 + $0x18] sm:$0xff] %v184_v21 }

// kernel: modified_resnet18_forward.75
= control target key start
LH: loop header
LB: loop body
LE: loop exit
PB: predicated region body
PF: predicated region fallthrough
CT: control target
= control target key end

     0   :  { %s3506_s12 = smov 0   ;;  %s3508_s13 = smov 0   ;;  %s3924_s0 = inlined_call_operand.vmem [shape: bf16[8,2304], index: 0, kind: input, shape index: {}]   ;;  %s3925_s1 = inlined_call_operand.vmem [shape: bf16[2304,512], index: 1, kind: input, shape index: {}]   ;;  %s3926_s2 = inlined_call_operand.vmem [shape: f32[8,512], index: 2, kind: output, shape index: {0}]   ;;  %s3927_s3 = inlined_call_operand.vmem [shape: f32[8,512], index: 3, kind: output, shape index: {1}]  }
   0x1   :  { %s3510_s14 = smov 0  }
   0x2 LB: > { %s23_s15 = sadd.s32 1, %s3476_s13  ;;  %p2680_p0 = scmp.ge.s32.totalorder %s3480_s14, 1  ;;  %s3480_s14 = sphi %s3510_s14, %s14_s14   ;;  %s3476_s13 = sphi %s3508_s13, %s3929_s13   ;;  %s3472_s12 = sphi %s3506_s12, %s3928_s12  }
   0x3   : > { %p24_p1 = scmp.ge.s32.totalorder %s23_s15, 2  ;;  %p171_p2 = scmp.lt.s32.totalorder %s3480_s14, 3 }
   0x5   : > { %s3931_s15 = smov (%p24_p1, %s23_s15), 0  ;;  %p172_p3 = pnand %p2680_p0, %p171_p2 }
   0x6   : > { %s210_s16 = smul.u32 (!%p172_p3), 9, %s3472_s12  ;;  %p2684_p6 = scmp.ne.s32.totalorder (!%p172_p3), %s3472_s12, 0 }
   0x7   : > { %175 = sbr.rel (%p172_p3) target bundleno = 563 (0x233), region = 28 }
   0x8   : > { %s220_s17 = smul.u32 (!%p172_p3), 144, %s3472_s12  ;;  %p213_p4 = scmp.lt.s32.totalorder (!%p172_p3), %s210_s16, 17 }
   0xa   : > { %p221_p5 = scmp.lt.s32.totalorder (!%p172_p3), %s220_s17, 287 }
   0xe   : > { %s3933_s16 = smov (!%p213_p4, %s210_s16), 17  ;;  %s3935_s17 = smov (!%p221_p5, %s220_s17), 287 }
   0xf   : > { %s2681_s18 = sshll.u32 %s3933_s16, 2  ;;  %s2988_s22 = sshll.u32 %s3935_s17, 4  ;;  %v3482_v0 = vmov (!%p2684_p6), 0.0  }
  0x10   : > { %s3531_s21 = scalar_lea.vmem %s3924_s0, %s2681_s18  ;;  %s3536_s25 = scalar_lea.vmem %s3925_s1, %s2988_s22  ;;  %242 = vst [vmem:[#allocation2] sm:$0xff] (!%p2684_p6), %v3482_v0  ;;  %243 = vst [vmem:[#allocation2 + $0x8] sm:$0xff] (!%p2684_p6), %v3482_v0 }
  0x11   : > { %241 = sbr.rel (%p2684_p6) target bundleno = 24 (0x18), region = 32  ;;  %244 = vst [vmem:[#allocation2 + $0x10] sm:$0xff] (!%p2684_p6), %v3482_v0  ;;  %245 = vst [vmem:[#allocation2 + $0x18] sm:$0xff] (!%p2684_p6), %v3482_v0 }
  0x18 PF: > { %v3017_v1 = vld [vmem:[%s3536_s25 + $0x4] ss:$16 sps:$4 sm:$0xff]   ;;  %v3021_v3 = vld [vmem:[%s3536_s25] ss:$16 sps:$4 sm:$0xff]   ;;  %v251_v49 = vld [vmem:[%s3531_s21 + $0x8] sm:$0xff]  ;;  %p2982_p7 = scmp.ne.s32.totalorder %s3472_s12, 1 }
  0x19   : > { %v3019_v2 = vld [vmem:[%s3536_s25 + $0x204] ss:$16 sps:$4 sm:$0xff]   ;;  %2015 = vmatprep.subr.bf16.mxu0 %v3017_v1  ;;  %v3022_v4 = vld [vmem:[%s3536_s25 + $0x200] ss:$16 sps:$4 sm:$0xff]   ;;  %v3591_v52 = vcombine.high %v251_v49, %v251_v49 }
  0x1a   : > { %2056 = vmatprep.subr.bf16.mxu1 %v3019_v2  ;;  %v3023_v5 = vld [vmem:[%s3536_s25 + $0x24] ss:$16 sps:$4 sm:$0xff]   ;;  %2016 = vmatpush1.bf16.msra.mxu0 %v3021_v3  ;;  %v3027_v7 = vld [vmem:[%s3536_s25 + $0x20] ss:$16 sps:$4 sm:$0xff]  }
  0x1b   : > { %2057 = vmatpush1.bf16.msra.mxu1 %v3022_v4  ;;  %v3025_v6 = vld [vmem:[%s3536_s25 + $0x224] ss:$16 sps:$4 sm:$0xff]   ;;  %2017 = vmatprep.subr.bf16.mxu0 %v3023_v5  ;;  %v3028_v8 = vld [vmem:[%s3536_s25 + $0x220] ss:$16 sps:$4 sm:$0xff]  }
  0x1c   : > { %2058 = vmatprep.subr.bf16.mxu1 %v3025_v6  ;;  %v3029_v9 = vld [vmem:[%s3536_s25 + $0x44] ss:$16 sps:$4 sm:$0xff]   ;;  %v3033_v11 = vld [vmem:[%s3536_s25 + $0x40] ss:$16 sps:$4 sm:$0xff]   ;;  %2088 = vmatprep.mubr.bf16.mxu1 %v3591_v52 }
  0x1d   : > { %v3031_v10 = vld [vmem:[%s3536_s25 + $0x244] ss:$16 sps:$4 sm:$0xff]   ;;  %v3034_v12 = vld [vmem:[%s3536_s25 + $0x240] ss:$16 sps:$4 sm:$0xff]  }
  0x1e   : > { %2018 = vmatpush1.bf16.msra.mxu0 %v3027_v7  ;;  %v3035_v13 = vld [vmem:[%s3536_s25 + $0x64] ss:$16 sps:$4 sm:$0xff]   ;;  %v3039_v15 = vld [vmem:[%s3536_s25 + $0x60] ss:$16 sps:$4 sm:$0xff]  }
  0x1f   : > { %2059 = vmatpush1.bf16.msra.mxu1 %v3028_v8  ;;  %2019 = vmatprep.subr.bf16.mxu0 %v3029_v9  ;;  %v3037_v14 = vld [vmem:[%s3536_s25 + $0x264] ss:$16 sps:$4 sm:$0xff]   ;;  %v3040_v16 = vld [vmem:[%s3536_s25 + $0x260] ss:$16 sps:$4 sm:$0xff]   ;;  %v3615_v8 = vcombine.low %v251_v49, %v251_v49 }
  0x20   : > { %2060 = vmatprep.subr.bf16.mxu1 %v3031_v10  ;;  %v3041_v17 = vld [vmem:[%s3536_s25 + $0x84] ss:$16 sps:$4 sm:$0xff]   ;;  %v3045_v19 = vld [vmem:[%s3536_s25 + $0x80] ss:$16 sps:$4 sm:$0xff]  }
  0x21   : > { %v3043_v18 = vld [vmem:[%s3536_s25 + $0x284] ss:$16 sps:$4 sm:$0xff]   ;;  %v3046_v20 = vld [vmem:[%s3536_s25 + $0x280] ss:$16 sps:$4 sm:$0xff]  }
  0x22   : > { %2020 = vmatpush1.bf16.msra.mxu0 %v3033_v11  ;;  %v3047_v21 = vld [vmem:[%s3536_s25 + $0xa4] ss:$16 sps:$4 sm:$0xff]   ;;  %v3051_v23 = vld [vmem:[%s3536_s25 + $0xa0] ss:$16 sps:$4 sm:$0xff]  }
  0x23   : > { %2061 = vmatpush1.bf16.msra.mxu1 %v3034_v12  ;;  %2021 = vmatprep.subr.bf16.mxu0 %v3035_v13  ;;  %v3049_v22 = vld [vmem:[%s3536_s25 + $0x2a4] ss:$16 sps:$4 sm:$0xff]   ;;  %v3052_v24 = vld [vmem:[%s3536_s25 + $0x2a0] ss:$16 sps:$4 sm:$0xff]  }
  0x24   : > { %2062 = vmatprep.subr.bf16.mxu1 %v3037_v14  ;;  %v3053_v25 = vld [vmem:[%s3536_s25 + $0xc4] ss:$16 sps:$4 sm:$0xff]   ;;  %v3057_v27 = vld [vmem:[%s3536_s25 + $0xc0] ss:$16 sps:$4 sm:$0xff]  }
  0x25   : > { %v3055_v26 = vld [vmem:[%s3536_s25 + $0x2c4] ss:$16 sps:$4 sm:$0xff]   ;;  %v3058_v28 = vld [vmem:[%s3536_s25 + $0x2c0] ss:$16 sps:$4 sm:$0xff]  }
  0x26   : > { %2022 = vmatpush1.bf16.msra.mxu0 %v3039_v15  ;;  %v3059_v29 = vld [vmem:[%s3536_s25 + $0xe4] ss:$16 sps:$4 sm:$0xff]   ;;  %v3063_v31 = vld [vmem:[%s3536_s25 + $0xe0] ss:$16 sps:$4 sm:$0xff]  }
  0x27   : > { %2063 = vmatpush1.bf16.msra.mxu1 %v3040_v16  ;;  %2023 = vmatprep.subr.bf16.mxu0 %v3041_v17  ;;  %v3061_v30 = vld [vmem:[%s3536_s25 + $0x2e4] ss:$16 sps:$4 sm:$0xff]   ;;  %v3064_v32 = vld [vmem:[%s3536_s25 + $0x2e0] ss:$16 sps:$4 sm:$0xff]  }
  0x28   : > { %2064 = vmatprep.subr.bf16.mxu1 %v3043_v18  ;;  %v3065_v33 = vld [vmem:[%s3536_s25 + $0x104] ss:$16 sps:$4 sm:$0xff]   ;;  %v3069_v35 = vld [vmem:[%s3536_s25 + $0x100] ss:$16 sps:$4 sm:$0xff]  }
  0x29   : > { %v3067_v34 = vld [vmem:[%s3536_s25 + $0x304] ss:$16 sps:$4 sm:$0xff]   ;;  %v3070_v36 = vld [vmem:[%s3536_s25 + $0x300] ss:$16 sps:$4 sm:$0xff]  }
  0x2a   : > { %2024 = vmatpush1.bf16.msra.mxu0 %v3045_v19  ;;  %v3071_v37 = vld [vmem:[%s3536_s25 + $0x124] ss:$16 sps:$4 sm:$0xff]   ;;  %v3075_v39 = vld [vmem:[%s3536_s25 + $0x120] ss:$16 sps:$4 sm:$0xff]  }
  0x2b   : > { %2065 = vmatpush1.bf16.msra.mxu1 %v3046_v20  ;;  %2025 = vmatprep.subr.bf16.mxu0 %v3047_v21  ;;  %v3073_v38 = vld [vmem:[%s3536_s25 + $0x324] ss:$16 sps:$4 sm:$0xff]   ;;  %v3076_v40 = vld [vmem:[%s3536_s25 + $0x320] ss:$16 sps:$4 sm:$0xff]  }
  0x2c   : > { %2066 = vmatprep.subr.bf16.mxu1 %v3049_v22  ;;  %v3077_v41 = vld [vmem:[%s3536_s25 + $0x144] ss:$16 sps:$4 sm:$0xff]   ;;  %v3081_v43 = vld [vmem:[%s3536_s25 + $0x140] ss:$16 sps:$4 sm:$0xff]  }
  0x2d   : > { %v3079_v42 = vld [vmem:[%s3536_s25 + $0x344] ss:$16 sps:$4 sm:$0xff]   ;;  %v3082_v44 = vld [vmem:[%s3536_s25 + $0x340] ss:$16 sps:$4 sm:$0xff]  }
  0x2e   : > { %2026 = vmatpush1.bf16.msra.mxu0 %v3051_v23  ;;  %v3083_v45 = vld [vmem:[%s3536_s25 + $0x164] ss:$16 sps:$4 sm:$0xff]   ;;  %v3087_v50 = vld [vmem:[%s3536_s25 + $0x160] ss:$16 sps:$4 sm:$0xff]  }
  0x2f   : > { %2067 = vmatpush1.bf16.msra.mxu1 %v3052_v24  ;;  %2027 = vmatprep.subr.bf16.mxu0 %v3053_v25  ;;  %v3085_v46 = vld [vmem:[%s3536_s25 + $0x364] ss:$16 sps:$4 sm:$0xff]   ;;  %v3088_v51 = vld [vmem:[%s3536_s25 + $0x360] ss:$16 sps:$4 sm:$0xff]  }
  0x30   : > { %2068 = vmatprep.subr.bf16.mxu1 %v3055_v26  ;;  %v250_v47 = vld [vmem:[%s3531_s21] sm:$0xff] }
  0x31   : > { %v3586_v48 = vcombine.high %v250_v47, %v250_v47  ;;  %v3089_v53 = vld [vmem:[%s3536_s25 + $0x184] ss:$16 sps:$4 sm:$0xff]   ;;  %v3093_v55 = vld [vmem:[%s3536_s25 + $0x180] ss:$16 sps:$4 sm:$0xff]   ;;  %v3613_v7 = vcombine.low %v250_v47, %v250_v47 }
  0x32   : > { %2028 = vmatpush1.bf16.msra.mxu0 %v3057_v27  ;;  %v3091_v54 = vld [vmem:[%s3536_s25 + $0x384] ss:$16 sps:$4 sm:$0xff]   ;;  %v3094_v56 = vld [vmem:[%s3536_s25 + $0x380] ss:$16 sps:$4 sm:$0xff]  }
  0x33   : > { %2069 = vmatpush1.bf16.msra.mxu1 %v3058_v28  ;;  %2029 = vmatprep.subr.bf16.mxu0 %v3059_v29  ;;  %v3095_v57 = vld [vmem:[%s3536_s25 + $0x1a4] ss:$16 sps:$4 sm:$0xff]   ;;  %v3099_v59 = vld [vmem:[%s3536_s25 + $0x1a0] ss:$16 sps:$4 sm:$0xff]  }
  0x34   : > { %2070 = vmatprep.subr.bf16.mxu1 %v3061_v30  ;;  %2047 = vmatprep.mubr.bf16.mxu0 %v3586_v48  ;;  %v3097_v58 = vld [vmem:[%s3536_s25 + $0x3a4] ss:$16 sps:$4 sm:$0xff]   ;;  %v3100_v60 = vld [vmem:[%s3536_s25 + $0x3a0] ss:$16 sps:$4 sm:$0xff]  }
  0x35   : > { %v3101_v61 = vld [vmem:[%s3536_s25 + $0x1c4] ss:$16 sps:$4 sm:$0xff]   ;;  %v3105_v63 = vld [vmem:[%s3536_s25 + $0x1c0] ss:$16 sps:$4 sm:$0xff]  }
  0x36   : > { %2030 = vmatpush1.bf16.msra.mxu0 %v3063_v31  ;;  %v3103_v62 = vld [vmem:[%s3536_s25 + $0x3c4] ss:$16 sps:$4 sm:$0xff]   ;;  %v3106_v0 = vld [vmem:[%s3536_s25 + $0x3c0] ss:$16 sps:$4 sm:$0xff]  }
  0x37   : > { %2071 = vmatpush1.bf16.msra.mxu1 %v3064_v32  ;;  %2031 = vmatprep.subr.bf16.mxu0 %v3065_v33  ;;  %v3107_v1 = vld [vmem:[%s3536_s25 + $0x1e4] ss:$16 sps:$4 sm:$0xff]   ;;  %v3111_v3 = vld [vmem:[%s3536_s25 + $0x1e0] ss:$16 sps:$4 sm:$0xff]  }
  0x38   : > { %2072 = vmatprep.subr.bf16.mxu1 %v3067_v34  ;;  %v3109_v2 = vld [vmem:[%s3536_s25 + $0x3e4] ss:$16 sps:$4 sm:$0xff]   ;;  %v3112_v4 = vld [vmem:[%s3536_s25 + $0x3e0] ss:$16 sps:$4 sm:$0xff]   ;;  %v3647_v34 = vld [vmem:[%s3531_s21 + $0x18] sm:$0xff] }
  0x39   : > { %v3119_v5 = vld [vmem:[%s3536_s25 + $0x404] ss:$16 sps:$4 sm:$0xff]   ;;  %v3117_v9 = vld [vmem:[%s3536_s25 + $0x400] ss:$16 sps:$4 sm:$0xff]  }
  0x3a   : > { %2032 = vmatpush1.bf16.msra.mxu0 %v3069_v35  ;;  %v3122_v6 = vld [vmem:[%s3536_s25 + $0x604] ss:$16 sps:$4 sm:$0xff]   ;;  %v3120_v10 = vld [vmem:[%s3536_s25 + $0x600] ss:$16 sps:$4 sm:$0xff]  }
  0x3b   : > { %2073 = vmatpush1.bf16.msra.mxu1 %v3070_v36  ;;  %2033 = vmatprep.subr.bf16.mxu0 %v3071_v37  ;;  %v3125_v11 = vld [vmem:[%s3536_s25 + $0x424] ss:$16 sps:$4 sm:$0xff]   ;;  %v3123_v13 = vld [vmem:[%s3536_s25 + $0x420] ss:$16 sps:$4 sm:$0xff]  }
  0x3c   : > { %2074 = vmatprep.subr.bf16.mxu1 %v3073_v38  ;;  %v3128_v12 = vld [vmem:[%s3536_s25 + $0x624] ss:$16 sps:$4 sm:$0xff]   ;;  %v3126_v14 = vld [vmem:[%s3536_s25 + $0x620] ss:$16 sps:$4 sm:$0xff]   ;;  %v3657_v38 = vcombine.high %v3647_v34, %v3647_v34 }
  0x3d   : > { %v3131_v15 = vld [vmem:[%s3536_s25 + $0x444] ss:$16 sps:$4 sm:$0xff]   ;;  %v3129_v17 = vld [vmem:[%s3536_s25 + $0x440] ss:$16 sps:$4 sm:$0xff]  }
  0x3e   : > { %2034 = vmatpush1.bf16.msra.mxu0 %v3075_v39  ;;  %v3134_v16 = vld [vmem:[%s3536_s25 + $0x644] ss:$16 sps:$4 sm:$0xff]   ;;  %v3132_v18 = vld [vmem:[%s3536_s25 + $0x640] ss:$16 sps:$4 sm:$0xff]  }
  0x3f   : > { %2075 = vmatpush1.bf16.msra.mxu1 %v3076_v40  ;;  %2035 = vmatprep.subr.bf16.mxu0 %v3077_v41  ;;  %v3137_v19 = vld [vmem:[%s3536_s25 + $0x464] ss:$16 sps:$4 sm:$0xff]   ;;  %v3135_v21 = vld [vmem:[%s3536_s25 + $0x460] ss:$16 sps:$4 sm:$0xff]  }
  0x40   : > { %2076 = vmatprep.subr.bf16.mxu1 %v3079_v42  ;;  %v3140_v20 = vld [vmem:[%s3536_s25 + $0x664] ss:$16 sps:$4 sm:$0xff]   ;;  %v3138_v22 = vld [vmem:[%s3536_s25 + $0x660] ss:$16 sps:$4 sm:$0xff]  }
  0x41   : > { %v3143_v23 = vld [vmem:[%s3536_s25 + $0x484] ss:$16 sps:$4 sm:$0xff]   ;;  %v3141_v25 = vld [vmem:[%s3536_s25 + $0x480] ss:$16 sps:$4 sm:$0xff]  }
  0x42   : > { %2036 = vmatpush1.bf16.msra.mxu0 %v3081_v43  ;;  %v3146_v24 = vld [vmem:[%s3536_s25 + $0x684] ss:$16 sps:$4 sm:$0xff]   ;;  %v3144_v26 = vld [vmem:[%s3536_s25 + $0x680] ss:$16 sps:$4 sm:$0xff]  }
  0x43   : > { %2077 = vmatpush1.bf16.msra.mxu1 %v3082_v44  ;;  %2037 = vmatprep.subr.bf16.mxu0 %v3083_v45  ;;  %v3149_v27 = vld [vmem:[%s3536_s25 + $0x4a4] ss:$16 sps:$4 sm:$0xff]   ;;  %v3147_v29 = vld [vmem:[%s3536_s25 + $0x4a0] ss:$16 sps:$4 sm:$0xff]  }
  0x44   : > { %2078 = vmatprep.subr.bf16.mxu1 %v3085_v46  ;;  %v3152_v28 = vld [vmem:[%s3536_s25 + $0x6a4] ss:$16 sps:$4 sm:$0xff]   ;;  %v3150_v30 = vld [vmem:[%s3536_s25 + $0x6a0] ss:$16 sps:$4 sm:$0xff]  }
  0x45   : > { %v3155_v31 = vld [vmem:[%s3536_s25 + $0x4c4] ss:$16 sps:$4 sm:$0xff]   ;;  %v3153_v35 = vld [vmem:[%s3536_s25 + $0x4c0] ss:$16 sps:$4 sm:$0xff]  }
  0x46   : > { %2038 = vmatpush1.bf16.msra.mxu0 %v3087_v50  ;;  %v3158_v32 = vld [vmem:[%s3536_s25 + $0x6c4] ss:$16 sps:$4 sm:$0xff]   ;;  %v3156_v36 = vld [vmem:[%s3536_s25 + $0x6c0] ss:$16 sps:$4 sm:$0xff]  }
  0x47   : > { %2079 = vmatpush1.bf16.msra.mxu1 %v3088_v51  ;;  %2039 = vmatprep.subr.bf16.mxu0 %v3089_v53  ;;  %v3644_v33 = vld [vmem:[%s3531_s21 + $0x10] sm:$0xff] }
  0x48   : > { %2080 = vmatprep.subr.bf16.mxu1 %v3091_v54  ;;  %v3653_v37 = vcombine.high %v3644_v33, %v3644_v33  ;;  %v3161_v39 = vld [vmem:[%s3536_s25 + $0x4e4] ss:$16 sps:$4 sm:$0xff]   ;;  %v3159_v41 = vld [vmem:[%s3536_s25 + $0x4e0] ss:$16 sps:$4 sm:$0xff]  }
  0x49   : > { %v3164_v40 = vld [vmem:[%s3536_s25 + $0x6e4] ss:$16 sps:$4 sm:$0xff]   ;;  %v3162_v42 = vld [vmem:[%s3536_s25 + $0x6e0] ss:$16 sps:$4 sm:$0xff]  }
  0x4a   : > { %2040 = vmatpush1.bf16.msra.mxu0 %v3093_v55  ;;  %v3167_v43 = vld [vmem:[%s3536_s25 + $0x504] ss:$16 sps:$4 sm:$0xff]   ;;  %v3165_v45 = vld [vmem:[%s3536_s25 + $0x500] ss:$16 sps:$4 sm:$0xff]  }
  0x4b   : > { %2081 = vmatpush1.bf16.msra.mxu1 %v3094_v56  ;;  %2041 = vmatprep.subr.bf16.mxu0 %v3095_v57  ;;  %v3170_v44 = vld [vmem:[%s3536_s25 + $0x704] ss:$16 sps:$4 sm:$0xff]   ;;  %v3168_v46 = vld [vmem:[%s3536_s25 + $0x700] ss:$16 sps:$4 sm:$0xff]  }
  0x4c   : > { %2082 = vmatprep.subr.bf16.mxu1 %v3097_v58  ;;  %v3173_v47 = vld [vmem:[%s3536_s25 + $0x524] ss:$16 sps:$4 sm:$0xff]   ;;  %v3171_v50 = vld [vmem:[%s3536_s25 + $0x520] ss:$16 sps:$4 sm:$0xff]  }
  0x4d   : > { %v3176_v49 = vld [vmem:[%s3536_s25 + $0x724] ss:$16 sps:$4 sm:$0xff]   ;;  %v3174_v51 = vld [vmem:[%s3536_s25 + $0x720] ss:$16 sps:$4 sm:$0xff]  }
  0x4e   : > { %2042 = vmatpush1.bf16.msra.mxu0 %v3099_v59  ;;  %v3179_v53 = vld [vmem:[%s3536_s25 + $0x544] ss:$16 sps:$4 sm:$0xff]   ;;  %v3177_v55 = vld [vmem:[%s3536_s25 + $0x540] ss:$16 sps:$4 sm:$0xff]  }
  0x4f   : > { %2083 = vmatpush1.bf16.msra.mxu1 %v3100_v60  ;;  %2043 = vmatprep.subr.bf16.mxu0 %v3101_v61  ;;  %v3182_v54 = vld [vmem:[%s3536_s25 + $0x744] ss:$16 sps:$4 sm:$0xff]   ;;  %v3180_v56 = vld [vmem:[%s3536_s25 + $0x740] ss:$16 sps:$4 sm:$0xff]  }
  0x50   : > { %2084 = vmatprep.subr.bf16.mxu1 %v3103_v62  ;;  %v3185_v57 = vld [vmem:[%s3536_s25 + $0x564] ss:$16 sps:$4 sm:$0xff]   ;;  %v3183_v59 = vld [vmem:[%s3536_s25 + $0x560] ss:$16 sps:$4 sm:$0xff]  }
  0x51   : > { %v3188_v58 = vld [vmem:[%s3536_s25 + $0x764] ss:$16 sps:$4 sm:$0xff]   ;;  %v3186_v60 = vld [vmem:[%s3536_s25 + $0x760] ss:$16 sps:$4 sm:$0xff]  }
  0x52   : > { %2044 = vmatpush1.bf16.msra.mxu0 %v3105_v63  ;;  %v3191_v61 = vld [vmem:[%s3536_s25 + $0x584] ss:$16 sps:$4 sm:$0xff]   ;;  %v3189_v63 = vld [vmem:[%s3536_s25 + $0x580] ss:$16 sps:$4 sm:$0xff]  }
  0x53   : > { %2085 = vmatpush1.bf16.msra.mxu1 %v3106_v0  ;;  %2045 = vmatprep.subr.bf16.mxu0 %v3107_v1  ;;  %v3194_v62 = vld [vmem:[%s3536_s25 + $0x784] ss:$16 sps:$4 sm:$0xff]   ;;  %v3192_v0 = vld [vmem:[%s3536_s25 + $0x780] ss:$16 sps:$4 sm:$0xff]  }
  0x54   : > { %2086 = vmatprep.subr.bf16.mxu1 %v3109_v2  ;;  %v3197_v1 = vld [vmem:[%s3536_s25 + $0x5a4] ss:$16 sps:$4 sm:$0xff]  }
  0x55   : > { %v3200_v2 = vld [vmem:[%s3536_s25 + $0x7a4] ss:$16 sps:$4 sm:$0xff]  }
  0x56   : > { %2046 = vmatpush1.bf16.msra.mxu0 %v3111_v3  ;;  %v3195_v3 = vld [vmem:[%s3536_s25 + $0x5a0] ss:$16 sps:$4 sm:$0xff]  }
  0x57   : > { %2087 = vmatpush1.bf16.msra.mxu1 %v3112_v4  ;;  %2097 = vmatprep.subr.bf16.mxu0 %v3119_v5  ;;  %v3198_v4 = vld [vmem:[%s3536_s25 + $0x7a0] ss:$16 sps:$4 sm:$0xff]   ;;  %v3203_v5 = vld [vmem:[%s3536_s25 + $0x5c4] ss:$16 sps:$4 sm:$0xff]  }
  0x58   : > { %2138 = vmatprep.subr.bf16.mxu1 %v3122_v6  ;;  %v3206_v6 = vld [vmem:[%s3536_s25 + $0x7c4] ss:$16 sps:$4 sm:$0xff]  }
  0x59   : > { %2048 = vmatmul.mubr.bf16.vlgmr.msra.gmra.mrb[0].mxu0 %v3613_v7 }
  0x5a   : > { %2089 = vmatmul.mubr.bf16.vlgmr.msra.gmra.mrb[0].mxu1 %v3615_v8  ;;  %2098 = vmatpush1.bf16.msra.mxu0 %v3117_v9  ;;  %v3201_v9 = vld [vmem:[%s3536_s25 + $0x5c0] ss:$16 sps:$4 sm:$0xff]  }
  0x5b   : > { %2139 = vmatpush1.bf16.msra.mxu1 %v3120_v10  ;;  %2099 = vmatprep.subr.bf16.mxu0 %v3125_v11  ;;  %v3204_v10 = vld [vmem:[%s3536_s25 + $0x7c0] ss:$16 sps:$4 sm:$0xff]   ;;  %v3209_v11 = vld [vmem:[%s3536_s25 + $0x5e4] ss:$16 sps:$4 sm:$0xff]  }
  0x5c   : > { %2140 = vmatprep.subr.bf16.mxu1 %v3128_v12  ;;  %2129 = vmatprep.mubr.bf16.mxu0 %v3653_v37  ;;  %v3212_v12 = vld [vmem:[%s3536_s25 + $0x7e4] ss:$16 sps:$4 sm:$0xff]  }
  0x5d   : > { %2170 = vmatprep.mubr.bf16.mxu1 %v3657_v38 }
  0x5e   : > { %2100 = vmatpush1.bf16.msra.mxu0 %v3123_v13  ;;  %v3207_v13 = vld [vmem:[%s3536_s25 + $0x5e0] ss:$16 sps:$4 sm:$0xff]  }
  0x5f   : > { %2141 = vmatpush1.bf16.msra.mxu1 %v3126_v14  ;;  %2101 = vmatprep.subr.bf16.mxu0 %v3131_v15  ;;  %v3210_v14 = vld [vmem:[%s3536_s25 + $0x7e0] ss:$16 sps:$4 sm:$0xff]   ;;  %v3219_v15 = vld [vmem:[%s3536_s25 + $0x804] ss:$16 sps:$4 sm:$0xff]  }
  0x60   : > { %2142 = vmatprep.subr.bf16.mxu1 %v3134_v16  ;;  %v3222_v16 = vld [vmem:[%s3536_s25 + $0xc] ss:$16 sps:$4 sm:$0xff]  }
  0x62   : > { %2102 = vmatpush1.bf16.msra.mxu0 %v3129_v17  ;;  %v3701_v17 = vcombine.low %v3644_v33, %v3644_v33  ;;  %v3238_v33 = vld [vmem:[%s3536_s25 + $0x68] ss:$16 sps:$4 sm:$0xff]  }
  0x63   : > { %2143 = vmatpush1.bf16.msra.mxu1 %v3132_v18  ;;  %2103 = vmatprep.subr.bf16.mxu0 %v3137_v19  ;;  %v3705_v18 = vcombine.low %v3647_v34, %v3647_v34  ;;  %v3217_v19 = vld [vmem:[%s3536_s25 + $0x800] ss:$16 sps:$4 sm:$0xff]   ;;  %v3246_v34 = vld [vmem:[%s3536_s25 + $0x8c] ss:$16 sps:$4 sm:$0xff]  }
  0x64   : > { %2144 = vmatprep.subr.bf16.mxu1 %v3140_v20  ;;  %v3220_v20 = vld [vmem:[%s3536_s25 + $0x8] ss:$16 sps:$4 sm:$0xff]  }
  0x66   : > { %2104 = vmatpush1.bf16.msra.mxu0 %v3135_v21  ;;  %v3225_v21 = vld [vmem:[%s3536_s25 + $0x824] ss:$16 sps:$4 sm:$0xff]  }
  0x67   : > { %2145 = vmatpush1.bf16.msra.mxu1 %v3138_v22  ;;  %2105 = vmatprep.subr.bf16.mxu0 %v3143_v23  ;;  %v3228_v22 = vld [vmem:[%s3536_s25 + $0x2c] ss:$16 sps:$4 sm:$0xff]   ;;  %v3223_v23 = vld [vmem:[%s3536_s25 + $0x820] ss:$16 sps:$4 sm:$0xff]  }
  0x68   : > { %2146 = vmatprep.subr.bf16.mxu1 %v3146_v24  ;;  %v3226_v24 = vld [vmem:[%s3536_s25 + $0x28] ss:$16 sps:$4 sm:$0xff]  }
  0x6a   : > { %2106 = vmatpush1.bf16.msra.mxu0 %v3141_v25  ;;  %v3231_v25 = vld [vmem:[%s3536_s25 + $0x844] ss:$16 sps:$4 sm:$0xff]  }
  0x6b   : > { %2147 = vmatpush1.bf16.msra.mxu1 %v3144_v26  ;;  %2107 = vmatprep.subr.bf16.mxu0 %v3149_v27  ;;  %v3234_v26 = vld [vmem:[%s3536_s25 + $0x4c] ss:$16 sps:$4 sm:$0xff]   ;;  %v3483_v27 = vmov 0  }
  0x6c   : > { %2148 = vmatprep.subr.bf16.mxu1 %v3152_v28  ;;  %v3229_v28 = vld [vmem:[%s3536_s25 + $0x840] ss:$16 sps:$4 sm:$0xff]  }
  0x6e   : > { %2108 = vmatpush1.bf16.msra.mxu0 %v3147_v29  ;;  %v3232_v29 = vld [vmem:[%s3536_s25 + $0x48] ss:$16 sps:$4 sm:$0xff]  }
  0x6f   : > { %2149 = vmatpush1.bf16.msra.mxu1 %v3150_v30  ;;  %2109 = vmatprep.subr.bf16.mxu0 %v3155_v31  ;;  %v3237_v30 = vld [vmem:[%s3536_s25 + $0x864] ss:$16 sps:$4 sm:$0xff]   ;;  %v3240_v31 = vld [vmem:[%s3536_s25 + $0x6c] ss:$16 sps:$4 sm:$0xff]  }
  0x70   : > { %2150 = vmatprep.subr.bf16.mxu1 %v3158_v32  ;;  %v3235_v32 = vld [vmem:[%s3536_s25 + $0x860] ss:$16 sps:$4 sm:$0xff]  }
  0x72   : > { %2110 = vmatpush1.bf16.msra.mxu0 %v3153_v35  ;;  %v3241_v35 = vld [vmem:[%s3536_s25 + $0x880] ss:$16 sps:$4 sm:$0xff]  }
  0x73   : > { %2151 = vmatpush1.bf16.msra.mxu1 %v3156_v36  ;;  %2111 = vmatprep.subr.bf16.mxu0 %v3161_v39  ;;  %v3244_v36 = vld [vmem:[%s3536_s25 + $0x88] ss:$16 sps:$4 sm:$0xff]   ;;  %v3249_v39 = vld [vmem:[%s3536_s25 + $0x8a4] ss:$16 sps:$4 sm:$0xff]  }
  0x74   : > { %2152 = vmatprep.subr.bf16.mxu1 %v3164_v40  ;;  %v3252_v40 = vld [vmem:[%s3536_s25 + $0xac] ss:$16 sps:$4 sm:$0xff]  }
  0x76   : > { %2112 = vmatpush1.bf16.msra.mxu0 %v3159_v41  ;;  %v3247_v41 = vld [vmem:[%s3536_s25 + $0x8a0] ss:$16 sps:$4 sm:$0xff]  }
  0x77   : > { %2153 = vmatpush1.bf16.msra.mxu1 %v3162_v42  ;;  %2113 = vmatprep.subr.bf16.mxu0 %v3167_v43  ;;  %v3250_v42 = vld [vmem:[%s3536_s25 + $0xa8] ss:$16 sps:$4 sm:$0xff]   ;;  %v3255_v43 = vld [vmem:[%s3536_s25 + $0x8c4] ss:$16 sps:$4 sm:$0xff]  }
  0x78   : > { %2154 = vmatprep.subr.bf16.mxu1 %v3170_v44  ;;  %v3258_v44 = vld [vmem:[%s3536_s25 + $0xcc] ss:$16 sps:$4 sm:$0xff]  }
  0x7a   : > { %2114 = vmatpush1.bf16.msra.mxu0 %v3165_v45  ;;  %v3253_v45 = vld [vmem:[%s3536_s25 + $0x8c0] ss:$16 sps:$4 sm:$0xff]  }
  0x7b   : > { %2155 = vmatpush1.bf16.msra.mxu1 %v3168_v46  ;;  %2115 = vmatprep.subr.bf16.mxu0 %v3173_v47  ;;  %v3256_v46 = vld [vmem:[%s3536_s25 + $0xc8] ss:$16 sps:$4 sm:$0xff]   ;;  %v3261_v47 = vld [vmem:[%s3536_s25 + $0x8e4] ss:$16 sps:$4 sm:$0xff]  }
  0x7c   : > { %2156 = vmatprep.subr.bf16.mxu1 %v3176_v49  ;;  %v3264_v49 = vld [vmem:[%s3536_s25 + $0xec] ss:$16 sps:$4 sm:$0xff]  }
  0x7e   : > { %2116 = vmatpush1.bf16.msra.mxu0 %v3171_v50  ;;  %v3259_v50 = vld [vmem:[%s3536_s25 + $0x8e0] ss:$16 sps:$4 sm:$0xff]  }
  0x7f   : > { %2157 = vmatpush1.bf16.msra.mxu1 %v3174_v51  ;;  %2117 = vmatprep.subr.bf16.mxu0 %v3179_v53  ;;  %v3262_v51 = vld [vmem:[%s3536_s25 + $0xe8] ss:$16 sps:$4 sm:$0xff]   ;;  %v3268_v53 = vld [vmem:[%s3536_s25 + $0x10c] ss:$16 sps:$4 sm:$0xff]  }
  0x80   : > { %2158 = vmatprep.subr.bf16.mxu1 %v3182_v54  ;;  %v3271_v54 = vld [vmem:[%s3536_s25 + $0x20c] ss:$16 sps:$4 sm:$0xff]  }
  0x82   : > { %2118 = vmatpush1.bf16.msra.mxu0 %v3177_v55  ;;  %v3744_v55 = vld [vmem:[%s3531_s21 + $0x20] ss:$0 sps:$4 sm:$0xff]  }
  0x83   : > { %2159 = vmatpush1.bf16.msra.mxu1 %v3180_v56  ;;  %2119 = vmatprep.subr.bf16.mxu0 %v3185_v57  ;;  %v3266_v56 = vld [vmem:[%s3536_s25 + $0x108] ss:$16 sps:$4 sm:$0xff]  }
  0x84   : > { %2160 = vmatprep.subr.bf16.mxu1 %v3188_v58  ;;  %v3269_v57 = vld [vmem:[%s3536_s25 + $0x208] ss:$16 sps:$4 sm:$0xff]   ;;  %v3274_v58 = vld [vmem:[%s3536_s25 + $0x12c] ss:$16 sps:$4 sm:$0xff]  }
  0x86   : > { %2120 = vmatpush1.bf16.msra.mxu0 %v3183_v59  ;;  %v3277_v59 = vld [vmem:[%s3536_s25 + $0x22c] ss:$16 sps:$4 sm:$0xff]  }
  0x87   : > { %2161 = vmatpush1.bf16.msra.mxu1 %v3186_v60  ;;  %2121 = vmatprep.subr.bf16.mxu0 %v3191_v61  ;;  %v3272_v60 = vld [vmem:[%s3536_s25 + $0x128] ss:$16 sps:$4 sm:$0xff]  }
  0x88   : > { %2162 = vmatprep.subr.bf16.mxu1 %v3194_v62  ;;  %v3275_v61 = vld [vmem:[%s3536_s25 + $0x228] ss:$16 sps:$4 sm:$0xff]   ;;  %v3280_v62 = vld [vmem:[%s3536_s25 + $0x14c] ss:$16 sps:$4 sm:$0xff]  }
  0x8a   : > { %2122 = vmatpush1.bf16.msra.mxu0 %v3189_v63  ;;  %v3283_v63 = vld [vmem:[%s3536_s25 + $0x24c] ss:$16 sps:$4 sm:$0xff]  }
  0x8b   : > { %2163 = vmatpush1.bf16.msra.mxu1 %v3192_v0  ;;  %2123 = vmatprep.subr.bf16.mxu0 %v3197_v1  ;;  %v3278_v0 = vld [vmem:[%s3536_s25 + $0x148] ss:$16 sps:$4 sm:$0xff]  }
  0x8c   : > { %2164 = vmatprep.subr.bf16.mxu1 %v3200_v2  ;;  %v3281_v1 = vld [vmem:[%s3536_s25 + $0x248] ss:$16 sps:$4 sm:$0xff]   ;;  %v3286_v2 = vld [vmem:[%s3536_s25 + $0x16c] ss:$16 sps:$4 sm:$0xff]  }
  0x8e   : > { %2124 = vmatpush1.bf16.msra.mxu0 %v3195_v3  ;;  %v3289_v3 = vld [vmem:[%s3536_s25 + $0x26c] ss:$16 sps:$4 sm:$0xff]  }
  0x8f   : > { %2165 = vmatpush1.bf16.msra.mxu1 %v3198_v4  ;;  %2125 = vmatprep.subr.bf16.mxu0 %v3203_v5  ;;  %v3284_v4 = vld [vmem:[%s3536_s25 + $0x168] ss:$16 sps:$4 sm:$0xff]  }
  0x90   : > { %2166 = vmatprep.subr.bf16.mxu1 %v3206_v6  ;;  %v3287_v5 = vld [vmem:[%s3536_s25 + $0x268] ss:$16 sps:$4 sm:$0xff]   ;;  %v3295_v6 = vld [vmem:[%s3536_s25 + $0x28c] ss:$16 sps:$4 sm:$0xff]  }
  0x92   : > { %2126 = vmatpush1.bf16.msra.mxu0 %v3201_v9  ;;  %v3290_v9 = vld [vmem:[%s3536_s25 + $0x188] ss:$16 sps:$4 sm:$0xff]  }
  0x93   : > { %2167 = vmatpush1.bf16.msra.mxu1 %v3204_v10  ;;  %2127 = vmatprep.subr.bf16.mxu0 %v3209_v11  ;;  %v3293_v10 = vld [vmem:[%s3536_s25 + $0x288] ss:$16 sps:$4 sm:$0xff]   ;;  %v3298_v11 = vld [vmem:[%s3536_s25 + $0x1ac] ss:$16 sps:$4 sm:$0xff]  }
  0x94   : > { %2168 = vmatprep.subr.bf16.mxu1 %v3212_v12  ;;  %v3301_v12 = vld [vmem:[%s3536_s25 + $0x2ac] ss:$16 sps:$4 sm:$0xff]  }
  0x96   : > { %2128 = vmatpush1.bf16.msra.mxu0 %v3207_v13  ;;  %v3296_v13 = vld [vmem:[%s3536_s25 + $0x1a8] ss:$16 sps:$4 sm:$0xff]  }
  0x97   : > { %2169 = vmatpush1.bf16.msra.mxu1 %v3210_v14  ;;  %2179 = vmatprep.subr.bf16.mxu0 %v3219_v15  ;;  %v3299_v14 = vld [vmem:[%s3536_s25 + $0x2a8] ss:$16 sps:$4 sm:$0xff]   ;;  %v3304_v15 = vld [vmem:[%s3536_s25 + $0x1cc] ss:$16 sps:$4 sm:$0xff]  }
  0x98   : > { %2220 = vmatprep.subr.bf16.mxu1 %v3222_v16  ;;  %v3307_v16 = vld [vmem:[%s3536_s25 + $0x2cc] ss:$16 sps:$4 sm:$0xff]  }
  0x99   : > { %2130 = vmatmul.mubr.bf16.vlgmr.msra.gmra.mrb[4].mxu0 %v3701_v17 }
  0x9a   : > { %2171 = vmatmul.mubr.bf16.vlgmr.msra.gmra.mrb[4].mxu1 %v3705_v18  ;;  %2180 = vmatpush1.bf16.msra.mxu0 %v3217_v19  ;;  %v3302_v19 = vld [vmem:[%s3536_s25 + $0x1c8] ss:$16 sps:$4 sm:$0xff]  }
  0x9b   : > { %2221 = vmatpush1.bf16.msra.mxu1 %v3220_v20  ;;  %2181 = vmatprep.subr.bf16.mxu0 %v3225_v21  ;;  %v3305_v20 = vld [vmem:[%s3536_s25 + $0x2c8] ss:$16 sps:$4 sm:$0xff]   ;;  %v3310_v21 = vld [vmem:[%s3536_s25 + $0x1ec] ss:$16 sps:$4 sm:$0xff]  }
  0x9c   : > { %2222 = vmatprep.subr.bf16.mxu1 %v3228_v22  ;;  %2211 = vmatprep.mubr.bf16.mxu0 %v3483_v27  ;;  %v3313_v22 = vld [vmem:[%s3536_s25 + $0x2ec] ss:$16 sps:$4 sm:$0xff]  }
  0x9d   : > { %2252 = vmatprep.mubr.bf16.mxu1 %v3586_v48  ;;  %v3243_v48 = vld [vmem:[%s3536_s25 + $0x884] ss:$16 sps:$4 sm:$0xff]  }
  0x9e   : > { %2182 = vmatpush1.bf16.msra.mxu0 %v3223_v23  ;;  %v3308_v23 = vld [vmem:[%s3536_s25 + $0x1e8] ss:$16 sps:$4 sm:$0xff]  }
  0x9f   : > { %2223 = vmatpush1.bf16.msra.mxu1 %v3226_v24  ;;  %2183 = vmatprep.subr.bf16.mxu0 %v3231_v25  ;;  %v3311_v24 = vld [vmem:[%s3536_s25 + $0x2e8] ss:$16 sps:$4 sm:$0xff]   ;;  %v3316_v25 = vld [vmem:[%s3536_s25 + $0x30c] ss:$16 sps:$4 sm:$0xff]  }
  0xa0   : > { %2224 = vmatprep.subr.bf16.mxu1 %v3234_v26  ;;  %v3319_v26 = vld [vmem:[%s3536_s25 + $0x40c] ss:$16 sps:$4 sm:$0xff]  }
  0xa2   : > { %2184 = vmatpush1.bf16.msra.mxu0 %v3229_v28  ;;  %v3314_v28 = vld [vmem:[%s3536_s25 + $0x308] ss:$16 sps:$4 sm:$0xff]  }
  0xa3   : > { %2225 = vmatpush1.bf16.msra.mxu1 %v3232_v29  ;;  %2185 = vmatprep.subr.bf16.mxu0 %v3237_v30  ;;  %v3317_v29 = vld [vmem:[%s3536_s25 + $0x408] ss:$16 sps:$4 sm:$0xff]   ;;  %v3322_v30 = vld [vmem:[%s3536_s25 + $0x32c] ss:$16 sps:$4 sm:$0xff]  }
  0xa4   : > { %2226 = vmatprep.subr.bf16.mxu1 %v3240_v31  ;;  %v3325_v31 = vld [vmem:[%s3536_s25 + $0x42c] ss:$16 sps:$4 sm:$0xff]  }
  0xa6   : > { %2186 = vmatpush1.bf16.msra.mxu0 %v3235_v32  ;;  %v3320_v32 = vld [vmem:[%s3536_s25 + $0x328] ss:$16 sps:$4 sm:$0xff]  }
  0xa7   : > { %2227 = vmatpush1.bf16.msra.mxu1 %v3238_v33  ;;  %2187 = vmatprep.subr.bf16.mxu0 %v3243_v48  ;;  %v3323_v33 = vld [vmem:[%s3536_s25 + $0x428] ss:$16 sps:$4 sm:$0xff]   ;;  %v3328_v48 = vld [vmem:[%s3536_s25 + $0x34c] ss:$16 sps:$4 sm:$0xff]  }
  0xa8   : > { %2228 = vmatprep.subr.bf16.mxu1 %v3246_v34  ;;  %v3331_v34 = vld [vmem:[%s3536_s25 + $0x44c] ss:$16 sps:$4 sm:$0xff]  }
  0xaa   : > { %2188 = vmatpush1.bf16.msra.mxu0 %v3241_v35  ;;  %v3326_v35 = vld [vmem:[%s3536_s25 + $0x348] ss:$16 sps:$4 sm:$0xff]  }
  0xab   : > { %2229 = vmatpush1.bf16.msra.mxu1 %v3244_v36  ;;  %2189 = vmatprep.subr.bf16.mxu0 %v3249_v39  ;;  %v3334_v36 = vld [vmem:[%s3536_s25 + $0x36c] ss:$16 sps:$4 sm:$0xff]  }
  0xac   : > { %2230 = vmatprep.subr.bf16.mxu1 %v3252_v40  ;;  %v3337_v39 = vld [vmem:[%s3536_s25 + $0x46c] ss:$16 sps:$4 sm:$0xff]   ;;  %v3332_v40 = vld [vmem:[%s3536_s25 + $0x368] ss:$16 sps:$4 sm:$0xff]  }
  0xae   : > { %2190 = vmatpush1.bf16.msra.mxu0 %v3247_v41  ;;  %v3335_v41 = vld [vmem:[%s3536_s25 + $0x468] ss:$16 sps:$4 sm:$0xff]  }
  0xaf   : > { %2231 = vmatpush1.bf16.msra.mxu1 %v3250_v42  ;;  %2191 = vmatprep.subr.bf16.mxu0 %v3255_v43  ;;  %v3343_v42 = vld [vmem:[%s3536_s25 + $0x48c] ss:$16 sps:$4 sm:$0xff]   ;;  %v3338_v43 = vld [vmem:[%s3536_s25 + $0x388] ss:$16 sps:$4 sm:$0xff]  }
  0xb0   : > { %2232 = vmatprep.subr.bf16.mxu1 %v3258_v44  ;;  %v3341_v44 = vld [vmem:[%s3536_s25 + $0x488] ss:$16 sps:$4 sm:$0xff]  }
  0xb2   : > { %2192 = vmatpush1.bf16.msra.mxu0 %v3253_v45  ;;  %v3346_v45 = vld [vmem:[%s3536_s25 + $0x3ac] ss:$16 sps:$4 sm:$0xff]  }
  0xb3   : > { %2233 = vmatpush1.bf16.msra.mxu1 %v3256_v46  ;;  %2193 = vmatprep.subr.bf16.mxu0 %v3261_v47  ;;  %v3349_v46 = vld [vmem:[%s3536_s25 + $0x4ac] ss:$16 sps:$4 sm:$0xff]   ;;  %v3344_v47 = vld [vmem:[%s3536_s25 + $0x3a8] ss:$16 sps:$4 sm:$0xff]  }
  0xb4   : > { %2234 = vmatprep.subr.bf16.mxu1 %v3264_v49  ;;  %v3347_v49 = vld [vmem:[%s3536_s25 + $0x4a8] ss:$16 sps:$4 sm:$0xff]  }
  0xb6   : > { %2194 = vmatpush1.bf16.msra.mxu0 %v3259_v50  ;;  %v3352_v50 = vld [vmem:[%s3536_s25 + $0x3cc] ss:$16 sps:$4 sm:$0xff]  }
  0xb7   : > { %2235 = vmatpush1.bf16.msra.mxu1 %v3262_v51  ;;  %2261 = vmatprep.subr.bf16.mxu0 %v3271_v54  ;;  %v3355_v51 = vld [vmem:[%s3536_s25 + $0x4cc] ss:$16 sps:$4 sm:$0xff]   ;;  %v3353_v54 = vld [vmem:[%s3536_s25 + $0x4c8] ss:$16 sps:$4 sm:$0xff]  }
  0xb8   : > { %2236 = vmatprep.subr.bf16.mxu1 %v3268_v53  ;;  %v3350_v53 = vld [vmem:[%s3536_s25 + $0x3c8] ss:$16 sps:$4 sm:$0xff]  }
  0xb9   : > { %2212 = vmatmul.mubr.bf16.vlgmr.msra.gmra.mrb[8].mxu0 %v3744_v55 }
  0xba   : > { %2262 = vmatpush1.bf16.msra.mxu0 %v3269_v57  ;;  %2293 = vmatprep.mubr.bf16.mxu0 %v3591_v52  ;;  %v3292_v52 = vld [vmem:[%s3536_s25 + $0x18c] ss:$16 sps:$4 sm:$0xff]  }
  0xbb   : > { %2237 = vmatpush1.bf16.msra.mxu1 %v3266_v56  ;;  %2263 = vmatprep.subr.bf16.mxu0 %v3277_v59  ;;  %v3358_v56 = vld [vmem:[%s3536_s25 + $0x3ec] ss:$16 sps:$4 sm:$0xff]   ;;  %v3359_v59 = vld [vmem:[%s3536_s25 + $0x4e8] ss:$16 sps:$4 sm:$0xff]  }
  0xbc   : > { %2238 = vmatprep.subr.bf16.mxu1 %v3274_v58  ;;  %v3361_v57 = vld [vmem:[%s3536_s25 + $0x4ec] ss:$16 sps:$4 sm:$0xff]   ;;  %v3356_v58 = vld [vmem:[%s3536_s25 + $0x3e8] ss:$16 sps:$4 sm:$0xff]  }
  0xbe   : > { %2264 = vmatpush1.bf16.msra.mxu0 %v3275_v61  ;;  %v3367_v61 = vld [vmem:[%s3536_s25 + $0x60c] ss:$16 sps:$4 sm:$0xff]  }
  0xbf   : > { %2239 = vmatpush1.bf16.msra.mxu1 %v3272_v60  ;;  %2265 = vmatprep.subr.bf16.mxu0 %v3283_v63  ;;  %v3364_v60 = vld [vmem:[%s3536_s25 + $0x50c] ss:$16 sps:$4 sm:$0xff]   ;;  %v3365_v63 = vld [vmem:[%s3536_s25 + $0x608] ss:$16 sps:$4 sm:$0xff]  }
  0xc0   : > { %2240 = vmatprep.subr.bf16.mxu1 %v3280_v62  ;;  %v3362_v62 = vld [vmem:[%s3536_s25 + $0x508] ss:$16 sps:$4 sm:$0xff]  }
  0xc2   : > { %2266 = vmatpush1.bf16.msra.mxu0 %v3281_v1  ;;  %v3373_v1 = vld [vmem:[%s3536_s25 + $0x62c] ss:$16 sps:$4 sm:$0xff]  }
  0xc3   : > { %2241 = vmatpush1.bf16.msra.mxu1 %v3278_v0  ;;  %2267 = vmatprep.subr.bf16.mxu0 %v3289_v3  ;;  %v3370_v0 = vld [vmem:[%s3536_s25 + $0x52c] ss:$16 sps:$4 sm:$0xff]   ;;  %v3371_v3 = vld [vmem:[%s3536_s25 + $0x628] ss:$16 sps:$4 sm:$0xff]  }
  0xc4   : > { %2242 = vmatprep.subr.bf16.mxu1 %v3286_v2  ;;  %v3368_v2 = vld [vmem:[%s3536_s25 + $0x528] ss:$16 sps:$4 sm:$0xff]  }
  0xc6   : > { %2268 = vmatpush1.bf16.msra.mxu0 %v3287_v5  ;;  %v3379_v5 = vld [vmem:[%s3536_s25 + $0x64c] ss:$16 sps:$4 sm:$0xff]  }
  0xc7   : > { %2243 = vmatpush1.bf16.msra.mxu1 %v3284_v4  ;;  %2269 = vmatprep.subr.bf16.mxu0 %v3295_v6  ;;  %v3376_v4 = vld [vmem:[%s3536_s25 + $0x54c] ss:$16 sps:$4 sm:$0xff]  }
  0xc8   : > { %2244 = vmatprep.subr.bf16.mxu1 %v3292_v52  ;;  %v3374_v52 = vld [vmem:[%s3536_s25 + $0x548] ss:$16 sps:$4 sm:$0xff]   ;;  %v3382_v6 = vld [vmem:[%s3536_s25 + $0x56c] ss:$16 sps:$4 sm:$0xff]  }
  0xca   : > { %2270 = vmatpush1.bf16.msra.mxu0 %v3293_v10  ;;  %v3380_v10 = vld [vmem:[%s3536_s25 + $0x568] ss:$16 sps:$4 sm:$0xff]  }
  0xcb   : > { %2245 = vmatpush1.bf16.msra.mxu1 %v3290_v9  ;;  %2271 = vmatprep.subr.bf16.mxu0 %v3301_v12  ;;  %v3385_v9 = vld [vmem:[%s3536_s25 + $0x66c] ss:$16 sps:$4 sm:$0xff]  }
  0xcc   : > { %2246 = vmatprep.subr.bf16.mxu1 %v3298_v11  ;;  %v3383_v11 = vld [vmem:[%s3536_s25 + $0x668] ss:$16 sps:$4 sm:$0xff]   ;;  %v3391_v12 = vld [vmem:[%s3536_s25 + $0x68c] ss:$16 sps:$4 sm:$0xff]  }
  0xce   : > { %2272 = vmatpush1.bf16.msra.mxu0 %v3299_v14  ;;  %v3389_v14 = vld [vmem:[%s3536_s25 + $0x688] ss:$16 sps:$4 sm:$0xff]  }
  0xcf   : > { %2247 = vmatpush1.bf16.msra.mxu1 %v3296_v13  ;;  %2273 = vmatprep.subr.bf16.mxu0 %v3307_v16  ;;  %v3386_v13 = vld [vmem:[%s3536_s25 + $0x588] ss:$16 sps:$4 sm:$0xff]   ;;  %v3397_v16 = vld [vmem:[%s3536_s25 + $0x6ac] ss:$16 sps:$4 sm:$0xff]  }
  0xd0   : > { %2248 = vmatprep.subr.bf16.mxu1 %v3304_v15  ;;  %v3394_v15 = vld [vmem:[%s3536_s25 + $0x5ac] ss:$16 sps:$4 sm:$0xff]  }
  0xd2   : > { %2274 = vmatpush1.bf16.msra.mxu0 %v3305_v20  ;;  %v3395_v20 = vld [vmem:[%s3536_s25 + $0x6a8] ss:$16 sps:$4 sm:$0xff]  }
  0xd3   : > { %2249 = vmatpush1.bf16.msra.mxu1 %v3302_v19  ;;  %2275 = vmatprep.subr.bf16.mxu0 %v3313_v22  ;;  %v3392_v19 = vld [vmem:[%s3536_s25 + $0x5a8] ss:$16 sps:$4 sm:$0xff]   ;;  %v3403_v22 = vld [vmem:[%s3536_s25 + $0x6cc] ss:$16 sps:$4 sm:$0xff]  }
  0xd4   : > { %2250 = vmatprep.subr.bf16.mxu1 %v3310_v21  ;;  %v3400_v21 = vld [vmem:[%s3536_s25 + $0x5cc] ss:$16 sps:$4 sm:$0xff]  }
  0xd6   : > { %2276 = vmatpush1.bf16.msra.mxu0 %v3311_v24  ;;  %v3401_v24 = vld [vmem:[%s3536_s25 + $0x6c8] ss:$16 sps:$4 sm:$0xff]  }
  0xd7   : > { %2251 = vmatpush1.bf16.msra.mxu1 %v3308_v23  ;;  %2277 = vmatprep.subr.bf16.mxu0 %v3316_v25  ;;  %v3398_v23 = vld [vmem:[%s3536_s25 + $0x5c8] ss:$16 sps:$4 sm:$0xff]   ;;  %v3406_v25 = vld [vmem:[%s3536_s25 + $0x5ec] ss:$16 sps:$4 sm:$0xff]  }
  0xd8   : > { %2302 = vmatprep.subr.bf16.mxu1 %v3319_v26  ;;  %v3409_v26 = vld [vmem:[%s3536_s25 + $0x6ec] ss:$16 sps:$4 sm:$0xff]  }
  0xda   : > { %2253 = vmatmul.mubr.bf16.vlgmr.msra.gmra.mrb[8].mxu1 %v3613_v7  ;;  %2278 = vmatpush1.bf16.msra.mxu0 %v3314_v28  ;;  %v3329_v7 = vld [vmem:[%s3536_s25 + $0x448] ss:$16 sps:$4 sm:$0xff]  }
  0xdb   : > { %2303 = vmatpush1.bf16.msra.mxu1 %v3317_v29  ;;  %2279 = vmatprep.subr.bf16.mxu0 %v3322_v30  ;;  %v3404_v28 = vld [vmem:[%s3536_s25 + $0x5e8] ss:$16 sps:$4 sm:$0xff]   ;;  %v3412_v30 = vld [vmem:[%s3536_s25 + $0x70c] ss:$16 sps:$4 sm:$0xff]  }
  0xdc   : > { %2304 = vmatprep.subr.bf16.mxu1 %v3325_v31  ;;  %2334 = vmatprep.mubr.bf16.mxu1 %v3653_v37  ;;  %v3340_v37 = vld [vmem:[%s3536_s25 + $0x38c] ss:$16 sps:$4 sm:$0xff]   ;;  %v3407_v29 = vld [vmem:[%s3536_s25 + $0x6e8] ss:$16 sps:$4 sm:$0xff]  }
  0xdd   : > { %v3415_v31 = vld [vmem:[%s3536_s25 + $0x80c] ss:$16 sps:$4 sm:$0xff]  }
  0xde   : > { %2280 = vmatpush1.bf16.msra.mxu0 %v3320_v32  ;;  %v3410_v32 = vld [vmem:[%s3536_s25 + $0x708] ss:$16 sps:$4 sm:$0xff]  }
  0xdf   : > { %2305 = vmatpush1.bf16.msra.mxu1 %v3323_v33  ;;  %2281 = vmatprep.subr.bf16.mxu0 %v3328_v48  ;;  %v3413_v33 = vld [vmem:[%s3536_s25 + $0x808] ss:$16 sps:$4 sm:$0xff]   ;;  %v3418_v48 = vld [vmem:[%s3536_s25 + $0x72c] ss:$16 sps:$4 sm:$0xff]  }
  0xe0   : > { %2306 = vmatprep.subr.bf16.mxu1 %v3331_v34  ;;  %v3421_v34 = vld [vmem:[%s3536_s25 + $0x82c] ss:$16 sps:$4 sm:$0xff]  }
  0xe2   : > { %2282 = vmatpush1.bf16.msra.mxu0 %v3326_v35  ;;  %v3416_v35 = vld [vmem:[%s3536_s25 + $0x728] ss:$16 sps:$4 sm:$0xff]  }
  0xe3   : > { %2307 = vmatpush1.bf16.msra.mxu1 %v3329_v7  ;;  %2283 = vmatprep.subr.bf16.mxu0 %v3334_v36  ;;  %v3419_v7 = vld [vmem:[%s3536_s25 + $0x828] ss:$16 sps:$4 sm:$0xff]   ;;  %v3424_v36 = vld [vmem:[%s3536_s25 + $0x74c] ss:$16 sps:$4 sm:$0xff]  }
  0xe4   : > { %2308 = vmatprep.subr.bf16.mxu1 %v3337_v39  ;;  %v3427_v39 = vld [vmem:[%s3536_s25 + $0x84c] ss:$16 sps:$4 sm:$0xff]  }
  0xe6   : > { %2284 = vmatpush1.bf16.msra.mxu0 %v3332_v40  ;;  %v3422_v40 = vld [vmem:[%s3536_s25 + $0x748] ss:$16 sps:$4 sm:$0xff]  }
  0xe7   : > { %2309 = vmatpush1.bf16.msra.mxu1 %v3335_v41  ;;  %2285 = vmatprep.subr.bf16.mxu0 %v3340_v37  ;;  %v3430_v41 = vld [vmem:[%s3536_s25 + $0x76c] ss:$16 sps:$4 sm:$0xff]  }
  0xe8   : > { %2310 = vmatprep.subr.bf16.mxu1 %v3343_v42  ;;  %v3433_v37 = vld [vmem:[%s3536_s25 + $0x86c] ss:$16 sps:$4 sm:$0xff]   ;;  %v3428_v42 = vld [vmem:[%s3536_s25 + $0x768] ss:$16 sps:$4 sm:$0xff]  }
  0xea   : > { %2286 = vmatpush1.bf16.msra.mxu0 %v3338_v43  ;;  %v3431_v43 = vld [vmem:[%s3536_s25 + $0x868] ss:$16 sps:$4 sm:$0xff]  }
  0xeb   : > { %2311 = vmatpush1.bf16.msra.mxu1 %v3341_v44  ;;  %2287 = vmatprep.subr.bf16.mxu0 %v3346_v45  ;;  %v3439_v44 = vld [vmem:[%s3536_s25 + $0x88c] ss:$16 sps:$4 sm:$0xff]   ;;  %v3434_v45 = vld [vmem:[%s3536_s25 + $0x788] ss:$16 sps:$4 sm:$0xff]  }
  0xec   : > { %2312 = vmatprep.subr.bf16.mxu1 %v3349_v46  ;;  %v3437_v46 = vld [vmem:[%s3536_s25 + $0x888] ss:$16 sps:$4 sm:$0xff]  }
  0xee   : > { %2288 = vmatpush1.bf16.msra.mxu0 %v3344_v47  ;;  %v3442_v47 = vld [vmem:[%s3536_s25 + $0x7ac] ss:$16 sps:$4 sm:$0xff]  }
  0xef   : > { %2313 = vmatpush1.bf16.msra.mxu1 %v3347_v49  ;;  %2289 = vmatprep.subr.bf16.mxu0 %v3352_v50  ;;  %v3445_v49 = vld [vmem:[%s3536_s25 + $0x8ac] ss:$16 sps:$4 sm:$0xff]   ;;  %v3440_v50 = vld [vmem:[%s3536_s25 + $0x7a8] ss:$16 sps:$4 sm:$0xff]  }
  0xf0   : > { %2314 = vmatprep.subr.bf16.mxu1 %v3355_v51  ;;  %v3443_v51 = vld [vmem:[%s3536_s25 + $0x8a8] ss:$16 sps:$4 sm:$0xff]  }
  0xf2   : > { %2290 = vmatpush1.bf16.msra.mxu0 %v3350_v53  ;;  %v3448_v53 = vld [vmem:[%s3536_s25 + $0x7cc] ss:$16 sps:$4 sm:$0xff]  }
  0xf3   : > { %2315 = vmatpush1.bf16.msra.mxu1 %v3353_v54  ;;  %2291 = vmatprep.subr.bf16.mxu0 %v3358_v56  ;;  %v3451_v54 = vld [vmem:[%s3536_s25 + $0x8cc] ss:$16 sps:$4 sm:$0xff]  }
  0xf4   : > { %2316 = vmatprep.subr.bf16.mxu1 %v3361_v57 }
  0xf6   : > { %2292 = vmatpush1.bf16.msra.mxu0 %v3356_v58 }
  0xf7   : > { %2317 = vmatpush1.bf16.msra.mxu1 %v3359_v59  ;;  %2343 = vmatprep.subr.bf16.mxu0 %v3367_v61 }
  0xf8   : > { %2318 = vmatprep.subr.bf16.mxu1 %v3364_v60 }
  0xf9   : > { %2294 = vmatmul.mubr.bf16.vlgmr.msra.gmra.mrb[12].mxu0 %v3615_v8  ;;  %v3377_v8 = vld [vmem:[%s3536_s25 + $0x648] ss:$16 sps:$4 sm:$0xff]  }
  0xfa   : > { %2344 = vmatpush1.bf16.msra.mxu0 %v3365_v63  ;;  %2375 = vmatprep.mubr.bf16.mxu0 %v3657_v38  ;;  %v3388_v38 = vld [vmem:[%s3536_s25 + $0x58c] ss:$16 sps:$4 sm:$0xff]  }
  0xfb   : > { %2319 = vmatpush1.bf16.msra.mxu1 %v3362_v62  ;;  %2345 = vmatprep.subr.bf16.mxu0 %v3373_v1  ;;  %v3449_v1 = vld [vmem:[%s3536_s25 + $0x8c8] ss:$16 sps:$4 sm:$0xff]  }
  0xfc   : > { %2320 = vmatprep.subr.bf16.mxu1 %v3370_v0  ;;  %v3446_v0 = vld [vmem:[%s3536_s25 + $0x7c8] ss:$16 sps:$4 sm:$0xff]  }
  0xfe   : > { %2346 = vmatpush1.bf16.msra.mxu0 %v3371_v3 }
  0xff   : > { %2321 = vmatpush1.bf16.msra.mxu1 %v3368_v2  ;;  %2347 = vmatprep.subr.bf16.mxu0 %v3379_v5  ;;  %v3457_v5 = vld [vmem:[%s3536_s25 + $0x8ec] ss:$16 sps:$4 sm:$0xff]  }
 0x100   : > { %2322 = vmatprep.subr.bf16.mxu1 %v3376_v4  ;;  %v3454_v4 = vld [vmem:[%s3536_s25 + $0x7ec] ss:$16 sps:$4 sm:$0xff]  }
 0x102   : > { %2348 = vmatpush1.bf16.msra.mxu0 %v3377_v8  ;;  %v3455_v8 = vld [vmem:[%s3536_s25 + $0x8e8] ss:$16 sps:$4 sm:$0xff]  }
 0x103   : > { %2323 = vmatpush1.bf16.msra.mxu1 %v3374_v52  ;;  %2349 = vmatprep.subr.bf16.mxu0 %v3385_v9  ;;  %v3452_v52 = vld [vmem:[%s3536_s25 + $0x7e8] ss:$16 sps:$4 sm:$0xff]  }
 0x104   : > { %2324 = vmatprep.subr.bf16.mxu1 %v3382_v6 }
 0x106   : > { %2350 = vmatpush1.bf16.msra.mxu0 %v3383_v11 }
 0x107   : > { %2325 = vmatpush1.bf16.msra.mxu1 %v3380_v10  ;;  %2351 = vmatprep.subr.bf16.mxu0 %v3391_v12 }
 0x108   : > { %2326 = vmatprep.subr.bf16.mxu1 %v3388_v38 }
 0x10a   : > { %2352 = vmatpush1.bf16.msra.mxu0 %v3389_v14 }
 0x10b   : > { %2327 = vmatpush1.bf16.msra.mxu1 %v3386_v13  ;;  %2353 = vmatprep.subr.bf16.mxu0 %v3397_v16 }
 0x10c   : > { %2328 = vmatprep.subr.bf16.mxu1 %v3394_v15 }
 0x10e   : > { %2354 = vmatpush1.bf16.msra.mxu0 %v3395_v20 }
 0x10f   : > { %2329 = vmatpush1.bf16.msra.mxu1 %v3392_v19  ;;  %2355 = vmatprep.subr.bf16.mxu0 %v3403_v22 }
 0x110   : > { %2330 = vmatprep.subr.bf16.mxu1 %v3400_v21  ;;  %v246_v21 = vld [vmem:[#allocation2] sm:$0xff] }
 0x112   : > { %2356 = vmatpush1.bf16.msra.mxu0 %v3401_v24  ;;  %v247_v24 = vld [vmem:[#allocation2 + $0x8] sm:$0xff] }
 0x113   : > { %2331 = vmatpush1.bf16.msra.mxu1 %v3398_v23  ;;  %2357 = vmatprep.subr.bf16.mxu0 %v3409_v26 }
 0x114   : > { %2332 = vmatprep.subr.bf16.mxu1 %v3406_v25 }
 0x116   : > { %2358 = vmatpush1.bf16.msra.mxu0 %v3407_v29 }
 0x117   : > { %2333 = vmatpush1.bf16.msra.mxu1 %v3404_v28  ;;  %2359 = vmatprep.subr.bf16.mxu0 %v3412_v30 }
 0x118   : > { %2384 = vmatprep.subr.bf16.mxu1 %v3415_v31 }
 0x11a   : > { %2335 = vmatmul.mubr.bf16.vlgmr.msra.gmra.mrb[12].mxu1 %v3701_v17  ;;  %2360 = vmatpush1.bf16.msra.mxu0 %v3410_v32  ;;  %v3425_v17 = vld [vmem:[%s3536_s25 + $0x848] ss:$16 sps:$4 sm:$0xff]  }
 0x11b   : > { %2385 = vmatpush1.bf16.msra.mxu1 %v3413_v33  ;;  %2361 = vmatprep.subr.bf16.mxu0 %v3418_v48 }
 0x11c   : > { %2386 = vmatprep.subr.bf16.mxu1 %v3421_v34  ;;  %2416 = vmatprep.mubr.bf16.mxu1 %v3483_v27  ;;  %v3436_v27 = vld [vmem:[%s3536_s25 + $0x78c] ss:$16 sps:$4 sm:$0xff]  }
 0x11e   : > { %2362 = vmatpush1.bf16.msra.mxu0 %v3416_v35 }
 0x11f   : > { %2387 = vmatpush1.bf16.msra.mxu1 %v3419_v7  ;;  %2363 = vmatprep.subr.bf16.mxu0 %v3424_v36 }
 0x120   : > { %2388 = vmatprep.subr.bf16.mxu1 %v3427_v39 }
 0x122   : > { %2364 = vmatpush1.bf16.msra.mxu0 %v3422_v40 }
 0x123   : > { %2389 = vmatpush1.bf16.msra.mxu1 %v3425_v17  ;;  %2365 = vmatprep.subr.bf16.mxu0 %v3430_v41 }
 0x124   : > { %2390 = vmatprep.subr.bf16.mxu1 %v3433_v37 }
 0x126   : > { %2366 = vmatpush1.bf16.msra.mxu0 %v3428_v42 }
 0x127   : > { %2391 = vmatpush1.bf16.msra.mxu1 %v3431_v43  ;;  %2367 = vmatprep.subr.bf16.mxu0 %v3436_v27 }
 0x128   : > { %2392 = vmatprep.subr.bf16.mxu1 %v3439_v44 }
 0x12a   : > { %2368 = vmatpush1.bf16.msra.mxu0 %v3434_v45 }
 0x12b   : > { %2393 = vmatpush1.bf16.msra.mxu1 %v3437_v46  ;;  %2369 = vmatprep.subr.bf16.mxu0 %v3442_v47 }
 0x12c   : > { %2394 = vmatprep.subr.bf16.mxu1 %v3445_v49  ;;  %v2049_v56 = vpop.f32.mrb[0].mxu0  ;;  %v248_v49 = vld [vmem:[#allocation2 + $0x10] sm:$0xff] }
 0x12d   : > { %v2090_v57 = vpop.f32.mrb[0].mxu1  ;;  %v2051_v59 = vpop.f32.mrb[1].mxu0 }
 0x12e   : > { %v2091_v58 = vadd.f32 %v2090_v57, %v2049_v56  ;;  %v2092_v60 = vpop.f32.mrb[1].mxu1  ;;  %v2053_v62 = vpop.f32.mrb[2].mxu0  ;;  %2370 = vmatpush1.bf16.msra.mxu0 %v3440_v50  ;;  %v249_v56 = vld [vmem:[#allocation2 + $0x18] sm:$0xff] }
 0x12f   : > { %v2093_v61 = vadd.f32 %v2092_v60, %v2051_v59  ;;  %v2094_v63 = vpop.f32.mrb[2].mxu1  ;;  %2395 = vmatpush1.bf16.msra.mxu1 %v3443_v51  ;;  %v2054_v2 = vpop.f32.mrb[3].mxu0  ;;  %2371 = vmatprep.subr.bf16.mxu0 %v3448_v53 }
 0x130   : > { %v2095_v3 = vpop.f32.mrb[3].mxu1  ;;  %2396 = vmatprep.subr.bf16.mxu1 %v3451_v54  ;;  %v3484_v2 = vmov (!%p2982_p7), 0.0  }
 0x131   : > { %2445 = vst [vmem:[%s3927_s3] sm:$0xff] (!%p2982_p7), %v3484_v2  ;;  %2446 = vst [vmem:[%s3927_s3 + $0x8] sm:$0xff] (!%p2982_p7), %v3484_v2 }
 0x132   : > { %2372 = vmatpush1.bf16.msra.mxu0 %v3446_v0  ;;  %2447 = vst [vmem:[%s3927_s3 + $0x10] sm:$0xff] (!%p2982_p7), %v3484_v2  ;;  %2448 = vst [vmem:[%s3927_s3 + $0x18] sm:$0xff] (!%p2982_p7), %v3484_v2 }
 0x133   : > { %2397 = vmatpush1.bf16.msra.mxu1 %v3449_v1  ;;  %2373 = vmatprep.subr.bf16.mxu0 %v3454_v4  ;;  %v2482_v1 = vlaneseq (!%p2982_p7) }
 0x134   : > { %2398 = vmatprep.subr.bf16.mxu1 %v3457_v5 }
 0x135   : > { %vm2504_vm0 = vcmp.lt.s32.totalorder (!%p2982_p7), %v2482_v1, 512 }
 0x136   : > { %2374 = vmatpush1.bf16.msra.mxu0 %v3452_v52 }
 0x137   : > { %2399 = vmatpush1.bf16.msra.mxu1 %v3455_v8 }
 0x139   : > { %2376 = vmatmul.mubr.bf16.vlgmr.msra.gmra.mrb[16].mxu0 %v3705_v18 }
 0x13a   : > { %2417 = vmatmul.mubr.bf16.vlgmr.msra.gmra.mrb[16].mxu1 %v3744_v55 }
 0x16c   : > { %v2131_v6 = vpop.f32.mrb[4].mxu0 }
 0x16d   : > { %v2172_v9 = vpop.f32.mrb[4].mxu1  ;;  %v2132_v10 = vadd.f32 %v2131_v6, %v2091_v58  ;;  %v2133_v11 = vpop.f32.mrb[5].mxu0 }
 0x16e   : > { %v2174_v38 = vpop.f32.mrb[5].mxu1  ;;  %v2134_v12 = vadd.f32 %v2133_v11, %v2093_v61  ;;  %v2135_v13 = vpop.f32.mrb[6].mxu0 }
 0x16f   : > { %v2176_v14 = vpop.f32.mrb[6].mxu1  ;;  %v2173_v15 = vadd.f32 %v2172_v9, %v2132_v10  ;;  %v2136_v16 = vpop.f32.mrb[7].mxu0 }
 0x170   : > { %v2177_v19 = vpop.f32.mrb[7].mxu1  ;;  %v2175_v20 = vadd.f32 %v2174_v38, %v2134_v12 }
 0x18c   : > { %v2213_v22 = vpop.f32.mrb[8].mxu0 }
 0x18d   : > { %v2214_v23 = vadd.f32 %v2213_v22, %v2173_v15  ;;  %v2215_v25 = vpop.f32.mrb[9].mxu0 }
 0x18e   : > { %v2216_v18 = vadd.f32 %v2215_v25, %v2175_v20  ;;  %v2217_v26 = vpop.f32.mrb[10].mxu0 }
 0x18f   : > { %v2425_v55 = vadd.f32 %v2214_v23, %v246_v21  ;;  %v2218_v28 = vpop.f32.mrb[11].mxu0 }
 0x190   : > { %v2426_v29 = vadd.f32 %v2216_v18, %v247_v24 }
 0x191   : > { %2429 = vst [vmem:[#allocation2] sm:$0xff] %v2425_v55 }
 0x192   : > { %2430 = vst [vmem:[#allocation2 + $0x8] sm:$0xff] %v2426_v29 }
 0x198   : > { %v2437_v62 = vld [vmem:[#allocation2] sm:$0xff] (!%p2982_p7) }
 0x199   : > { %v2438_v63 = vld [vmem:[#allocation2 + $0x8] sm:$0xff] (!%p2982_p7)  ;;  %2441 = vst [vmem:[%s3926_s2] sm:$0xff] (!%p2982_p7), %v2437_v62  ;;  %v2449_v3 = vrot.slane (!%p2982_p7), %v2437_v62, 4  ;;  %v2508_v4 = vmul.f32 (!%p2982_p7), %v2437_v62, %v2437_v62 }
 0x19a   : > { %2442 = vst [vmem:[%s3926_s2 + $0x8] sm:$0xff] (!%p2982_p7), %v2438_v63  ;;  %v2455_v5 = vrot.slane (!%p2982_p7), %v2438_v63, 4  ;;  %v2509_v52 = vmul.f32 (!%p2982_p7), %v2438_v63, %v2438_v63 }
 0x19b   : > { %v2450_v38 = vadd.f32 (!%p2982_p7), %v2449_v3, %v2437_v62  ;;  %v2512_v12 = vrot.slane (!%p2982_p7), %v2508_v4, 4 }
 0x19c   : > { %v2456_v13 = vadd.f32 (!%p2982_p7), %v2455_v5, %v2438_v63  ;;  %v2518_v14 = vrot.slane (!%p2982_p7), %v2509_v52, 4 }
 0x19d   : > { %v2451_v21 = vrot.slane (!%p2982_p7), %v2450_v38, 2  ;;  %v2513_v22 = vadd.f32 (!%p2982_p7), %v2512_v12, %v2508_v4 }
 0x19e   : > { %v2457_v23 = vrot.slane (!%p2982_p7), %v2456_v13, 2  ;;  %v2519_v24 = vadd.f32 (!%p2982_p7), %v2518_v14, %v2509_v52 }
 0x19f   : > { %v2452_v28 = vadd.f32 (!%p2982_p7), %v2451_v21, %v2450_v38  ;;  %v2514_v29 = vrot.slane (!%p2982_p7), %v2513_v22, 2 }
 0x1ad   : > { %v2254_v30 = vpop.f32.mrb[8].mxu1 }
 0x1ae   : > { %v2256_v31 = vpop.f32.mrb[9].mxu1 }
 0x1af   : > { %v2258_v32 = vpop.f32.mrb[10].mxu1 }
 0x1b0   : > { %v2259_v33 = vpop.f32.mrb[11].mxu1 }
 0x1cc   : > { %v2295_v48 = vpop.f32.mrb[12].mxu0 }
 0x1cd   : > { %v2296_v34 = vadd.f32 %v2295_v48, %v2254_v30  ;;  %v2297_v35 = vpop.f32.mrb[13].mxu0  ;;  %v2458_v30 = vadd.f32 (!%p2982_p7), %v2457_v23, %v2456_v13 }
 0x1ce   : > { %v2298_v7 = vadd.f32 %v2297_v35, %v2256_v31  ;;  %v2299_v36 = vpop.f32.mrb[14].mxu0  ;;  %v2520_v31 = vrot.slane (!%p2982_p7), %v2519_v24, 2  ;;  %v2453_v35 = vrot.slane (!%p2982_p7), %v2452_v28, 1 }
 0x1cf   : > { %v2300_v39 = vpop.f32.mrb[15].mxu0  ;;  %v2459_v36 = vrot.slane (!%p2982_p7), %v2458_v30, 1 }
 0x1d0   : > { %v2521_v39 = vadd.f32 (!%p2982_p7), %v2520_v31, %v2519_v24 }
 0x1ed   : > { %v2336_v40 = vpop.f32.mrb[12].mxu1 }
 0x1ee   : > { %v2337_v17 = vadd.f32 %v2336_v40, %v2296_v34  ;;  %v2338_v41 = vpop.f32.mrb[13].mxu1 }
 0x1ef   : > { %v2339_v37 = vadd.f32 %v2338_v41, %v2298_v7  ;;  %v2340_v42 = vpop.f32.mrb[14].mxu1  ;;  %v2515_v7 = vadd.f32 (!%p2982_p7), %v2514_v29, %v2513_v22 }
 0x1f0   : > { %v2341_v43 = vpop.f32.mrb[15].mxu1  ;;  %v2454_v42 = vadd.f32 (!%p2982_p7), %v2453_v35, %v2452_v28 }
 0x1f1   : > { %v2516_v43 = vrot.slane (!%p2982_p7), %v2515_v7, 1 }
 0x20c   : > { %v2377_v27 = vpop.f32.mrb[16].mxu0 }
 0x20d   : > { %v2418_v44 = vpop.f32.mrb[16].mxu1  ;;  %v2378_v45 = vadd.f32 %v2377_v27, %v2337_v17  ;;  %v2379_v46 = vpop.f32.mrb[17].mxu0  ;;  %v2460_v27 = vadd.f32 (!%p2982_p7), %v2459_v36, %v2458_v30 }
 0x20e   : > { %v2420_v47 = vpop.f32.mrb[17].mxu1  ;;  %v2380_v50 = vadd.f32 %v2379_v46, %v2339_v37  ;;  %v2381_v51 = vpop.f32.mrb[18].mxu0  ;;  %2436 = sbr.rel (%p2982_p7) target bundleno = 563 (0x233), region = 36 }
 0x20f   : > { %v2422_v53 = vpop.f32.mrb[18].mxu1  ;;  %v2419_v54 = vadd.f32 %v2418_v44, %v2378_v45  ;;  %v2382_v57 = vpop.f32.mrb[19].mxu0  ;;  %v2522_v44 = vrot.slane (!%p2982_p7), %v2521_v39, 1 }
 0x210   : > { %v2423_v58 = vpop.f32.mrb[19].mxu1  ;;  %v2421_v59 = vadd.f32 %v2420_v47, %v2380_v50  ;;  %v2517_v50 = vadd.f32 (!%p2982_p7), %v2516_v43, %v2515_v7  ;;  %v3485_v53 = vmov (!%p2982_p7), 1966171168  }
 0x211   : > { %v2427_v60 = vadd.f32 %v2419_v54, %v248_v49  ;;  %v2523_v51 = vadd.f32 (!%p2982_p7), %v2522_v44, %v2521_v39  ;;  %v2480_v54 = vunpack.c.l.s4 (!%p2982_p7), %v3485_v53  ;;  %v2483_v58 = vshrl.u32 (!%p2982_p7), %v2482_v1, 7 }
 0x212   : > { %v2428_v61 = vadd.f32 %v2421_v59, %v249_v56  ;;  %v2477_v59 = vcombine.low (!%p2982_p7), %v2454_v42, %v2460_v27 }
 0x213   : > { %2431 = vst [vmem:[#allocation2 + $0x10] sm:$0xff] %v2427_v60  ;;  %v2540_v60 = vcombine.low (!%p2982_p7), %v2517_v50, %v2523_v51  ;;  %v2481_v62 = vunpack.c.0.s8 (!%p2982_p7), %v2480_v54 }
 0x214   : > { %2432 = vst [vmem:[#allocation2 + $0x18] sm:$0xff] %v2428_v61 }
 0x21a   : > { %v2439_v0 = vld [vmem:[#allocation2 + $0x10] sm:$0xff] }
 0x21b   : > { %2443 = vst [vmem:[%s3926_s2 + $0x10] sm:$0xff] %v2439_v0  ;;  %v2440_v8 = vld [vmem:[#allocation2 + $0x18] sm:$0xff]  ;;  %v2461_v6 = vrot.slane %v2439_v0, 4  ;;  %v2510_v9 = vmul.f32 %v2439_v0, %v2439_v0 }
 0x21c   : > { %2444 = vst [vmem:[%s3926_s2 + $0x18] sm:$0xff] %v2440_v8  ;;  %v2467_v10 = vrot.slane %v2440_v8, 4  ;;  %v2511_v11 = vmul.f32 %v2440_v8, %v2440_v8 }
 0x21d   : > { %v2462_v15 = vadd.f32 %v2461_v6, %v2439_v0  ;;  %v2524_v16 = vrot.slane %v2510_v9, 4  ;;  %v2484_v0 = vsub.s32 %v2481_v62, %v2483_v58 }
 0x21e   : > { %v2468_v19 = vadd.f32 %v2467_v10, %v2440_v8  ;;  %v2530_v20 = vrot.slane %v2511_v11, 4 }
 0x21f   : > { %v2463_v25 = vrot.slane %v2462_v15, 2  ;;  %v2525_v18 = vadd.f32 %v2524_v16, %v2510_v9  ;;  %v2485_v2 = vrot.slane %v2477_v59, %v2484_v0  ;;  %v2548_v4 = vrot.slane %v2540_v60, %v2484_v0 }
 0x220   : > { %v2469_v26 = vrot.slane %v2468_v19, 2  ;;  %v2531_v55 = vadd.f32 %v2530_v20, %v2511_v11 }
 0x221   : > { %v2464_v32 = vadd.f32 %v2463_v25, %v2462_v15  ;;  %v2526_v33 = vrot.slane %v2525_v18, 2 }
 0x222   : > { %v2470_v48 = vadd.f32 %v2469_v26, %v2468_v19  ;;  %v2532_v34 = vrot.slane %v2531_v55, 2 }
 0x223   : > { %v2465_v40 = vrot.slane %v2464_v32, 1  ;;  %v2527_v17 = vadd.f32 %v2526_v33, %v2525_v18 }
 0x224   : > { %v2471_v41 = vrot.slane %v2470_v48, 1  ;;  %v2533_v37 = vadd.f32 %v2532_v34, %v2531_v55 }
 0x225   : > { %v2466_v45 = vadd.f32 %v2465_v40, %v2464_v32  ;;  %v2528_v46 = vrot.slane %v2527_v17, 1 }
 0x226   : > { %v2472_v47 = vadd.f32 %v2471_v41, %v2470_v48  ;;  %v2534_v49 = vrot.slane %v2533_v37, 1 }
 0x227   : > { %v2529_v56 = vadd.f32 %v2528_v46, %v2527_v17 }
 0x228   : > { %v2535_v57 = vadd.f32 %v2534_v49, %v2533_v37  ;;  %v2478_v61 = vcombine.low %v2466_v45, %v2472_v47 }
 0x22a   : > { %v2541_v63 = vcombine.low %v2529_v56, %v2535_v57  ;;  %v2492_v3 = vrot.slane %v2478_v61, %v2484_v0 }
 0x22c   : > { %v2555_v5 = vrot.slane %v2541_v63, %v2484_v0  ;;  %v2493_v52 = vcombine.low %v2485_v2, %v2492_v3 }
 0x22e   : > { %v2556_v8 = vcombine.low %v2548_v4, %v2555_v5  ;;  %v2500_v6 = vrot.slane %v2493_v52, %v2484_v0 }
 0x230   : > { %v2563_v9 = vrot.slane %v2556_v8, %v2484_v0  ;;  %2506 = vst.msk [vmem:[%s3927_s3] ss:$8 sm:$0xf] %vm2504_vm0, %v2500_v6 }
 0x232   : > { %2983 = vst.msk [vmem:[%s3927_s3 + $0x1] ss:$8 sm:$0xf] %vm2504_vm0, %v2563_v9 }
 0x233 PF: > { %s14_s14 = sadd.s32 1, %s3480_s14   ;;  %s3928_s12 = smov %s3476_s13 }
 0x234   : > { %p11_p8 = scmp.ge.s32.totalorder %s14_s14, 4   ;;  %s3929_s13 = smov %s3931_s15 }
 0x236   :  { %13 = sbr.rel (!%p11_p8) target bundleno = 2 (0x2), region = 82 }

// kernel: modified_resnet18_forward.77
= control target key start
LH: loop header
LB: loop body
LE: loop exit
PB: predicated region body
PF: predicated region fallthrough
CT: control target
= control target key end

     0   :  { %s4418_s12 = smov 0   ;;  %s4420_s13 = smov 0   ;;  %s4967_s0 = inlined_call_operand.vmem [shape: bf16[8,4608], index: 0, kind: input, shape index: {}]   ;;  %s4968_s1 = inlined_call_operand.vmem [shape: bf16[4608,512], index: 1, kind: input, shape index: {}]   ;;  %s4969_s2 = inlined_call_operand.vmem [shape: f32[8,512], index: 2, kind: output, shape index: {0}]   ;;  %s4970_s3 = inlined_call_operand.vmem [shape: f32[8,512], index: 3, kind: output, shape index: {1}]  }
   0x1   :  { %s4422_s14 = smov 0  }
   0x2 LB: > { %s23_s15 = sadd.s32 1, %s4389_s13  ;;  %p3348_p0 = scmp.ge.s32.totalorder %s4393_s14, 1  ;;  %s4393_s14 = sphi %s4422_s14, %s14_s14   ;;  %s4389_s13 = sphi %s4420_s13, %s4972_s13   ;;  %s4385_s12 = sphi %s4418_s12, %s4971_s12  }
   0x3   : > { %p24_p1 = scmp.ge.s32.totalorder %s23_s15, 3  ;;  %p171_p2 = scmp.lt.s32.totalorder %s4393_s14, 4 }
   0x5   : > { %s4974_s15 = smov (%p24_p1, %s23_s15), 0  ;;  %p172_p3 = pnand %p3348_p0, %p171_p2 }
   0x6   : > { %s210_s16 = smul.u32 (!%p172_p3), 12, %s4385_s12  ;;  %p3352_p6 = scmp.ne.s32.totalorder (!%p172_p3), %s4385_s12, 0 }
   0x7   : > { %175 = sbr.rel (%p172_p3) target bundleno = 659 (0x293), region = 28 }
   0x8   : > { %s220_s17 = smul.u32 (!%p172_p3), 192, %s4385_s12  ;;  %p213_p4 = scmp.lt.s32.totalorder (!%p172_p3), %s210_s16, 35 }
   0xa   : > { %p221_p5 = scmp.lt.s32.totalorder (!%p172_p3), %s220_s17, 575 }
   0xe   : > { %s4976_s16 = smov (!%p213_p4, %s210_s16), 35  ;;  %s4978_s17 = smov (!%p221_p5, %s220_s17), 575 }
   0xf   : > { %s3349_s18 = sshll.u32 %s4976_s16, 2  ;;  %s3755_s22 = sshll.u32 %s4978_s17, 4  ;;  %v4395_v0 = vmov (!%p3352_p6), 0.0  }
  0x10   : > { %s4443_s21 = scalar_lea.vmem %s4967_s0, %s3349_s18  ;;  %s4448_s25 = scalar_lea.vmem %s4968_s1, %s3755_s22  ;;  %241 = vst [vmem:[#allocation2] sm:$0xff] (!%p3352_p6), %v4395_v0  ;;  %242 = vst [vmem:[#allocation2 + $0x8] sm:$0xff] (!%p3352_p6), %v4395_v0 }
  0x11   : > { %240 = sbr.rel (%p3352_p6) target bundleno = 24 (0x18), region = 32  ;;  %243 = vst [vmem:[#allocation2 + $0x10] sm:$0xff] (!%p3352_p6), %v4395_v0  ;;  %244 = vst [vmem:[#allocation2 + $0x18] sm:$0xff] (!%p3352_p6), %v4395_v0 }
  0x18 PF: > { %v3783_v1 = vld [vmem:[%s4448_s25 + $0x4] ss:$16 sps:$4 sm:$0xff]   ;;  %v3787_v3 = vld [vmem:[%s4448_s25] ss:$16 sps:$4 sm:$0xff]   ;;  %v250_v49 = vld [vmem:[%s4443_s21 + $0x8] sm:$0xff]  ;;  %p3749_p7 = scmp.ne.s32.totalorder %s4385_s12, 2 }
  0x19   : > { %v3785_v2 = vld [vmem:[%s4448_s25 + $0x204] ss:$16 sps:$4 sm:$0xff]   ;;  %2601 = vmatprep.subr.bf16.mxu0 %v3783_v1  ;;  %v3788_v4 = vld [vmem:[%s4448_s25 + $0x200] ss:$16 sps:$4 sm:$0xff]   ;;  %v4503_v52 = vcombine.high %v250_v49, %v250_v49 }
  0x1a   : > { %2642 = vmatprep.subr.bf16.mxu1 %v3785_v2  ;;  %v3789_v5 = vld [vmem:[%s4448_s25 + $0x24] ss:$16 sps:$4 sm:$0xff]   ;;  %2602 = vmatpush1.bf16.msra.mxu0 %v3787_v3  ;;  %v3793_v7 = vld [vmem:[%s4448_s25 + $0x20] ss:$16 sps:$4 sm:$0xff]  }
  0x1b   : > { %2643 = vmatpush1.bf16.msra.mxu1 %v3788_v4  ;;  %v3791_v6 = vld [vmem:[%s4448_s25 + $0x224] ss:$16 sps:$4 sm:$0xff]   ;;  %2603 = vmatprep.subr.bf16.mxu0 %v3789_v5  ;;  %v3794_v8 = vld [vmem:[%s4448_s25 + $0x220] ss:$16 sps:$4 sm:$0xff]  }
  0x1c   : > { %2644 = vmatprep.subr.bf16.mxu1 %v3791_v6  ;;  %v3795_v9 = vld [vmem:[%s4448_s25 + $0x44] ss:$16 sps:$4 sm:$0xff]   ;;  %v3799_v11 = vld [vmem:[%s4448_s25 + $0x40] ss:$16 sps:$4 sm:$0xff]   ;;  %2674 = vmatprep.mubr.bf16.mxu1 %v4503_v52 }
  0x1d   : > { %v3797_v10 = vld [vmem:[%s4448_s25 + $0x244] ss:$16 sps:$4 sm:$0xff]   ;;  %v3800_v12 = vld [vmem:[%s4448_s25 + $0x240] ss:$16 sps:$4 sm:$0xff]  }
  0x1e   : > { %2604 = vmatpush1.bf16.msra.mxu0 %v3793_v7  ;;  %v3801_v13 = vld [vmem:[%s4448_s25 + $0x64] ss:$16 sps:$4 sm:$0xff]   ;;  %v3805_v15 = vld [vmem:[%s4448_s25 + $0x60] ss:$16 sps:$4 sm:$0xff]  }
  0x1f   : > { %2645 = vmatpush1.bf16.msra.mxu1 %v3794_v8  ;;  %2605 = vmatprep.subr.bf16.mxu0 %v3795_v9  ;;  %v3803_v14 = vld [vmem:[%s4448_s25 + $0x264] ss:$16 sps:$4 sm:$0xff]   ;;  %v3806_v16 = vld [vmem:[%s4448_s25 + $0x260] ss:$16 sps:$4 sm:$0xff]   ;;  %v4527_v8 = vcombine.low %v250_v49, %v250_v49 }
  0x20   : > { %2646 = vmatprep.subr.bf16.mxu1 %v3797_v10  ;;  %v3807_v17 = vld [vmem:[%s4448_s25 + $0x84] ss:$16 sps:$4 sm:$0xff]   ;;  %v3811_v19 = vld [vmem:[%s4448_s25 + $0x80] ss:$16 sps:$4 sm:$0xff]  }
  0x21   : > { %v3809_v18 = vld [vmem:[%s4448_s25 + $0x284] ss:$16 sps:$4 sm:$0xff]   ;;  %v3812_v20 = vld [vmem:[%s4448_s25 + $0x280] ss:$16 sps:$4 sm:$0xff]  }
  0x22   : > { %2606 = vmatpush1.bf16.msra.mxu0 %v3799_v11  ;;  %v3813_v21 = vld [vmem:[%s4448_s25 + $0xa4] ss:$16 sps:$4 sm:$0xff]   ;;  %v3817_v23 = vld [vmem:[%s4448_s25 + $0xa0] ss:$16 sps:$4 sm:$0xff]  }
  0x23   : > { %2647 = vmatpush1.bf16.msra.mxu1 %v3800_v12  ;;  %2607 = vmatprep.subr.bf16.mxu0 %v3801_v13  ;;  %v3815_v22 = vld [vmem:[%s4448_s25 + $0x2a4] ss:$16 sps:$4 sm:$0xff]   ;;  %v3818_v24 = vld [vmem:[%s4448_s25 + $0x2a0] ss:$16 sps:$4 sm:$0xff]  }
  0x24   : > { %2648 = vmatprep.subr.bf16.mxu1 %v3803_v14  ;;  %v3819_v25 = vld [vmem:[%s4448_s25 + $0xc4] ss:$16 sps:$4 sm:$0xff]   ;;  %v3823_v27 = vld [vmem:[%s4448_s25 + $0xc0] ss:$16 sps:$4 sm:$0xff]  }
  0x25   : > { %v3821_v26 = vld [vmem:[%s4448_s25 + $0x2c4] ss:$16 sps:$4 sm:$0xff]   ;;  %v3824_v28 = vld [vmem:[%s4448_s25 + $0x2c0] ss:$16 sps:$4 sm:$0xff]  }
  0x26   : > { %2608 = vmatpush1.bf16.msra.mxu0 %v3805_v15  ;;  %v3825_v29 = vld [vmem:[%s4448_s25 + $0xe4] ss:$16 sps:$4 sm:$0xff]   ;;  %v3829_v31 = vld [vmem:[%s4448_s25 + $0xe0] ss:$16 sps:$4 sm:$0xff]  }
  0x27   : > { %2649 = vmatpush1.bf16.msra.mxu1 %v3806_v16  ;;  %2609 = vmatprep.subr.bf16.mxu0 %v3807_v17  ;;  %v3827_v30 = vld [vmem:[%s4448_s25 + $0x2e4] ss:$16 sps:$4 sm:$0xff]   ;;  %v3830_v32 = vld [vmem:[%s4448_s25 + $0x2e0] ss:$16 sps:$4 sm:$0xff]  }
  0x28   : > { %2650 = vmatprep.subr.bf16.mxu1 %v3809_v18  ;;  %v3831_v33 = vld [vmem:[%s4448_s25 + $0x104] ss:$16 sps:$4 sm:$0xff]   ;;  %v3835_v35 = vld [vmem:[%s4448_s25 + $0x100] ss:$16 sps:$4 sm:$0xff]  }
  0x29   : > { %v3833_v34 = vld [vmem:[%s4448_s25 + $0x304] ss:$16 sps:$4 sm:$0xff]   ;;  %v3836_v36 = vld [vmem:[%s4448_s25 + $0x300] ss:$16 sps:$4 sm:$0xff]  }
  0x2a   : > { %2610 = vmatpush1.bf16.msra.mxu0 %v3811_v19  ;;  %v3837_v37 = vld [vmem:[%s4448_s25 + $0x124] ss:$16 sps:$4 sm:$0xff]   ;;  %v3841_v39 = vld [vmem:[%s4448_s25 + $0x120] ss:$16 sps:$4 sm:$0xff]  }
  0x2b   : > { %2651 = vmatpush1.bf16.msra.mxu1 %v3812_v20  ;;  %2611 = vmatprep.subr.bf16.mxu0 %v3813_v21  ;;  %v3839_v38 = vld [vmem:[%s4448_s25 + $0x324] ss:$16 sps:$4 sm:$0xff]   ;;  %v3842_v40 = vld [vmem:[%s4448_s25 + $0x320] ss:$16 sps:$4 sm:$0xff]  }
  0x2c   : > { %2652 = vmatprep.subr.bf16.mxu1 %v3815_v22  ;;  %v3843_v41 = vld [vmem:[%s4448_s25 + $0x144] ss:$16 sps:$4 sm:$0xff]   ;;  %v3847_v43 = vld [vmem:[%s4448_s25 + $0x140] ss:$16 sps:$4 sm:$0xff]  }
  0x2d   : > { %v3845_v42 = vld [vmem:[%s4448_s25 + $0x344] ss:$16 sps:$4 sm:$0xff]   ;;  %v3848_v44 = vld [vmem:[%s4448_s25 + $0x340] ss:$16 sps:$4 sm:$0xff]  }
  0x2e   : > { %2612 = vmatpush1.bf16.msra.mxu0 %v3817_v23  ;;  %v3849_v45 = vld [vmem:[%s4448_s25 + $0x164] ss:$16 sps:$4 sm:$0xff]   ;;  %v3853_v50 = vld [vmem:[%s4448_s25 + $0x160] ss:$16 sps:$4 sm:$0xff]  }
  0x2f   : > { %2653 = vmatpush1.bf16.msra.mxu1 %v3818_v24  ;;  %2613 = vmatprep.subr.bf16.mxu0 %v3819_v25  ;;  %v3851_v46 = vld [vmem:[%s4448_s25 + $0x364] ss:$16 sps:$4 sm:$0xff]   ;;  %v3854_v51 = vld [vmem:[%s4448_s25 + $0x360] ss:$16 sps:$4 sm:$0xff]  }
  0x30   : > { %2654 = vmatprep.subr.bf16.mxu1 %v3821_v26  ;;  %v249_v47 = vld [vmem:[%s4443_s21] sm:$0xff] }
  0x31   : > { %v4498_v48 = vcombine.high %v249_v47, %v249_v47  ;;  %v3855_v53 = vld [vmem:[%s4448_s25 + $0x184] ss:$16 sps:$4 sm:$0xff]   ;;  %v3859_v55 = vld [vmem:[%s4448_s25 + $0x180] ss:$16 sps:$4 sm:$0xff]   ;;  %v4525_v7 = vcombine.low %v249_v47, %v249_v47 }
  0x32   : > { %2614 = vmatpush1.bf16.msra.mxu0 %v3823_v27  ;;  %v3857_v54 = vld [vmem:[%s4448_s25 + $0x384] ss:$16 sps:$4 sm:$0xff]   ;;  %v3860_v56 = vld [vmem:[%s4448_s25 + $0x380] ss:$16 sps:$4 sm:$0xff]  }
  0x33   : > { %2655 = vmatpush1.bf16.msra.mxu1 %v3824_v28  ;;  %2615 = vmatprep.subr.bf16.mxu0 %v3825_v29  ;;  %v3861_v57 = vld [vmem:[%s4448_s25 + $0x1a4] ss:$16 sps:$4 sm:$0xff]   ;;  %v3865_v59 = vld [vmem:[%s4448_s25 + $0x1a0] ss:$16 sps:$4 sm:$0xff]  }
  0x34   : > { %2656 = vmatprep.subr.bf16.mxu1 %v3827_v30  ;;  %2633 = vmatprep.mubr.bf16.mxu0 %v4498_v48  ;;  %v3863_v58 = vld [vmem:[%s4448_s25 + $0x3a4] ss:$16 sps:$4 sm:$0xff]   ;;  %v3866_v60 = vld [vmem:[%s4448_s25 + $0x3a0] ss:$16 sps:$4 sm:$0xff]  }
  0x35   : > { %v3867_v61 = vld [vmem:[%s4448_s25 + $0x1c4] ss:$16 sps:$4 sm:$0xff]   ;;  %v3871_v63 = vld [vmem:[%s4448_s25 + $0x1c0] ss:$16 sps:$4 sm:$0xff]  }
  0x36   : > { %2616 = vmatpush1.bf16.msra.mxu0 %v3829_v31  ;;  %v3869_v62 = vld [vmem:[%s4448_s25 + $0x3c4] ss:$16 sps:$4 sm:$0xff]   ;;  %v3872_v0 = vld [vmem:[%s4448_s25 + $0x3c0] ss:$16 sps:$4 sm:$0xff]  }
  0x37   : > { %2657 = vmatpush1.bf16.msra.mxu1 %v3830_v32  ;;  %2617 = vmatprep.subr.bf16.mxu0 %v3831_v33  ;;  %v3873_v1 = vld [vmem:[%s4448_s25 + $0x1e4] ss:$16 sps:$4 sm:$0xff]   ;;  %v3877_v3 = vld [vmem:[%s4448_s25 + $0x1e0] ss:$16 sps:$4 sm:$0xff]  }
  0x38   : > { %2658 = vmatprep.subr.bf16.mxu1 %v3833_v34  ;;  %v3875_v2 = vld [vmem:[%s4448_s25 + $0x3e4] ss:$16 sps:$4 sm:$0xff]   ;;  %v3878_v4 = vld [vmem:[%s4448_s25 + $0x3e0] ss:$16 sps:$4 sm:$0xff]   ;;  %v4559_v34 = vld [vmem:[%s4443_s21 + $0x18] sm:$0xff] }
  0x39   : > { %v3885_v5 = vld [vmem:[%s4448_s25 + $0x404] ss:$16 sps:$4 sm:$0xff]   ;;  %v3883_v9 = vld [vmem:[%s4448_s25 + $0x400] ss:$16 sps:$4 sm:$0xff]  }
  0x3a   : > { %2618 = vmatpush1.bf16.msra.mxu0 %v3835_v35  ;;  %v3888_v6 = vld [vmem:[%s4448_s25 + $0x604] ss:$16 sps:$4 sm:$0xff]   ;;  %v3886_v10 = vld [vmem:[%s4448_s25 + $0x600] ss:$16 sps:$4 sm:$0xff]  }
  0x3b   : > { %2659 = vmatpush1.bf16.msra.mxu1 %v3836_v36  ;;  %2619 = vmatprep.subr.bf16.mxu0 %v3837_v37  ;;  %v3891_v11 = vld [vmem:[%s4448_s25 + $0x424] ss:$16 sps:$4 sm:$0xff]   ;;  %v3889_v13 = vld [vmem:[%s4448_s25 + $0x420] ss:$16 sps:$4 sm:$0xff]  }
  0x3c   : > { %2660 = vmatprep.subr.bf16.mxu1 %v3839_v38  ;;  %v3894_v12 = vld [vmem:[%s4448_s25 + $0x624] ss:$16 sps:$4 sm:$0xff]   ;;  %v3892_v14 = vld [vmem:[%s4448_s25 + $0x620] ss:$16 sps:$4 sm:$0xff]   ;;  %v4569_v38 = vcombine.high %v4559_v34, %v4559_v34 }
  0x3d   : > { %v3897_v15 = vld [vmem:[%s4448_s25 + $0x444] ss:$16 sps:$4 sm:$0xff]   ;;  %v3895_v17 = vld [vmem:[%s4448_s25 + $0x440] ss:$16 sps:$4 sm:$0xff]  }
  0x3e   : > { %2620 = vmatpush1.bf16.msra.mxu0 %v3841_v39  ;;  %v3900_v16 = vld [vmem:[%s4448_s25 + $0x644] ss:$16 sps:$4 sm:$0xff]   ;;  %v3898_v18 = vld [vmem:[%s4448_s25 + $0x640] ss:$16 sps:$4 sm:$0xff]  }
  0x3f   : > { %2661 = vmatpush1.bf16.msra.mxu1 %v3842_v40  ;;  %2621 = vmatprep.subr.bf16.mxu0 %v3843_v41  ;;  %v3903_v19 = vld [vmem:[%s4448_s25 + $0x464] ss:$16 sps:$4 sm:$0xff]   ;;  %v3901_v21 = vld [vmem:[%s4448_s25 + $0x460] ss:$16 sps:$4 sm:$0xff]  }
  0x40   : > { %2662 = vmatprep.subr.bf16.mxu1 %v3845_v42  ;;  %v3906_v20 = vld [vmem:[%s4448_s25 + $0x664] ss:$16 sps:$4 sm:$0xff]   ;;  %v3904_v22 = vld [vmem:[%s4448_s25 + $0x660] ss:$16 sps:$4 sm:$0xff]  }
  0x41   : > { %v3909_v23 = vld [vmem:[%s4448_s25 + $0x484] ss:$16 sps:$4 sm:$0xff]   ;;  %v3907_v25 = vld [vmem:[%s4448_s25 + $0x480] ss:$16 sps:$4 sm:$0xff]  }
  0x42   : > { %2622 = vmatpush1.bf16.msra.mxu0 %v3847_v43  ;;  %v3912_v24 = vld [vmem:[%s4448_s25 + $0x684] ss:$16 sps:$4 sm:$0xff]   ;;  %v3910_v26 = vld [vmem:[%s4448_s25 + $0x680] ss:$16 sps:$4 sm:$0xff]  }
  0x43   : > { %2663 = vmatpush1.bf16.msra.mxu1 %v3848_v44  ;;  %2623 = vmatprep.subr.bf16.mxu0 %v3849_v45  ;;  %v3915_v27 = vld [vmem:[%s4448_s25 + $0x4a4] ss:$16 sps:$4 sm:$0xff]   ;;  %v3913_v29 = vld [vmem:[%s4448_s25 + $0x4a0] ss:$16 sps:$4 sm:$0xff]  }
  0x44   : > { %2664 = vmatprep.subr.bf16.mxu1 %v3851_v46  ;;  %v3918_v28 = vld [vmem:[%s4448_s25 + $0x6a4] ss:$16 sps:$4 sm:$0xff]   ;;  %v3916_v30 = vld [vmem:[%s4448_s25 + $0x6a0] ss:$16 sps:$4 sm:$0xff]  }
  0x45   : > { %v3921_v31 = vld [vmem:[%s4448_s25 + $0x4c4] ss:$16 sps:$4 sm:$0xff]   ;;  %v3919_v35 = vld [vmem:[%s4448_s25 + $0x4c0] ss:$16 sps:$4 sm:$0xff]  }
  0x46   : > { %2624 = vmatpush1.bf16.msra.mxu0 %v3853_v50  ;;  %v3924_v32 = vld [vmem:[%s4448_s25 + $0x6c4] ss:$16 sps:$4 sm:$0xff]   ;;  %v3922_v36 = vld [vmem:[%s4448_s25 + $0x6c0] ss:$16 sps:$4 sm:$0xff]  }
  0x47   : > { %2665 = vmatpush1.bf16.msra.mxu1 %v3854_v51  ;;  %2625 = vmatprep.subr.bf16.mxu0 %v3855_v53  ;;  %v4556_v33 = vld [vmem:[%s4443_s21 + $0x10] sm:$0xff] }
  0x48   : > { %2666 = vmatprep.subr.bf16.mxu1 %v3857_v54  ;;  %v4565_v37 = vcombine.high %v4556_v33, %v4556_v33  ;;  %v3927_v39 = vld [vmem:[%s4448_s25 + $0x4e4] ss:$16 sps:$4 sm:$0xff]   ;;  %v3925_v41 = vld [vmem:[%s4448_s25 + $0x4e0] ss:$16 sps:$4 sm:$0xff]  }
  0x49   : > { %v3930_v40 = vld [vmem:[%s4448_s25 + $0x6e4] ss:$16 sps:$4 sm:$0xff]   ;;  %v3928_v42 = vld [vmem:[%s4448_s25 + $0x6e0] ss:$16 sps:$4 sm:$0xff]  }
  0x4a   : > { %2626 = vmatpush1.bf16.msra.mxu0 %v3859_v55  ;;  %v3933_v43 = vld [vmem:[%s4448_s25 + $0x504] ss:$16 sps:$4 sm:$0xff]   ;;  %v3931_v45 = vld [vmem:[%s4448_s25 + $0x500] ss:$16 sps:$4 sm:$0xff]  }
  0x4b   : > { %2667 = vmatpush1.bf16.msra.mxu1 %v3860_v56  ;;  %2627 = vmatprep.subr.bf16.mxu0 %v3861_v57  ;;  %v3936_v44 = vld [vmem:[%s4448_s25 + $0x704] ss:$16 sps:$4 sm:$0xff]   ;;  %v3934_v46 = vld [vmem:[%s4448_s25 + $0x700] ss:$16 sps:$4 sm:$0xff]  }
  0x4c   : > { %2668 = vmatprep.subr.bf16.mxu1 %v3863_v58  ;;  %v3939_v47 = vld [vmem:[%s4448_s25 + $0x524] ss:$16 sps:$4 sm:$0xff]   ;;  %v3937_v50 = vld [vmem:[%s4448_s25 + $0x520] ss:$16 sps:$4 sm:$0xff]  }
  0x4d   : > { %v3942_v49 = vld [vmem:[%s4448_s25 + $0x724] ss:$16 sps:$4 sm:$0xff]   ;;  %v3940_v51 = vld [vmem:[%s4448_s25 + $0x720] ss:$16 sps:$4 sm:$0xff]  }
  0x4e   : > { %2628 = vmatpush1.bf16.msra.mxu0 %v3865_v59  ;;  %v3945_v53 = vld [vmem:[%s4448_s25 + $0x544] ss:$16 sps:$4 sm:$0xff]   ;;  %v3943_v55 = vld [vmem:[%s4448_s25 + $0x540] ss:$16 sps:$4 sm:$0xff]  }
  0x4f   : > { %2669 = vmatpush1.bf16.msra.mxu1 %v3866_v60  ;;  %2629 = vmatprep.subr.bf16.mxu0 %v3867_v61  ;;  %v3948_v54 = vld [vmem:[%s4448_s25 + $0x744] ss:$16 sps:$4 sm:$0xff]   ;;  %v3946_v56 = vld [vmem:[%s4448_s25 + $0x740] ss:$16 sps:$4 sm:$0xff]  }
  0x50   : > { %2670 = vmatprep.subr.bf16.mxu1 %v3869_v62  ;;  %v3951_v57 = vld [vmem:[%s4448_s25 + $0x564] ss:$16 sps:$4 sm:$0xff]   ;;  %v3949_v59 = vld [vmem:[%s4448_s25 + $0x560] ss:$16 sps:$4 sm:$0xff]  }
  0x51   : > { %v3954_v58 = vld [vmem:[%s4448_s25 + $0x764] ss:$16 sps:$4 sm:$0xff]   ;;  %v3952_v60 = vld [vmem:[%s4448_s25 + $0x760] ss:$16 sps:$4 sm:$0xff]  }
  0x52   : > { %2630 = vmatpush1.bf16.msra.mxu0 %v3871_v63  ;;  %v3957_v61 = vld [vmem:[%s4448_s25 + $0x584] ss:$16 sps:$4 sm:$0xff]   ;;  %v3955_v63 = vld [vmem:[%s4448_s25 + $0x580] ss:$16 sps:$4 sm:$0xff]  }
  0x53   : > { %2671 = vmatpush1.bf16.msra.mxu1 %v3872_v0  ;;  %2631 = vmatprep.subr.bf16.mxu0 %v3873_v1  ;;  %v3960_v62 = vld [vmem:[%s4448_s25 + $0x784] ss:$16 sps:$4 sm:$0xff]   ;;  %v3958_v0 = vld [vmem:[%s4448_s25 + $0x780] ss:$16 sps:$4 sm:$0xff]  }
  0x54   : > { %2672 = vmatprep.subr.bf16.mxu1 %v3875_v2  ;;  %v3963_v1 = vld [vmem:[%s4448_s25 + $0x5a4] ss:$16 sps:$4 sm:$0xff]  }
  0x55   : > { %v3966_v2 = vld [vmem:[%s4448_s25 + $0x7a4] ss:$16 sps:$4 sm:$0xff]  }
  0x56   : > { %2632 = vmatpush1.bf16.msra.mxu0 %v3877_v3  ;;  %v3961_v3 = vld [vmem:[%s4448_s25 + $0x5a0] ss:$16 sps:$4 sm:$0xff]  }
  0x57   : > { %2673 = vmatpush1.bf16.msra.mxu1 %v3878_v4  ;;  %2683 = vmatprep.subr.bf16.mxu0 %v3885_v5  ;;  %v3964_v4 = vld [vmem:[%s4448_s25 + $0x7a0] ss:$16 sps:$4 sm:$0xff]   ;;  %v3969_v5 = vld [vmem:[%s4448_s25 + $0x5c4] ss:$16 sps:$4 sm:$0xff]  }
  0x58   : > { %2724 = vmatprep.subr.bf16.mxu1 %v3888_v6  ;;  %v3972_v6 = vld [vmem:[%s4448_s25 + $0x7c4] ss:$16 sps:$4 sm:$0xff]  }
  0x59   : > { %2634 = vmatmul.mubr.bf16.vlgmr.msra.gmra.mrb[0].mxu0 %v4525_v7 }
  0x5a   : > { %2675 = vmatmul.mubr.bf16.vlgmr.msra.gmra.mrb[0].mxu1 %v4527_v8  ;;  %2684 = vmatpush1.bf16.msra.mxu0 %v3883_v9  ;;  %v3967_v9 = vld [vmem:[%s4448_s25 + $0x5c0] ss:$16 sps:$4 sm:$0xff]  }
  0x5b   : > { %2725 = vmatpush1.bf16.msra.mxu1 %v3886_v10  ;;  %2685 = vmatprep.subr.bf16.mxu0 %v3891_v11  ;;  %v3970_v10 = vld [vmem:[%s4448_s25 + $0x7c0] ss:$16 sps:$4 sm:$0xff]   ;;  %v3975_v11 = vld [vmem:[%s4448_s25 + $0x5e4] ss:$16 sps:$4 sm:$0xff]  }
  0x5c   : > { %2726 = vmatprep.subr.bf16.mxu1 %v3894_v12  ;;  %2715 = vmatprep.mubr.bf16.mxu0 %v4565_v37  ;;  %v3978_v12 = vld [vmem:[%s4448_s25 + $0x7e4] ss:$16 sps:$4 sm:$0xff]  }
  0x5d   : > { %2756 = vmatprep.mubr.bf16.mxu1 %v4569_v38 }
  0x5e   : > { %2686 = vmatpush1.bf16.msra.mxu0 %v3889_v13  ;;  %v3973_v13 = vld [vmem:[%s4448_s25 + $0x5e0] ss:$16 sps:$4 sm:$0xff]  }
  0x5f   : > { %2727 = vmatpush1.bf16.msra.mxu1 %v3892_v14  ;;  %2687 = vmatprep.subr.bf16.mxu0 %v3897_v15  ;;  %v3976_v14 = vld [vmem:[%s4448_s25 + $0x7e0] ss:$16 sps:$4 sm:$0xff]   ;;  %v3985_v15 = vld [vmem:[%s4448_s25 + $0x804] ss:$16 sps:$4 sm:$0xff]  }
  0x60   : > { %2728 = vmatprep.subr.bf16.mxu1 %v3900_v16  ;;  %v3988_v16 = vld [vmem:[%s4448_s25 + $0xa04] ss:$16 sps:$4 sm:$0xff]  }
  0x62   : > { %2688 = vmatpush1.bf16.msra.mxu0 %v3895_v17  ;;  %v4613_v17 = vcombine.low %v4556_v33, %v4556_v33  ;;  %v4003_v33 = vld [vmem:[%s4448_s25 + $0x864] ss:$16 sps:$4 sm:$0xff]  }
  0x63   : > { %2729 = vmatpush1.bf16.msra.mxu1 %v3898_v18  ;;  %2689 = vmatprep.subr.bf16.mxu0 %v3903_v19  ;;  %v4617_v18 = vcombine.low %v4559_v34, %v4559_v34  ;;  %v3983_v19 = vld [vmem:[%s4448_s25 + $0x800] ss:$16 sps:$4 sm:$0xff]   ;;  %v4006_v34 = vld [vmem:[%s4448_s25 + $0xa64] ss:$16 sps:$4 sm:$0xff]  }
  0x64   : > { %2730 = vmatprep.subr.bf16.mxu1 %v3906_v20  ;;  %v3986_v20 = vld [vmem:[%s4448_s25 + $0xa00] ss:$16 sps:$4 sm:$0xff]  }
  0x66   : > { %2690 = vmatpush1.bf16.msra.mxu0 %v3901_v21  ;;  %v3991_v21 = vld [vmem:[%s4448_s25 + $0x824] ss:$16 sps:$4 sm:$0xff]  }
  0x67   : > { %2731 = vmatpush1.bf16.msra.mxu1 %v3904_v22  ;;  %2691 = vmatprep.subr.bf16.mxu0 %v3909_v23  ;;  %v3994_v22 = vld [vmem:[%s4448_s25 + $0xa24] ss:$16 sps:$4 sm:$0xff]  }
  0x68   : > { %2732 = vmatprep.subr.bf16.mxu1 %v3912_v24  ;;  %v4624_v23 = vld [vmem:[%s4443_s21 + $0x20] sm:$0xff]  ;;  %v4627_v24 = vld [vmem:[%s4443_s21 + $0x28] sm:$0xff] }
  0x6a   : > { %2692 = vmatpush1.bf16.msra.mxu0 %v3907_v25  ;;  %v4631_v25 = vcombine.high %v4624_v23, %v4624_v23 }
  0x6b   : > { %2733 = vmatpush1.bf16.msra.mxu1 %v3910_v26  ;;  %2693 = vmatprep.subr.bf16.mxu0 %v3915_v27  ;;  %v4635_v26 = vcombine.high %v4627_v24, %v4627_v24  ;;  %v3989_v27 = vld [vmem:[%s4448_s25 + $0x820] ss:$16 sps:$4 sm:$0xff]  }
  0x6c   : > { %2734 = vmatprep.subr.bf16.mxu1 %v3918_v28  ;;  %v3992_v28 = vld [vmem:[%s4448_s25 + $0xa20] ss:$16 sps:$4 sm:$0xff]  }
  0x6e   : > { %2694 = vmatpush1.bf16.msra.mxu0 %v3913_v29  ;;  %v3997_v29 = vld [vmem:[%s4448_s25 + $0x844] ss:$16 sps:$4 sm:$0xff]  }
  0x6f   : > { %2735 = vmatpush1.bf16.msra.mxu1 %v3916_v30  ;;  %2695 = vmatprep.subr.bf16.mxu0 %v3921_v31  ;;  %v4000_v30 = vld [vmem:[%s4448_s25 + $0xa44] ss:$16 sps:$4 sm:$0xff]   ;;  %v3995_v31 = vld [vmem:[%s4448_s25 + $0x840] ss:$16 sps:$4 sm:$0xff]  }
  0x70   : > { %2736 = vmatprep.subr.bf16.mxu1 %v3924_v32  ;;  %v3998_v32 = vld [vmem:[%s4448_s25 + $0xa40] ss:$16 sps:$4 sm:$0xff]  }
  0x72   : > { %2696 = vmatpush1.bf16.msra.mxu0 %v3919_v35  ;;  %v4001_v35 = vld [vmem:[%s4448_s25 + $0x860] ss:$16 sps:$4 sm:$0xff]  }
  0x73   : > { %2737 = vmatpush1.bf16.msra.mxu1 %v3922_v36  ;;  %2697 = vmatprep.subr.bf16.mxu0 %v3927_v39  ;;  %v4004_v36 = vld [vmem:[%s4448_s25 + $0xa60] ss:$16 sps:$4 sm:$0xff]   ;;  %v4009_v39 = vld [vmem:[%s4448_s25 + $0x884] ss:$16 sps:$4 sm:$0xff]  }
  0x74   : > { %2738 = vmatprep.subr.bf16.mxu1 %v3930_v40  ;;  %v4012_v40 = vld [vmem:[%s4448_s25 + $0xa84] ss:$16 sps:$4 sm:$0xff]  }
  0x76   : > { %2698 = vmatpush1.bf16.msra.mxu0 %v3925_v41  ;;  %v4007_v41 = vld [vmem:[%s4448_s25 + $0x880] ss:$16 sps:$4 sm:$0xff]  }
  0x77   : > { %2739 = vmatpush1.bf16.msra.mxu1 %v3928_v42  ;;  %2699 = vmatprep.subr.bf16.mxu0 %v3933_v43  ;;  %v4010_v42 = vld [vmem:[%s4448_s25 + $0xa80] ss:$16 sps:$4 sm:$0xff]   ;;  %v4015_v43 = vld [vmem:[%s4448_s25 + $0x8a4] ss:$16 sps:$4 sm:$0xff]  }
  0x78   : > { %2740 = vmatprep.subr.bf16.mxu1 %v3936_v44  ;;  %v4018_v44 = vld [vmem:[%s4448_s25 + $0xaa4] ss:$16 sps:$4 sm:$0xff]  }
  0x7a   : > { %2700 = vmatpush1.bf16.msra.mxu0 %v3931_v45  ;;  %v4013_v45 = vld [vmem:[%s4448_s25 + $0x8a0] ss:$16 sps:$4 sm:$0xff]  }
  0x7b   : > { %2741 = vmatpush1.bf16.msra.mxu1 %v3934_v46  ;;  %2701 = vmatprep.subr.bf16.mxu0 %v3939_v47  ;;  %v4016_v46 = vld [vmem:[%s4448_s25 + $0xaa0] ss:$16 sps:$4 sm:$0xff]   ;;  %v4021_v47 = vld [vmem:[%s4448_s25 + $0x8c4] ss:$16 sps:$4 sm:$0xff]  }
  0x7c   : > { %2742 = vmatprep.subr.bf16.mxu1 %v3942_v49  ;;  %v4024_v49 = vld [vmem:[%s4448_s25 + $0xac4] ss:$16 sps:$4 sm:$0xff]  }
  0x7e   : > { %2702 = vmatpush1.bf16.msra.mxu0 %v3937_v50  ;;  %v4019_v50 = vld [vmem:[%s4448_s25 + $0x8c0] ss:$16 sps:$4 sm:$0xff]  }
  0x7f   : > { %2743 = vmatpush1.bf16.msra.mxu1 %v3940_v51  ;;  %2703 = vmatprep.subr.bf16.mxu0 %v3945_v53  ;;  %v4022_v51 = vld [vmem:[%s4448_s25 + $0xac0] ss:$16 sps:$4 sm:$0xff]   ;;  %v4027_v53 = vld [vmem:[%s4448_s25 + $0x8e4] ss:$16 sps:$4 sm:$0xff]  }
  0x80   : > { %2744 = vmatprep.subr.bf16.mxu1 %v3948_v54  ;;  %v4030_v54 = vld [vmem:[%s4448_s25 + $0xae4] ss:$16 sps:$4 sm:$0xff]  }
  0x82   : > { %2704 = vmatpush1.bf16.msra.mxu0 %v3943_v55  ;;  %v4025_v55 = vld [vmem:[%s4448_s25 + $0x8e0] ss:$16 sps:$4 sm:$0xff]  }
  0x83   : > { %2745 = vmatpush1.bf16.msra.mxu1 %v3946_v56  ;;  %2705 = vmatprep.subr.bf16.mxu0 %v3951_v57  ;;  %v4028_v56 = vld [vmem:[%s4448_s25 + $0xae0] ss:$16 sps:$4 sm:$0xff]   ;;  %v4033_v57 = vld [vmem:[%s4448_s25 + $0x904] ss:$16 sps:$4 sm:$0xff]  }
  0x84   : > { %2746 = vmatprep.subr.bf16.mxu1 %v3954_v58  ;;  %v4036_v58 = vld [vmem:[%s4448_s25 + $0xb04] ss:$16 sps:$4 sm:$0xff]  }
  0x86   : > { %2706 = vmatpush1.bf16.msra.mxu0 %v3949_v59  ;;  %v4031_v59 = vld [vmem:[%s4448_s25 + $0x900] ss:$16 sps:$4 sm:$0xff]  }
  0x87   : > { %2747 = vmatpush1.bf16.msra.mxu1 %v3952_v60  ;;  %2707 = vmatprep.subr.bf16.mxu0 %v3957_v61  ;;  %v4034_v60 = vld [vmem:[%s4448_s25 + $0xb00] ss:$16 sps:$4 sm:$0xff]   ;;  %v4039_v61 = vld [vmem:[%s4448_s25 + $0x924] ss:$16 sps:$4 sm:$0xff]  }
  0x88   : > { %2748 = vmatprep.subr.bf16.mxu1 %v3960_v62  ;;  %v4042_v62 = vld [vmem:[%s4448_s25 + $0xb24] ss:$16 sps:$4 sm:$0xff]  }
  0x8a   : > { %2708 = vmatpush1.bf16.msra.mxu0 %v3955_v63  ;;  %v4037_v63 = vld [vmem:[%s4448_s25 + $0x920] ss:$16 sps:$4 sm:$0xff]  }
  0x8b   : > { %2749 = vmatpush1.bf16.msra.mxu1 %v3958_v0  ;;  %2709 = vmatprep.subr.bf16.mxu0 %v3963_v1  ;;  %v4040_v0 = vld [vmem:[%s4448_s25 + $0xb20] ss:$16 sps:$4 sm:$0xff]   ;;  %v4045_v1 = vld [vmem:[%s4448_s25 + $0x944] ss:$16 sps:$4 sm:$0xff]  }
  0x8c   : > { %2750 = vmatprep.subr.bf16.mxu1 %v3966_v2  ;;  %v4048_v2 = vld [vmem:[%s4448_s25 + $0xb44] ss:$16 sps:$4 sm:$0xff]  }
  0x8e   : > { %2710 = vmatpush1.bf16.msra.mxu0 %v3961_v3  ;;  %v4043_v3 = vld [vmem:[%s4448_s25 + $0x940] ss:$16 sps:$4 sm:$0xff]  }
  0x8f   : > { %2751 = vmatpush1.bf16.msra.mxu1 %v3964_v4  ;;  %2711 = vmatprep.subr.bf16.mxu0 %v3969_v5  ;;  %v4046_v4 = vld [vmem:[%s4448_s25 + $0xb40] ss:$16 sps:$4 sm:$0xff]   ;;  %v4051_v5 = vld [vmem:[%s4448_s25 + $0x964] ss:$16 sps:$4 sm:$0xff]  }
  0x90   : > { %2752 = vmatprep.subr.bf16.mxu1 %v3972_v6  ;;  %v4054_v6 = vld [vmem:[%s4448_s25 + $0xb64] ss:$16 sps:$4 sm:$0xff]  }
  0x92   : > { %2712 = vmatpush1.bf16.msra.mxu0 %v3967_v9  ;;  %v4049_v9 = vld [vmem:[%s4448_s25 + $0x960] ss:$16 sps:$4 sm:$0xff]  }
  0x93   : > { %2753 = vmatpush1.bf16.msra.mxu1 %v3970_v10  ;;  %2713 = vmatprep.subr.bf16.mxu0 %v3975_v11  ;;  %v4052_v10 = vld [vmem:[%s4448_s25 + $0xb60] ss:$16 sps:$4 sm:$0xff]   ;;  %v4057_v11 = vld [vmem:[%s4448_s25 + $0x984] ss:$16 sps:$4 sm:$0xff]  }
  0x94   : > { %2754 = vmatprep.subr.bf16.mxu1 %v3978_v12  ;;  %v4060_v12 = vld [vmem:[%s4448_s25 + $0xb84] ss:$16 sps:$4 sm:$0xff]  }
  0x96   : > { %2714 = vmatpush1.bf16.msra.mxu0 %v3973_v13  ;;  %v4055_v13 = vld [vmem:[%s4448_s25 + $0x980] ss:$16 sps:$4 sm:$0xff]  }
  0x97   : > { %2755 = vmatpush1.bf16.msra.mxu1 %v3976_v14  ;;  %2765 = vmatprep.subr.bf16.mxu0 %v3985_v15  ;;  %v4058_v14 = vld [vmem:[%s4448_s25 + $0xb80] ss:$16 sps:$4 sm:$0xff]   ;;  %v4063_v15 = vld [vmem:[%s4448_s25 + $0x9a4] ss:$16 sps:$4 sm:$0xff]  }
  0x98   : > { %2806 = vmatprep.subr.bf16.mxu1 %v3988_v16  ;;  %v4066_v16 = vld [vmem:[%s4448_s25 + $0xba4] ss:$16 sps:$4 sm:$0xff]  }
  0x99   : > { %2716 = vmatmul.mubr.bf16.vlgmr.msra.gmra.mrb[4].mxu0 %v4613_v17 }
  0x9a   : > { %2757 = vmatmul.mubr.bf16.vlgmr.msra.gmra.mrb[4].mxu1 %v4617_v18  ;;  %2766 = vmatpush1.bf16.msra.mxu0 %v3983_v19  ;;  %v4061_v19 = vld [vmem:[%s4448_s25 + $0x9a0] ss:$16 sps:$4 sm:$0xff]  }
  0x9b   : > { %2807 = vmatpush1.bf16.msra.mxu1 %v3986_v20  ;;  %2767 = vmatprep.subr.bf16.mxu0 %v3991_v21  ;;  %v4064_v20 = vld [vmem:[%s4448_s25 + $0xba0] ss:$16 sps:$4 sm:$0xff]   ;;  %v4069_v21 = vld [vmem:[%s4448_s25 + $0x9c4] ss:$16 sps:$4 sm:$0xff]  }
  0x9c   : > { %2808 = vmatprep.subr.bf16.mxu1 %v3994_v22  ;;  %2797 = vmatprep.mubr.bf16.mxu0 %v4631_v25  ;;  %v4072_v22 = vld [vmem:[%s4448_s25 + $0xbc4] ss:$16 sps:$4 sm:$0xff]  }
  0x9d   : > { %2838 = vmatprep.mubr.bf16.mxu1 %v4635_v26 }
  0x9e   : > { %2768 = vmatpush1.bf16.msra.mxu0 %v3989_v27  ;;  %v4067_v27 = vld [vmem:[%s4448_s25 + $0x9c0] ss:$16 sps:$4 sm:$0xff]  }
  0x9f   : > { %2809 = vmatpush1.bf16.msra.mxu1 %v3992_v28  ;;  %2769 = vmatprep.subr.bf16.mxu0 %v3997_v29  ;;  %v4070_v28 = vld [vmem:[%s4448_s25 + $0xbc0] ss:$16 sps:$4 sm:$0xff]   ;;  %v4075_v29 = vld [vmem:[%s4448_s25 + $0x9e4] ss:$16 sps:$4 sm:$0xff]  }
  0xa0   : > { %2810 = vmatprep.subr.bf16.mxu1 %v4000_v30  ;;  %v4078_v30 = vld [vmem:[%s4448_s25 + $0xbe4] ss:$16 sps:$4 sm:$0xff]  }
  0xa2   : > { %2770 = vmatpush1.bf16.msra.mxu0 %v3995_v31  ;;  %v4073_v31 = vld [vmem:[%s4448_s25 + $0x9e0] ss:$16 sps:$4 sm:$0xff]  }
  0xa3   : > { %2811 = vmatpush1.bf16.msra.mxu1 %v3998_v32  ;;  %2771 = vmatprep.subr.bf16.mxu0 %v4003_v33  ;;  %v4076_v32 = vld [vmem:[%s4448_s25 + $0xbe0] ss:$16 sps:$4 sm:$0xff]   ;;  %v4085_v33 = vld [vmem:[%s4448_s25 + $0xc] ss:$16 sps:$4 sm:$0xff]  }
  0xa4   : > { %2812 = vmatprep.subr.bf16.mxu1 %v4006_v34  ;;  %v4088_v34 = vld [vmem:[%s4448_s25 + $0x20c] ss:$16 sps:$4 sm:$0xff]  }
  0xa6   : > { %2772 = vmatpush1.bf16.msra.mxu0 %v4001_v35  ;;  %v4703_v35 = vcombine.low %v4624_v23, %v4624_v23  ;;  %v4089_v23 = vld [vmem:[%s4448_s25 + $0x28] ss:$16 sps:$4 sm:$0xff]  }
  0xa7   : > { %2813 = vmatpush1.bf16.msra.mxu1 %v4004_v36  ;;  %2773 = vmatprep.subr.bf16.mxu0 %v4009_v39  ;;  %v4707_v36 = vcombine.low %v4627_v24, %v4627_v24  ;;  %v4083_v39 = vld [vmem:[%s4448_s25 + $0x8] ss:$16 sps:$4 sm:$0xff]  }
  0xa8   : > { %2814 = vmatprep.subr.bf16.mxu1 %v4012_v40  ;;  %v4086_v40 = vld [vmem:[%s4448_s25 + $0x208] ss:$16 sps:$4 sm:$0xff]  }
  0xa9   : > { %v4092_v24 = vld [vmem:[%s4448_s25 + $0x228] ss:$16 sps:$4 sm:$0xff]  }
  0xaa   : > { %2774 = vmatpush1.bf16.msra.mxu0 %v4007_v41  ;;  %v4091_v41 = vld [vmem:[%s4448_s25 + $0x2c] ss:$16 sps:$4 sm:$0xff]  }
  0xab   : > { %2815 = vmatpush1.bf16.msra.mxu1 %v4010_v42  ;;  %2775 = vmatprep.subr.bf16.mxu0 %v4015_v43  ;;  %v4094_v42 = vld [vmem:[%s4448_s25 + $0x22c] ss:$16 sps:$4 sm:$0xff]  }
  0xac   : > { %2816 = vmatprep.subr.bf16.mxu1 %v4018_v44  ;;  %v4097_v43 = vld [vmem:[%s4448_s25 + $0x4c] ss:$16 sps:$4 sm:$0xff]  }
  0xad   : > { %v4100_v44 = vld [vmem:[%s4448_s25 + $0x24c] ss:$16 sps:$4 sm:$0xff]  }
  0xae   : > { %2776 = vmatpush1.bf16.msra.mxu0 %v4013_v45  ;;  %v4095_v45 = vld [vmem:[%s4448_s25 + $0x48] ss:$16 sps:$4 sm:$0xff]  }
  0xaf   : > { %2817 = vmatpush1.bf16.msra.mxu1 %v4016_v46  ;;  %2777 = vmatprep.subr.bf16.mxu0 %v4021_v47  ;;  %v4098_v46 = vld [vmem:[%s4448_s25 + $0x248] ss:$16 sps:$4 sm:$0xff]   ;;  %v4103_v47 = vld [vmem:[%s4448_s25 + $0x6c] ss:$16 sps:$4 sm:$0xff]  }
  0xb0   : > { %2818 = vmatprep.subr.bf16.mxu1 %v4024_v49  ;;  %v4106_v49 = vld [vmem:[%s4448_s25 + $0x26c] ss:$16 sps:$4 sm:$0xff]  }
  0xb2   : > { %2778 = vmatpush1.bf16.msra.mxu0 %v4019_v50  ;;  %v4101_v50 = vld [vmem:[%s4448_s25 + $0x68] ss:$16 sps:$4 sm:$0xff]  }
  0xb3   : > { %2819 = vmatpush1.bf16.msra.mxu1 %v4022_v51  ;;  %2779 = vmatprep.subr.bf16.mxu0 %v4027_v53  ;;  %v4112_v51 = vld [vmem:[%s4448_s25 + $0x28c] ss:$16 sps:$4 sm:$0xff]   ;;  %v4107_v53 = vld [vmem:[%s4448_s25 + $0x88] ss:$16 sps:$4 sm:$0xff]  }
  0xb4   : > { %2820 = vmatprep.subr.bf16.mxu1 %v4030_v54  ;;  %v4110_v54 = vld [vmem:[%s4448_s25 + $0x288] ss:$16 sps:$4 sm:$0xff]  }
  0xb6   : > { %2780 = vmatpush1.bf16.msra.mxu0 %v4025_v55  ;;  %v4115_v55 = vld [vmem:[%s4448_s25 + $0xac] ss:$16 sps:$4 sm:$0xff]  }
  0xb7   : > { %2821 = vmatpush1.bf16.msra.mxu1 %v4028_v56  ;;  %2781 = vmatprep.subr.bf16.mxu0 %v4033_v57  ;;  %v4118_v56 = vld [vmem:[%s4448_s25 + $0x2ac] ss:$16 sps:$4 sm:$0xff]   ;;  %v4113_v57 = vld [vmem:[%s4448_s25 + $0xa8] ss:$16 sps:$4 sm:$0xff]  }
  0xb8   : > { %2822 = vmatprep.subr.bf16.mxu1 %v4036_v58  ;;  %v4116_v58 = vld [vmem:[%s4448_s25 + $0x2a8] ss:$16 sps:$4 sm:$0xff]  }
  0xba   : > { %2782 = vmatpush1.bf16.msra.mxu0 %v4031_v59  ;;  %v4121_v59 = vld [vmem:[%s4448_s25 + $0xcc] ss:$16 sps:$4 sm:$0xff]  }
  0xbb   : > { %2823 = vmatpush1.bf16.msra.mxu1 %v4034_v60  ;;  %2783 = vmatprep.subr.bf16.mxu0 %v4039_v61  ;;  %v4124_v60 = vld [vmem:[%s4448_s25 + $0x2cc] ss:$16 sps:$4 sm:$0xff]   ;;  %v4119_v61 = vld [vmem:[%s4448_s25 + $0xc8] ss:$16 sps:$4 sm:$0xff]  }
  0xbc   : > { %2824 = vmatprep.subr.bf16.mxu1 %v4042_v62  ;;  %v4122_v62 = vld [vmem:[%s4448_s25 + $0x2c8] ss:$16 sps:$4 sm:$0xff]  }
  0xbe   : > { %2784 = vmatpush1.bf16.msra.mxu0 %v4037_v63  ;;  %v4127_v63 = vld [vmem:[%s4448_s25 + $0xec] ss:$16 sps:$4 sm:$0xff]  }
  0xbf   : > { %2825 = vmatpush1.bf16.msra.mxu1 %v4040_v0  ;;  %2785 = vmatprep.subr.bf16.mxu0 %v4045_v1  ;;  %v4130_v0 = vld [vmem:[%s4448_s25 + $0x2ec] ss:$16 sps:$4 sm:$0xff]   ;;  %v4125_v1 = vld [vmem:[%s4448_s25 + $0xe8] ss:$16 sps:$4 sm:$0xff]  }
  0xc0   : > { %2826 = vmatprep.subr.bf16.mxu1 %v4048_v2  ;;  %v4128_v2 = vld [vmem:[%s4448_s25 + $0x2e8] ss:$16 sps:$4 sm:$0xff]  }
  0xc2   : > { %2786 = vmatpush1.bf16.msra.mxu0 %v4043_v3  ;;  %v4133_v3 = vld [vmem:[%s4448_s25 + $0x10c] ss:$16 sps:$4 sm:$0xff]  }
  0xc3   : > { %2827 = vmatpush1.bf16.msra.mxu1 %v4046_v4  ;;  %2787 = vmatprep.subr.bf16.mxu0 %v4051_v5  ;;  %v4136_v4 = vld [vmem:[%s4448_s25 + $0x30c] ss:$16 sps:$4 sm:$0xff]   ;;  %v4131_v5 = vld [vmem:[%s4448_s25 + $0x108] ss:$16 sps:$4 sm:$0xff]  }
  0xc4   : > { %2828 = vmatprep.subr.bf16.mxu1 %v4054_v6  ;;  %v4134_v6 = vld [vmem:[%s4448_s25 + $0x308] ss:$16 sps:$4 sm:$0xff]  }
  0xc6   : > { %2788 = vmatpush1.bf16.msra.mxu0 %v4049_v9  ;;  %v4139_v9 = vld [vmem:[%s4448_s25 + $0x12c] ss:$16 sps:$4 sm:$0xff]  }
  0xc7   : > { %2829 = vmatpush1.bf16.msra.mxu1 %v4052_v10  ;;  %2789 = vmatprep.subr.bf16.mxu0 %v4057_v11  ;;  %v4142_v10 = vld [vmem:[%s4448_s25 + $0x32c] ss:$16 sps:$4 sm:$0xff]   ;;  %v4137_v11 = vld [vmem:[%s4448_s25 + $0x128] ss:$16 sps:$4 sm:$0xff]  }
  0xc8   : > { %2830 = vmatprep.subr.bf16.mxu1 %v4060_v12  ;;  %v4140_v12 = vld [vmem:[%s4448_s25 + $0x328] ss:$16 sps:$4 sm:$0xff]  }
  0xca   : > { %2790 = vmatpush1.bf16.msra.mxu0 %v4055_v13  ;;  %v4145_v13 = vld [vmem:[%s4448_s25 + $0x14c] ss:$16 sps:$4 sm:$0xff]  }
  0xcb   : > { %2831 = vmatpush1.bf16.msra.mxu1 %v4058_v14  ;;  %2791 = vmatprep.subr.bf16.mxu0 %v4063_v15  ;;  %v4148_v14 = vld [vmem:[%s4448_s25 + $0x34c] ss:$16 sps:$4 sm:$0xff]   ;;  %v4143_v15 = vld [vmem:[%s4448_s25 + $0x148] ss:$16 sps:$4 sm:$0xff]  }
  0xcc   : > { %2832 = vmatprep.subr.bf16.mxu1 %v4066_v16  ;;  %v4146_v16 = vld [vmem:[%s4448_s25 + $0x348] ss:$16 sps:$4 sm:$0xff]  }
  0xce   : > { %2792 = vmatpush1.bf16.msra.mxu0 %v4061_v19  ;;  %v4151_v19 = vld [vmem:[%s4448_s25 + $0x16c] ss:$16 sps:$4 sm:$0xff]  }
  0xcf   : > { %2833 = vmatpush1.bf16.msra.mxu1 %v4064_v20  ;;  %2793 = vmatprep.subr.bf16.mxu0 %v4069_v21  ;;  %v4154_v20 = vld [vmem:[%s4448_s25 + $0x36c] ss:$16 sps:$4 sm:$0xff]   ;;  %v4149_v21 = vld [vmem:[%s4448_s25 + $0x168] ss:$16 sps:$4 sm:$0xff]  }
  0xd0   : > { %2834 = vmatprep.subr.bf16.mxu1 %v4072_v22  ;;  %v4152_v22 = vld [vmem:[%s4448_s25 + $0x368] ss:$16 sps:$4 sm:$0xff]  }
  0xd2   : > { %2794 = vmatpush1.bf16.msra.mxu0 %v4067_v27  ;;  %v4157_v27 = vld [vmem:[%s4448_s25 + $0x18c] ss:$16 sps:$4 sm:$0xff]  }
  0xd3   : > { %2835 = vmatpush1.bf16.msra.mxu1 %v4070_v28  ;;  %2795 = vmatprep.subr.bf16.mxu0 %v4075_v29  ;;  %v4160_v28 = vld [vmem:[%s4448_s25 + $0x38c] ss:$16 sps:$4 sm:$0xff]   ;;  %v4155_v29 = vld [vmem:[%s4448_s25 + $0x188] ss:$16 sps:$4 sm:$0xff]  }
  0xd4   : > { %2836 = vmatprep.subr.bf16.mxu1 %v4078_v30  ;;  %v4158_v30 = vld [vmem:[%s4448_s25 + $0x388] ss:$16 sps:$4 sm:$0xff]  }
  0xd6   : > { %2796 = vmatpush1.bf16.msra.mxu0 %v4073_v31  ;;  %v4163_v31 = vld [vmem:[%s4448_s25 + $0x1ac] ss:$16 sps:$4 sm:$0xff]  }
  0xd7   : > { %2837 = vmatpush1.bf16.msra.mxu1 %v4076_v32  ;;  %2847 = vmatprep.subr.bf16.mxu0 %v4085_v33  ;;  %v4166_v32 = vld [vmem:[%s4448_s25 + $0x3ac] ss:$16 sps:$4 sm:$0xff]   ;;  %v4161_v33 = vld [vmem:[%s4448_s25 + $0x1a8] ss:$16 sps:$4 sm:$0xff]  }
  0xd8   : > { %2888 = vmatprep.subr.bf16.mxu1 %v4088_v34  ;;  %v4164_v34 = vld [vmem:[%s4448_s25 + $0x3a8] ss:$16 sps:$4 sm:$0xff]  }
  0xd9   : > { %2798 = vmatmul.mubr.bf16.vlgmr.msra.gmra.mrb[8].mxu0 %v4703_v35 }
  0xda   : > { %2839 = vmatmul.mubr.bf16.vlgmr.msra.gmra.mrb[8].mxu1 %v4707_v36  ;;  %2848 = vmatpush1.bf16.msra.mxu0 %v4083_v39  ;;  %v4169_v39 = vld [vmem:[%s4448_s25 + $0x1cc] ss:$16 sps:$4 sm:$0xff]  }
  0xdb   : > { %2889 = vmatpush1.bf16.msra.mxu1 %v4086_v40  ;;  %2849 = vmatprep.subr.bf16.mxu0 %v4091_v41  ;;  %v4172_v40 = vld [vmem:[%s4448_s25 + $0x3cc] ss:$16 sps:$4 sm:$0xff]   ;;  %v4167_v41 = vld [vmem:[%s4448_s25 + $0x1c8] ss:$16 sps:$4 sm:$0xff]  }
  0xdc   : > { %2890 = vmatprep.subr.bf16.mxu1 %v4094_v42  ;;  %2879 = vmatprep.mubr.bf16.mxu0 %v4498_v48  ;;  %v4104_v48 = vld [vmem:[%s4448_s25 + $0x268] ss:$16 sps:$4 sm:$0xff]  }
  0xdd   : > { %2920 = vmatprep.mubr.bf16.mxu1 %v4503_v52  ;;  %v4109_v52 = vld [vmem:[%s4448_s25 + $0x8c] ss:$16 sps:$4 sm:$0xff]   ;;  %v4170_v42 = vld [vmem:[%s4448_s25 + $0x3c8] ss:$16 sps:$4 sm:$0xff]  }
  0xde   : > { %2850 = vmatpush1.bf16.msra.mxu0 %v4089_v23  ;;  %v4175_v23 = vld [vmem:[%s4448_s25 + $0x1ec] ss:$16 sps:$4 sm:$0xff]  }
  0xdf   : > { %2891 = vmatpush1.bf16.msra.mxu1 %v4092_v24  ;;  %2851 = vmatprep.subr.bf16.mxu0 %v4097_v43  ;;  %v4178_v24 = vld [vmem:[%s4448_s25 + $0x3ec] ss:$16 sps:$4 sm:$0xff]   ;;  %v4173_v43 = vld [vmem:[%s4448_s25 + $0x1e8] ss:$16 sps:$4 sm:$0xff]  }
  0xe0   : > { %2892 = vmatprep.subr.bf16.mxu1 %v4100_v44  ;;  %v4176_v44 = vld [vmem:[%s4448_s25 + $0x3e8] ss:$16 sps:$4 sm:$0xff]  }
  0xe2   : > { %2852 = vmatpush1.bf16.msra.mxu0 %v4095_v45  ;;  %v4181_v45 = vld [vmem:[%s4448_s25 + $0x40c] ss:$16 sps:$4 sm:$0xff]  }
  0xe3   : > { %2893 = vmatpush1.bf16.msra.mxu1 %v4098_v46  ;;  %2853 = vmatprep.subr.bf16.mxu0 %v4103_v47  ;;  %v4184_v46 = vld [vmem:[%s4448_s25 + $0x60c] ss:$16 sps:$4 sm:$0xff]   ;;  %v4179_v47 = vld [vmem:[%s4448_s25 + $0x408] ss:$16 sps:$4 sm:$0xff]  }
  0xe4   : > { %2894 = vmatprep.subr.bf16.mxu1 %v4106_v49  ;;  %v4182_v49 = vld [vmem:[%s4448_s25 + $0x608] ss:$16 sps:$4 sm:$0xff]  }
  0xe6   : > { %2854 = vmatpush1.bf16.msra.mxu0 %v4101_v50  ;;  %v4187_v50 = vld [vmem:[%s4448_s25 + $0x42c] ss:$16 sps:$4 sm:$0xff]  }
  0xe7   : > { %2895 = vmatpush1.bf16.msra.mxu1 %v4104_v48  ;;  %2855 = vmatprep.subr.bf16.mxu0 %v4109_v52  ;;  %v4190_v48 = vld [vmem:[%s4448_s25 + $0x62c] ss:$16 sps:$4 sm:$0xff]   ;;  %v4185_v52 = vld [vmem:[%s4448_s25 + $0x428] ss:$16 sps:$4 sm:$0xff]  }
  0xe8   : > { %2896 = vmatprep.subr.bf16.mxu1 %v4112_v51  ;;  %v4188_v51 = vld [vmem:[%s4448_s25 + $0x628] ss:$16 sps:$4 sm:$0xff]  }
  0xea   : > { %2856 = vmatpush1.bf16.msra.mxu0 %v4107_v53  ;;  %v4193_v53 = vld [vmem:[%s4448_s25 + $0x44c] ss:$16 sps:$4 sm:$0xff]  }
  0xeb   : > { %2897 = vmatpush1.bf16.msra.mxu1 %v4110_v54  ;;  %2857 = vmatprep.subr.bf16.mxu0 %v4115_v55  ;;  %v4196_v54 = vld [vmem:[%s4448_s25 + $0x64c] ss:$16 sps:$4 sm:$0xff]  }
  0xec   : > { %2898 = vmatprep.subr.bf16.mxu1 %v4118_v56  ;;  %v4199_v55 = vld [vmem:[%s4448_s25 + $0x46c] ss:$16 sps:$4 sm:$0xff]  }
  0xed   : > { %v4202_v56 = vld [vmem:[%s4448_s25 + $0x66c] ss:$16 sps:$4 sm:$0xff]  }
  0xee   : > { %2858 = vmatpush1.bf16.msra.mxu0 %v4113_v57  ;;  %v4197_v57 = vld [vmem:[%s4448_s25 + $0x468] ss:$16 sps:$4 sm:$0xff]  }
  0xef   : > { %2899 = vmatpush1.bf16.msra.mxu1 %v4116_v58  ;;  %2859 = vmatprep.subr.bf16.mxu0 %v4121_v59  ;;  %v4208_v58 = vld [vmem:[%s4448_s25 + $0x68c] ss:$16 sps:$4 sm:$0xff]   ;;  %v4203_v59 = vld [vmem:[%s4448_s25 + $0x488] ss:$16 sps:$4 sm:$0xff]  }
  0xf0   : > { %2900 = vmatprep.subr.bf16.mxu1 %v4124_v60  ;;  %v4206_v60 = vld [vmem:[%s4448_s25 + $0x688] ss:$16 sps:$4 sm:$0xff]  }
  0xf2   : > { %2860 = vmatpush1.bf16.msra.mxu0 %v4119_v61  ;;  %v4211_v61 = vld [vmem:[%s4448_s25 + $0x4ac] ss:$16 sps:$4 sm:$0xff]  }
  0xf3   : > { %2901 = vmatpush1.bf16.msra.mxu1 %v4122_v62  ;;  %2861 = vmatprep.subr.bf16.mxu0 %v4127_v63  ;;  %v4214_v62 = vld [vmem:[%s4448_s25 + $0x6ac] ss:$16 sps:$4 sm:$0xff]   ;;  %v4209_v63 = vld [vmem:[%s4448_s25 + $0x4a8] ss:$16 sps:$4 sm:$0xff]  }
  0xf4   : > { %2902 = vmatprep.subr.bf16.mxu1 %v4130_v0  ;;  %v4212_v0 = vld [vmem:[%s4448_s25 + $0x6a8] ss:$16 sps:$4 sm:$0xff]  }
  0xf6   : > { %2862 = vmatpush1.bf16.msra.mxu0 %v4125_v1  ;;  %v4217_v1 = vld [vmem:[%s4448_s25 + $0x4cc] ss:$16 sps:$4 sm:$0xff]  }
  0xf7   : > { %2903 = vmatpush1.bf16.msra.mxu1 %v4128_v2  ;;  %2863 = vmatprep.subr.bf16.mxu0 %v4133_v3  ;;  %v4220_v2 = vld [vmem:[%s4448_s25 + $0x6cc] ss:$16 sps:$4 sm:$0xff]  }
  0xf8   : > { %2904 = vmatprep.subr.bf16.mxu1 %v4136_v4 }
  0xfa   : > { %2864 = vmatpush1.bf16.msra.mxu0 %v4131_v5 }
  0xfb   : > { %2905 = vmatpush1.bf16.msra.mxu1 %v4134_v6  ;;  %2865 = vmatprep.subr.bf16.mxu0 %v4139_v9 }
  0xfc   : > { %2906 = vmatprep.subr.bf16.mxu1 %v4142_v10 }
  0xfe   : > { %2866 = vmatpush1.bf16.msra.mxu0 %v4137_v11 }
  0xff   : > { %2907 = vmatpush1.bf16.msra.mxu1 %v4140_v12  ;;  %2867 = vmatprep.subr.bf16.mxu0 %v4145_v13  ;;  %v4215_v13 = vld [vmem:[%s4448_s25 + $0x4c8] ss:$16 sps:$4 sm:$0xff]  }
 0x100   : > { %2908 = vmatprep.subr.bf16.mxu1 %v4148_v14  ;;  %v4218_v14 = vld [vmem:[%s4448_s25 + $0x6c8] ss:$16 sps:$4 sm:$0xff]  }
 0x102   : > { %2868 = vmatpush1.bf16.msra.mxu0 %v4143_v15 }
 0x103   : > { %2909 = vmatpush1.bf16.msra.mxu1 %v4146_v16  ;;  %2869 = vmatprep.subr.bf16.mxu0 %v4151_v19  ;;  %v4223_v19 = vld [vmem:[%s4448_s25 + $0x4ec] ss:$16 sps:$4 sm:$0xff]  }
 0x104   : > { %2910 = vmatprep.subr.bf16.mxu1 %v4154_v20  ;;  %v4226_v20 = vld [vmem:[%s4448_s25 + $0x6ec] ss:$16 sps:$4 sm:$0xff]  }
 0x106   : > { %2870 = vmatpush1.bf16.msra.mxu0 %v4149_v21  ;;  %v4221_v21 = vld [vmem:[%s4448_s25 + $0x4e8] ss:$16 sps:$4 sm:$0xff]  }
 0x107   : > { %2911 = vmatpush1.bf16.msra.mxu1 %v4152_v22  ;;  %2871 = vmatprep.subr.bf16.mxu0 %v4157_v27  ;;  %v4224_v22 = vld [vmem:[%s4448_s25 + $0x6e8] ss:$16 sps:$4 sm:$0xff]   ;;  %v4229_v27 = vld [vmem:[%s4448_s25 + $0x50c] ss:$16 sps:$4 sm:$0xff]  }
 0x108   : > { %2912 = vmatprep.subr.bf16.mxu1 %v4160_v28  ;;  %v4232_v28 = vld [vmem:[%s4448_s25 + $0x70c] ss:$16 sps:$4 sm:$0xff]  }
 0x10a   : > { %2872 = vmatpush1.bf16.msra.mxu0 %v4155_v29  ;;  %v4227_v29 = vld [vmem:[%s4448_s25 + $0x508] ss:$16 sps:$4 sm:$0xff]  }
 0x10b   : > { %2913 = vmatpush1.bf16.msra.mxu1 %v4158_v30  ;;  %2873 = vmatprep.subr.bf16.mxu0 %v4163_v31  ;;  %v4230_v30 = vld [vmem:[%s4448_s25 + $0x708] ss:$16 sps:$4 sm:$0xff]   ;;  %v4235_v31 = vld [vmem:[%s4448_s25 + $0x52c] ss:$16 sps:$4 sm:$0xff]  }
 0x10c   : > { %2914 = vmatprep.subr.bf16.mxu1 %v4166_v32  ;;  %v4238_v32 = vld [vmem:[%s4448_s25 + $0x72c] ss:$16 sps:$4 sm:$0xff]  }
 0x10e   : > { %2874 = vmatpush1.bf16.msra.mxu0 %v4161_v33  ;;  %v4233_v33 = vld [vmem:[%s4448_s25 + $0x528] ss:$16 sps:$4 sm:$0xff]  }
 0x10f   : > { %2915 = vmatpush1.bf16.msra.mxu1 %v4164_v34  ;;  %2875 = vmatprep.subr.bf16.mxu0 %v4169_v39  ;;  %v4236_v34 = vld [vmem:[%s4448_s25 + $0x728] ss:$16 sps:$4 sm:$0xff]   ;;  %v4241_v39 = vld [vmem:[%s4448_s25 + $0x54c] ss:$16 sps:$4 sm:$0xff]  }
 0x110   : > { %2916 = vmatprep.subr.bf16.mxu1 %v4172_v40  ;;  %v4244_v40 = vld [vmem:[%s4448_s25 + $0x74c] ss:$16 sps:$4 sm:$0xff]  }
 0x112   : > { %2876 = vmatpush1.bf16.msra.mxu0 %v4167_v41  ;;  %v4239_v41 = vld [vmem:[%s4448_s25 + $0x548] ss:$16 sps:$4 sm:$0xff]  }
 0x113   : > { %2917 = vmatpush1.bf16.msra.mxu1 %v4170_v42  ;;  %2877 = vmatprep.subr.bf16.mxu0 %v4175_v23  ;;  %v4242_v42 = vld [vmem:[%s4448_s25 + $0x748] ss:$16 sps:$4 sm:$0xff]   ;;  %v4247_v23 = vld [vmem:[%s4448_s25 + $0x56c] ss:$16 sps:$4 sm:$0xff]  }
 0x114   : > { %2918 = vmatprep.subr.bf16.mxu1 %v4178_v24  ;;  %v4250_v24 = vld [vmem:[%s4448_s25 + $0x76c] ss:$16 sps:$4 sm:$0xff]  }
 0x116   : > { %2878 = vmatpush1.bf16.msra.mxu0 %v4173_v43  ;;  %v4245_v43 = vld [vmem:[%s4448_s25 + $0x568] ss:$16 sps:$4 sm:$0xff]  }
 0x117   : > { %2919 = vmatpush1.bf16.msra.mxu1 %v4176_v44  ;;  %2929 = vmatprep.subr.bf16.mxu0 %v4181_v45  ;;  %v4248_v44 = vld [vmem:[%s4448_s25 + $0x768] ss:$16 sps:$4 sm:$0xff]   ;;  %v4253_v45 = vld [vmem:[%s4448_s25 + $0x58c] ss:$16 sps:$4 sm:$0xff]  }
 0x118   : > { %2970 = vmatprep.subr.bf16.mxu1 %v4184_v46  ;;  %v4256_v46 = vld [vmem:[%s4448_s25 + $0x78c] ss:$16 sps:$4 sm:$0xff]  }
 0x119   : > { %2880 = vmatmul.mubr.bf16.vlgmr.msra.gmra.mrb[12].mxu0 %v4525_v7  ;;  %v4191_v7 = vld [vmem:[%s4448_s25 + $0x448] ss:$16 sps:$4 sm:$0xff]  }
 0x11a   : > { %2921 = vmatmul.mubr.bf16.vlgmr.msra.gmra.mrb[12].mxu1 %v4527_v8  ;;  %2930 = vmatpush1.bf16.msra.mxu0 %v4179_v47  ;;  %v4194_v8 = vld [vmem:[%s4448_s25 + $0x648] ss:$16 sps:$4 sm:$0xff]  }
 0x11b   : > { %2971 = vmatpush1.bf16.msra.mxu1 %v4182_v49  ;;  %2931 = vmatprep.subr.bf16.mxu0 %v4187_v50  ;;  %v4251_v47 = vld [vmem:[%s4448_s25 + $0x588] ss:$16 sps:$4 sm:$0xff]   ;;  %v4259_v50 = vld [vmem:[%s4448_s25 + $0x5ac] ss:$16 sps:$4 sm:$0xff]  }
 0x11c   : > { %2972 = vmatprep.subr.bf16.mxu1 %v4190_v48  ;;  %2961 = vmatprep.mubr.bf16.mxu0 %v4565_v37  ;;  %v4200_v37 = vld [vmem:[%s4448_s25 + $0x668] ss:$16 sps:$4 sm:$0xff]   ;;  %v4262_v48 = vld [vmem:[%s4448_s25 + $0x7ac] ss:$16 sps:$4 sm:$0xff]  }
 0x11d   : > { %3002 = vmatprep.mubr.bf16.mxu1 %v4569_v38  ;;  %v4205_v38 = vld [vmem:[%s4448_s25 + $0x48c] ss:$16 sps:$4 sm:$0xff]   ;;  %v4254_v49 = vld [vmem:[%s4448_s25 + $0x788] ss:$16 sps:$4 sm:$0xff]  }
 0x11e   : > { %2932 = vmatpush1.bf16.msra.mxu0 %v4185_v52  ;;  %v4257_v52 = vld [vmem:[%s4448_s25 + $0x5a8] ss:$16 sps:$4 sm:$0xff]  }
 0x11f   : > { %2973 = vmatpush1.bf16.msra.mxu1 %v4188_v51  ;;  %2933 = vmatprep.subr.bf16.mxu0 %v4193_v53  ;;  %v4260_v51 = vld [vmem:[%s4448_s25 + $0x7a8] ss:$16 sps:$4 sm:$0xff]   ;;  %v4265_v53 = vld [vmem:[%s4448_s25 + $0x5cc] ss:$16 sps:$4 sm:$0xff]  }
 0x120   : > { %2974 = vmatprep.subr.bf16.mxu1 %v4196_v54  ;;  %v4268_v54 = vld [vmem:[%s4448_s25 + $0x7cc] ss:$16 sps:$4 sm:$0xff]  }
 0x122   : > { %2934 = vmatpush1.bf16.msra.mxu0 %v4191_v7  ;;  %v4263_v7 = vld [vmem:[%s4448_s25 + $0x5c8] ss:$16 sps:$4 sm:$0xff]  }
 0x123   : > { %2975 = vmatpush1.bf16.msra.mxu1 %v4194_v8  ;;  %2935 = vmatprep.subr.bf16.mxu0 %v4199_v55  ;;  %v4266_v8 = vld [vmem:[%s4448_s25 + $0x7c8] ss:$16 sps:$4 sm:$0xff]   ;;  %v4271_v55 = vld [vmem:[%s4448_s25 + $0x5ec] ss:$16 sps:$4 sm:$0xff]  }
 0x124   : > { %2976 = vmatprep.subr.bf16.mxu1 %v4202_v56  ;;  %v4274_v56 = vld [vmem:[%s4448_s25 + $0x7ec] ss:$16 sps:$4 sm:$0xff]  }
 0x126   : > { %2936 = vmatpush1.bf16.msra.mxu0 %v4197_v57  ;;  %v4269_v57 = vld [vmem:[%s4448_s25 + $0x5e8] ss:$16 sps:$4 sm:$0xff]  }
 0x127   : > { %2977 = vmatpush1.bf16.msra.mxu1 %v4200_v37  ;;  %2937 = vmatprep.subr.bf16.mxu0 %v4205_v38  ;;  %v4272_v37 = vld [vmem:[%s4448_s25 + $0x7e8] ss:$16 sps:$4 sm:$0xff]   ;;  %v4277_v38 = vld [vmem:[%s4448_s25 + $0x80c] ss:$16 sps:$4 sm:$0xff]  }
 0x128   : > { %2978 = vmatprep.subr.bf16.mxu1 %v4208_v58  ;;  %v4280_v58 = vld [vmem:[%s4448_s25 + $0xa0c] ss:$16 sps:$4 sm:$0xff]  }
 0x12a   : > { %2938 = vmatpush1.bf16.msra.mxu0 %v4203_v59  ;;  %v4275_v59 = vld [vmem:[%s4448_s25 + $0x808] ss:$16 sps:$4 sm:$0xff]  }
 0x12b   : > { %2979 = vmatpush1.bf16.msra.mxu1 %v4206_v60  ;;  %2939 = vmatprep.subr.bf16.mxu0 %v4211_v61  ;;  %v4278_v60 = vld [vmem:[%s4448_s25 + $0xa08] ss:$16 sps:$4 sm:$0xff]   ;;  %v4283_v61 = vld [vmem:[%s4448_s25 + $0x82c] ss:$16 sps:$4 sm:$0xff]  }
 0x12c   : > { %2980 = vmatprep.subr.bf16.mxu1 %v4214_v62  ;;  %v2635_v3 = vpop.f32.mrb[0].mxu0  ;;  %v4286_v62 = vld [vmem:[%s4448_s25 + $0xa2c] ss:$16 sps:$4 sm:$0xff]  }
 0x12d   : > { %v2676_v4 = vpop.f32.mrb[0].mxu1  ;;  %v2637_v6 = vpop.f32.mrb[1].mxu0 }
 0x12e   : > { %v4805_v5 = vadd.f32 %v2676_v4, %v2635_v3  ;;  %v2678_v9 = vpop.f32.mrb[1].mxu1  ;;  %v2639_v11 = vpop.f32.mrb[2].mxu0  ;;  %2940 = vmatpush1.bf16.msra.mxu0 %v4209_v63  ;;  %v4281_v63 = vld [vmem:[%s4448_s25 + $0x828] ss:$16 sps:$4 sm:$0xff]   ;;  %v4295_v3 = vld [vmem:[%s4448_s25 + $0x86c] ss:$16 sps:$4 sm:$0xff]  }
 0x12f   : > { %v4807_v10 = vadd.f32 %v2678_v9, %v2637_v6  ;;  %v2680_v12 = vpop.f32.mrb[2].mxu1  ;;  %2981 = vmatpush1.bf16.msra.mxu1 %v4212_v0  ;;  %v2640_v15 = vpop.f32.mrb[3].mxu0  ;;  %2941 = vmatprep.subr.bf16.mxu0 %v4217_v1  ;;  %v4284_v0 = vld [vmem:[%s4448_s25 + $0xa28] ss:$16 sps:$4 sm:$0xff]   ;;  %v4289_v1 = vld [vmem:[%s4448_s25 + $0x84c] ss:$16 sps:$4 sm:$0xff]  }
 0x130   : > { %v2681_v16 = vpop.f32.mrb[3].mxu1  ;;  %2982 = vmatprep.subr.bf16.mxu1 %v4220_v2  ;;  %v4292_v2 = vld [vmem:[%s4448_s25 + $0xa4c] ss:$16 sps:$4 sm:$0xff]   ;;  %v4293_v6 = vld [vmem:[%s4448_s25 + $0x868] ss:$16 sps:$4 sm:$0xff]  }
 0x131   : > { %v4298_v4 = vld [vmem:[%s4448_s25 + $0xa6c] ss:$16 sps:$4 sm:$0xff]   ;;  %v4299_v11 = vld [vmem:[%s4448_s25 + $0x888] ss:$16 sps:$4 sm:$0xff]  }
 0x132   : > { %2942 = vmatpush1.bf16.msra.mxu0 %v4215_v13  ;;  %v4304_v9 = vld [vmem:[%s4448_s25 + $0xa8c] ss:$16 sps:$4 sm:$0xff]   ;;  %v4302_v12 = vld [vmem:[%s4448_s25 + $0xa88] ss:$16 sps:$4 sm:$0xff]  }
 0x133   : > { %2983 = vmatpush1.bf16.msra.mxu1 %v4218_v14  ;;  %2943 = vmatprep.subr.bf16.mxu0 %v4223_v19  ;;  %v4307_v13 = vld [vmem:[%s4448_s25 + $0x8ac] ss:$16 sps:$4 sm:$0xff]   ;;  %v4305_v15 = vld [vmem:[%s4448_s25 + $0x8a8] ss:$16 sps:$4 sm:$0xff]  }
 0x134   : > { %2984 = vmatprep.subr.bf16.mxu1 %v4226_v20  ;;  %v4310_v14 = vld [vmem:[%s4448_s25 + $0xaac] ss:$16 sps:$4 sm:$0xff]   ;;  %v4308_v16 = vld [vmem:[%s4448_s25 + $0xaa8] ss:$16 sps:$4 sm:$0xff]  }
 0x135   : > { %v4313_v19 = vld [vmem:[%s4448_s25 + $0x8cc] ss:$16 sps:$4 sm:$0xff]  }
 0x136   : > { %2944 = vmatpush1.bf16.msra.mxu0 %v4221_v21  ;;  %v4316_v20 = vld [vmem:[%s4448_s25 + $0xacc] ss:$16 sps:$4 sm:$0xff]  }
 0x137   : > { %2985 = vmatpush1.bf16.msra.mxu1 %v4224_v22  ;;  %2945 = vmatprep.subr.bf16.mxu0 %v4229_v27 }
 0x138   : > { %2986 = vmatprep.subr.bf16.mxu1 %v4232_v28 }
 0x13a   : > { %2946 = vmatpush1.bf16.msra.mxu0 %v4227_v29 }
 0x13b   : > { %2987 = vmatpush1.bf16.msra.mxu1 %v4230_v30  ;;  %2947 = vmatprep.subr.bf16.mxu0 %v4235_v31 }
 0x13c   : > { %2988 = vmatprep.subr.bf16.mxu1 %v4238_v32 }
 0x13e   : > { %2948 = vmatpush1.bf16.msra.mxu0 %v4233_v33  ;;  %v4311_v33 = vld [vmem:[%s4448_s25 + $0x8c8] ss:$16 sps:$4 sm:$0xff]  }
 0x13f   : > { %2989 = vmatpush1.bf16.msra.mxu1 %v4236_v34  ;;  %2949 = vmatprep.subr.bf16.mxu0 %v4241_v39  ;;  %v4314_v34 = vld [vmem:[%s4448_s25 + $0xac8] ss:$16 sps:$4 sm:$0xff]  }
 0x140   : > { %2990 = vmatprep.subr.bf16.mxu1 %v4244_v40 }
 0x142   : > { %2950 = vmatpush1.bf16.msra.mxu0 %v4239_v41 }
 0x143   : > { %2991 = vmatpush1.bf16.msra.mxu1 %v4242_v42  ;;  %2951 = vmatprep.subr.bf16.mxu0 %v4247_v23  ;;  %v4317_v23 = vld [vmem:[%s4448_s25 + $0x8e8] ss:$16 sps:$4 sm:$0xff]  }
 0x144   : > { %2992 = vmatprep.subr.bf16.mxu1 %v4250_v24  ;;  %v4320_v24 = vld [vmem:[%s4448_s25 + $0xae8] ss:$16 sps:$4 sm:$0xff]  }
 0x146   : > { %2952 = vmatpush1.bf16.msra.mxu0 %v4245_v43  ;;  %v4325_v43 = vld [vmem:[%s4448_s25 + $0x90c] ss:$16 sps:$4 sm:$0xff]  }
 0x147   : > { %2993 = vmatpush1.bf16.msra.mxu1 %v4248_v44  ;;  %2953 = vmatprep.subr.bf16.mxu0 %v4253_v45  ;;  %v4328_v44 = vld [vmem:[%s4448_s25 + $0xb0c] ss:$16 sps:$4 sm:$0xff]   ;;  %v4323_v45 = vld [vmem:[%s4448_s25 + $0x908] ss:$16 sps:$4 sm:$0xff]  }
 0x148   : > { %2994 = vmatprep.subr.bf16.mxu1 %v4256_v46  ;;  %v4326_v46 = vld [vmem:[%s4448_s25 + $0xb08] ss:$16 sps:$4 sm:$0xff]  }
 0x14a   : > { %2954 = vmatpush1.bf16.msra.mxu0 %v4251_v47  ;;  %v4331_v47 = vld [vmem:[%s4448_s25 + $0x92c] ss:$16 sps:$4 sm:$0xff]  }
 0x14b   : > { %2995 = vmatpush1.bf16.msra.mxu1 %v4254_v49  ;;  %2955 = vmatprep.subr.bf16.mxu0 %v4259_v50  ;;  %v4334_v49 = vld [vmem:[%s4448_s25 + $0xb2c] ss:$16 sps:$4 sm:$0xff]   ;;  %v4329_v50 = vld [vmem:[%s4448_s25 + $0x928] ss:$16 sps:$4 sm:$0xff]  }
 0x14c   : > { %2996 = vmatprep.subr.bf16.mxu1 %v4262_v48  ;;  %v4332_v48 = vld [vmem:[%s4448_s25 + $0xb28] ss:$16 sps:$4 sm:$0xff]  }
 0x14e   : > { %2956 = vmatpush1.bf16.msra.mxu0 %v4257_v52  ;;  %v4337_v52 = vld [vmem:[%s4448_s25 + $0x94c] ss:$16 sps:$4 sm:$0xff]  }
 0x14f   : > { %2997 = vmatpush1.bf16.msra.mxu1 %v4260_v51  ;;  %2957 = vmatprep.subr.bf16.mxu0 %v4265_v53  ;;  %v4340_v51 = vld [vmem:[%s4448_s25 + $0xb4c] ss:$16 sps:$4 sm:$0xff]   ;;  %v4335_v53 = vld [vmem:[%s4448_s25 + $0x948] ss:$16 sps:$4 sm:$0xff]  }
 0x150   : > { %2998 = vmatprep.subr.bf16.mxu1 %v4268_v54  ;;  %v4338_v54 = vld [vmem:[%s4448_s25 + $0xb48] ss:$16 sps:$4 sm:$0xff]  }
 0x152   : > { %2958 = vmatpush1.bf16.msra.mxu0 %v4263_v7  ;;  %v4343_v7 = vld [vmem:[%s4448_s25 + $0x96c] ss:$16 sps:$4 sm:$0xff]  }
 0x153   : > { %2999 = vmatpush1.bf16.msra.mxu1 %v4266_v8  ;;  %2959 = vmatprep.subr.bf16.mxu0 %v4271_v55  ;;  %v4346_v8 = vld [vmem:[%s4448_s25 + $0xb6c] ss:$16 sps:$4 sm:$0xff]   ;;  %v4341_v55 = vld [vmem:[%s4448_s25 + $0x968] ss:$16 sps:$4 sm:$0xff]  }
 0x154   : > { %3000 = vmatprep.subr.bf16.mxu1 %v4274_v56  ;;  %v4344_v56 = vld [vmem:[%s4448_s25 + $0xb68] ss:$16 sps:$4 sm:$0xff]  }
 0x156   : > { %2960 = vmatpush1.bf16.msra.mxu0 %v4269_v57  ;;  %v4349_v57 = vld [vmem:[%s4448_s25 + $0x98c] ss:$16 sps:$4 sm:$0xff]  }
 0x157   : > { %3001 = vmatpush1.bf16.msra.mxu1 %v4272_v37  ;;  %3011 = vmatprep.subr.bf16.mxu0 %v4277_v38  ;;  %v4352_v37 = vld [vmem:[%s4448_s25 + $0xb8c] ss:$16 sps:$4 sm:$0xff]   ;;  %v4347_v38 = vld [vmem:[%s4448_s25 + $0x988] ss:$16 sps:$4 sm:$0xff]  }
 0x158   : > { %3052 = vmatprep.subr.bf16.mxu1 %v4280_v58  ;;  %v4350_v58 = vld [vmem:[%s4448_s25 + $0xb88] ss:$16 sps:$4 sm:$0xff]  }
 0x159   : > { %2962 = vmatmul.mubr.bf16.vlgmr.msra.gmra.mrb[16].mxu0 %v4613_v17  ;;  %v4287_v17 = vld [vmem:[%s4448_s25 + $0x848] ss:$16 sps:$4 sm:$0xff]  }
 0x15a   : > { %3003 = vmatmul.mubr.bf16.vlgmr.msra.gmra.mrb[16].mxu1 %v4617_v18  ;;  %3012 = vmatpush1.bf16.msra.mxu0 %v4275_v59  ;;  %v4290_v18 = vld [vmem:[%s4448_s25 + $0xa48] ss:$16 sps:$4 sm:$0xff]   ;;  %v4355_v59 = vld [vmem:[%s4448_s25 + $0x9ac] ss:$16 sps:$4 sm:$0xff]  }
 0x15b   : > { %3053 = vmatpush1.bf16.msra.mxu1 %v4278_v60  ;;  %3013 = vmatprep.subr.bf16.mxu0 %v4283_v61  ;;  %v4358_v60 = vld [vmem:[%s4448_s25 + $0xbac] ss:$16 sps:$4 sm:$0xff]   ;;  %v4353_v61 = vld [vmem:[%s4448_s25 + $0x9a8] ss:$16 sps:$4 sm:$0xff]  }
 0x15c   : > { %3054 = vmatprep.subr.bf16.mxu1 %v4286_v62  ;;  %3043 = vmatprep.mubr.bf16.mxu0 %v4631_v25  ;;  %v4296_v25 = vld [vmem:[%s4448_s25 + $0xa68] ss:$16 sps:$4 sm:$0xff]  }
 0x15d   : > { %3084 = vmatprep.mubr.bf16.mxu1 %v4635_v26  ;;  %v4301_v26 = vld [vmem:[%s4448_s25 + $0x88c] ss:$16 sps:$4 sm:$0xff]   ;;  %v4356_v62 = vld [vmem:[%s4448_s25 + $0xba8] ss:$16 sps:$4 sm:$0xff]  }
 0x15e   : > { %3014 = vmatpush1.bf16.msra.mxu0 %v4281_v63  ;;  %v4361_v63 = vld [vmem:[%s4448_s25 + $0x9cc] ss:$16 sps:$4 sm:$0xff]  }
 0x15f   : > { %3055 = vmatpush1.bf16.msra.mxu1 %v4284_v0  ;;  %3015 = vmatprep.subr.bf16.mxu0 %v4289_v1  ;;  %v4364_v0 = vld [vmem:[%s4448_s25 + $0xbcc] ss:$16 sps:$4 sm:$0xff]   ;;  %v4359_v1 = vld [vmem:[%s4448_s25 + $0x9c8] ss:$16 sps:$4 sm:$0xff]  }
 0x160   : > { %3056 = vmatprep.subr.bf16.mxu1 %v4292_v2  ;;  %v4362_v2 = vld [vmem:[%s4448_s25 + $0xbc8] ss:$16 sps:$4 sm:$0xff]  }
 0x162   : > { %3016 = vmatpush1.bf16.msra.mxu0 %v4287_v17  ;;  %v4367_v17 = vld [vmem:[%s4448_s25 + $0x9ec] ss:$16 sps:$4 sm:$0xff]  }
 0x163   : > { %3057 = vmatpush1.bf16.msra.mxu1 %v4290_v18  ;;  %3017 = vmatprep.subr.bf16.mxu0 %v4295_v3  ;;  %v4370_v18 = vld [vmem:[%s4448_s25 + $0xbec] ss:$16 sps:$4 sm:$0xff]   ;;  %v4365_v3 = vld [vmem:[%s4448_s25 + $0x9e8] ss:$16 sps:$4 sm:$0xff]  }
 0x164   : > { %3058 = vmatprep.subr.bf16.mxu1 %v4298_v4  ;;  %v4368_v4 = vld [vmem:[%s4448_s25 + $0xbe8] ss:$16 sps:$4 sm:$0xff]  }
 0x166   : > { %3018 = vmatpush1.bf16.msra.mxu0 %v4293_v6 }
 0x167   : > { %3059 = vmatpush1.bf16.msra.mxu1 %v4296_v25  ;;  %3019 = vmatprep.subr.bf16.mxu0 %v4301_v26 }
 0x168   : > { %3060 = vmatprep.subr.bf16.mxu1 %v4304_v9 }
 0x16a   : > { %3020 = vmatpush1.bf16.msra.mxu0 %v4299_v11 }
 0x16b   : > { %3061 = vmatpush1.bf16.msra.mxu1 %v4302_v12  ;;  %3021 = vmatprep.subr.bf16.mxu0 %v4307_v13  ;;  %v245_v12 = vld [vmem:[#allocation2] sm:$0xff] }
 0x16c   : > { %3062 = vmatprep.subr.bf16.mxu1 %v4310_v14  ;;  %v2717_v21 = vpop.f32.mrb[4].mxu0 }
 0x16d   : > { %v2758_v22 = vpop.f32.mrb[4].mxu1  ;;  %v2718_v27 = vadd.f32 %v2717_v21, %v4805_v5  ;;  %v2719_v28 = vpop.f32.mrb[5].mxu0  ;;  %v4319_v5 = vld [vmem:[%s4448_s25 + $0x8ec] ss:$16 sps:$4 sm:$0xff]  }
 0x16e   : > { %v2760_v29 = vpop.f32.mrb[5].mxu1  ;;  %v2720_v30 = vadd.f32 %v2719_v28, %v4807_v10  ;;  %v2721_v31 = vpop.f32.mrb[6].mxu0  ;;  %3022 = vmatpush1.bf16.msra.mxu0 %v4305_v15  ;;  %v4322_v10 = vld [vmem:[%s4448_s25 + $0xaec] ss:$16 sps:$4 sm:$0xff]  }
 0x16f   : > { %v2762_v32 = vpop.f32.mrb[6].mxu1  ;;  %3063 = vmatpush1.bf16.msra.mxu1 %v4308_v16  ;;  %v4881_v39 = vadd.f32 %v2758_v22, %v2718_v27  ;;  %v2722_v40 = vpop.f32.mrb[7].mxu0  ;;  %3023 = vmatprep.subr.bf16.mxu0 %v4313_v19  ;;  %v246_v19 = vld [vmem:[#allocation2 + $0x8] sm:$0xff] }
 0x170   : > { %v2763_v41 = vpop.f32.mrb[7].mxu1  ;;  %3064 = vmatprep.subr.bf16.mxu1 %v4316_v20  ;;  %v4885_v42 = vadd.f32 %v2760_v29, %v2720_v30 }
 0x172   : > { %3024 = vmatpush1.bf16.msra.mxu0 %v4311_v33 }
 0x173   : > { %3065 = vmatpush1.bf16.msra.mxu1 %v4314_v34  ;;  %3025 = vmatprep.subr.bf16.mxu0 %v4319_v5 }
 0x174   : > { %3066 = vmatprep.subr.bf16.mxu1 %v4322_v10 }
 0x176   : > { %3026 = vmatpush1.bf16.msra.mxu0 %v4317_v23 }
 0x177   : > { %3067 = vmatpush1.bf16.msra.mxu1 %v4320_v24  ;;  %3027 = vmatprep.subr.bf16.mxu0 %v4325_v43 }
 0x178   : > { %3068 = vmatprep.subr.bf16.mxu1 %v4328_v44 }
 0x17a   : > { %3028 = vmatpush1.bf16.msra.mxu0 %v4323_v45 }
 0x17b   : > { %3069 = vmatpush1.bf16.msra.mxu1 %v4326_v46  ;;  %3029 = vmatprep.subr.bf16.mxu0 %v4331_v47 }
 0x17c   : > { %3070 = vmatprep.subr.bf16.mxu1 %v4334_v49 }
 0x17e   : > { %3030 = vmatpush1.bf16.msra.mxu0 %v4329_v50 }
 0x17f   : > { %3071 = vmatpush1.bf16.msra.mxu1 %v4332_v48  ;;  %3031 = vmatprep.subr.bf16.mxu0 %v4337_v52 }
 0x180   : > { %3072 = vmatprep.subr.bf16.mxu1 %v4340_v51 }
 0x182   : > { %3032 = vmatpush1.bf16.msra.mxu0 %v4335_v53 }
 0x183   : > { %3073 = vmatpush1.bf16.msra.mxu1 %v4338_v54  ;;  %3033 = vmatprep.subr.bf16.mxu0 %v4343_v7  ;;  %v247_v54 = vld [vmem:[#allocation2 + $0x10] sm:$0xff] }
 0x184   : > { %3074 = vmatprep.subr.bf16.mxu1 %v4346_v8 }
 0x186   : > { %3034 = vmatpush1.bf16.msra.mxu0 %v4341_v55 }
 0x187   : > { %3075 = vmatpush1.bf16.msra.mxu1 %v4344_v56  ;;  %3035 = vmatprep.subr.bf16.mxu0 %v4349_v57  ;;  %v248_v57 = vld [vmem:[#allocation2 + $0x18] sm:$0xff] }
 0x188   : > { %3076 = vmatprep.subr.bf16.mxu1 %v4352_v37 }
 0x18a   : > { %3036 = vmatpush1.bf16.msra.mxu0 %v4347_v38 }
 0x18b   : > { %3077 = vmatpush1.bf16.msra.mxu1 %v4350_v58  ;;  %3037 = vmatprep.subr.bf16.mxu0 %v4355_v59 }
 0x18c   : > { %3078 = vmatprep.subr.bf16.mxu1 %v4358_v60 }
 0x18e   : > { %3038 = vmatpush1.bf16.msra.mxu0 %v4353_v61 }
 0x18f   : > { %3079 = vmatpush1.bf16.msra.mxu1 %v4356_v62  ;;  %3039 = vmatprep.subr.bf16.mxu0 %v4361_v63 }
 0x190   : > { %3080 = vmatprep.subr.bf16.mxu1 %v4364_v0  ;;  %v3150_v0 = vlaneseq (!%p3749_p7) }
 0x192   : > { %3040 = vmatpush1.bf16.msra.mxu0 %v4359_v1  ;;  %v4396_v1 = vmov (!%p3749_p7), 0.0   ;;  %vm3172_vm0 = vcmp.lt.s32.totalorder (!%p3749_p7), %v3150_v0, 512 }
 0x193   : > { %3081 = vmatpush1.bf16.msra.mxu1 %v4362_v2  ;;  %3041 = vmatprep.subr.bf16.mxu0 %v4367_v17  ;;  %3113 = vst [vmem:[%s4970_s3] sm:$0xff] (!%p3749_p7), %v4396_v1  ;;  %3114 = vst [vmem:[%s4970_s3 + $0x8] sm:$0xff] (!%p3749_p7), %v4396_v1 }
 0x194   : > { %3082 = vmatprep.subr.bf16.mxu1 %v4370_v18  ;;  %3115 = vst [vmem:[%s4970_s3 + $0x10] sm:$0xff] (!%p3749_p7), %v4396_v1  ;;  %3116 = vst [vmem:[%s4970_s3 + $0x18] sm:$0xff] (!%p3749_p7), %v4396_v1 }
 0x196   : > { %3042 = vmatpush1.bf16.msra.mxu0 %v4365_v3 }
 0x197   : > { %3083 = vmatpush1.bf16.msra.mxu1 %v4368_v4 }
 0x199   : > { %3044 = vmatmul.mubr.bf16.vlgmr.msra.gmra.mrb[20].mxu0 %v4703_v35 }
 0x19a   : > { %3085 = vmatmul.mubr.bf16.vlgmr.msra.gmra.mrb[20].mxu1 %v4707_v36 }
 0x1ac   : > { %v2799_v6 = vpop.f32.mrb[8].mxu0 }
 0x1ad   : > { %v2840_v25 = vpop.f32.mrb[8].mxu1  ;;  %v2800_v26 = vadd.f32 %v2799_v6, %v4881_v39  ;;  %v2801_v9 = vpop.f32.mrb[9].mxu0 }
 0x1ae   : > { %v2842_v11 = vpop.f32.mrb[9].mxu1  ;;  %v2802_v13 = vadd.f32 %v2801_v9, %v4885_v42  ;;  %v2803_v14 = vpop.f32.mrb[10].mxu0 }
 0x1af   : > { %v2844_v15 = vpop.f32.mrb[10].mxu1  ;;  %v2841_v16 = vadd.f32 %v2840_v25, %v2800_v26  ;;  %v2804_v20 = vpop.f32.mrb[11].mxu0 }
 0x1b0   : > { %v2845_v21 = vpop.f32.mrb[11].mxu1  ;;  %v2843_v22 = vadd.f32 %v2842_v11, %v2802_v13 }
 0x1b1   : > { %v3093_v27 = vadd.f32 %v2841_v16, %v245_v12 }
 0x1b2   : > { %v3094_v35 = vadd.f32 %v2843_v22, %v246_v19 }
 0x1b3   : > { %3097 = vst [vmem:[#allocation2] sm:$0xff] %v3093_v27 }
 0x1b4   : > { %3098 = vst [vmem:[#allocation2 + $0x8] sm:$0xff] %v3094_v35 }
 0x1ba   : > { %v3105_v61 = vld [vmem:[#allocation2] sm:$0xff] (!%p3749_p7) }
 0x1bb   : > { %v3106_v62 = vld [vmem:[#allocation2 + $0x8] sm:$0xff] (!%p3749_p7)  ;;  %3109 = vst [vmem:[%s4969_s2] sm:$0xff] (!%p3749_p7), %v3105_v61  ;;  %v3117_v2 = vrot.slane (!%p3749_p7), %v3105_v61, 4  ;;  %v3176_v17 = vmul.f32 (!%p3749_p7), %v3105_v61, %v3105_v61 }
 0x1bc   : > { %3110 = vst [vmem:[%s4969_s2 + $0x8] sm:$0xff] (!%p3749_p7), %v3106_v62  ;;  %v3123_v18 = vrot.slane (!%p3749_p7), %v3106_v62, 4  ;;  %v3177_v3 = vmul.f32 (!%p3749_p7), %v3106_v62, %v3106_v62 }
 0x1bd   : > { %v3118_v11 = vadd.f32 (!%p3749_p7), %v3117_v2, %v3105_v61  ;;  %v3180_v12 = vrot.slane (!%p3749_p7), %v3176_v17, 4 }
 0x1be   : > { %v3124_v13 = vadd.f32 (!%p3749_p7), %v3123_v18, %v3106_v62  ;;  %v3186_v14 = vrot.slane (!%p3749_p7), %v3177_v3, 4 }
 0x1bf   : > { %v3119_v21 = vrot.slane (!%p3749_p7), %v3118_v11, 2  ;;  %v3181_v22 = vadd.f32 (!%p3749_p7), %v3180_v12, %v3176_v17 }
 0x1c0   : > { %v3125_v27 = vrot.slane (!%p3749_p7), %v3124_v13, 2  ;;  %v3187_v35 = vadd.f32 (!%p3749_p7), %v3186_v14, %v3177_v3 }
 0x1ec   : > { %v2881_v36 = vpop.f32.mrb[12].mxu0 }
 0x1ed   : > { %v2922_v28 = vpop.f32.mrb[12].mxu1  ;;  %v2883_v30 = vpop.f32.mrb[13].mxu0 }
 0x1ee   : > { %v2923_v29 = vadd.f32 %v2922_v28, %v2881_v36  ;;  %v2924_v31 = vpop.f32.mrb[13].mxu1  ;;  %v2885_v33 = vpop.f32.mrb[14].mxu0 }
 0x1ef   : > { %v2925_v32 = vadd.f32 %v2924_v31, %v2883_v30  ;;  %v2926_v34 = vpop.f32.mrb[14].mxu1  ;;  %v2886_v39 = vpop.f32.mrb[15].mxu0  ;;  %v3120_v31 = vadd.f32 (!%p3749_p7), %v3119_v21, %v3118_v11  ;;  %v3126_v33 = vadd.f32 (!%p3749_p7), %v3125_v27, %v3124_v13 }
 0x1f0   : > { %v2927_v40 = vpop.f32.mrb[15].mxu1  ;;  %v3188_v34 = vrot.slane (!%p3749_p7), %v3187_v35, 2 }
 0x22c   : > { %v2963_v41 = vpop.f32.mrb[16].mxu0 }
 0x22d   : > { %v3004_v5 = vpop.f32.mrb[16].mxu1  ;;  %v2964_v10 = vadd.f32 %v2963_v41, %v2923_v29  ;;  %v2965_v42 = vpop.f32.mrb[17].mxu0 }
 0x22e   : > { %v3006_v23 = vpop.f32.mrb[17].mxu1  ;;  %v2966_v24 = vadd.f32 %v2965_v42, %v2925_v32  ;;  %v2967_v43 = vpop.f32.mrb[18].mxu0  ;;  %v3182_v32 = vrot.slane (!%p3749_p7), %v3181_v22, 2 }
 0x22f   : > { %v3008_v44 = vpop.f32.mrb[18].mxu1  ;;  %v3005_v45 = vadd.f32 %v3004_v5, %v2964_v10  ;;  %v2968_v46 = vpop.f32.mrb[19].mxu0  ;;  %v3121_v10 = vrot.slane (!%p3749_p7), %v3120_v31, 1 }
 0x230   : > { %v3009_v47 = vpop.f32.mrb[19].mxu1  ;;  %v3007_v49 = vadd.f32 %v3006_v23, %v2966_v24  ;;  %v3183_v42 = vadd.f32 (!%p3749_p7), %v3182_v32, %v3181_v22  ;;  %v3127_v23 = vrot.slane (!%p3749_p7), %v3126_v33, 1  ;;  %v3189_v24 = vadd.f32 (!%p3749_p7), %v3188_v34, %v3187_v35 }
 0x231   : > { %v3122_v47 = vadd.f32 (!%p3749_p7), %v3121_v10, %v3120_v31 }
 0x26c   : > { %v3045_v50 = vpop.f32.mrb[20].mxu0 }
 0x26d   : > { %v3086_v48 = vpop.f32.mrb[20].mxu1  ;;  %v3046_v52 = vadd.f32 %v3045_v50, %v3005_v45  ;;  %v3047_v51 = vpop.f32.mrb[21].mxu0  ;;  %v3128_v50 = vadd.f32 (!%p3749_p7), %v3127_v23, %v3126_v33 }
 0x26e   : > { %v3088_v53 = vpop.f32.mrb[21].mxu1  ;;  %v3048_v7 = vadd.f32 %v3047_v51, %v3007_v49  ;;  %v3049_v8 = vpop.f32.mrb[22].mxu0  ;;  %3104 = sbr.rel (%p3749_p7) target bundleno = 659 (0x293), region = 36  ;;  %v3184_v49 = vrot.slane (!%p3749_p7), %v3183_v42, 1 }
 0x26f   : > { %v3090_v55 = vpop.f32.mrb[22].mxu1  ;;  %v3087_v56 = vadd.f32 %v3086_v48, %v3046_v52  ;;  %v3050_v37 = vpop.f32.mrb[23].mxu0  ;;  %v3190_v48 = vrot.slane (!%p3749_p7), %v3189_v24, 1 }
 0x270   : > { %v3091_v38 = vpop.f32.mrb[23].mxu1  ;;  %v3089_v58 = vadd.f32 %v3088_v53, %v3048_v7  ;;  %v3185_v7 = vadd.f32 (!%p3749_p7), %v3184_v49, %v3183_v42  ;;  %v4397_v55 = vmov (!%p3749_p7), 1966171168  }
 0x271   : > { %v3095_v59 = vadd.f32 %v3087_v56, %v247_v54  ;;  %v3191_v8 = vadd.f32 (!%p3749_p7), %v3190_v48, %v3189_v24  ;;  %v3148_v56 = vunpack.c.l.s4 (!%p3749_p7), %v4397_v55  ;;  %v3151_v38 = vshrl.u32 (!%p3749_p7), %v3150_v0, 7 }
 0x272   : > { %v3096_v60 = vadd.f32 %v3089_v58, %v248_v57  ;;  %v3145_v58 = vcombine.low (!%p3749_p7), %v3122_v47, %v3128_v50 }
 0x273   : > { %3099 = vst [vmem:[#allocation2 + $0x10] sm:$0xff] %v3095_v59  ;;  %v3208_v59 = vcombine.low (!%p3749_p7), %v3185_v7, %v3191_v8  ;;  %v3149_v61 = vunpack.c.0.s8 (!%p3749_p7), %v3148_v56 }
 0x274   : > { %3100 = vst [vmem:[#allocation2 + $0x18] sm:$0xff] %v3096_v60 }
 0x27a   : > { %v3107_v63 = vld [vmem:[#allocation2 + $0x10] sm:$0xff] }
 0x27b   : > { %3111 = vst [vmem:[%s4969_s2 + $0x10] sm:$0xff] %v3107_v63  ;;  %v3108_v4 = vld [vmem:[#allocation2 + $0x18] sm:$0xff]  ;;  %v3129_v6 = vrot.slane %v3107_v63, 4  ;;  %v3178_v25 = vmul.f32 %v3107_v63, %v3107_v63 }
 0x27c   : > { %3112 = vst [vmem:[%s4969_s2 + $0x18] sm:$0xff] %v3108_v4  ;;  %v3135_v26 = vrot.slane %v3108_v4, 4  ;;  %v3179_v9 = vmul.f32 %v3108_v4, %v3108_v4 }
 0x27d   : > { %v3130_v15 = vadd.f32 %v3129_v6, %v3107_v63  ;;  %v3192_v16 = vrot.slane %v3178_v25, 4  ;;  %v3152_v63 = vsub.s32 %v3149_v61, %v3151_v38 }
 0x27e   : > { %v3136_v19 = vadd.f32 %v3135_v26, %v3108_v4  ;;  %v3198_v20 = vrot.slane %v3179_v9, 4 }
 0x27f   : > { %v3131_v36 = vrot.slane %v3130_v15, 2  ;;  %v3193_v28 = vadd.f32 %v3192_v16, %v3178_v25  ;;  %v3153_v1 = vrot.slane %v3145_v58, %v3152_v63  ;;  %v3216_v17 = vrot.slane %v3208_v59, %v3152_v63 }
 0x280   : > { %v3137_v29 = vrot.slane %v3136_v19, 2  ;;  %v3199_v30 = vadd.f32 %v3198_v20, %v3179_v9 }
 0x281   : > { %v3132_v39 = vadd.f32 %v3131_v36, %v3130_v15  ;;  %v3194_v40 = vrot.slane %v3193_v28, 2 }
 0x282   : > { %v3138_v41 = vadd.f32 %v3137_v29, %v3136_v19  ;;  %v3200_v5 = vrot.slane %v3199_v30, 2 }
 0x283   : > { %v3133_v43 = vrot.slane %v3132_v39, 1  ;;  %v3195_v44 = vadd.f32 %v3194_v40, %v3193_v28 }
 0x284   : > { %v3139_v45 = vrot.slane %v3138_v41, 1  ;;  %v3201_v46 = vadd.f32 %v3200_v5, %v3199_v30 }
 0x285   : > { %v3134_v52 = vadd.f32 %v3133_v43, %v3132_v39  ;;  %v3196_v51 = vrot.slane %v3195_v44, 1 }
 0x286   : > { %v3140_v53 = vadd.f32 %v3139_v45, %v3138_v41  ;;  %v3202_v54 = vrot.slane %v3201_v46, 1 }
 0x287   : > { %v3197_v57 = vadd.f32 %v3196_v51, %v3195_v44 }
 0x288   : > { %v3203_v37 = vadd.f32 %v3202_v54, %v3201_v46  ;;  %v3146_v60 = vcombine.low %v3134_v52, %v3140_v53 }
 0x28a   : > { %v3209_v62 = vcombine.low %v3197_v57, %v3203_v37  ;;  %v3160_v2 = vrot.slane %v3146_v60, %v3152_v63 }
 0x28c   : > { %v3223_v18 = vrot.slane %v3209_v62, %v3152_v63  ;;  %v3161_v3 = vcombine.low %v3153_v1, %v3160_v2 }
 0x28e   : > { %v3224_v4 = vcombine.low %v3216_v17, %v3223_v18  ;;  %v3168_v6 = vrot.slane %v3161_v3, %v3152_v63 }
 0x290   : > { %v3231_v25 = vrot.slane %v3224_v4, %v3152_v63  ;;  %3174 = vst.msk [vmem:[%s4970_s3] ss:$8 sm:$0xf] %vm3172_vm0, %v3168_v6 }
 0x292   : > { %3750 = vst.msk [vmem:[%s4970_s3 + $0x1] ss:$8 sm:$0xf] %vm3172_vm0, %v3231_v25 }
 0x293 PF: > { %s14_s14 = sadd.s32 1, %s4393_s14   ;;  %s4971_s12 = smov %s4389_s13 }
 0x294   : > { %p11_p8 = scmp.ge.s32.totalorder %s14_s14, 5   ;;  %s4972_s13 = smov %s4974_s15 }
 0x296   :  { %13 = sbr.rel (!%p11_p8) target bundleno = 2 (0x2), region = 82 }

// kernel: modified_resnet18_forward.78
= control target key start
LH: loop header
LB: loop body
LE: loop exit
PB: predicated region body
PF: predicated region fallthrough
CT: control target
= control target key end

     0   :  { %v213_v28 = vmov 1966171168   ;;  %v74_v30 = vlaneseq  ;;  %s298_s1 = inlined_call_operand.vmem [shape: f32[1,8,512], index: 1, kind: input, shape index: {}]   ;;  %s299_s2 = inlined_call_operand.vmem [shape: f32[1,512], index: 2, kind: input, shape index: {}]   ;;  %s300_s0 = inlined_call_operand.vmem [shape: f32[8,512], index: 0, kind: input, shape index: {}]   ;;  %s301_s3 = inlined_call_operand.vmem [shape: f32[1,512], index: 3, kind: input, shape index: {}]   ;;  %s302_s4 = inlined_call_operand.vmem [shape: f32[8,512], index: 4, kind: input, shape index: {}]   ;;  %s303_s5 = inlined_call_operand.vmem [shape: f32[8,512], index: 5, kind: output, shape index: {}]  }
   0x1   :  { %v20_v0 = vld [vmem:[%s298_s1] sm:$0xff]  ;;  %v21_v1 = vld [vmem:[%s298_s1 + $0x8] sm:$0xff]  ;;  %v22_v2 = vld [vmem:[%s298_s1 + $0x10] sm:$0xff]  ;;  %v72_v29 = vunpack.c.l.s4 %v213_v28 }
   0x2   :  { %v23_v3 = vld [vmem:[%s298_s1 + $0x18] sm:$0xff]  ;;  %v28_v4 = vmul.f32 0.5, %v20_v0  ;;  %v29_v5 = vmul.f32 0.5, %v21_v1  ;;  %v30_v6 = vmul.f32 0.5, %v22_v2  ;;  %v75_v32 = vshrl.u32 %v74_v30, 7  ;;  %v151_v0 = vld [vmem:[%s300_s0] sm:$0xff] }
   0x3   :  { %v31_v7 = vmul.f32 0.5, %v23_v3  ;;  %v73_v31 = vunpack.c.0.s8 %v72_v29  ;;  %v56_v43 = vld [vmem:[%s299_s2] sm:$0xf]  ;;  %v152_v1 = vld [vmem:[%s300_s0 + $0x8] sm:$0xff]  ;;  %v153_v2 = vld [vmem:[%s300_s0 + $0x10] sm:$0xff] }
   0x4   :  { %v32_v8 = vmul.f32 %v28_v4, %v28_v4  ;;  %v33_v9 = vmul.f32 %v29_v5, %v29_v5  ;;  %v34_v10 = vmul.f32 %v30_v6, %v30_v6  ;;  %v99_v44 = vsub.s32 0, %v75_v32  ;;  %v95_v62 = vld [vmem:[%s301_s3] sm:$0xf]  ;;  %v154_v3 = vld [vmem:[%s300_s0 + $0x18] sm:$0xff] }
   0x5   :  { %v35_v11 = vmul.f32 %v31_v7, %v31_v7  ;;  %v76_v34 = vsub.s32 %v73_v31, %v75_v32  ;;  %v103_v46 = vsub.s32 1, %v75_v32  ;;  %v107_v47 = vsub.s32 2, %v75_v32 }
   0x6   :  { %v40_v12 = vrot.slane %v32_v8, 7  ;;  %v41_v13 = vrot.slane %v33_v9, 7  ;;  %v42_v14 = vrot.slane %v34_v10, 7  ;;  %v111_v48 = vsub.s32 3, %v75_v32 }
   0x7   :  { %v43_v15 = vrot.slane %v35_v11, 7  ;;  %v184_v11 = vld [vmem:[%s302_s4] sm:$0xff] }
   0x8   :  { %v48_v16 = vsub.f32 %v28_v4, %v40_v12  ;;  %v49_v17 = vsub.f32 %v29_v5, %v41_v13  ;;  %v50_v18 = vsub.f32 %v30_v6, %v42_v14 }
   0x9   :  { %v51_v19 = vsub.f32 %v31_v7, %v43_v15  ;;  %v185_v15 = vld [vmem:[%s302_s4 + $0x8] sm:$0xff] }
   0xa   :  { %v52_v20 = vmax.f32 %v48_v16, 0.0  ;;  %v53_v21 = vmax.f32 %v49_v17, 0.0  ;;  %v54_v22 = vmax.f32 %v50_v18, 0.0  ;;  %v186_v16 = vld [vmem:[%s302_s4 + $0x10] sm:$0xff]  ;;  %v187_v17 = vld [vmem:[%s302_s4 + $0x18] sm:$0xff] }
   0xb   :  { %v55_v23 = vmax.f32 %v51_v19, 0.0 }
   0xc   :  { %v57_v24 = vadd.f32 1e-05, %v52_v20  ;;  %v58_v25 = vadd.f32 1e-05, %v53_v21  ;;  %v59_v26 = vadd.f32 1e-05, %v54_v22 }
   0xd   :  { %v60_v27 = vadd.f32 1e-05, %v55_v23 }
   0xe   :  { %205 = vrsqrt.f32 %v57_v24 }
   0xf   :  { %207 = vrsqrt.f32 %v58_v25 }
  0x10   :  { %209 = vrsqrt.f32 %v59_v26 }
  0x11   :  { %211 = vrsqrt.f32 %v60_v27 }
  0x18   :  { %v206_v33 = vpop.eup %205 }
  0x19   :  { %v208_v35 = vpop.eup %207 }
  0x1a   :  { %v210_v36 = vpop.eup %209  ;;  %v69_v37 = vcombine.low %v206_v33, %v208_v35 }
  0x1b   :  { %v212_v38 = vpop.eup %211 }
  0x1c   :  { %v70_v39 = vcombine.low %v210_v36, %v212_v38  ;;  %v77_v40 = vrot.slane %v69_v37, %v76_v34 }
  0x1e   :  { %v84_v41 = vrot.slane %v70_v39, %v76_v34 }
  0x20   :  { %v85_v42 = vcombine.high %v77_v40, %v84_v41 }
  0x22   :  { %v92_v45 = vrot.slane %v85_v42, %v76_v34 }
  0x24   :  { %v94_v49 = vmul.f32 %v92_v45, %v56_v43 }
  0x26   :  { %v100_v50 = vrot.slane %v94_v49, %v99_v44  ;;  %v104_v51 = vrot.slane %v94_v49, %v103_v46  ;;  %v108_v52 = vrot.slane %v94_v49, %v107_v47  ;;  %v112_v53 = vrot.slane %v94_v49, %v111_v48 }
  0x28   :  { %v117_v54 = vmul.f32 %v100_v50, %v28_v4  ;;  %v118_v55 = vmul.f32 %v104_v51, %v29_v5  ;;  %v119_v56 = vmul.f32 %v108_v52, %v30_v6  ;;  %v120_v57 = vmul.f32 %v112_v53, %v31_v7 }
  0x29   :  { %v155_v5 = vmul.f32 %v151_v0, %v100_v50  ;;  %v156_v7 = vmul.f32 %v152_v1, %v104_v51  ;;  %v157_v8 = vmul.f32 %v153_v2, %v108_v52  ;;  %v158_v9 = vmul.f32 %v154_v3, %v112_v53 }
  0x2a   :  { %v125_v58 = vcombine.low %v117_v54, %v118_v55  ;;  %v126_v59 = vcombine.low %v119_v56, %v120_v57 }
  0x2c   :  { %v133_v60 = vrot.slane %v125_v58, %v76_v34  ;;  %v140_v61 = vrot.slane %v126_v59, %v76_v34 }
  0x2e   :  { %v141_v63 = vcombine.low %v133_v60, %v140_v61 }
  0x30   :  { %v148_v4 = vrot.slane %v141_v63, %v76_v34 }
  0x32   :  { %v150_v6 = vsub.f32 %v95_v62, %v148_v4 }
  0x34   :  { %v163_v10 = vrot.slane %v150_v6, %v99_v44  ;;  %v167_v12 = vrot.slane %v150_v6, %v103_v46  ;;  %v171_v13 = vrot.slane %v150_v6, %v107_v47  ;;  %v175_v14 = vrot.slane %v150_v6, %v111_v48 }
  0x36   :  { %v180_v18 = vadd.f32 %v163_v10, %v155_v5  ;;  %v181_v19 = vadd.f32 %v167_v12, %v156_v7  ;;  %v182_v20 = vadd.f32 %v171_v13, %v157_v8  ;;  %v183_v21 = vadd.f32 %v175_v14, %v158_v9 }
  0x38   :  { %v188_v22 = vadd.f32 %v184_v11, %v180_v18  ;;  %v189_v23 = vadd.f32 %v185_v15, %v181_v19  ;;  %v190_v24 = vadd.f32 %v186_v16, %v182_v20  ;;  %v191_v25 = vadd.f32 %v187_v17, %v183_v21 }
  0x3a   :  { %v192_v26 = vmax.f32 %v188_v22, 0.0  ;;  %v193_v27 = vmax.f32 %v189_v23, 0.0  ;;  %v194_v28 = vmax.f32 %v190_v24, 0.0  ;;  %v195_v29 = vmax.f32 %v191_v25, 0.0 }
  0x3c   :  { %196 = vst [vmem:[%s303_s5] sm:$0xff] %v192_v26  ;;  %197 = vst [vmem:[%s303_s5 + $0x8] sm:$0xff] %v193_v27 }
  0x3d   :  { %198 = vst [vmem:[%s303_s5 + $0x10] sm:$0xff] %v194_v28  ;;  %199 = vst [vmem:[%s303_s5 + $0x18] sm:$0xff] %v195_v29 }

// kernel: modified_resnet18_forward.83
= control target key start
LH: loop header
LB: loop body
LE: loop exit
PB: predicated region body
PF: predicated region fallthrough
CT: control target
= control target key end

     0   :  { %v470_v60 = vmov 1966171168   ;;  %v116_v62 = vlaneseq  ;;  %s701_s1 = inlined_call_operand.vmem [shape: f32[512,128], index: 1, kind: input, shape index: {}]   ;;  %s702_s0 = inlined_call_operand.vmem [shape: f32[8,1,512], index: 0, kind: input, shape index: {}]   ;;  %s703_s2 = inlined_call_operand.vmem [shape: f32[1,128], index: 2, kind: input, shape index: {}]   ;;  %s704_s3 = inlined_call_operand.vmem [shape: f32[8,128], index: 3, kind: output, shape index: {}]  }
   0x1   :  { %v46_v0 = vld [vmem:[%s701_s1 + $0x80] sm:$0xff]  ;;  %v47_v1 = vld [vmem:[%s701_s1 + $0x88] sm:$0xff]  ;;  %v48_v11 = vld [vmem:[%s701_s1 + $0x90] sm:$0xff]  ;;  %v114_v61 = vunpack.c.l.s4 %v470_v60 }
   0x2   :  { %v30_v2 = vld [vmem:[%s701_s1] sm:$0xff]  ;;  %v397_v3 = vpack.c.bf16 %v47_v1, %v46_v0  ;;  %v31_v4 = vld [vmem:[%s701_s1 + $0x8] sm:$0xff]  ;;  %v49_v13 = vld [vmem:[%s701_s1 + $0x98] sm:$0xff] }
   0x3   :  { %v78_v5 = vld [vmem:[%s701_s1 + $0x180] sm:$0xff]  ;;  %v79_v6 = vld [vmem:[%s701_s1 + $0x188] sm:$0xff]  ;;  %v399_v7 = vpack.c.bf16 %v31_v4, %v30_v2  ;;  %v32_v14 = vld [vmem:[%s701_s1 + $0x10] sm:$0xff]  ;;  %v401_v16 = vpack.c.bf16 %v49_v13, %v48_v11  ;;  %v115_v11 = vunpack.c.0.s8 %v114_v61 }
   0x4   :  { %v429_v8 = vpack.c.bf16 %v79_v6, %v78_v5  ;;  %v62_v9 = vld [vmem:[%s701_s1 + $0x100] sm:$0xff]  ;;  %v63_v10 = vld [vmem:[%s701_s1 + $0x108] sm:$0xff]  ;;  %398 = vmatprep.subr.bf16.mxu0 %v397_v3  ;;  %v33_v15 = vld [vmem:[%s701_s1 + $0x18] sm:$0xff] }
   0x5   :  { %v431_v12 = vpack.c.bf16 %v63_v10, %v62_v9  ;;  %400 = vmatpush3.bf16.msra.mxu0 %v399_v7  ;;  %v403_v17 = vpack.c.bf16 %v33_v15, %v32_v14  ;;  %v80_v18 = vld [vmem:[%s701_s1 + $0x190] sm:$0xff]  ;;  %v81_v19 = vld [vmem:[%s701_s1 + $0x198] sm:$0xff]  ;;  %v50_v23 = vld [vmem:[%s701_s1 + $0xa0] sm:$0xff] }
   0x6   :  { %430 = vmatprep.subr.bf16.mxu1 %v429_v8  ;;  %v64_v20 = vld [vmem:[%s701_s1 + $0x110] sm:$0xff]  ;;  %v433_v21 = vpack.c.bf16 %v81_v19, %v80_v18  ;;  %v65_v22 = vld [vmem:[%s701_s1 + $0x118] sm:$0xff]  ;;  %v51_v24 = vld [vmem:[%s701_s1 + $0xa8] sm:$0xff]  ;;  %402 = vmatprep.subr.bf16.mxu0 %v401_v16 }
   0x7   :  { %432 = vmatpush3.bf16.msra.mxu1 %v431_v12  ;;  %v435_v25 = vpack.c.bf16 %v65_v22, %v64_v20  ;;  %v405_v26 = vpack.c.bf16 %v51_v24, %v50_v23  ;;  %v34_v27 = vld [vmem:[%s701_s1 + $0x20] sm:$0xff]  ;;  %v35_v28 = vld [vmem:[%s701_s1 + $0x28] sm:$0xff]  ;;  %v52_v35 = vld [vmem:[%s701_s1 + $0xb0] sm:$0xff]  ;;  %v117_v12 = vshrl.u32 %v116_v62, 7 }
   0x8   :  { %v82_v29 = vld [vmem:[%s701_s1 + $0x1a0] sm:$0xff]  ;;  %434 = vmatprep.subr.bf16.mxu1 %v433_v21  ;;  %v83_v30 = vld [vmem:[%s701_s1 + $0x1a8] sm:$0xff]  ;;  %v407_v33 = vpack.c.bf16 %v35_v28, %v34_v27  ;;  %v53_v36 = vld [vmem:[%s701_s1 + $0xb8] sm:$0xff] }
   0x9   :  { %v66_v31 = vld [vmem:[%s701_s1 + $0x120] sm:$0xff]  ;;  %v67_v32 = vld [vmem:[%s701_s1 + $0x128] sm:$0xff]  ;;  %404 = vmatpush3.bf16.msra.mxu0 %v403_v17  ;;  %v437_v34 = vpack.c.bf16 %v83_v30, %v82_v29  ;;  %v36_v37 = vld [vmem:[%s701_s1 + $0x30] sm:$0xff]  ;;  %v409_v39 = vpack.c.bf16 %v53_v36, %v52_v35  ;;  %v118_v27 = vsub.s32 %v115_v11, %v117_v12 }
   0xa   :  { %406 = vmatprep.subr.bf16.mxu0 %v405_v26  ;;  %v439_v38 = vpack.c.bf16 %v67_v32, %v66_v31  ;;  %v37_v40 = vld [vmem:[%s701_s1 + $0x38] sm:$0xff]  ;;  %v84_v41 = vld [vmem:[%s701_s1 + $0x1b0] sm:$0xff]  ;;  %v54_v46 = vld [vmem:[%s701_s1 + $0xc0] sm:$0xff] }
   0xb   :  { %436 = vmatpush3.bf16.msra.mxu1 %v435_v25  ;;  %v85_v42 = vld [vmem:[%s701_s1 + $0x1b8] sm:$0xff]  ;;  %v68_v44 = vld [vmem:[%s701_s1 + $0x130] sm:$0xff]  ;;  %v55_v47 = vld [vmem:[%s701_s1 + $0xc8] sm:$0xff]  ;;  %v411_v48 = vpack.c.bf16 %v37_v40, %v36_v37 }
   0xc   :  { %438 = vmatprep.subr.bf16.mxu1 %v437_v34  ;;  %v441_v43 = vpack.c.bf16 %v85_v42, %v84_v41  ;;  %v69_v45 = vld [vmem:[%s701_s1 + $0x138] sm:$0xff]  ;;  %v86_v49 = vld [vmem:[%s701_s1 + $0x1c0] sm:$0xff]  ;;  %v87_v50 = vld [vmem:[%s701_s1 + $0x1c8] sm:$0xff]  ;;  %v413_v52 = vpack.c.bf16 %v55_v47, %v54_v46 }
   0xd   :  { %408 = vmatpush3.bf16.msra.mxu0 %v407_v33  ;;  %v443_v51 = vpack.c.bf16 %v69_v45, %v68_v44  ;;  %v38_v53 = vld [vmem:[%s701_s1 + $0x40] sm:$0xff]  ;;  %v39_v54 = vld [vmem:[%s701_s1 + $0x48] sm:$0xff]  ;;  %v445_v56 = vpack.c.bf16 %v87_v50, %v86_v49  ;;  %v56_v58 = vld [vmem:[%s701_s1 + $0xd0] sm:$0xff] }
   0xe   :  { %410 = vmatprep.subr.bf16.mxu0 %v409_v39  ;;  %v70_v55 = vld [vmem:[%s701_s1 + $0x140] sm:$0xff]  ;;  %v71_v57 = vld [vmem:[%s701_s1 + $0x148] sm:$0xff]  ;;  %v57_v59 = vld [vmem:[%s701_s1 + $0xd8] sm:$0xff]  ;;  %v415_v1 = vpack.c.bf16 %v39_v54, %v38_v53 }
   0xf   :  { %440 = vmatpush3.bf16.msra.mxu1 %v439_v38  ;;  %v88_v63 = vld [vmem:[%s701_s1 + $0x1d0] sm:$0xff]  ;;  %v89_v0 = vld [vmem:[%s701_s1 + $0x1d8] sm:$0xff]  ;;  %v447_v2 = vpack.c.bf16 %v71_v57, %v70_v55  ;;  %v417_v3 = vpack.c.bf16 %v57_v59, %v56_v58  ;;  %v58_v9 = vld [vmem:[%s701_s1 + $0xe0] sm:$0xff] }
  0x10   :  { %442 = vmatprep.subr.bf16.mxu1 %v441_v43  ;;  %v40_v4 = vld [vmem:[%s701_s1 + $0x50] sm:$0xff]  ;;  %v41_v5 = vld [vmem:[%s701_s1 + $0x58] sm:$0xff]  ;;  %v449_v7 = vpack.c.bf16 %v89_v0, %v88_v63  ;;  %v59_v10 = vld [vmem:[%s701_s1 + $0xe8] sm:$0xff] }
  0x11   :  { %412 = vmatpush3.bf16.msra.mxu0 %v411_v48  ;;  %v72_v6 = vld [vmem:[%s701_s1 + $0x150] sm:$0xff]  ;;  %v73_v8 = vld [vmem:[%s701_s1 + $0x158] sm:$0xff]  ;;  %v42_v13 = vld [vmem:[%s701_s1 + $0x60] sm:$0xff]  ;;  %v419_v17 = vpack.c.bf16 %v41_v5, %v40_v4  ;;  %v421_v23 = vpack.c.bf16 %v59_v10, %v58_v9 }
  0x12   :  { %414 = vmatprep.subr.bf16.mxu0 %v413_v52  ;;  %v43_v14 = vld [vmem:[%s701_s1 + $0x68] sm:$0xff]  ;;  %v90_v15 = vld [vmem:[%s701_s1 + $0x1e0] sm:$0xff]  ;;  %v60_v20 = vld [vmem:[%s701_s1 + $0xf0] sm:$0xff]  ;;  %v451_v22 = vpack.c.bf16 %v73_v8, %v72_v6 }
  0x13   :  { %444 = vmatpush3.bf16.msra.mxu1 %v443_v51  ;;  %v91_v16 = vld [vmem:[%s701_s1 + $0x1e8] sm:$0xff]  ;;  %v74_v18 = vld [vmem:[%s701_s1 + $0x160] sm:$0xff]  ;;  %v61_v21 = vld [vmem:[%s701_s1 + $0xf8] sm:$0xff]  ;;  %v423_v28 = vpack.c.bf16 %v43_v14, %v42_v13 }
  0x14   :  { %446 = vmatprep.subr.bf16.mxu1 %v445_v56  ;;  %v75_v19 = vld [vmem:[%s701_s1 + $0x168] sm:$0xff]  ;;  %v92_v24 = vld [vmem:[%s701_s1 + $0x1f0] sm:$0xff]  ;;  %v93_v25 = vld [vmem:[%s701_s1 + $0x1f8] sm:$0xff]  ;;  %v453_v26 = vpack.c.bf16 %v91_v16, %v90_v15  ;;  %v425_v33 = vpack.c.bf16 %v61_v21, %v60_v20 }
  0x15   :  { %416 = vmatpush3.bf16.msra.mxu0 %v415_v1  ;;  %v466_v29 = vld.sshfl [vmem:[%s702_s0] sm:$0xff pattern:$0x75316420]  ;;  %v467_v30 = vld.sshfl [vmem:[%s702_s0 + $0x8] sm:$0xff pattern:$0x75316420]  ;;  %v455_v32 = vpack.c.bf16 %v75_v19, %v74_v18  ;;  %v457_v37 = vpack.c.bf16 %v93_v25, %v92_v24 }
  0x16   :  { %418 = vmatprep.subr.bf16.mxu0 %v417_v3  ;;  %v468_v31 = vld.sshfl [vmem:[%s702_s0 + $0x10] sm:$0xff pattern:$0x75316420]  ;;  %v45_v35 = vld [vmem:[%s701_s1 + $0x78] sm:$0xff]  ;;  %v142_v41 = vcombine.high %v466_v29, %v467_v30  ;;  %v141_v42 = vcombine.low %v466_v29, %v467_v30  ;;  %v326_v56 = vld [vmem:[%s703_s2] ss:$0 sm:$0xff] }
  0x17   :  { %448 = vmatpush3.bf16.msra.mxu1 %v447_v2  ;;  %v44_v34 = vld [vmem:[%s701_s1 + $0x70] sm:$0xff]  ;;  %v469_v36 = vld.sshfl [vmem:[%s702_s0 + $0x18] sm:$0xff pattern:$0x75316420] }
  0x18   :  { %450 = vmatprep.subr.bf16.mxu1 %v449_v7  ;;  %v76_v38 = vld [vmem:[%s701_s1 + $0x170] sm:$0xff]  ;;  %v77_v39 = vld [vmem:[%s701_s1 + $0x178] sm:$0xff]  ;;  %v427_v40 = vpack.c.bf16 %v45_v35, %v44_v34  ;;  %v144_v44 = vcombine.high %v468_v31, %v469_v36  ;;  %v143_v45 = vcombine.low %v468_v31, %v469_v36  ;;  %v158_v46 = vrot.slane %v142_v41, %v118_v27 }
  0x19   :  { %420 = vmatpush3.bf16.msra.mxu0 %v419_v17  ;;  %v459_v43 = vpack.c.bf16 %v77_v39, %v76_v38  ;;  %v151_v47 = vrot.slane %v141_v42, %v118_v27 }
  0x1a   :  { %422 = vmatprep.subr.bf16.mxu0 %v421_v23  ;;  %v172_v48 = vrot.slane %v144_v44, %v118_v27  ;;  %v165_v49 = vrot.slane %v143_v45, %v118_v27 }
  0x1b   :  { %452 = vmatpush3.bf16.msra.mxu1 %v451_v22 }
  0x1c   :  { %454 = vmatprep.subr.bf16.mxu1 %v453_v26  ;;  %v175_v50 = vcombine.low %v158_v46, %v172_v48  ;;  %v173_v51 = vcombine.low %v151_v47, %v165_v49  ;;  %v176_v52 = vcombine.high %v158_v46, %v172_v48  ;;  %v174_v53 = vcombine.high %v151_v47, %v165_v49 }
  0x1d   :  { %424 = vmatpush3.bf16.msra.mxu0 %v423_v28 }
  0x1e   :  { %426 = vmatprep.subr.bf16.mxu0 %v425_v33  ;;  %245 = vmatprep.mubr.f32.mxu0 %v175_v50 }
  0x1f   :  { %456 = vmatpush3.bf16.msra.mxu1 %v455_v32  ;;  %315 = vmatprep.mubr.f32.mxu1 %v176_v52 }
  0x20   :  { %458 = vmatprep.subr.bf16.mxu1 %v457_v37 }
  0x21   :  { %428 = vmatpush3.bf16.msra.mxu0 %v427_v40 }
  0x23   :  { %460 = vmatpush3.bf16.msra.mxu1 %v459_v43 }
  0x24   :  { %246 = vmatmul.mubr.f32.vlgmr.msra.gmra.mrb[0].mxu0 %v173_v51 }
  0x26   :  { %316 = vmatmul.mubr.f32.vlgmr.msra.gmra.mrb[0].mxu1 %v174_v53 }
  0xf7   :  { %v359_v54 = vpop.f32.mrb[0].mxu0 }
  0xf8   :  { %v360_v57 = vpop.f32.mrb[1].mxu0 }
  0xf9   :  { %v394_v55 = vpop.f32.mrb[0].mxu1  ;;  %v361_v59 = vadd.f32 %v360_v57, %v359_v54 }
  0xfa   :  { %v395_v58 = vpop.f32.mrb[1].mxu1 }
  0xfb   :  { %v396_v60 = vadd.f32 %v395_v58, %v394_v55  ;;  %v248_v61 = vadd.f32 %v361_v59, %v326_v56 }
  0xfd   :  { %v318_v62 = vadd.f32 %v396_v60, %v248_v61 }
  0xff   :  { %321 = vst [vmem:[%s704_s3] sm:$0xff] %v318_v62 }

</bundles_post_ra>
